<compile_context>
chip_gen: v7x
topology: tpu7x:2x2x1
jax: 0.10.0
libtpu: 0.0.40
codegen_flags: <defaults>
</compile_context>

<pallas_src>
import jax
import jax.numpy as jnp
from jax.experimental import pallas as pl
from jax.experimental.pallas import tpu as pltpu

# ---- model hyper-parameters (from Net.__init__ defaults) ----
PARA = 10          # input_sizes[0]  (x feature length)
QUES = 3           # input_sizes[1]  (h feature length)
H0 = 64            # hidden_size[0]  (conv out channels == LSTM input size)
H1 = 128           # hidden_size[1]  (LSTM hidden size)
NUM_CLASSES = 1
NUM_LAYERS = 3
KSIZE = 3
T = PARA - KSIZE + 1   # conv output length == LSTM sequence length == 8

BT = 8             # batch tile (rows per grid step); multiple of 8 sublanes


def _sig_approx(v):
    # exp + approximate reciprocal both land on the EUP slot.
    return pl.reciprocal(1.0 + jnp.exp(-v), approx=True)


def _sig_exact(v):
    # Exact sigmoid for error-sensitive spots (forget gate, output head).
    return 1.0 / (1.0 + jnp.exp(-v))


def net_kernel(patches_ref, hq_ref,
               emb_w_ref, emb_b_ref,
               w0f_ref, b0f_ref, whh0_ref,
               wih1_ref, whh1_ref, b1_ref,
               wih2_ref, whh2_ref, b2_ref,
               out_w_ref, out_b_ref,
               o_ref):
    # ---- embedding: Linear(QUES -> H1); used as both h0 and c0 for every layer.
    h_init = (jnp.dot(hq_ref[...], emb_w_ref[...],
                      preferred_element_type=jnp.float32)
              + emb_b_ref[...])                                    # (BT, H1) f32

    whh = (whh0_ref, whh1_ref, whh2_ref)       # recurrent weights, bf16
    wih = (None, wih1_ref, wih2_ref)           # input weights for layers 1, 2
    b = (None, b1_ref, b2_ref)

    h = [h_init] * NUM_LAYERS                  # per-layer hidden state (f32)
    c = [h_init] * NUM_LAYERS                  # per-layer cell state   (f32)

    # ---- wavefront over (layer, time): at wave s, layer l computes t = s - l.
    # Layers are processed in DESCENDING order so each layer reads the layer
    # below's previous-wave output (h[l-1]) before it is overwritten.
    for s in range(T + NUM_LAYERS - 1):
        for l in range(NUM_LAYERS - 1, -1, -1):
            t = s - l
            if t < 0 or t >= T:
                continue
            if l == 0:
                # Conv1d folded into the layer-0 input weights: (BT,3)@(3,4*H1).
                gx = (jnp.dot(patches_ref[t].astype(jnp.bfloat16), w0f_ref[...],
                              preferred_element_type=jnp.float32)
                      + b0f_ref[...])
            else:
                # Per-step input projection from the layer below's h at time t.
                gx = (jnp.dot(h[l - 1].astype(jnp.bfloat16), wih[l][...],
                              preferred_element_type=jnp.float32)
                      + b[l][...])
            gates = (jnp.dot(h[l].astype(jnp.bfloat16), whh[l][...],
                             preferred_element_type=jnp.float32) + gx)
            # PyTorch gate order: i, f, g, o.
            i_g = _sig_approx(gates[:, 0 * H1:1 * H1])
            f_g = _sig_exact(gates[:, 1 * H1:2 * H1])
            g_g = jnp.tanh(gates[:, 2 * H1:3 * H1])
            o_g = _sig_approx(gates[:, 3 * H1:4 * H1])
            c[l] = f_g * c[l] + i_g * g_g
            h[l] = o_g * jnp.tanh(c[l])

    # ---- output head: Linear(H1 -> 1) + Sigmoid as VPU multiply + lane reduce.
    last_h = h[NUM_LAYERS - 1]                                 # r_out[:, -1, :]
    logits = (jnp.sum(last_h * out_w_ref[...], axis=-1, keepdims=True)
              + out_b_ref[...])                                # (BT, 1)
    o_ref[...] = _sig_exact(logits)


def prepare_params(p):
    """One-time weight preprocessing (outside the per-call jit).

    Folds Conv1d(1->64, k=3) into the layer-0 LSTM input weights and casts
    all large matmul weights to bf16; biases/small weights stay f32.
    """
    w0f = jnp.dot(p["conv_w"], p["wih0"])                  # (3, 4*H1)
    b0f = jnp.dot(p["conv_b"], p["wih0"]) + p["b0"]        # (1, 4*H1)
    bf16 = lambda a: a.astype(jnp.bfloat16)
    return {
        "emb_w": p["emb_w"], "emb_b": p["emb_b"],
        "w0f": bf16(w0f), "b0f": b0f,
        "whh0": bf16(p["whh0"]),
        "wih1": bf16(p["wih1"]), "whh1": bf16(p["whh1"]), "b1": p["b1"],
        "wih2": bf16(p["wih2"]), "whh2": bf16(p["whh2"]), "b2": p["b2"],
        "out_w": p["out_w"].T, "out_b": p["out_b"],
    }


def net_forward(x, h, pp):
    B = x.shape[0]
    assert B % BT == 0, "batch must be a multiple of the 8-row tile"

    # im2col: (T, B, KSIZE) conv patches, time on the leading axis.
    patches = jnp.stack([x[:, t:t + KSIZE] for t in range(T)], axis=0)

    const2 = lambda i: (0, 0)
    w_spec = lambda arr: pl.BlockSpec(arr.shape, const2)   # weights stay resident

    in_specs = [
        pl.BlockSpec((T, BT, KSIZE), lambda i: (0, i, 0)),
        pl.BlockSpec((BT, QUES), lambda i: (i, 0)),
        w_spec(pp["emb_w"]), w_spec(pp["emb_b"]),
        w_spec(pp["w0f"]), w_spec(pp["b0f"]), w_spec(pp["whh0"]),
        w_spec(pp["wih1"]), w_spec(pp["whh1"]), w_spec(pp["b1"]),
        w_spec(pp["wih2"]), w_spec(pp["whh2"]), w_spec(pp["b2"]),
        w_spec(pp["out_w"]), w_spec(pp["out_b"]),
    ]
    out_spec = pl.BlockSpec((BT, NUM_CLASSES), lambda i: (i, 0))

    return pl.pallas_call(
        net_kernel,
        out_shape=jax.ShapeDtypeStruct((B, NUM_CLASSES), jnp.float32),
        grid=(B // BT,),
        in_specs=in_specs,
        out_specs=out_spec,
        compiler_params=pltpu.CompilerParams(
            dimension_semantics=("parallel",)),
    )(patches, h,
      pp["emb_w"], pp["emb_b"],
      pp["w0f"], pp["b0f"], pp["whh0"],
      pp["wih1"], pp["whh1"], pp["b1"],
      pp["wih2"], pp["whh2"], pp["b2"],
      pp["out_w"], pp["out_b"])


def net_ref(x, h, p):
    """Pure-JAX f32 reference with the original (unfused) math."""
    h_init = jnp.dot(h, p["emb_w"]) + p["emb_b"]
    seq = [jnp.dot(x[:, t:t + KSIZE], p["conv_w"]) + p["conv_b"] for t in range(T)]
    wih = [p["wih0"], p["wih1"], p["wih2"]]
    whh = [p["whh0"], p["whh1"], p["whh2"]]
    bias = [p["b0"], p["b1"], p["b2"]]
    last_h = h_init
    for l in range(NUM_LAYERS):
        h_t = h_init
        c_t = h_init
        outs = []
        for t in range(T):
            g = jnp.dot(seq[t], wih[l]) + jnp.dot(h_t, whh[l]) + bias[l]
            i_g = jax.nn.sigmoid(g[:, 0 * H1:1 * H1])
            f_g = jax.nn.sigmoid(g[:, 1 * H1:2 * H1])
            g_g = jnp.tanh(g[:, 2 * H1:3 * H1])
            o_g = jax.nn.sigmoid(g[:, 3 * H1:4 * H1])
            c_t = f_g * c_t + i_g * g_g
            h_t = o_g * jnp.tanh(c_t)
            outs.append(h_t)
        seq = outs
        last_h = h_t
    return jax.nn.sigmoid(jnp.dot(last_h, p["out_w"]) + p["out_b"])


def init_params(key):
    ks = jax.random.split(key, 16)
    s = 0.1

    def rnd(k, shape):
        return (s * jax.random.normal(k, shape)).astype(jnp.float32)

    return {
        # Linear(QUES -> H1): stored as (in, out)
        "emb_w": rnd(ks[0], (QUES, H1)),
        "emb_b": rnd(ks[1], (1, H1)),
        # Conv1d(1 -> H0, k=3): PyTorch weight (H0,1,3) stored transposed as (3, H0)
        "conv_w": rnd(ks[2], (KSIZE, H0)),
        "conv_b": rnd(ks[3], (1, H0)),
        # LSTM layer 0: input size H0
        "wih0": rnd(ks[4], (H0, 4 * H1)),
        "whh0": rnd(ks[5], (H1, 4 * H1)),
        "b0":   rnd(ks[6], (1, 4 * H1)),    # b_ih + b_hh combined
        # LSTM layers 1, 2: input size H1
        "wih1": rnd(ks[7], (H1, 4 * H1)),
        "whh1": rnd(ks[8], (H1, 4 * H1)),
        "b1":   rnd(ks[9], (1, 4 * H1)),
        "wih2": rnd(ks[10], (H1, 4 * H1)),
        "whh2": rnd(ks[11], (H1, 4 * H1)),
        "b2":   rnd(ks[12], (1, 4 * H1)),
        # Linear(H1 -> 1)
        "out_w": rnd(ks[13], (H1, NUM_CLASSES)),
        "out_b": rnd(ks[14], (1, NUM_CLASSES)),
    }


if __name__ == "__main__":
    key = jax.random.PRNGKey(0)
    k_x, k_h, k_p = jax.random.split(key, 3)

    B = 8  # multiple of 8 -> one full sublane-aligned batch tile
    x = jax.random.normal(k_x, (B, PARA), dtype=jnp.float32)   # (8, 10)
    h = jax.random.normal(k_h, (B, QUES), dtype=jnp.float32)   # (8, 3)
    params = init_params(k_p)

    # Weight preprocessing hoisted out of the per-call path: done once here.
    prepped = prepare_params(params)

    fwd = jax.jit(net_forward)
    out = jax.block_until_ready(fwd(x, h, prepped))

    ref = net_ref(x, h, params)
    assert out.shape == (B, NUM_CLASSES)
    # bf16 matmul weights + approx sigmoids on the non-critical gates; forget
    # gate and output sigmoid are exact -> tolerance tightened vs. 1e-2.
    assert jnp.allclose(out, ref, atol=5e-3, rtol=5e-3), (out, ref)

    print("KERNEL_OK")
</pallas_src>

<mosaic_0001>
module attributes {stable_mosaic.version = 11 : i64} {
  func.func @net_kernel(%arg0: i32, %arg1: memref<8x8x3xf32, #tpu.memory_space<vmem>>, %arg2: memref<8x3xf32, #tpu.memory_space<vmem>>, %arg3: memref<3x128xf32, #tpu.memory_space<vmem>>, %arg4: memref<1x128xf32, #tpu.memory_space<vmem>>, %arg5: memref<3x512xbf16, #tpu.memory_space<vmem>>, %arg6: memref<1x512xf32, #tpu.memory_space<vmem>>, %arg7: memref<128x512xbf16, #tpu.memory_space<vmem>>, %arg8: memref<128x512xbf16, #tpu.memory_space<vmem>>, %arg9: memref<128x512xbf16, #tpu.memory_space<vmem>>, %arg10: memref<1x512xf32, #tpu.memory_space<vmem>>, %arg11: memref<128x512xbf16, #tpu.memory_space<vmem>>, %arg12: memref<128x512xbf16, #tpu.memory_space<vmem>>, %arg13: memref<1x512xf32, #tpu.memory_space<vmem>>, %arg14: memref<1x128xf32, #tpu.memory_space<vmem>>, %arg15: memref<1x1xf32, #tpu.memory_space<vmem>>, %arg16: memref<8x1xf32, #tpu.memory_space<vmem>>) attributes {dimension_semantics = [#tpu.dimension_semantics<parallel>], iteration_bounds = array<i64: 1>, scalar_prefetch = 0 : i64, scratch_operands = 0 : i64, tpu.core_type = #tpu.core_type<tc>, window_params = [{transform_indices = @transform_0, window_bounds = array<i64: 8, 8, 3>}, {transform_indices = @transform_1, window_bounds = array<i64: 8, 3>}, {pipeline_mode = #tpu.pipeline_mode<synchronous>, transform_indices = @transform_2, window_bounds = array<i64: 3, 128>}, {pipeline_mode = #tpu.pipeline_mode<synchronous>, transform_indices = @transform_3, window_bounds = array<i64: 1, 128>}, {pipeline_mode = #tpu.pipeline_mode<synchronous>, transform_indices = @transform_4, window_bounds = array<i64: 3, 512>}, {pipeline_mode = #tpu.pipeline_mode<synchronous>, transform_indices = @transform_5, window_bounds = array<i64: 1, 512>}, {pipeline_mode = #tpu.pipeline_mode<synchronous>, transform_indices = @transform_6, window_bounds = array<i64: 128, 512>}, {pipeline_mode = #tpu.pipeline_mode<synchronous>, transform_indices = @transform_7, window_bounds = array<i64: 128, 512>}, {pipeline_mode = #tpu.pipeline_mode<synchronous>, transform_indices = @transform_8, window_bounds = array<i64: 128, 512>}, {pipeline_mode = #tpu.pipeline_mode<synchronous>, transform_indices = @transform_9, window_bounds = array<i64: 1, 512>}, {pipeline_mode = #tpu.pipeline_mode<synchronous>, transform_indices = @transform_10, window_bounds = array<i64: 128, 512>}, {pipeline_mode = #tpu.pipeline_mode<synchronous>, transform_indices = @transform_11, window_bounds = array<i64: 128, 512>}, {pipeline_mode = #tpu.pipeline_mode<synchronous>, transform_indices = @transform_12, window_bounds = array<i64: 1, 512>}, {pipeline_mode = #tpu.pipeline_mode<synchronous>, transform_indices = @transform_13, window_bounds = array<i64: 1, 128>}, {pipeline_mode = #tpu.pipeline_mode<synchronous>, transform_indices = @transform_14, window_bounds = array<i64: 1, 1>}, {transform_indices = @transform_15, window_bounds = array<i64: 8, 1>}]} {
    %c0 = arith.constant 0 : index
    %c0_0 = arith.constant 0 : index
    %0 = vector.load %arg2[%c0, %c0_0] : memref<8x3xf32, #tpu.memory_space<vmem>>, vector<8x3xf32>
    %c0_1 = arith.constant 0 : index
    %c0_2 = arith.constant 0 : index
    %1 = vector.load %arg3[%c0_1, %c0_2] : memref<3x128xf32, #tpu.memory_space<vmem>>, vector<3x128xf32>
    %cst = arith.constant dense<0.000000e+00> : vector<8x128xf32>
    %2 = tpu.matmul %0, %1, %cst {dimension_numbers = #tpu.dot_dimension_numbers<[1], [0], [0], [1], [0, 0, 1, 1], [], []>} : vector<8x3xf32>, vector<3x128xf32>, vector<8x128xf32> -> vector<8x128xf32>
    %c0_3 = arith.constant 0 : index
    %c0_4 = arith.constant 0 : index
    %3 = vector.load %arg4[%c0_3, %c0_4] : memref<1x128xf32, #tpu.memory_space<vmem>>, vector<1x128xf32>
    %4 = vector.broadcast %3 : vector<1x128xf32> to vector<8x128xf32>
    %5 = arith.addf %2, %4 : vector<8x128xf32>
    %c0_5 = arith.constant 0 : index
    %c0_6 = arith.constant 0 : index
    %c0_7 = arith.constant 0 : index
    %6 = vector.load %arg1[%c0_5, %c0_6, %c0_7] : memref<8x8x3xf32, #tpu.memory_space<vmem>>, vector<1x8x3xf32>
    %7 = vector.shape_cast %6 : vector<1x8x3xf32> to vector<8x3xf32>
    %8 = arith.truncf %7 : vector<8x3xf32> to vector<8x3xbf16>
    %c0_8 = arith.constant 0 : index
    %c0_9 = arith.constant 0 : index
    %9 = vector.load %arg5[%c0_8, %c0_9] : memref<3x512xbf16, #tpu.memory_space<vmem>>, vector<3x512xbf16>
    %cst_10 = arith.constant dense<0.000000e+00> : vector<8x512xf32>
    %10 = tpu.matmul %8, %9, %cst_10 {dimension_numbers = #tpu.dot_dimension_numbers<[1], [0], [0], [1], [0, 0, 1, 1], [], []>} : vector<8x3xbf16>, vector<3x512xbf16>, vector<8x512xf32> -> vector<8x512xf32>
    %c0_11 = arith.constant 0 : index
    %c0_12 = arith.constant 0 : index
    %11 = vector.load %arg6[%c0_11, %c0_12] : memref<1x512xf32, #tpu.memory_space<vmem>>, vector<1x512xf32>
    %12 = vector.broadcast %11 : vector<1x512xf32> to vector<8x512xf32>
    %13 = arith.addf %10, %12 : vector<8x512xf32>
    %14 = arith.truncf %5 : vector<8x128xf32> to vector<8x128xbf16>
    %c0_13 = arith.constant 0 : index
    %c0_14 = arith.constant 0 : index
    %15 = vector.load %arg7[%c0_13, %c0_14] : memref<128x512xbf16, #tpu.memory_space<vmem>>, vector<128x512xbf16>
    %cst_15 = arith.constant dense<0.000000e+00> : vector<8x512xf32>
    %16 = tpu.matmul %14, %15, %cst_15 {dimension_numbers = #tpu.dot_dimension_numbers<[1], [0], [0], [1], [0, 0, 1, 1], [], []>} : vector<8x128xbf16>, vector<128x512xbf16>, vector<8x512xf32> -> vector<8x512xf32>
    %17 = arith.addf %16, %13 : vector<8x512xf32>
    %18 = vector.extract_strided_slice %17 {offsets = [0, 0], sizes = [8, 128], strides = [1, 1]} : vector<8x512xf32> to vector<8x128xf32>
    %cst_16 = arith.constant 0.000000e+00 : f32
    %19 = vector.broadcast %cst_16 : f32 to vector<8x128xf32>
    %20 = arith.subf %19, %18 : vector<8x128xf32>
    %21 = math.exp %20 : vector<8x128xf32>
    %cst_17 = arith.constant 1.000000e+00 : f32
    %22 = vector.broadcast %cst_17 : f32 to vector<8x128xf32>
    %23 = arith.addf %22, %21 : vector<8x128xf32>
    %24 = tpu.reciprocal %23 {approx = true} : vector<8x128xf32> -> vector<8x128xf32>
    %25 = vector.extract_strided_slice %17 {offsets = [0, 128], sizes = [8, 128], strides = [1, 1]} : vector<8x512xf32> to vector<8x128xf32>
    %cst_18 = arith.constant 0.000000e+00 : f32
    %26 = vector.broadcast %cst_18 : f32 to vector<8x128xf32>
    %27 = arith.subf %26, %25 : vector<8x128xf32>
    %28 = math.exp %27 : vector<8x128xf32>
    %cst_19 = arith.constant 1.000000e+00 : f32
    %29 = vector.broadcast %cst_19 : f32 to vector<8x128xf32>
    %30 = arith.addf %29, %28 : vector<8x128xf32>
    %cst_20 = arith.constant 1.000000e+00 : f32
    %31 = vector.broadcast %cst_20 : f32 to vector<8x128xf32>
    %32 = arith.divf %31, %30 : vector<8x128xf32>
    %33 = vector.extract_strided_slice %17 {offsets = [0, 256], sizes = [8, 128], strides = [1, 1]} : vector<8x512xf32> to vector<8x128xf32>
    %34 = math.tanh %33 : vector<8x128xf32>
    %35 = vector.extract_strided_slice %17 {offsets = [0, 384], sizes = [8, 128], strides = [1, 1]} : vector<8x512xf32> to vector<8x128xf32>
    %cst_21 = arith.constant 0.000000e+00 : f32
    %36 = vector.broadcast %cst_21 : f32 to vector<8x128xf32>
    %37 = arith.subf %36, %35 : vector<8x128xf32>
    %38 = math.exp %37 : vector<8x128xf32>
    %cst_22 = arith.constant 1.000000e+00 : f32
    %39 = vector.broadcast %cst_22 : f32 to vector<8x128xf32>
    %40 = arith.addf %39, %38 : vector<8x128xf32>
    %41 = tpu.reciprocal %40 {approx = true} : vector<8x128xf32> -> vector<8x128xf32>
    %42 = arith.mulf %32, %5 : vector<8x128xf32>
    %43 = arith.mulf %24, %34 : vector<8x128xf32>
    %44 = arith.addf %42, %43 : vector<8x128xf32>
    %45 = math.tanh %44 : vector<8x128xf32>
    %46 = arith.mulf %41, %45 : vector<8x128xf32>
    %47 = arith.truncf %46 : vector<8x128xf32> to vector<8x128xbf16>
    %c0_23 = arith.constant 0 : index
    %c0_24 = arith.constant 0 : index
    %48 = vector.load %arg8[%c0_23, %c0_24] : memref<128x512xbf16, #tpu.memory_space<vmem>>, vector<128x512xbf16>
    %cst_25 = arith.constant dense<0.000000e+00> : vector<8x512xf32>
    %49 = tpu.matmul %47, %48, %cst_25 {dimension_numbers = #tpu.dot_dimension_numbers<[1], [0], [0], [1], [0, 0, 1, 1], [], []>} : vector<8x128xbf16>, vector<128x512xbf16>, vector<8x512xf32> -> vector<8x512xf32>
    %c0_26 = arith.constant 0 : index
    %c0_27 = arith.constant 0 : index
    %50 = vector.load %arg10[%c0_26, %c0_27] : memref<1x512xf32, #tpu.memory_space<vmem>>, vector<1x512xf32>
    %51 = vector.broadcast %50 : vector<1x512xf32> to vector<8x512xf32>
    %52 = arith.addf %49, %51 : vector<8x512xf32>
    %53 = arith.truncf %5 : vector<8x128xf32> to vector<8x128xbf16>
    %c0_28 = arith.constant 0 : index
    %c0_29 = arith.constant 0 : index
    %54 = vector.load %arg9[%c0_28, %c0_29] : memref<128x512xbf16, #tpu.memory_space<vmem>>, vector<128x512xbf16>
    %cst_30 = arith.constant dense<0.000000e+00> : vector<8x512xf32>
    %55 = tpu.matmul %53, %54, %cst_30 {dimension_numbers = #tpu.dot_dimension_numbers<[1], [0], [0], [1], [0, 0, 1, 1], [], []>} : vector<8x128xbf16>, vector<128x512xbf16>, vector<8x512xf32> -> vector<8x512xf32>
    %56 = arith.addf %55, %52 : vector<8x512xf32>
    %57 = vector.extract_strided_slice %56 {offsets = [0, 0], sizes = [8, 128], strides = [1, 1]} : vector<8x512xf32> to vector<8x128xf32>
    %cst_31 = arith.constant 0.000000e+00 : f32
    %58 = vector.broadcast %cst_31 : f32 to vector<8x128xf32>
    %59 = arith.subf %58, %57 : vector<8x128xf32>
    %60 = math.exp %59 : vector<8x128xf32>
    %cst_32 = arith.constant 1.000000e+00 : f32
    %61 = vector.broadcast %cst_32 : f32 to vector<8x128xf32>
    %62 = arith.addf %61, %60 : vector<8x128xf32>
    %63 = tpu.reciprocal %62 {approx = true} : vector<8x128xf32> -> vector<8x128xf32>
    %64 = vector.extract_strided_slice %56 {offsets = [0, 128], sizes = [8, 128], strides = [1, 1]} : vector<8x512xf32> to vector<8x128xf32>
    %cst_33 = arith.constant 0.000000e+00 : f32
    %65 = vector.broadcast %cst_33 : f32 to vector<8x128xf32>
    %66 = arith.subf %65, %64 : vector<8x128xf32>
    %67 = math.exp %66 : vector<8x128xf32>
    %cst_34 = arith.constant 1.000000e+00 : f32
    %68 = vector.broadcast %cst_34 : f32 to vector<8x128xf32>
    %69 = arith.addf %68, %67 : vector<8x128xf32>
    %cst_35 = arith.constant 1.000000e+00 : f32
    %70 = vector.broadcast %cst_35 : f32 to vector<8x128xf32>
    %71 = arith.divf %70, %69 : vector<8x128xf32>
    %72 = vector.extract_strided_slice %56 {offsets = [0, 256], sizes = [8, 128], strides = [1, 1]} : vector<8x512xf32> to vector<8x128xf32>
    %73 = math.tanh %72 : vector<8x128xf32>
    %74 = vector.extract_strided_slice %56 {offsets = [0, 384], sizes = [8, 128], strides = [1, 1]} : vector<8x512xf32> to vector<8x128xf32>
    %cst_36 = arith.constant 0.000000e+00 : f32
    %75 = vector.broadcast %cst_36 : f32 to vector<8x128xf32>
    %76 = arith.subf %75, %74 : vector<8x128xf32>
    %77 = math.exp %76 : vector<8x128xf32>
    %cst_37 = arith.constant 1.000000e+00 : f32
    %78 = vector.broadcast %cst_37 : f32 to vector<8x128xf32>
    %79 = arith.addf %78, %77 : vector<8x128xf32>
    %80 = tpu.reciprocal %79 {approx = true} : vector<8x128xf32> -> vector<8x128xf32>
    %81 = arith.mulf %71, %5 : vector<8x128xf32>
    %82 = arith.mulf %63, %73 : vector<8x128xf32>
    %83 = arith.addf %81, %82 : vector<8x128xf32>
    %84 = math.tanh %83 : vector<8x128xf32>
    %85 = arith.mulf %80, %84 : vector<8x128xf32>
    %c1 = arith.constant 1 : index
    %c0_38 = arith.constant 0 : index
    %c0_39 = arith.constant 0 : index
    %86 = vector.load %arg1[%c1, %c0_38, %c0_39] : memref<8x8x3xf32, #tpu.memory_space<vmem>>, vector<1x8x3xf32>
    %87 = vector.shape_cast %86 : vector<1x8x3xf32> to vector<8x3xf32>
    %88 = arith.truncf %87 : vector<8x3xf32> to vector<8x3xbf16>
    %c0_40 = arith.constant 0 : index
    %c0_41 = arith.constant 0 : index
    %89 = vector.load %arg5[%c0_40, %c0_41] : memref<3x512xbf16, #tpu.memory_space<vmem>>, vector<3x512xbf16>
    %cst_42 = arith.constant dense<0.000000e+00> : vector<8x512xf32>
    %90 = tpu.matmul %88, %89, %cst_42 {dimension_numbers = #tpu.dot_dimension_numbers<[1], [0], [0], [1], [0, 0, 1, 1], [], []>} : vector<8x3xbf16>, vector<3x512xbf16>, vector<8x512xf32> -> vector<8x512xf32>
    %c0_43 = arith.constant 0 : index
    %c0_44 = arith.constant 0 : index
    %91 = vector.load %arg6[%c0_43, %c0_44] : memref<1x512xf32, #tpu.memory_space<vmem>>, vector<1x512xf32>
    %92 = vector.broadcast %91 : vector<1x512xf32> to vector<8x512xf32>
    %93 = arith.addf %90, %92 : vector<8x512xf32>
    %94 = arith.truncf %46 : vector<8x128xf32> to vector<8x128xbf16>
    %c0_45 = arith.constant 0 : index
    %c0_46 = arith.constant 0 : index
    %95 = vector.load %arg7[%c0_45, %c0_46] : memref<128x512xbf16, #tpu.memory_space<vmem>>, vector<128x512xbf16>
    %cst_47 = arith.constant dense<0.000000e+00> : vector<8x512xf32>
    %96 = tpu.matmul %94, %95, %cst_47 {dimension_numbers = #tpu.dot_dimension_numbers<[1], [0], [0], [1], [0, 0, 1, 1], [], []>} : vector<8x128xbf16>, vector<128x512xbf16>, vector<8x512xf32> -> vector<8x512xf32>
    %97 = arith.addf %96, %93 : vector<8x512xf32>
    %98 = vector.extract_strided_slice %97 {offsets = [0, 0], sizes = [8, 128], strides = [1, 1]} : vector<8x512xf32> to vector<8x128xf32>
    %cst_48 = arith.constant 0.000000e+00 : f32
    %99 = vector.broadcast %cst_48 : f32 to vector<8x128xf32>
    %100 = arith.subf %99, %98 : vector<8x128xf32>
    %101 = math.exp %100 : vector<8x128xf32>
    %cst_49 = arith.constant 1.000000e+00 : f32
    %102 = vector.broadcast %cst_49 : f32 to vector<8x128xf32>
    %103 = arith.addf %102, %101 : vector<8x128xf32>
    %104 = tpu.reciprocal %103 {approx = true} : vector<8x128xf32> -> vector<8x128xf32>
    %105 = vector.extract_strided_slice %97 {offsets = [0, 128], sizes = [8, 128], strides = [1, 1]} : vector<8x512xf32> to vector<8x128xf32>
    %cst_50 = arith.constant 0.000000e+00 : f32
    %106 = vector.broadcast %cst_50 : f32 to vector<8x128xf32>
    %107 = arith.subf %106, %105 : vector<8x128xf32>
    %108 = math.exp %107 : vector<8x128xf32>
    %cst_51 = arith.constant 1.000000e+00 : f32
    %109 = vector.broadcast %cst_51 : f32 to vector<8x128xf32>
    %110 = arith.addf %109, %108 : vector<8x128xf32>
    %cst_52 = arith.constant 1.000000e+00 : f32
    %111 = vector.broadcast %cst_52 : f32 to vector<8x128xf32>
    %112 = arith.divf %111, %110 : vector<8x128xf32>
    %113 = vector.extract_strided_slice %97 {offsets = [0, 256], sizes = [8, 128], strides = [1, 1]} : vector<8x512xf32> to vector<8x128xf32>
    %114 = math.tanh %113 : vector<8x128xf32>
    %115 = vector.extract_strided_slice %97 {offsets = [0, 384], sizes = [8, 128], strides = [1, 1]} : vector<8x512xf32> to vector<8x128xf32>
    %cst_53 = arith.constant 0.000000e+00 : f32
    %116 = vector.broadcast %cst_53 : f32 to vector<8x128xf32>
    %117 = arith.subf %116, %115 : vector<8x128xf32>
    %118 = math.exp %117 : vector<8x128xf32>
    %cst_54 = arith.constant 1.000000e+00 : f32
    %119 = vector.broadcast %cst_54 : f32 to vector<8x128xf32>
    %120 = arith.addf %119, %118 : vector<8x128xf32>
    %121 = tpu.reciprocal %120 {approx = true} : vector<8x128xf32> -> vector<8x128xf32>
    %122 = arith.mulf %112, %44 : vector<8x128xf32>
    %123 = arith.mulf %104, %114 : vector<8x128xf32>
    %124 = arith.addf %122, %123 : vector<8x128xf32>
    %125 = math.tanh %124 : vector<8x128xf32>
    %126 = arith.mulf %121, %125 : vector<8x128xf32>
    %127 = arith.truncf %85 : vector<8x128xf32> to vector<8x128xbf16>
    %c0_55 = arith.constant 0 : index
    %c0_56 = arith.constant 0 : index
    %128 = vector.load %arg11[%c0_55, %c0_56] : memref<128x512xbf16, #tpu.memory_space<vmem>>, vector<128x512xbf16>
    %cst_57 = arith.constant dense<0.000000e+00> : vector<8x512xf32>
    %129 = tpu.matmul %127, %128, %cst_57 {dimension_numbers = #tpu.dot_dimension_numbers<[1], [0], [0], [1], [0, 0, 1, 1], [], []>} : vector<8x128xbf16>, vector<128x512xbf16>, vector<8x512xf32> -> vector<8x512xf32>
    %c0_58 = arith.constant 0 : index
    %c0_59 = arith.constant 0 : index
    %130 = vector.load %arg13[%c0_58, %c0_59] : memref<1x512xf32, #tpu.memory_space<vmem>>, vector<1x512xf32>
    %131 = vector.broadcast %130 : vector<1x512xf32> to vector<8x512xf32>
    %132 = arith.addf %129, %131 : vector<8x512xf32>
    %133 = arith.truncf %5 : vector<8x128xf32> to vector<8x128xbf16>
    %c0_60 = arith.constant 0 : index
    %c0_61 = arith.constant 0 : index
    %134 = vector.load %arg12[%c0_60, %c0_61] : memref<128x512xbf16, #tpu.memory_space<vmem>>, vector<128x512xbf16>
    %cst_62 = arith.constant dense<0.000000e+00> : vector<8x512xf32>
    %135 = tpu.matmul %133, %134, %cst_62 {dimension_numbers = #tpu.dot_dimension_numbers<[1], [0], [0], [1], [0, 0, 1, 1], [], []>} : vector<8x128xbf16>, vector<128x512xbf16>, vector<8x512xf32> -> vector<8x512xf32>
    %136 = arith.addf %135, %132 : vector<8x512xf32>
    %137 = vector.extract_strided_slice %136 {offsets = [0, 0], sizes = [8, 128], strides = [1, 1]} : vector<8x512xf32> to vector<8x128xf32>
    %cst_63 = arith.constant 0.000000e+00 : f32
    %138 = vector.broadcast %cst_63 : f32 to vector<8x128xf32>
    %139 = arith.subf %138, %137 : vector<8x128xf32>
    %140 = math.exp %139 : vector<8x128xf32>
    %cst_64 = arith.constant 1.000000e+00 : f32
    %141 = vector.broadcast %cst_64 : f32 to vector<8x128xf32>
    %142 = arith.addf %141, %140 : vector<8x128xf32>
    %143 = tpu.reciprocal %142 {approx = true} : vector<8x128xf32> -> vector<8x128xf32>
    %144 = vector.extract_strided_slice %136 {offsets = [0, 128], sizes = [8, 128], strides = [1, 1]} : vector<8x512xf32> to vector<8x128xf32>
    %cst_65 = arith.constant 0.000000e+00 : f32
    %145 = vector.broadcast %cst_65 : f32 to vector<8x128xf32>
    %146 = arith.subf %145, %144 : vector<8x128xf32>
    %147 = math.exp %146 : vector<8x128xf32>
    %cst_66 = arith.constant 1.000000e+00 : f32
    %148 = vector.broadcast %cst_66 : f32 to vector<8x128xf32>
    %149 = arith.addf %148, %147 : vector<8x128xf32>
    %cst_67 = arith.constant 1.000000e+00 : f32
    %150 = vector.broadcast %cst_67 : f32 to vector<8x128xf32>
    %151 = arith.divf %150, %149 : vector<8x128xf32>
    %152 = vector.extract_strided_slice %136 {offsets = [0, 256], sizes = [8, 128], strides = [1, 1]} : vector<8x512xf32> to vector<8x128xf32>
    %153 = math.tanh %152 : vector<8x128xf32>
    %154 = vector.extract_strided_slice %136 {offsets = [0, 384], sizes = [8, 128], strides = [1, 1]} : vector<8x512xf32> to vector<8x128xf32>
    %cst_68 = arith.constant 0.000000e+00 : f32
    %155 = vector.broadcast %cst_68 : f32 to vector<8x128xf32>
    %156 = arith.subf %155, %154 : vector<8x128xf32>
    %157 = math.exp %156 : vector<8x128xf32>
    %cst_69 = arith.constant 1.000000e+00 : f32
    %158 = vector.broadcast %cst_69 : f32 to vector<8x128xf32>
    %159 = arith.addf %158, %157 : vector<8x128xf32>
    %160 = tpu.reciprocal %159 {approx = true} : vector<8x128xf32> -> vector<8x128xf32>
    %161 = arith.mulf %151, %5 : vector<8x128xf32>
    %162 = arith.mulf %143, %153 : vector<8x128xf32>
    %163 = arith.addf %161, %162 : vector<8x128xf32>
    %164 = math.tanh %163 : vector<8x128xf32>
    %165 = arith.mulf %160, %164 : vector<8x128xf32>
    %166 = arith.truncf %126 : vector<8x128xf32> to vector<8x128xbf16>
    %c0_70 = arith.constant 0 : index
    %c0_71 = arith.constant 0 : index
    %167 = vector.load %arg8[%c0_70, %c0_71] : memref<128x512xbf16, #tpu.memory_space<vmem>>, vector<128x512xbf16>
    %cst_72 = arith.constant dense<0.000000e+00> : vector<8x512xf32>
    %168 = tpu.matmul %166, %167, %cst_72 {dimension_numbers = #tpu.dot_dimension_numbers<[1], [0], [0], [1], [0, 0, 1, 1], [], []>} : vector<8x128xbf16>, vector<128x512xbf16>, vector<8x512xf32> -> vector<8x512xf32>
    %c0_73 = arith.constant 0 : index
    %c0_74 = arith.constant 0 : index
    %169 = vector.load %arg10[%c0_73, %c0_74] : memref<1x512xf32, #tpu.memory_space<vmem>>, vector<1x512xf32>
    %170 = vector.broadcast %169 : vector<1x512xf32> to vector<8x512xf32>
    %171 = arith.addf %168, %170 : vector<8x512xf32>
    %172 = arith.truncf %85 : vector<8x128xf32> to vector<8x128xbf16>
    %c0_75 = arith.constant 0 : index
    %c0_76 = arith.constant 0 : index
    %173 = vector.load %arg9[%c0_75, %c0_76] : memref<128x512xbf16, #tpu.memory_space<vmem>>, vector<128x512xbf16>
    %cst_77 = arith.constant dense<0.000000e+00> : vector<8x512xf32>
    %174 = tpu.matmul %172, %173, %cst_77 {dimension_numbers = #tpu.dot_dimension_numbers<[1], [0], [0], [1], [0, 0, 1, 1], [], []>} : vector<8x128xbf16>, vector<128x512xbf16>, vector<8x512xf32> -> vector<8x512xf32>
    %175 = arith.addf %174, %171 : vector<8x512xf32>
    %176 = vector.extract_strided_slice %175 {offsets = [0, 0], sizes = [8, 128], strides = [1, 1]} : vector<8x512xf32> to vector<8x128xf32>
    %cst_78 = arith.constant 0.000000e+00 : f32
    %177 = vector.broadcast %cst_78 : f32 to vector<8x128xf32>
    %178 = arith.subf %177, %176 : vector<8x128xf32>
    %179 = math.exp %178 : vector<8x128xf32>
    %cst_79 = arith.constant 1.000000e+00 : f32
    %180 = vector.broadcast %cst_79 : f32 to vector<8x128xf32>
    %181 = arith.addf %180, %179 : vector<8x128xf32>
    %182 = tpu.reciprocal %181 {approx = true} : vector<8x128xf32> -> vector<8x128xf32>
    %183 = vector.extract_strided_slice %175 {offsets = [0, 128], sizes = [8, 128], strides = [1, 1]} : vector<8x512xf32> to vector<8x128xf32>
    %cst_80 = arith.constant 0.000000e+00 : f32
    %184 = vector.broadcast %cst_80 : f32 to vector<8x128xf32>
    %185 = arith.subf %184, %183 : vector<8x128xf32>
    %186 = math.exp %185 : vector<8x128xf32>
    %cst_81 = arith.constant 1.000000e+00 : f32
    %187 = vector.broadcast %cst_81 : f32 to vector<8x128xf32>
    %188 = arith.addf %187, %186 : vector<8x128xf32>
    %cst_82 = arith.constant 1.000000e+00 : f32
    %189 = vector.broadcast %cst_82 : f32 to vector<8x128xf32>
    %190 = arith.divf %189, %188 : vector<8x128xf32>
    %191 = vector.extract_strided_slice %175 {offsets = [0, 256], sizes = [8, 128], strides = [1, 1]} : vector<8x512xf32> to vector<8x128xf32>
    %192 = math.tanh %191 : vector<8x128xf32>
    %193 = vector.extract_strided_slice %175 {offsets = [0, 384], sizes = [8, 128], strides = [1, 1]} : vector<8x512xf32> to vector<8x128xf32>
    %cst_83 = arith.constant 0.000000e+00 : f32
    %194 = vector.broadcast %cst_83 : f32 to vector<8x128xf32>
    %195 = arith.subf %194, %193 : vector<8x128xf32>
    %196 = math.exp %195 : vector<8x128xf32>
    %cst_84 = arith.constant 1.000000e+00 : f32
    %197 = vector.broadcast %cst_84 : f32 to vector<8x128xf32>
    %198 = arith.addf %197, %196 : vector<8x128xf32>
    %199 = tpu.reciprocal %198 {approx = true} : vector<8x128xf32> -> vector<8x128xf32>
    %200 = arith.mulf %190, %83 : vector<8x128xf32>
    %201 = arith.mulf %182, %192 : vector<8x128xf32>
    %202 = arith.addf %200, %201 : vector<8x128xf32>
    %203 = math.tanh %202 : vector<8x128xf32>
    %204 = arith.mulf %199, %203 : vector<8x128xf32>
    %c2 = arith.constant 2 : index
    %c0_85 = arith.constant 0 : index
    %c0_86 = arith.constant 0 : index
    %205 = vector.load %arg1[%c2, %c0_85, %c0_86] : memref<8x8x3xf32, #tpu.memory_space<vmem>>, vector<1x8x3xf32>
    %206 = vector.shape_cast %205 : vector<1x8x3xf32> to vector<8x3xf32>
    %207 = arith.truncf %206 : vector<8x3xf32> to vector<8x3xbf16>
    %c0_87 = arith.constant 0 : index
    %c0_88 = arith.constant 0 : index
    %208 = vector.load %arg5[%c0_87, %c0_88] : memref<3x512xbf16, #tpu.memory_space<vmem>>, vector<3x512xbf16>
    %cst_89 = arith.constant dense<0.000000e+00> : vector<8x512xf32>
    %209 = tpu.matmul %207, %208, %cst_89 {dimension_numbers = #tpu.dot_dimension_numbers<[1], [0], [0], [1], [0, 0, 1, 1], [], []>} : vector<8x3xbf16>, vector<3x512xbf16>, vector<8x512xf32> -> vector<8x512xf32>
    %c0_90 = arith.constant 0 : index
    %c0_91 = arith.constant 0 : index
    %210 = vector.load %arg6[%c0_90, %c0_91] : memref<1x512xf32, #tpu.memory_space<vmem>>, vector<1x512xf32>
    %211 = vector.broadcast %210 : vector<1x512xf32> to vector<8x512xf32>
    %212 = arith.addf %209, %211 : vector<8x512xf32>
    %213 = arith.truncf %126 : vector<8x128xf32> to vector<8x128xbf16>
    %c0_92 = arith.constant 0 : index
    %c0_93 = arith.constant 0 : index
    %214 = vector.load %arg7[%c0_92, %c0_93] : memref<128x512xbf16, #tpu.memory_space<vmem>>, vector<128x512xbf16>
    %cst_94 = arith.constant dense<0.000000e+00> : vector<8x512xf32>
    %215 = tpu.matmul %213, %214, %cst_94 {dimension_numbers = #tpu.dot_dimension_numbers<[1], [0], [0], [1], [0, 0, 1, 1], [], []>} : vector<8x128xbf16>, vector<128x512xbf16>, vector<8x512xf32> -> vector<8x512xf32>
    %216 = arith.addf %215, %212 : vector<8x512xf32>
    %217 = vector.extract_strided_slice %216 {offsets = [0, 0], sizes = [8, 128], strides = [1, 1]} : vector<8x512xf32> to vector<8x128xf32>
    %cst_95 = arith.constant 0.000000e+00 : f32
    %218 = vector.broadcast %cst_95 : f32 to vector<8x128xf32>
    %219 = arith.subf %218, %217 : vector<8x128xf32>
    %220 = math.exp %219 : vector<8x128xf32>
    %cst_96 = arith.constant 1.000000e+00 : f32
    %221 = vector.broadcast %cst_96 : f32 to vector<8x128xf32>
    %222 = arith.addf %221, %220 : vector<8x128xf32>
    %223 = tpu.reciprocal %222 {approx = true} : vector<8x128xf32> -> vector<8x128xf32>
    %224 = vector.extract_strided_slice %216 {offsets = [0, 128], sizes = [8, 128], strides = [1, 1]} : vector<8x512xf32> to vector<8x128xf32>
    %cst_97 = arith.constant 0.000000e+00 : f32
    %225 = vector.broadcast %cst_97 : f32 to vector<8x128xf32>
    %226 = arith.subf %225, %224 : vector<8x128xf32>
    %227 = math.exp %226 : vector<8x128xf32>
    %cst_98 = arith.constant 1.000000e+00 : f32
    %228 = vector.broadcast %cst_98 : f32 to vector<8x128xf32>
    %229 = arith.addf %228, %227 : vector<8x128xf32>
    %cst_99 = arith.constant 1.000000e+00 : f32
    %230 = vector.broadcast %cst_99 : f32 to vector<8x128xf32>
    %231 = arith.divf %230, %229 : vector<8x128xf32>
    %232 = vector.extract_strided_slice %216 {offsets = [0, 256], sizes = [8, 128], strides = [1, 1]} : vector<8x512xf32> to vector<8x128xf32>
    %233 = math.tanh %232 : vector<8x128xf32>
    %234 = vector.extract_strided_slice %216 {offsets = [0, 384], sizes = [8, 128], strides = [1, 1]} : vector<8x512xf32> to vector<8x128xf32>
    %cst_100 = arith.constant 0.000000e+00 : f32
    %235 = vector.broadcast %cst_100 : f32 to vector<8x128xf32>
    %236 = arith.subf %235, %234 : vector<8x128xf32>
    %237 = math.exp %236 : vector<8x128xf32>
    %cst_101 = arith.constant 1.000000e+00 : f32
    %238 = vector.broadcast %cst_101 : f32 to vector<8x128xf32>
    %239 = arith.addf %238, %237 : vector<8x128xf32>
    %240 = tpu.reciprocal %239 {approx = true} : vector<8x128xf32> -> vector<8x128xf32>
    %241 = arith.mulf %231, %124 : vector<8x128xf32>
    %242 = arith.mulf %223, %233 : vector<8x128xf32>
    %243 = arith.addf %241, %242 : vector<8x128xf32>
    %244 = math.tanh %243 : vector<8x128xf32>
    %245 = arith.mulf %240, %244 : vector<8x128xf32>
    %246 = arith.truncf %204 : vector<8x128xf32> to vector<8x128xbf16>
    %c0_102 = arith.constant 0 : index
    %c0_103 = arith.constant 0 : index
    %247 = vector.load %arg11[%c0_102, %c0_103] : memref<128x512xbf16, #tpu.memory_space<vmem>>, vector<128x512xbf16>
    %cst_104 = arith.constant dense<0.000000e+00> : vector<8x512xf32>
    %248 = tpu.matmul %246, %247, %cst_104 {dimension_numbers = #tpu.dot_dimension_numbers<[1], [0], [0], [1], [0, 0, 1, 1], [], []>} : vector<8x128xbf16>, vector<128x512xbf16>, vector<8x512xf32> -> vector<8x512xf32>
    %c0_105 = arith.constant 0 : index
    %c0_106 = arith.constant 0 : index
    %249 = vector.load %arg13[%c0_105, %c0_106] : memref<1x512xf32, #tpu.memory_space<vmem>>, vector<1x512xf32>
    %250 = vector.broadcast %249 : vector<1x512xf32> to vector<8x512xf32>
    %251 = arith.addf %248, %250 : vector<8x512xf32>
    %252 = arith.truncf %165 : vector<8x128xf32> to vector<8x128xbf16>
    %c0_107 = arith.constant 0 : index
    %c0_108 = arith.constant 0 : index
    %253 = vector.load %arg12[%c0_107, %c0_108] : memref<128x512xbf16, #tpu.memory_space<vmem>>, vector<128x512xbf16>
    %cst_109 = arith.constant dense<0.000000e+00> : vector<8x512xf32>
    %254 = tpu.matmul %252, %253, %cst_109 {dimension_numbers = #tpu.dot_dimension_numbers<[1], [0], [0], [1], [0, 0, 1, 1], [], []>} : vector<8x128xbf16>, vector<128x512xbf16>, vector<8x512xf32> -> vector<8x512xf32>
    %255 = arith.addf %254, %251 : vector<8x512xf32>
    %256 = vector.extract_strided_slice %255 {offsets = [0, 0], sizes = [8, 128], strides = [1, 1]} : vector<8x512xf32> to vector<8x128xf32>
    %cst_110 = arith.constant 0.000000e+00 : f32
    %257 = vector.broadcast %cst_110 : f32 to vector<8x128xf32>
    %258 = arith.subf %257, %256 : vector<8x128xf32>
    %259 = math.exp %258 : vector<8x128xf32>
    %cst_111 = arith.constant 1.000000e+00 : f32
    %260 = vector.broadcast %cst_111 : f32 to vector<8x128xf32>
    %261 = arith.addf %260, %259 : vector<8x128xf32>
    %262 = tpu.reciprocal %261 {approx = true} : vector<8x128xf32> -> vector<8x128xf32>
    %263 = vector.extract_strided_slice %255 {offsets = [0, 128], sizes = [8, 128], strides = [1, 1]} : vector<8x512xf32> to vector<8x128xf32>
    %cst_112 = arith.constant 0.000000e+00 : f32
    %264 = vector.broadcast %cst_112 : f32 to vector<8x128xf32>
    %265 = arith.subf %264, %263 : vector<8x128xf32>
    %266 = math.exp %265 : vector<8x128xf32>
    %cst_113 = arith.constant 1.000000e+00 : f32
    %267 = vector.broadcast %cst_113 : f32 to vector<8x128xf32>
    %268 = arith.addf %267, %266 : vector<8x128xf32>
    %cst_114 = arith.constant 1.000000e+00 : f32
    %269 = vector.broadcast %cst_114 : f32 to vector<8x128xf32>
    %270 = arith.divf %269, %268 : vector<8x128xf32>
    %271 = vector.extract_strided_slice %255 {offsets = [0, 256], sizes = [8, 128], strides = [1, 1]} : vector<8x512xf32> to vector<8x128xf32>
    %272 = math.tanh %271 : vector<8x128xf32>
    %273 = vector.extract_strided_slice %255 {offsets = [0, 384], sizes = [8, 128], strides = [1, 1]} : vector<8x512xf32> to vector<8x128xf32>
    %cst_115 = arith.constant 0.000000e+00 : f32
    %274 = vector.broadcast %cst_115 : f32 to vector<8x128xf32>
    %275 = arith.subf %274, %273 : vector<8x128xf32>
    %276 = math.exp %275 : vector<8x128xf32>
    %cst_116 = arith.constant 1.000000e+00 : f32
    %277 = vector.broadcast %cst_116 : f32 to vector<8x128xf32>
    %278 = arith.addf %277, %276 : vector<8x128xf32>
    %279 = tpu.reciprocal %278 {approx = true} : vector<8x128xf32> -> vector<8x128xf32>
    %280 = arith.mulf %270, %163 : vector<8x128xf32>
    %281 = arith.mulf %262, %272 : vector<8x128xf32>
    %282 = arith.addf %280, %281 : vector<8x128xf32>
    %283 = math.tanh %282 : vector<8x128xf32>
    %284 = arith.mulf %279, %283 : vector<8x128xf32>
    %285 = arith.truncf %245 : vector<8x128xf32> to vector<8x128xbf16>
    %c0_117 = arith.constant 0 : index
    %c0_118 = arith.constant 0 : index
    %286 = vector.load %arg8[%c0_117, %c0_118] : memref<128x512xbf16, #tpu.memory_space<vmem>>, vector<128x512xbf16>
    %cst_119 = arith.constant dense<0.000000e+00> : vector<8x512xf32>
    %287 = tpu.matmul %285, %286, %cst_119 {dimension_numbers = #tpu.dot_dimension_numbers<[1], [0], [0], [1], [0, 0, 1, 1], [], []>} : vector<8x128xbf16>, vector<128x512xbf16>, vector<8x512xf32> -> vector<8x512xf32>
    %c0_120 = arith.constant 0 : index
    %c0_121 = arith.constant 0 : index
    %288 = vector.load %arg10[%c0_120, %c0_121] : memref<1x512xf32, #tpu.memory_space<vmem>>, vector<1x512xf32>
    %289 = vector.broadcast %288 : vector<1x512xf32> to vector<8x512xf32>
    %290 = arith.addf %287, %289 : vector<8x512xf32>
    %291 = arith.truncf %204 : vector<8x128xf32> to vector<8x128xbf16>
    %c0_122 = arith.constant 0 : index
    %c0_123 = arith.constant 0 : index
    %292 = vector.load %arg9[%c0_122, %c0_123] : memref<128x512xbf16, #tpu.memory_space<vmem>>, vector<128x512xbf16>
    %cst_124 = arith.constant dense<0.000000e+00> : vector<8x512xf32>
    %293 = tpu.matmul %291, %292, %cst_124 {dimension_numbers = #tpu.dot_dimension_numbers<[1], [0], [0], [1], [0, 0, 1, 1], [], []>} : vector<8x128xbf16>, vector<128x512xbf16>, vector<8x512xf32> -> vector<8x512xf32>
    %294 = arith.addf %293, %290 : vector<8x512xf32>
    %295 = vector.extract_strided_slice %294 {offsets = [0, 0], sizes = [8, 128], strides = [1, 1]} : vector<8x512xf32> to vector<8x128xf32>
    %cst_125 = arith.constant 0.000000e+00 : f32
    %296 = vector.broadcast %cst_125 : f32 to vector<8x128xf32>
    %297 = arith.subf %296, %295 : vector<8x128xf32>
    %298 = math.exp %297 : vector<8x128xf32>
    %cst_126 = arith.constant 1.000000e+00 : f32
    %299 = vector.broadcast %cst_126 : f32 to vector<8x128xf32>
    %300 = arith.addf %299, %298 : vector<8x128xf32>
    %301 = tpu.reciprocal %300 {approx = true} : vector<8x128xf32> -> vector<8x128xf32>
    %302 = vector.extract_strided_slice %294 {offsets = [0, 128], sizes = [8, 128], strides = [1, 1]} : vector<8x512xf32> to vector<8x128xf32>
    %cst_127 = arith.constant 0.000000e+00 : f32
    %303 = vector.broadcast %cst_127 : f32 to vector<8x128xf32>
    %304 = arith.subf %303, %302 : vector<8x128xf32>
    %305 = math.exp %304 : vector<8x128xf32>
    %cst_128 = arith.constant 1.000000e+00 : f32
    %306 = vector.broadcast %cst_128 : f32 to vector<8x128xf32>
    %307 = arith.addf %306, %305 : vector<8x128xf32>
    %cst_129 = arith.constant 1.000000e+00 : f32
    %308 = vector.broadcast %cst_129 : f32 to vector<8x128xf32>
    %309 = arith.divf %308, %307 : vector<8x128xf32>
    %310 = vector.extract_strided_slice %294 {offsets = [0, 256], sizes = [8, 128], strides = [1, 1]} : vector<8x512xf32> to vector<8x128xf32>
    %311 = math.tanh %310 : vector<8x128xf32>
    %312 = vector.extract_strided_slice %294 {offsets = [0, 384], sizes = [8, 128], strides = [1, 1]} : vector<8x512xf32> to vector<8x128xf32>
    %cst_130 = arith.constant 0.000000e+00 : f32
    %313 = vector.broadcast %cst_130 : f32 to vector<8x128xf32>
    %314 = arith.subf %313, %312 : vector<8x128xf32>
    %315 = math.exp %314 : vector<8x128xf32>
    %cst_131 = arith.constant 1.000000e+00 : f32
    %316 = vector.broadcast %cst_131 : f32 to vector<8x128xf32>
    %317 = arith.addf %316, %315 : vector<8x128xf32>
    %318 = tpu.reciprocal %317 {approx = true} : vector<8x128xf32> -> vector<8x128xf32>
    %319 = arith.mulf %309, %202 : vector<8x128xf32>
    %320 = arith.mulf %301, %311 : vector<8x128xf32>
    %321 = arith.addf %319, %320 : vector<8x128xf32>
    %322 = math.tanh %321 : vector<8x128xf32>
    %323 = arith.mulf %318, %322 : vector<8x128xf32>
    %c3 = arith.constant 3 : index
    %c0_132 = arith.constant 0 : index
    %c0_133 = arith.constant 0 : index
    %324 = vector.load %arg1[%c3, %c0_132, %c0_133] : memref<8x8x3xf32, #tpu.memory_space<vmem>>, vector<1x8x3xf32>
    %325 = vector.shape_cast %324 : vector<1x8x3xf32> to vector<8x3xf32>
    %326 = arith.truncf %325 : vector<8x3xf32> to vector<8x3xbf16>
    %c0_134 = arith.constant 0 : index
    %c0_135 = arith.constant 0 : index
    %327 = vector.load %arg5[%c0_134, %c0_135] : memref<3x512xbf16, #tpu.memory_space<vmem>>, vector<3x512xbf16>
    %cst_136 = arith.constant dense<0.000000e+00> : vector<8x512xf32>
    %328 = tpu.matmul %326, %327, %cst_136 {dimension_numbers = #tpu.dot_dimension_numbers<[1], [0], [0], [1], [0, 0, 1, 1], [], []>} : vector<8x3xbf16>, vector<3x512xbf16>, vector<8x512xf32> -> vector<8x512xf32>
    %c0_137 = arith.constant 0 : index
    %c0_138 = arith.constant 0 : index
    %329 = vector.load %arg6[%c0_137, %c0_138] : memref<1x512xf32, #tpu.memory_space<vmem>>, vector<1x512xf32>
    %330 = vector.broadcast %329 : vector<1x512xf32> to vector<8x512xf32>
    %331 = arith.addf %328, %330 : vector<8x512xf32>
    %332 = arith.truncf %245 : vector<8x128xf32> to vector<8x128xbf16>
    %c0_139 = arith.constant 0 : index
    %c0_140 = arith.constant 0 : index
    %333 = vector.load %arg7[%c0_139, %c0_140] : memref<128x512xbf16, #tpu.memory_space<vmem>>, vector<128x512xbf16>
    %cst_141 = arith.constant dense<0.000000e+00> : vector<8x512xf32>
    %334 = tpu.matmul %332, %333, %cst_141 {dimension_numbers = #tpu.dot_dimension_numbers<[1], [0], [0], [1], [0, 0, 1, 1], [], []>} : vector<8x128xbf16>, vector<128x512xbf16>, vector<8x512xf32> -> vector<8x512xf32>
    %335 = arith.addf %334, %331 : vector<8x512xf32>
    %336 = vector.extract_strided_slice %335 {offsets = [0, 0], sizes = [8, 128], strides = [1, 1]} : vector<8x512xf32> to vector<8x128xf32>
    %cst_142 = arith.constant 0.000000e+00 : f32
    %337 = vector.broadcast %cst_142 : f32 to vector<8x128xf32>
    %338 = arith.subf %337, %336 : vector<8x128xf32>
    %339 = math.exp %338 : vector<8x128xf32>
    %cst_143 = arith.constant 1.000000e+00 : f32
    %340 = vector.broadcast %cst_143 : f32 to vector<8x128xf32>
    %341 = arith.addf %340, %339 : vector<8x128xf32>
    %342 = tpu.reciprocal %341 {approx = true} : vector<8x128xf32> -> vector<8x128xf32>
    %343 = vector.extract_strided_slice %335 {offsets = [0, 128], sizes = [8, 128], strides = [1, 1]} : vector<8x512xf32> to vector<8x128xf32>
    %cst_144 = arith.constant 0.000000e+00 : f32
    %344 = vector.broadcast %cst_144 : f32 to vector<8x128xf32>
    %345 = arith.subf %344, %343 : vector<8x128xf32>
    %346 = math.exp %345 : vector<8x128xf32>
    %cst_145 = arith.constant 1.000000e+00 : f32
    %347 = vector.broadcast %cst_145 : f32 to vector<8x128xf32>
    %348 = arith.addf %347, %346 : vector<8x128xf32>
    %cst_146 = arith.constant 1.000000e+00 : f32
    %349 = vector.broadcast %cst_146 : f32 to vector<8x128xf32>
    %350 = arith.divf %349, %348 : vector<8x128xf32>
    %351 = vector.extract_strided_slice %335 {offsets = [0, 256], sizes = [8, 128], strides = [1, 1]} : vector<8x512xf32> to vector<8x128xf32>
    %352 = math.tanh %351 : vector<8x128xf32>
    %353 = vector.extract_strided_slice %335 {offsets = [0, 384], sizes = [8, 128], strides = [1, 1]} : vector<8x512xf32> to vector<8x128xf32>
    %cst_147 = arith.constant 0.000000e+00 : f32
    %354 = vector.broadcast %cst_147 : f32 to vector<8x128xf32>
    %355 = arith.subf %354, %353 : vector<8x128xf32>
    %356 = math.exp %355 : vector<8x128xf32>
    %cst_148 = arith.constant 1.000000e+00 : f32
    %357 = vector.broadcast %cst_148 : f32 to vector<8x128xf32>
    %358 = arith.addf %357, %356 : vector<8x128xf32>
    %359 = tpu.reciprocal %358 {approx = true} : vector<8x128xf32> -> vector<8x128xf32>
    %360 = arith.mulf %350, %243 : vector<8x128xf32>
    %361 = arith.mulf %342, %352 : vector<8x128xf32>
    %362 = arith.addf %360, %361 : vector<8x128xf32>
    %363 = math.tanh %362 : vector<8x128xf32>
    %364 = arith.mulf %359, %363 : vector<8x128xf32>
    %365 = arith.truncf %323 : vector<8x128xf32> to vector<8x128xbf16>
    %c0_149 = arith.constant 0 : index
    %c0_150 = arith.constant 0 : index
    %366 = vector.load %arg11[%c0_149, %c0_150] : memref<128x512xbf16, #tpu.memory_space<vmem>>, vector<128x512xbf16>
    %cst_151 = arith.constant dense<0.000000e+00> : vector<8x512xf32>
    %367 = tpu.matmul %365, %366, %cst_151 {dimension_numbers = #tpu.dot_dimension_numbers<[1], [0], [0], [1], [0, 0, 1, 1], [], []>} : vector<8x128xbf16>, vector<128x512xbf16>, vector<8x512xf32> -> vector<8x512xf32>
    %c0_152 = arith.constant 0 : index
    %c0_153 = arith.constant 0 : index
    %368 = vector.load %arg13[%c0_152, %c0_153] : memref<1x512xf32, #tpu.memory_space<vmem>>, vector<1x512xf32>
    %369 = vector.broadcast %368 : vector<1x512xf32> to vector<8x512xf32>
    %370 = arith.addf %367, %369 : vector<8x512xf32>
    %371 = arith.truncf %284 : vector<8x128xf32> to vector<8x128xbf16>
    %c0_154 = arith.constant 0 : index
    %c0_155 = arith.constant 0 : index
    %372 = vector.load %arg12[%c0_154, %c0_155] : memref<128x512xbf16, #tpu.memory_space<vmem>>, vector<128x512xbf16>
    %cst_156 = arith.constant dense<0.000000e+00> : vector<8x512xf32>
    %373 = tpu.matmul %371, %372, %cst_156 {dimension_numbers = #tpu.dot_dimension_numbers<[1], [0], [0], [1], [0, 0, 1, 1], [], []>} : vector<8x128xbf16>, vector<128x512xbf16>, vector<8x512xf32> -> vector<8x512xf32>
    %374 = arith.addf %373, %370 : vector<8x512xf32>
    %375 = vector.extract_strided_slice %374 {offsets = [0, 0], sizes = [8, 128], strides = [1, 1]} : vector<8x512xf32> to vector<8x128xf32>
    %cst_157 = arith.constant 0.000000e+00 : f32
    %376 = vector.broadcast %cst_157 : f32 to vector<8x128xf32>
    %377 = arith.subf %376, %375 : vector<8x128xf32>
    %378 = math.exp %377 : vector<8x128xf32>
    %cst_158 = arith.constant 1.000000e+00 : f32
    %379 = vector.broadcast %cst_158 : f32 to vector<8x128xf32>
    %380 = arith.addf %379, %378 : vector<8x128xf32>
    %381 = tpu.reciprocal %380 {approx = true} : vector<8x128xf32> -> vector<8x128xf32>
    %382 = vector.extract_strided_slice %374 {offsets = [0, 128], sizes = [8, 128], strides = [1, 1]} : vector<8x512xf32> to vector<8x128xf32>
    %cst_159 = arith.constant 0.000000e+00 : f32
    %383 = vector.broadcast %cst_159 : f32 to vector<8x128xf32>
    %384 = arith.subf %383, %382 : vector<8x128xf32>
    %385 = math.exp %384 : vector<8x128xf32>
    %cst_160 = arith.constant 1.000000e+00 : f32
    %386 = vector.broadcast %cst_160 : f32 to vector<8x128xf32>
    %387 = arith.addf %386, %385 : vector<8x128xf32>
    %cst_161 = arith.constant 1.000000e+00 : f32
    %388 = vector.broadcast %cst_161 : f32 to vector<8x128xf32>
    %389 = arith.divf %388, %387 : vector<8x128xf32>
    %390 = vector.extract_strided_slice %374 {offsets = [0, 256], sizes = [8, 128], strides = [1, 1]} : vector<8x512xf32> to vector<8x128xf32>
    %391 = math.tanh %390 : vector<8x128xf32>
    %392 = vector.extract_strided_slice %374 {offsets = [0, 384], sizes = [8, 128], strides = [1, 1]} : vector<8x512xf32> to vector<8x128xf32>
    %cst_162 = arith.constant 0.000000e+00 : f32
    %393 = vector.broadcast %cst_162 : f32 to vector<8x128xf32>
    %394 = arith.subf %393, %392 : vector<8x128xf32>
    %395 = math.exp %394 : vector<8x128xf32>
    %cst_163 = arith.constant 1.000000e+00 : f32
    %396 = vector.broadcast %cst_163 : f32 to vector<8x128xf32>
    %397 = arith.addf %396, %395 : vector<8x128xf32>
    %398 = tpu.reciprocal %397 {approx = true} : vector<8x128xf32> -> vector<8x128xf32>
    %399 = arith.mulf %389, %282 : vector<8x128xf32>
    %400 = arith.mulf %381, %391 : vector<8x128xf32>
    %401 = arith.addf %399, %400 : vector<8x128xf32>
    %402 = math.tanh %401 : vector<8x128xf32>
    %403 = arith.mulf %398, %402 : vector<8x128xf32>
    %404 = arith.truncf %364 : vector<8x128xf32> to vector<8x128xbf16>
    %c0_164 = arith.constant 0 : index
    %c0_165 = arith.constant 0 : index
    %405 = vector.load %arg8[%c0_164, %c0_165] : memref<128x512xbf16, #tpu.memory_space<vmem>>, vector<128x512xbf16>
    %cst_166 = arith.constant dense<0.000000e+00> : vector<8x512xf32>
    %406 = tpu.matmul %404, %405, %cst_166 {dimension_numbers = #tpu.dot_dimension_numbers<[1], [0], [0], [1], [0, 0, 1, 1], [], []>} : vector<8x128xbf16>, vector<128x512xbf16>, vector<8x512xf32> -> vector<8x512xf32>
    %c0_167 = arith.constant 0 : index
    %c0_168 = arith.constant 0 : index
    %407 = vector.load %arg10[%c0_167, %c0_168] : memref<1x512xf32, #tpu.memory_space<vmem>>, vector<1x512xf32>
    %408 = vector.broadcast %407 : vector<1x512xf32> to vector<8x512xf32>
    %409 = arith.addf %406, %408 : vector<8x512xf32>
    %410 = arith.truncf %323 : vector<8x128xf32> to vector<8x128xbf16>
    %c0_169 = arith.constant 0 : index
    %c0_170 = arith.constant 0 : index
    %411 = vector.load %arg9[%c0_169, %c0_170] : memref<128x512xbf16, #tpu.memory_space<vmem>>, vector<128x512xbf16>
    %cst_171 = arith.constant dense<0.000000e+00> : vector<8x512xf32>
    %412 = tpu.matmul %410, %411, %cst_171 {dimension_numbers = #tpu.dot_dimension_numbers<[1], [0], [0], [1], [0, 0, 1, 1], [], []>} : vector<8x128xbf16>, vector<128x512xbf16>, vector<8x512xf32> -> vector<8x512xf32>
    %413 = arith.addf %412, %409 : vector<8x512xf32>
    %414 = vector.extract_strided_slice %413 {offsets = [0, 0], sizes = [8, 128], strides = [1, 1]} : vector<8x512xf32> to vector<8x128xf32>
    %cst_172 = arith.constant 0.000000e+00 : f32
    %415 = vector.broadcast %cst_172 : f32 to vector<8x128xf32>
    %416 = arith.subf %415, %414 : vector<8x128xf32>
    %417 = math.exp %416 : vector<8x128xf32>
    %cst_173 = arith.constant 1.000000e+00 : f32
    %418 = vector.broadcast %cst_173 : f32 to vector<8x128xf32>
    %419 = arith.addf %418, %417 : vector<8x128xf32>
    %420 = tpu.reciprocal %419 {approx = true} : vector<8x128xf32> -> vector<8x128xf32>
    %421 = vector.extract_strided_slice %413 {offsets = [0, 128], sizes = [8, 128], strides = [1, 1]} : vector<8x512xf32> to vector<8x128xf32>
    %cst_174 = arith.constant 0.000000e+00 : f32
    %422 = vector.broadcast %cst_174 : f32 to vector<8x128xf32>
    %423 = arith.subf %422, %421 : vector<8x128xf32>
    %424 = math.exp %423 : vector<8x128xf32>
    %cst_175 = arith.constant 1.000000e+00 : f32
    %425 = vector.broadcast %cst_175 : f32 to vector<8x128xf32>
    %426 = arith.addf %425, %424 : vector<8x128xf32>
    %cst_176 = arith.constant 1.000000e+00 : f32
    %427 = vector.broadcast %cst_176 : f32 to vector<8x128xf32>
    %428 = arith.divf %427, %426 : vector<8x128xf32>
    %429 = vector.extract_strided_slice %413 {offsets = [0, 256], sizes = [8, 128], strides = [1, 1]} : vector<8x512xf32> to vector<8x128xf32>
    %430 = math.tanh %429 : vector<8x128xf32>
    %431 = vector.extract_strided_slice %413 {offsets = [0, 384], sizes = [8, 128], strides = [1, 1]} : vector<8x512xf32> to vector<8x128xf32>
    %cst_177 = arith.constant 0.000000e+00 : f32
    %432 = vector.broadcast %cst_177 : f32 to vector<8x128xf32>
    %433 = arith.subf %432, %431 : vector<8x128xf32>
    %434 = math.exp %433 : vector<8x128xf32>
    %cst_178 = arith.constant 1.000000e+00 : f32
    %435 = vector.broadcast %cst_178 : f32 to vector<8x128xf32>
    %436 = arith.addf %435, %434 : vector<8x128xf32>
    %437 = tpu.reciprocal %436 {approx = true} : vector<8x128xf32> -> vector<8x128xf32>
    %438 = arith.mulf %428, %321 : vector<8x128xf32>
    %439 = arith.mulf %420, %430 : vector<8x128xf32>
    %440 = arith.addf %438, %439 : vector<8x128xf32>
    %441 = math.tanh %440 : vector<8x128xf32>
    %442 = arith.mulf %437, %441 : vector<8x128xf32>
    %c4 = arith.constant 4 : index
    %c0_179 = arith.constant 0 : index
    %c0_180 = arith.constant 0 : index
    %443 = vector.load %arg1[%c4, %c0_179, %c0_180] : memref<8x8x3xf32, #tpu.memory_space<vmem>>, vector<1x8x3xf32>
    %444 = vector.shape_cast %443 : vector<1x8x3xf32> to vector<8x3xf32>
    %445 = arith.truncf %444 : vector<8x3xf32> to vector<8x3xbf16>
    %c0_181 = arith.constant 0 : index
    %c0_182 = arith.constant 0 : index
    %446 = vector.load %arg5[%c0_181, %c0_182] : memref<3x512xbf16, #tpu.memory_space<vmem>>, vector<3x512xbf16>
    %cst_183 = arith.constant dense<0.000000e+00> : vector<8x512xf32>
    %447 = tpu.matmul %445, %446, %cst_183 {dimension_numbers = #tpu.dot_dimension_numbers<[1], [0], [0], [1], [0, 0, 1, 1], [], []>} : vector<8x3xbf16>, vector<3x512xbf16>, vector<8x512xf32> -> vector<8x512xf32>
    %c0_184 = arith.constant 0 : index
    %c0_185 = arith.constant 0 : index
    %448 = vector.load %arg6[%c0_184, %c0_185] : memref<1x512xf32, #tpu.memory_space<vmem>>, vector<1x512xf32>
    %449 = vector.broadcast %448 : vector<1x512xf32> to vector<8x512xf32>
    %450 = arith.addf %447, %449 : vector<8x512xf32>
    %451 = arith.truncf %364 : vector<8x128xf32> to vector<8x128xbf16>
    %c0_186 = arith.constant 0 : index
    %c0_187 = arith.constant 0 : index
    %452 = vector.load %arg7[%c0_186, %c0_187] : memref<128x512xbf16, #tpu.memory_space<vmem>>, vector<128x512xbf16>
    %cst_188 = arith.constant dense<0.000000e+00> : vector<8x512xf32>
    %453 = tpu.matmul %451, %452, %cst_188 {dimension_numbers = #tpu.dot_dimension_numbers<[1], [0], [0], [1], [0, 0, 1, 1], [], []>} : vector<8x128xbf16>, vector<128x512xbf16>, vector<8x512xf32> -> vector<8x512xf32>
    %454 = arith.addf %453, %450 : vector<8x512xf32>
    %455 = vector.extract_strided_slice %454 {offsets = [0, 0], sizes = [8, 128], strides = [1, 1]} : vector<8x512xf32> to vector<8x128xf32>
    %cst_189 = arith.constant 0.000000e+00 : f32
    %456 = vector.broadcast %cst_189 : f32 to vector<8x128xf32>
    %457 = arith.subf %456, %455 : vector<8x128xf32>
    %458 = math.exp %457 : vector<8x128xf32>
    %cst_190 = arith.constant 1.000000e+00 : f32
    %459 = vector.broadcast %cst_190 : f32 to vector<8x128xf32>
    %460 = arith.addf %459, %458 : vector<8x128xf32>
    %461 = tpu.reciprocal %460 {approx = true} : vector<8x128xf32> -> vector<8x128xf32>
    %462 = vector.extract_strided_slice %454 {offsets = [0, 128], sizes = [8, 128], strides = [1, 1]} : vector<8x512xf32> to vector<8x128xf32>
    %cst_191 = arith.constant 0.000000e+00 : f32
    %463 = vector.broadcast %cst_191 : f32 to vector<8x128xf32>
    %464 = arith.subf %463, %462 : vector<8x128xf32>
    %465 = math.exp %464 : vector<8x128xf32>
    %cst_192 = arith.constant 1.000000e+00 : f32
    %466 = vector.broadcast %cst_192 : f32 to vector<8x128xf32>
    %467 = arith.addf %466, %465 : vector<8x128xf32>
    %cst_193 = arith.constant 1.000000e+00 : f32
    %468 = vector.broadcast %cst_193 : f32 to vector<8x128xf32>
    %469 = arith.divf %468, %467 : vector<8x128xf32>
    %470 = vector.extract_strided_slice %454 {offsets = [0, 256], sizes = [8, 128], strides = [1, 1]} : vector<8x512xf32> to vector<8x128xf32>
    %471 = math.tanh %470 : vector<8x128xf32>
    %472 = vector.extract_strided_slice %454 {offsets = [0, 384], sizes = [8, 128], strides = [1, 1]} : vector<8x512xf32> to vector<8x128xf32>
    %cst_194 = arith.constant 0.000000e+00 : f32
    %473 = vector.broadcast %cst_194 : f32 to vector<8x128xf32>
    %474 = arith.subf %473, %472 : vector<8x128xf32>
    %475 = math.exp %474 : vector<8x128xf32>
    %cst_195 = arith.constant 1.000000e+00 : f32
    %476 = vector.broadcast %cst_195 : f32 to vector<8x128xf32>
    %477 = arith.addf %476, %475 : vector<8x128xf32>
    %478 = tpu.reciprocal %477 {approx = true} : vector<8x128xf32> -> vector<8x128xf32>
    %479 = arith.mulf %469, %362 : vector<8x128xf32>
    %480 = arith.mulf %461, %471 : vector<8x128xf32>
    %481 = arith.addf %479, %480 : vector<8x128xf32>
    %482 = math.tanh %481 : vector<8x128xf32>
    %483 = arith.mulf %478, %482 : vector<8x128xf32>
    %484 = arith.truncf %442 : vector<8x128xf32> to vector<8x128xbf16>
    %c0_196 = arith.constant 0 : index
    %c0_197 = arith.constant 0 : index
    %485 = vector.load %arg11[%c0_196, %c0_197] : memref<128x512xbf16, #tpu.memory_space<vmem>>, vector<128x512xbf16>
    %cst_198 = arith.constant dense<0.000000e+00> : vector<8x512xf32>
    %486 = tpu.matmul %484, %485, %cst_198 {dimension_numbers = #tpu.dot_dimension_numbers<[1], [0], [0], [1], [0, 0, 1, 1], [], []>} : vector<8x128xbf16>, vector<128x512xbf16>, vector<8x512xf32> -> vector<8x512xf32>
    %c0_199 = arith.constant 0 : index
    %c0_200 = arith.constant 0 : index
    %487 = vector.load %arg13[%c0_199, %c0_200] : memref<1x512xf32, #tpu.memory_space<vmem>>, vector<1x512xf32>
    %488 = vector.broadcast %487 : vector<1x512xf32> to vector<8x512xf32>
    %489 = arith.addf %486, %488 : vector<8x512xf32>
    %490 = arith.truncf %403 : vector<8x128xf32> to vector<8x128xbf16>
    %c0_201 = arith.constant 0 : index
    %c0_202 = arith.constant 0 : index
    %491 = vector.load %arg12[%c0_201, %c0_202] : memref<128x512xbf16, #tpu.memory_space<vmem>>, vector<128x512xbf16>
    %cst_203 = arith.constant dense<0.000000e+00> : vector<8x512xf32>
    %492 = tpu.matmul %490, %491, %cst_203 {dimension_numbers = #tpu.dot_dimension_numbers<[1], [0], [0], [1], [0, 0, 1, 1], [], []>} : vector<8x128xbf16>, vector<128x512xbf16>, vector<8x512xf32> -> vector<8x512xf32>
    %493 = arith.addf %492, %489 : vector<8x512xf32>
    %494 = vector.extract_strided_slice %493 {offsets = [0, 0], sizes = [8, 128], strides = [1, 1]} : vector<8x512xf32> to vector<8x128xf32>
    %cst_204 = arith.constant 0.000000e+00 : f32
    %495 = vector.broadcast %cst_204 : f32 to vector<8x128xf32>
    %496 = arith.subf %495, %494 : vector<8x128xf32>
    %497 = math.exp %496 : vector<8x128xf32>
    %cst_205 = arith.constant 1.000000e+00 : f32
    %498 = vector.broadcast %cst_205 : f32 to vector<8x128xf32>
    %499 = arith.addf %498, %497 : vector<8x128xf32>
    %500 = tpu.reciprocal %499 {approx = true} : vector<8x128xf32> -> vector<8x128xf32>
    %501 = vector.extract_strided_slice %493 {offsets = [0, 128], sizes = [8, 128], strides = [1, 1]} : vector<8x512xf32> to vector<8x128xf32>
    %cst_206 = arith.constant 0.000000e+00 : f32
    %502 = vector.broadcast %cst_206 : f32 to vector<8x128xf32>
    %503 = arith.subf %502, %501 : vector<8x128xf32>
    %504 = math.exp %503 : vector<8x128xf32>
    %cst_207 = arith.constant 1.000000e+00 : f32
    %505 = vector.broadcast %cst_207 : f32 to vector<8x128xf32>
    %506 = arith.addf %505, %504 : vector<8x128xf32>
    %cst_208 = arith.constant 1.000000e+00 : f32
    %507 = vector.broadcast %cst_208 : f32 to vector<8x128xf32>
    %508 = arith.divf %507, %506 : vector<8x128xf32>
    %509 = vector.extract_strided_slice %493 {offsets = [0, 256], sizes = [8, 128], strides = [1, 1]} : vector<8x512xf32> to vector<8x128xf32>
    %510 = math.tanh %509 : vector<8x128xf32>
    %511 = vector.extract_strided_slice %493 {offsets = [0, 384], sizes = [8, 128], strides = [1, 1]} : vector<8x512xf32> to vector<8x128xf32>
    %cst_209 = arith.constant 0.000000e+00 : f32
    %512 = vector.broadcast %cst_209 : f32 to vector<8x128xf32>
    %513 = arith.subf %512, %511 : vector<8x128xf32>
    %514 = math.exp %513 : vector<8x128xf32>
    %cst_210 = arith.constant 1.000000e+00 : f32
    %515 = vector.broadcast %cst_210 : f32 to vector<8x128xf32>
    %516 = arith.addf %515, %514 : vector<8x128xf32>
    %517 = tpu.reciprocal %516 {approx = true} : vector<8x128xf32> -> vector<8x128xf32>
    %518 = arith.mulf %508, %401 : vector<8x128xf32>
    %519 = arith.mulf %500, %510 : vector<8x128xf32>
    %520 = arith.addf %518, %519 : vector<8x128xf32>
    %521 = math.tanh %520 : vector<8x128xf32>
    %522 = arith.mulf %517, %521 : vector<8x128xf32>
    %523 = arith.truncf %483 : vector<8x128xf32> to vector<8x128xbf16>
    %c0_211 = arith.constant 0 : index
    %c0_212 = arith.constant 0 : index
    %524 = vector.load %arg8[%c0_211, %c0_212] : memref<128x512xbf16, #tpu.memory_space<vmem>>, vector<128x512xbf16>
    %cst_213 = arith.constant dense<0.000000e+00> : vector<8x512xf32>
    %525 = tpu.matmul %523, %524, %cst_213 {dimension_numbers = #tpu.dot_dimension_numbers<[1], [0], [0], [1], [0, 0, 1, 1], [], []>} : vector<8x128xbf16>, vector<128x512xbf16>, vector<8x512xf32> -> vector<8x512xf32>
    %c0_214 = arith.constant 0 : index
    %c0_215 = arith.constant 0 : index
    %526 = vector.load %arg10[%c0_214, %c0_215] : memref<1x512xf32, #tpu.memory_space<vmem>>, vector<1x512xf32>
    %527 = vector.broadcast %526 : vector<1x512xf32> to vector<8x512xf32>
    %528 = arith.addf %525, %527 : vector<8x512xf32>
    %529 = arith.truncf %442 : vector<8x128xf32> to vector<8x128xbf16>
    %c0_216 = arith.constant 0 : index
    %c0_217 = arith.constant 0 : index
    %530 = vector.load %arg9[%c0_216, %c0_217] : memref<128x512xbf16, #tpu.memory_space<vmem>>, vector<128x512xbf16>
    %cst_218 = arith.constant dense<0.000000e+00> : vector<8x512xf32>
    %531 = tpu.matmul %529, %530, %cst_218 {dimension_numbers = #tpu.dot_dimension_numbers<[1], [0], [0], [1], [0, 0, 1, 1], [], []>} : vector<8x128xbf16>, vector<128x512xbf16>, vector<8x512xf32> -> vector<8x512xf32>
    %532 = arith.addf %531, %528 : vector<8x512xf32>
    %533 = vector.extract_strided_slice %532 {offsets = [0, 0], sizes = [8, 128], strides = [1, 1]} : vector<8x512xf32> to vector<8x128xf32>
    %cst_219 = arith.constant 0.000000e+00 : f32
    %534 = vector.broadcast %cst_219 : f32 to vector<8x128xf32>
    %535 = arith.subf %534, %533 : vector<8x128xf32>
    %536 = math.exp %535 : vector<8x128xf32>
    %cst_220 = arith.constant 1.000000e+00 : f32
    %537 = vector.broadcast %cst_220 : f32 to vector<8x128xf32>
    %538 = arith.addf %537, %536 : vector<8x128xf32>
    %539 = tpu.reciprocal %538 {approx = true} : vector<8x128xf32> -> vector<8x128xf32>
    %540 = vector.extract_strided_slice %532 {offsets = [0, 128], sizes = [8, 128], strides = [1, 1]} : vector<8x512xf32> to vector<8x128xf32>
    %cst_221 = arith.constant 0.000000e+00 : f32
    %541 = vector.broadcast %cst_221 : f32 to vector<8x128xf32>
    %542 = arith.subf %541, %540 : vector<8x128xf32>
    %543 = math.exp %542 : vector<8x128xf32>
    %cst_222 = arith.constant 1.000000e+00 : f32
    %544 = vector.broadcast %cst_222 : f32 to vector<8x128xf32>
    %545 = arith.addf %544, %543 : vector<8x128xf32>
    %cst_223 = arith.constant 1.000000e+00 : f32
    %546 = vector.broadcast %cst_223 : f32 to vector<8x128xf32>
    %547 = arith.divf %546, %545 : vector<8x128xf32>
    %548 = vector.extract_strided_slice %532 {offsets = [0, 256], sizes = [8, 128], strides = [1, 1]} : vector<8x512xf32> to vector<8x128xf32>
    %549 = math.tanh %548 : vector<8x128xf32>
    %550 = vector.extract_strided_slice %532 {offsets = [0, 384], sizes = [8, 128], strides = [1, 1]} : vector<8x512xf32> to vector<8x128xf32>
    %cst_224 = arith.constant 0.000000e+00 : f32
    %551 = vector.broadcast %cst_224 : f32 to vector<8x128xf32>
    %552 = arith.subf %551, %550 : vector<8x128xf32>
    %553 = math.exp %552 : vector<8x128xf32>
    %cst_225 = arith.constant 1.000000e+00 : f32
    %554 = vector.broadcast %cst_225 : f32 to vector<8x128xf32>
    %555 = arith.addf %554, %553 : vector<8x128xf32>
    %556 = tpu.reciprocal %555 {approx = true} : vector<8x128xf32> -> vector<8x128xf32>
    %557 = arith.mulf %547, %440 : vector<8x128xf32>
    %558 = arith.mulf %539, %549 : vector<8x128xf32>
    %559 = arith.addf %557, %558 : vector<8x128xf32>
    %560 = math.tanh %559 : vector<8x128xf32>
    %561 = arith.mulf %556, %560 : vector<8x128xf32>
    %c5 = arith.constant 5 : index
    %c0_226 = arith.constant 0 : index
    %c0_227 = arith.constant 0 : index
    %562 = vector.load %arg1[%c5, %c0_226, %c0_227] : memref<8x8x3xf32, #tpu.memory_space<vmem>>, vector<1x8x3xf32>
    %563 = vector.shape_cast %562 : vector<1x8x3xf32> to vector<8x3xf32>
    %564 = arith.truncf %563 : vector<8x3xf32> to vector<8x3xbf16>
    %c0_228 = arith.constant 0 : index
    %c0_229 = arith.constant 0 : index
    %565 = vector.load %arg5[%c0_228, %c0_229] : memref<3x512xbf16, #tpu.memory_space<vmem>>, vector<3x512xbf16>
    %cst_230 = arith.constant dense<0.000000e+00> : vector<8x512xf32>
    %566 = tpu.matmul %564, %565, %cst_230 {dimension_numbers = #tpu.dot_dimension_numbers<[1], [0], [0], [1], [0, 0, 1, 1], [], []>} : vector<8x3xbf16>, vector<3x512xbf16>, vector<8x512xf32> -> vector<8x512xf32>
    %c0_231 = arith.constant 0 : index
    %c0_232 = arith.constant 0 : index
    %567 = vector.load %arg6[%c0_231, %c0_232] : memref<1x512xf32, #tpu.memory_space<vmem>>, vector<1x512xf32>
    %568 = vector.broadcast %567 : vector<1x512xf32> to vector<8x512xf32>
    %569 = arith.addf %566, %568 : vector<8x512xf32>
    %570 = arith.truncf %483 : vector<8x128xf32> to vector<8x128xbf16>
    %c0_233 = arith.constant 0 : index
    %c0_234 = arith.constant 0 : index
    %571 = vector.load %arg7[%c0_233, %c0_234] : memref<128x512xbf16, #tpu.memory_space<vmem>>, vector<128x512xbf16>
    %cst_235 = arith.constant dense<0.000000e+00> : vector<8x512xf32>
    %572 = tpu.matmul %570, %571, %cst_235 {dimension_numbers = #tpu.dot_dimension_numbers<[1], [0], [0], [1], [0, 0, 1, 1], [], []>} : vector<8x128xbf16>, vector<128x512xbf16>, vector<8x512xf32> -> vector<8x512xf32>
    %573 = arith.addf %572, %569 : vector<8x512xf32>
    %574 = vector.extract_strided_slice %573 {offsets = [0, 0], sizes = [8, 128], strides = [1, 1]} : vector<8x512xf32> to vector<8x128xf32>
    %cst_236 = arith.constant 0.000000e+00 : f32
    %575 = vector.broadcast %cst_236 : f32 to vector<8x128xf32>
    %576 = arith.subf %575, %574 : vector<8x128xf32>
    %577 = math.exp %576 : vector<8x128xf32>
    %cst_237 = arith.constant 1.000000e+00 : f32
    %578 = vector.broadcast %cst_237 : f32 to vector<8x128xf32>
    %579 = arith.addf %578, %577 : vector<8x128xf32>
    %580 = tpu.reciprocal %579 {approx = true} : vector<8x128xf32> -> vector<8x128xf32>
    %581 = vector.extract_strided_slice %573 {offsets = [0, 128], sizes = [8, 128], strides = [1, 1]} : vector<8x512xf32> to vector<8x128xf32>
    %cst_238 = arith.constant 0.000000e+00 : f32
    %582 = vector.broadcast %cst_238 : f32 to vector<8x128xf32>
    %583 = arith.subf %582, %581 : vector<8x128xf32>
    %584 = math.exp %583 : vector<8x128xf32>
    %cst_239 = arith.constant 1.000000e+00 : f32
    %585 = vector.broadcast %cst_239 : f32 to vector<8x128xf32>
    %586 = arith.addf %585, %584 : vector<8x128xf32>
    %cst_240 = arith.constant 1.000000e+00 : f32
    %587 = vector.broadcast %cst_240 : f32 to vector<8x128xf32>
    %588 = arith.divf %587, %586 : vector<8x128xf32>
    %589 = vector.extract_strided_slice %573 {offsets = [0, 256], sizes = [8, 128], strides = [1, 1]} : vector<8x512xf32> to vector<8x128xf32>
    %590 = math.tanh %589 : vector<8x128xf32>
    %591 = vector.extract_strided_slice %573 {offsets = [0, 384], sizes = [8, 128], strides = [1, 1]} : vector<8x512xf32> to vector<8x128xf32>
    %cst_241 = arith.constant 0.000000e+00 : f32
    %592 = vector.broadcast %cst_241 : f32 to vector<8x128xf32>
    %593 = arith.subf %592, %591 : vector<8x128xf32>
    %594 = math.exp %593 : vector<8x128xf32>
    %cst_242 = arith.constant 1.000000e+00 : f32
    %595 = vector.broadcast %cst_242 : f32 to vector<8x128xf32>
    %596 = arith.addf %595, %594 : vector<8x128xf32>
    %597 = tpu.reciprocal %596 {approx = true} : vector<8x128xf32> -> vector<8x128xf32>
    %598 = arith.mulf %588, %481 : vector<8x128xf32>
    %599 = arith.mulf %580, %590 : vector<8x128xf32>
    %600 = arith.addf %598, %599 : vector<8x128xf32>
    %601 = math.tanh %600 : vector<8x128xf32>
    %602 = arith.mulf %597, %601 : vector<8x128xf32>
    %603 = arith.truncf %561 : vector<8x128xf32> to vector<8x128xbf16>
    %c0_243 = arith.constant 0 : index
    %c0_244 = arith.constant 0 : index
    %604 = vector.load %arg11[%c0_243, %c0_244] : memref<128x512xbf16, #tpu.memory_space<vmem>>, vector<128x512xbf16>
    %cst_245 = arith.constant dense<0.000000e+00> : vector<8x512xf32>
    %605 = tpu.matmul %603, %604, %cst_245 {dimension_numbers = #tpu.dot_dimension_numbers<[1], [0], [0], [1], [0, 0, 1, 1], [], []>} : vector<8x128xbf16>, vector<128x512xbf16>, vector<8x512xf32> -> vector<8x512xf32>
    %c0_246 = arith.constant 0 : index
    %c0_247 = arith.constant 0 : index
    %606 = vector.load %arg13[%c0_246, %c0_247] : memref<1x512xf32, #tpu.memory_space<vmem>>, vector<1x512xf32>
    %607 = vector.broadcast %606 : vector<1x512xf32> to vector<8x512xf32>
    %608 = arith.addf %605, %607 : vector<8x512xf32>
    %609 = arith.truncf %522 : vector<8x128xf32> to vector<8x128xbf16>
    %c0_248 = arith.constant 0 : index
    %c0_249 = arith.constant 0 : index
    %610 = vector.load %arg12[%c0_248, %c0_249] : memref<128x512xbf16, #tpu.memory_space<vmem>>, vector<128x512xbf16>
    %cst_250 = arith.constant dense<0.000000e+00> : vector<8x512xf32>
    %611 = tpu.matmul %609, %610, %cst_250 {dimension_numbers = #tpu.dot_dimension_numbers<[1], [0], [0], [1], [0, 0, 1, 1], [], []>} : vector<8x128xbf16>, vector<128x512xbf16>, vector<8x512xf32> -> vector<8x512xf32>
    %612 = arith.addf %611, %608 : vector<8x512xf32>
    %613 = vector.extract_strided_slice %612 {offsets = [0, 0], sizes = [8, 128], strides = [1, 1]} : vector<8x512xf32> to vector<8x128xf32>
    %cst_251 = arith.constant 0.000000e+00 : f32
    %614 = vector.broadcast %cst_251 : f32 to vector<8x128xf32>
    %615 = arith.subf %614, %613 : vector<8x128xf32>
    %616 = math.exp %615 : vector<8x128xf32>
    %cst_252 = arith.constant 1.000000e+00 : f32
    %617 = vector.broadcast %cst_252 : f32 to vector<8x128xf32>
    %618 = arith.addf %617, %616 : vector<8x128xf32>
    %619 = tpu.reciprocal %618 {approx = true} : vector<8x128xf32> -> vector<8x128xf32>
    %620 = vector.extract_strided_slice %612 {offsets = [0, 128], sizes = [8, 128], strides = [1, 1]} : vector<8x512xf32> to vector<8x128xf32>
    %cst_253 = arith.constant 0.000000e+00 : f32
    %621 = vector.broadcast %cst_253 : f32 to vector<8x128xf32>
    %622 = arith.subf %621, %620 : vector<8x128xf32>
    %623 = math.exp %622 : vector<8x128xf32>
    %cst_254 = arith.constant 1.000000e+00 : f32
    %624 = vector.broadcast %cst_254 : f32 to vector<8x128xf32>
    %625 = arith.addf %624, %623 : vector<8x128xf32>
    %cst_255 = arith.constant 1.000000e+00 : f32
    %626 = vector.broadcast %cst_255 : f32 to vector<8x128xf32>
    %627 = arith.divf %626, %625 : vector<8x128xf32>
    %628 = vector.extract_strided_slice %612 {offsets = [0, 256], sizes = [8, 128], strides = [1, 1]} : vector<8x512xf32> to vector<8x128xf32>
    %629 = math.tanh %628 : vector<8x128xf32>
    %630 = vector.extract_strided_slice %612 {offsets = [0, 384], sizes = [8, 128], strides = [1, 1]} : vector<8x512xf32> to vector<8x128xf32>
    %cst_256 = arith.constant 0.000000e+00 : f32
    %631 = vector.broadcast %cst_256 : f32 to vector<8x128xf32>
    %632 = arith.subf %631, %630 : vector<8x128xf32>
    %633 = math.exp %632 : vector<8x128xf32>
    %cst_257 = arith.constant 1.000000e+00 : f32
    %634 = vector.broadcast %cst_257 : f32 to vector<8x128xf32>
    %635 = arith.addf %634, %633 : vector<8x128xf32>
    %636 = tpu.reciprocal %635 {approx = true} : vector<8x128xf32> -> vector<8x128xf32>
    %637 = arith.mulf %627, %520 : vector<8x128xf32>
    %638 = arith.mulf %619, %629 : vector<8x128xf32>
    %639 = arith.addf %637, %638 : vector<8x128xf32>
    %640 = math.tanh %639 : vector<8x128xf32>
    %641 = arith.mulf %636, %640 : vector<8x128xf32>
    %642 = arith.truncf %602 : vector<8x128xf32> to vector<8x128xbf16>
    %c0_258 = arith.constant 0 : index
    %c0_259 = arith.constant 0 : index
    %643 = vector.load %arg8[%c0_258, %c0_259] : memref<128x512xbf16, #tpu.memory_space<vmem>>, vector<128x512xbf16>
    %cst_260 = arith.constant dense<0.000000e+00> : vector<8x512xf32>
    %644 = tpu.matmul %642, %643, %cst_260 {dimension_numbers = #tpu.dot_dimension_numbers<[1], [0], [0], [1], [0, 0, 1, 1], [], []>} : vector<8x128xbf16>, vector<128x512xbf16>, vector<8x512xf32> -> vector<8x512xf32>
    %c0_261 = arith.constant 0 : index
    %c0_262 = arith.constant 0 : index
    %645 = vector.load %arg10[%c0_261, %c0_262] : memref<1x512xf32, #tpu.memory_space<vmem>>, vector<1x512xf32>
    %646 = vector.broadcast %645 : vector<1x512xf32> to vector<8x512xf32>
    %647 = arith.addf %644, %646 : vector<8x512xf32>
    %648 = arith.truncf %561 : vector<8x128xf32> to vector<8x128xbf16>
    %c0_263 = arith.constant 0 : index
    %c0_264 = arith.constant 0 : index
    %649 = vector.load %arg9[%c0_263, %c0_264] : memref<128x512xbf16, #tpu.memory_space<vmem>>, vector<128x512xbf16>
    %cst_265 = arith.constant dense<0.000000e+00> : vector<8x512xf32>
    %650 = tpu.matmul %648, %649, %cst_265 {dimension_numbers = #tpu.dot_dimension_numbers<[1], [0], [0], [1], [0, 0, 1, 1], [], []>} : vector<8x128xbf16>, vector<128x512xbf16>, vector<8x512xf32> -> vector<8x512xf32>
    %651 = arith.addf %650, %647 : vector<8x512xf32>
    %652 = vector.extract_strided_slice %651 {offsets = [0, 0], sizes = [8, 128], strides = [1, 1]} : vector<8x512xf32> to vector<8x128xf32>
    %cst_266 = arith.constant 0.000000e+00 : f32
    %653 = vector.broadcast %cst_266 : f32 to vector<8x128xf32>
    %654 = arith.subf %653, %652 : vector<8x128xf32>
    %655 = math.exp %654 : vector<8x128xf32>
    %cst_267 = arith.constant 1.000000e+00 : f32
    %656 = vector.broadcast %cst_267 : f32 to vector<8x128xf32>
    %657 = arith.addf %656, %655 : vector<8x128xf32>
    %658 = tpu.reciprocal %657 {approx = true} : vector<8x128xf32> -> vector<8x128xf32>
    %659 = vector.extract_strided_slice %651 {offsets = [0, 128], sizes = [8, 128], strides = [1, 1]} : vector<8x512xf32> to vector<8x128xf32>
    %cst_268 = arith.constant 0.000000e+00 : f32
    %660 = vector.broadcast %cst_268 : f32 to vector<8x128xf32>
    %661 = arith.subf %660, %659 : vector<8x128xf32>
    %662 = math.exp %661 : vector<8x128xf32>
    %cst_269 = arith.constant 1.000000e+00 : f32
    %663 = vector.broadcast %cst_269 : f32 to vector<8x128xf32>
    %664 = arith.addf %663, %662 : vector<8x128xf32>
    %cst_270 = arith.constant 1.000000e+00 : f32
    %665 = vector.broadcast %cst_270 : f32 to vector<8x128xf32>
    %666 = arith.divf %665, %664 : vector<8x128xf32>
    %667 = vector.extract_strided_slice %651 {offsets = [0, 256], sizes = [8, 128], strides = [1, 1]} : vector<8x512xf32> to vector<8x128xf32>
    %668 = math.tanh %667 : vector<8x128xf32>
    %669 = vector.extract_strided_slice %651 {offsets = [0, 384], sizes = [8, 128], strides = [1, 1]} : vector<8x512xf32> to vector<8x128xf32>
    %cst_271 = arith.constant 0.000000e+00 : f32
    %670 = vector.broadcast %cst_271 : f32 to vector<8x128xf32>
    %671 = arith.subf %670, %669 : vector<8x128xf32>
    %672 = math.exp %671 : vector<8x128xf32>
    %cst_272 = arith.constant 1.000000e+00 : f32
    %673 = vector.broadcast %cst_272 : f32 to vector<8x128xf32>
    %674 = arith.addf %673, %672 : vector<8x128xf32>
    %675 = tpu.reciprocal %674 {approx = true} : vector<8x128xf32> -> vector<8x128xf32>
    %676 = arith.mulf %666, %559 : vector<8x128xf32>
    %677 = arith.mulf %658, %668 : vector<8x128xf32>
    %678 = arith.addf %676, %677 : vector<8x128xf32>
    %679 = math.tanh %678 : vector<8x128xf32>
    %680 = arith.mulf %675, %679 : vector<8x128xf32>
    %c6 = arith.constant 6 : index
    %c0_273 = arith.constant 0 : index
    %c0_274 = arith.constant 0 : index
    %681 = vector.load %arg1[%c6, %c0_273, %c0_274] : memref<8x8x3xf32, #tpu.memory_space<vmem>>, vector<1x8x3xf32>
    %682 = vector.shape_cast %681 : vector<1x8x3xf32> to vector<8x3xf32>
    %683 = arith.truncf %682 : vector<8x3xf32> to vector<8x3xbf16>
    %c0_275 = arith.constant 0 : index
    %c0_276 = arith.constant 0 : index
    %684 = vector.load %arg5[%c0_275, %c0_276] : memref<3x512xbf16, #tpu.memory_space<vmem>>, vector<3x512xbf16>
    %cst_277 = arith.constant dense<0.000000e+00> : vector<8x512xf32>
    %685 = tpu.matmul %683, %684, %cst_277 {dimension_numbers = #tpu.dot_dimension_numbers<[1], [0], [0], [1], [0, 0, 1, 1], [], []>} : vector<8x3xbf16>, vector<3x512xbf16>, vector<8x512xf32> -> vector<8x512xf32>
    %c0_278 = arith.constant 0 : index
    %c0_279 = arith.constant 0 : index
    %686 = vector.load %arg6[%c0_278, %c0_279] : memref<1x512xf32, #tpu.memory_space<vmem>>, vector<1x512xf32>
    %687 = vector.broadcast %686 : vector<1x512xf32> to vector<8x512xf32>
    %688 = arith.addf %685, %687 : vector<8x512xf32>
    %689 = arith.truncf %602 : vector<8x128xf32> to vector<8x128xbf16>
    %c0_280 = arith.constant 0 : index
    %c0_281 = arith.constant 0 : index
    %690 = vector.load %arg7[%c0_280, %c0_281] : memref<128x512xbf16, #tpu.memory_space<vmem>>, vector<128x512xbf16>
    %cst_282 = arith.constant dense<0.000000e+00> : vector<8x512xf32>
    %691 = tpu.matmul %689, %690, %cst_282 {dimension_numbers = #tpu.dot_dimension_numbers<[1], [0], [0], [1], [0, 0, 1, 1], [], []>} : vector<8x128xbf16>, vector<128x512xbf16>, vector<8x512xf32> -> vector<8x512xf32>
    %692 = arith.addf %691, %688 : vector<8x512xf32>
    %693 = vector.extract_strided_slice %692 {offsets = [0, 0], sizes = [8, 128], strides = [1, 1]} : vector<8x512xf32> to vector<8x128xf32>
    %cst_283 = arith.constant 0.000000e+00 : f32
    %694 = vector.broadcast %cst_283 : f32 to vector<8x128xf32>
    %695 = arith.subf %694, %693 : vector<8x128xf32>
    %696 = math.exp %695 : vector<8x128xf32>
    %cst_284 = arith.constant 1.000000e+00 : f32
    %697 = vector.broadcast %cst_284 : f32 to vector<8x128xf32>
    %698 = arith.addf %697, %696 : vector<8x128xf32>
    %699 = tpu.reciprocal %698 {approx = true} : vector<8x128xf32> -> vector<8x128xf32>
    %700 = vector.extract_strided_slice %692 {offsets = [0, 128], sizes = [8, 128], strides = [1, 1]} : vector<8x512xf32> to vector<8x128xf32>
    %cst_285 = arith.constant 0.000000e+00 : f32
    %701 = vector.broadcast %cst_285 : f32 to vector<8x128xf32>
    %702 = arith.subf %701, %700 : vector<8x128xf32>
    %703 = math.exp %702 : vector<8x128xf32>
    %cst_286 = arith.constant 1.000000e+00 : f32
    %704 = vector.broadcast %cst_286 : f32 to vector<8x128xf32>
    %705 = arith.addf %704, %703 : vector<8x128xf32>
    %cst_287 = arith.constant 1.000000e+00 : f32
    %706 = vector.broadcast %cst_287 : f32 to vector<8x128xf32>
    %707 = arith.divf %706, %705 : vector<8x128xf32>
    %708 = vector.extract_strided_slice %692 {offsets = [0, 256], sizes = [8, 128], strides = [1, 1]} : vector<8x512xf32> to vector<8x128xf32>
    %709 = math.tanh %708 : vector<8x128xf32>
    %710 = vector.extract_strided_slice %692 {offsets = [0, 384], sizes = [8, 128], strides = [1, 1]} : vector<8x512xf32> to vector<8x128xf32>
    %cst_288 = arith.constant 0.000000e+00 : f32
    %711 = vector.broadcast %cst_288 : f32 to vector<8x128xf32>
    %712 = arith.subf %711, %710 : vector<8x128xf32>
    %713 = math.exp %712 : vector<8x128xf32>
    %cst_289 = arith.constant 1.000000e+00 : f32
    %714 = vector.broadcast %cst_289 : f32 to vector<8x128xf32>
    %715 = arith.addf %714, %713 : vector<8x128xf32>
    %716 = tpu.reciprocal %715 {approx = true} : vector<8x128xf32> -> vector<8x128xf32>
    %717 = arith.mulf %707, %600 : vector<8x128xf32>
    %718 = arith.mulf %699, %709 : vector<8x128xf32>
    %719 = arith.addf %717, %718 : vector<8x128xf32>
    %720 = math.tanh %719 : vector<8x128xf32>
    %721 = arith.mulf %716, %720 : vector<8x128xf32>
    %722 = arith.truncf %680 : vector<8x128xf32> to vector<8x128xbf16>
    %c0_290 = arith.constant 0 : index
    %c0_291 = arith.constant 0 : index
    %723 = vector.load %arg11[%c0_290, %c0_291] : memref<128x512xbf16, #tpu.memory_space<vmem>>, vector<128x512xbf16>
    %cst_292 = arith.constant dense<0.000000e+00> : vector<8x512xf32>
    %724 = tpu.matmul %722, %723, %cst_292 {dimension_numbers = #tpu.dot_dimension_numbers<[1], [0], [0], [1], [0, 0, 1, 1], [], []>} : vector<8x128xbf16>, vector<128x512xbf16>, vector<8x512xf32> -> vector<8x512xf32>
    %c0_293 = arith.constant 0 : index
    %c0_294 = arith.constant 0 : index
    %725 = vector.load %arg13[%c0_293, %c0_294] : memref<1x512xf32, #tpu.memory_space<vmem>>, vector<1x512xf32>
    %726 = vector.broadcast %725 : vector<1x512xf32> to vector<8x512xf32>
    %727 = arith.addf %724, %726 : vector<8x512xf32>
    %728 = arith.truncf %641 : vector<8x128xf32> to vector<8x128xbf16>
    %c0_295 = arith.constant 0 : index
    %c0_296 = arith.constant 0 : index
    %729 = vector.load %arg12[%c0_295, %c0_296] : memref<128x512xbf16, #tpu.memory_space<vmem>>, vector<128x512xbf16>
    %cst_297 = arith.constant dense<0.000000e+00> : vector<8x512xf32>
    %730 = tpu.matmul %728, %729, %cst_297 {dimension_numbers = #tpu.dot_dimension_numbers<[1], [0], [0], [1], [0, 0, 1, 1], [], []>} : vector<8x128xbf16>, vector<128x512xbf16>, vector<8x512xf32> -> vector<8x512xf32>
    %731 = arith.addf %730, %727 : vector<8x512xf32>
    %732 = vector.extract_strided_slice %731 {offsets = [0, 0], sizes = [8, 128], strides = [1, 1]} : vector<8x512xf32> to vector<8x128xf32>
    %cst_298 = arith.constant 0.000000e+00 : f32
    %733 = vector.broadcast %cst_298 : f32 to vector<8x128xf32>
    %734 = arith.subf %733, %732 : vector<8x128xf32>
    %735 = math.exp %734 : vector<8x128xf32>
    %cst_299 = arith.constant 1.000000e+00 : f32
    %736 = vector.broadcast %cst_299 : f32 to vector<8x128xf32>
    %737 = arith.addf %736, %735 : vector<8x128xf32>
    %738 = tpu.reciprocal %737 {approx = true} : vector<8x128xf32> -> vector<8x128xf32>
    %739 = vector.extract_strided_slice %731 {offsets = [0, 128], sizes = [8, 128], strides = [1, 1]} : vector<8x512xf32> to vector<8x128xf32>
    %cst_300 = arith.constant 0.000000e+00 : f32
    %740 = vector.broadcast %cst_300 : f32 to vector<8x128xf32>
    %741 = arith.subf %740, %739 : vector<8x128xf32>
    %742 = math.exp %741 : vector<8x128xf32>
    %cst_301 = arith.constant 1.000000e+00 : f32
    %743 = vector.broadcast %cst_301 : f32 to vector<8x128xf32>
    %744 = arith.addf %743, %742 : vector<8x128xf32>
    %cst_302 = arith.constant 1.000000e+00 : f32
    %745 = vector.broadcast %cst_302 : f32 to vector<8x128xf32>
    %746 = arith.divf %745, %744 : vector<8x128xf32>
    %747 = vector.extract_strided_slice %731 {offsets = [0, 256], sizes = [8, 128], strides = [1, 1]} : vector<8x512xf32> to vector<8x128xf32>
    %748 = math.tanh %747 : vector<8x128xf32>
    %749 = vector.extract_strided_slice %731 {offsets = [0, 384], sizes = [8, 128], strides = [1, 1]} : vector<8x512xf32> to vector<8x128xf32>
    %cst_303 = arith.constant 0.000000e+00 : f32
    %750 = vector.broadcast %cst_303 : f32 to vector<8x128xf32>
    %751 = arith.subf %750, %749 : vector<8x128xf32>
    %752 = math.exp %751 : vector<8x128xf32>
    %cst_304 = arith.constant 1.000000e+00 : f32
    %753 = vector.broadcast %cst_304 : f32 to vector<8x128xf32>
    %754 = arith.addf %753, %752 : vector<8x128xf32>
    %755 = tpu.reciprocal %754 {approx = true} : vector<8x128xf32> -> vector<8x128xf32>
    %756 = arith.mulf %746, %639 : vector<8x128xf32>
    %757 = arith.mulf %738, %748 : vector<8x128xf32>
    %758 = arith.addf %756, %757 : vector<8x128xf32>
    %759 = math.tanh %758 : vector<8x128xf32>
    %760 = arith.mulf %755, %759 : vector<8x128xf32>
    %761 = arith.truncf %721 : vector<8x128xf32> to vector<8x128xbf16>
    %c0_305 = arith.constant 0 : index
    %c0_306 = arith.constant 0 : index
    %762 = vector.load %arg8[%c0_305, %c0_306] : memref<128x512xbf16, #tpu.memory_space<vmem>>, vector<128x512xbf16>
    %cst_307 = arith.constant dense<0.000000e+00> : vector<8x512xf32>
    %763 = tpu.matmul %761, %762, %cst_307 {dimension_numbers = #tpu.dot_dimension_numbers<[1], [0], [0], [1], [0, 0, 1, 1], [], []>} : vector<8x128xbf16>, vector<128x512xbf16>, vector<8x512xf32> -> vector<8x512xf32>
    %c0_308 = arith.constant 0 : index
    %c0_309 = arith.constant 0 : index
    %764 = vector.load %arg10[%c0_308, %c0_309] : memref<1x512xf32, #tpu.memory_space<vmem>>, vector<1x512xf32>
    %765 = vector.broadcast %764 : vector<1x512xf32> to vector<8x512xf32>
    %766 = arith.addf %763, %765 : vector<8x512xf32>
    %767 = arith.truncf %680 : vector<8x128xf32> to vector<8x128xbf16>
    %c0_310 = arith.constant 0 : index
    %c0_311 = arith.constant 0 : index
    %768 = vector.load %arg9[%c0_310, %c0_311] : memref<128x512xbf16, #tpu.memory_space<vmem>>, vector<128x512xbf16>
    %cst_312 = arith.constant dense<0.000000e+00> : vector<8x512xf32>
    %769 = tpu.matmul %767, %768, %cst_312 {dimension_numbers = #tpu.dot_dimension_numbers<[1], [0], [0], [1], [0, 0, 1, 1], [], []>} : vector<8x128xbf16>, vector<128x512xbf16>, vector<8x512xf32> -> vector<8x512xf32>
    %770 = arith.addf %769, %766 : vector<8x512xf32>
    %771 = vector.extract_strided_slice %770 {offsets = [0, 0], sizes = [8, 128], strides = [1, 1]} : vector<8x512xf32> to vector<8x128xf32>
    %cst_313 = arith.constant 0.000000e+00 : f32
    %772 = vector.broadcast %cst_313 : f32 to vector<8x128xf32>
    %773 = arith.subf %772, %771 : vector<8x128xf32>
    %774 = math.exp %773 : vector<8x128xf32>
    %cst_314 = arith.constant 1.000000e+00 : f32
    %775 = vector.broadcast %cst_314 : f32 to vector<8x128xf32>
    %776 = arith.addf %775, %774 : vector<8x128xf32>
    %777 = tpu.reciprocal %776 {approx = true} : vector<8x128xf32> -> vector<8x128xf32>
    %778 = vector.extract_strided_slice %770 {offsets = [0, 128], sizes = [8, 128], strides = [1, 1]} : vector<8x512xf32> to vector<8x128xf32>
    %cst_315 = arith.constant 0.000000e+00 : f32
    %779 = vector.broadcast %cst_315 : f32 to vector<8x128xf32>
    %780 = arith.subf %779, %778 : vector<8x128xf32>
    %781 = math.exp %780 : vector<8x128xf32>
    %cst_316 = arith.constant 1.000000e+00 : f32
    %782 = vector.broadcast %cst_316 : f32 to vector<8x128xf32>
    %783 = arith.addf %782, %781 : vector<8x128xf32>
    %cst_317 = arith.constant 1.000000e+00 : f32
    %784 = vector.broadcast %cst_317 : f32 to vector<8x128xf32>
    %785 = arith.divf %784, %783 : vector<8x128xf32>
    %786 = vector.extract_strided_slice %770 {offsets = [0, 256], sizes = [8, 128], strides = [1, 1]} : vector<8x512xf32> to vector<8x128xf32>
    %787 = math.tanh %786 : vector<8x128xf32>
    %788 = vector.extract_strided_slice %770 {offsets = [0, 384], sizes = [8, 128], strides = [1, 1]} : vector<8x512xf32> to vector<8x128xf32>
    %cst_318 = arith.constant 0.000000e+00 : f32
    %789 = vector.broadcast %cst_318 : f32 to vector<8x128xf32>
    %790 = arith.subf %789, %788 : vector<8x128xf32>
    %791 = math.exp %790 : vector<8x128xf32>
    %cst_319 = arith.constant 1.000000e+00 : f32
    %792 = vector.broadcast %cst_319 : f32 to vector<8x128xf32>
    %793 = arith.addf %792, %791 : vector<8x128xf32>
    %794 = tpu.reciprocal %793 {approx = true} : vector<8x128xf32> -> vector<8x128xf32>
    %795 = arith.mulf %785, %678 : vector<8x128xf32>
    %796 = arith.mulf %777, %787 : vector<8x128xf32>
    %797 = arith.addf %795, %796 : vector<8x128xf32>
    %798 = math.tanh %797 : vector<8x128xf32>
    %799 = arith.mulf %794, %798 : vector<8x128xf32>
    %c7 = arith.constant 7 : index
    %c0_320 = arith.constant 0 : index
    %c0_321 = arith.constant 0 : index
    %800 = vector.load %arg1[%c7, %c0_320, %c0_321] : memref<8x8x3xf32, #tpu.memory_space<vmem>>, vector<1x8x3xf32>
    %801 = vector.shape_cast %800 : vector<1x8x3xf32> to vector<8x3xf32>
    %802 = arith.truncf %801 : vector<8x3xf32> to vector<8x3xbf16>
    %c0_322 = arith.constant 0 : index
    %c0_323 = arith.constant 0 : index
    %803 = vector.load %arg5[%c0_322, %c0_323] : memref<3x512xbf16, #tpu.memory_space<vmem>>, vector<3x512xbf16>
    %cst_324 = arith.constant dense<0.000000e+00> : vector<8x512xf32>
    %804 = tpu.matmul %802, %803, %cst_324 {dimension_numbers = #tpu.dot_dimension_numbers<[1], [0], [0], [1], [0, 0, 1, 1], [], []>} : vector<8x3xbf16>, vector<3x512xbf16>, vector<8x512xf32> -> vector<8x512xf32>
    %c0_325 = arith.constant 0 : index
    %c0_326 = arith.constant 0 : index
    %805 = vector.load %arg6[%c0_325, %c0_326] : memref<1x512xf32, #tpu.memory_space<vmem>>, vector<1x512xf32>
    %806 = vector.broadcast %805 : vector<1x512xf32> to vector<8x512xf32>
    %807 = arith.addf %804, %806 : vector<8x512xf32>
    %808 = arith.truncf %721 : vector<8x128xf32> to vector<8x128xbf16>
    %c0_327 = arith.constant 0 : index
    %c0_328 = arith.constant 0 : index
    %809 = vector.load %arg7[%c0_327, %c0_328] : memref<128x512xbf16, #tpu.memory_space<vmem>>, vector<128x512xbf16>
    %cst_329 = arith.constant dense<0.000000e+00> : vector<8x512xf32>
    %810 = tpu.matmul %808, %809, %cst_329 {dimension_numbers = #tpu.dot_dimension_numbers<[1], [0], [0], [1], [0, 0, 1, 1], [], []>} : vector<8x128xbf16>, vector<128x512xbf16>, vector<8x512xf32> -> vector<8x512xf32>
    %811 = arith.addf %810, %807 : vector<8x512xf32>
    %812 = vector.extract_strided_slice %811 {offsets = [0, 0], sizes = [8, 128], strides = [1, 1]} : vector<8x512xf32> to vector<8x128xf32>
    %cst_330 = arith.constant 0.000000e+00 : f32
    %813 = vector.broadcast %cst_330 : f32 to vector<8x128xf32>
    %814 = arith.subf %813, %812 : vector<8x128xf32>
    %815 = math.exp %814 : vector<8x128xf32>
    %cst_331 = arith.constant 1.000000e+00 : f32
    %816 = vector.broadcast %cst_331 : f32 to vector<8x128xf32>
    %817 = arith.addf %816, %815 : vector<8x128xf32>
    %818 = tpu.reciprocal %817 {approx = true} : vector<8x128xf32> -> vector<8x128xf32>
    %819 = vector.extract_strided_slice %811 {offsets = [0, 128], sizes = [8, 128], strides = [1, 1]} : vector<8x512xf32> to vector<8x128xf32>
    %cst_332 = arith.constant 0.000000e+00 : f32
    %820 = vector.broadcast %cst_332 : f32 to vector<8x128xf32>
    %821 = arith.subf %820, %819 : vector<8x128xf32>
    %822 = math.exp %821 : vector<8x128xf32>
    %cst_333 = arith.constant 1.000000e+00 : f32
    %823 = vector.broadcast %cst_333 : f32 to vector<8x128xf32>
    %824 = arith.addf %823, %822 : vector<8x128xf32>
    %cst_334 = arith.constant 1.000000e+00 : f32
    %825 = vector.broadcast %cst_334 : f32 to vector<8x128xf32>
    %826 = arith.divf %825, %824 : vector<8x128xf32>
    %827 = vector.extract_strided_slice %811 {offsets = [0, 256], sizes = [8, 128], strides = [1, 1]} : vector<8x512xf32> to vector<8x128xf32>
    %828 = math.tanh %827 : vector<8x128xf32>
    %829 = vector.extract_strided_slice %811 {offsets = [0, 384], sizes = [8, 128], strides = [1, 1]} : vector<8x512xf32> to vector<8x128xf32>
    %cst_335 = arith.constant 0.000000e+00 : f32
    %830 = vector.broadcast %cst_335 : f32 to vector<8x128xf32>
    %831 = arith.subf %830, %829 : vector<8x128xf32>
    %832 = math.exp %831 : vector<8x128xf32>
    %cst_336 = arith.constant 1.000000e+00 : f32
    %833 = vector.broadcast %cst_336 : f32 to vector<8x128xf32>
    %834 = arith.addf %833, %832 : vector<8x128xf32>
    %835 = tpu.reciprocal %834 {approx = true} : vector<8x128xf32> -> vector<8x128xf32>
    %836 = arith.mulf %826, %719 : vector<8x128xf32>
    %837 = arith.mulf %818, %828 : vector<8x128xf32>
    %838 = arith.addf %836, %837 : vector<8x128xf32>
    %839 = math.tanh %838 : vector<8x128xf32>
    %840 = arith.mulf %835, %839 : vector<8x128xf32>
    %841 = arith.truncf %799 : vector<8x128xf32> to vector<8x128xbf16>
    %c0_337 = arith.constant 0 : index
    %c0_338 = arith.constant 0 : index
    %842 = vector.load %arg11[%c0_337, %c0_338] : memref<128x512xbf16, #tpu.memory_space<vmem>>, vector<128x512xbf16>
    %cst_339 = arith.constant dense<0.000000e+00> : vector<8x512xf32>
    %843 = tpu.matmul %841, %842, %cst_339 {dimension_numbers = #tpu.dot_dimension_numbers<[1], [0], [0], [1], [0, 0, 1, 1], [], []>} : vector<8x128xbf16>, vector<128x512xbf16>, vector<8x512xf32> -> vector<8x512xf32>
    %c0_340 = arith.constant 0 : index
    %c0_341 = arith.constant 0 : index
    %844 = vector.load %arg13[%c0_340, %c0_341] : memref<1x512xf32, #tpu.memory_space<vmem>>, vector<1x512xf32>
    %845 = vector.broadcast %844 : vector<1x512xf32> to vector<8x512xf32>
    %846 = arith.addf %843, %845 : vector<8x512xf32>
    %847 = arith.truncf %760 : vector<8x128xf32> to vector<8x128xbf16>
    %c0_342 = arith.constant 0 : index
    %c0_343 = arith.constant 0 : index
    %848 = vector.load %arg12[%c0_342, %c0_343] : memref<128x512xbf16, #tpu.memory_space<vmem>>, vector<128x512xbf16>
    %cst_344 = arith.constant dense<0.000000e+00> : vector<8x512xf32>
    %849 = tpu.matmul %847, %848, %cst_344 {dimension_numbers = #tpu.dot_dimension_numbers<[1], [0], [0], [1], [0, 0, 1, 1], [], []>} : vector<8x128xbf16>, vector<128x512xbf16>, vector<8x512xf32> -> vector<8x512xf32>
    %850 = arith.addf %849, %846 : vector<8x512xf32>
    %851 = vector.extract_strided_slice %850 {offsets = [0, 0], sizes = [8, 128], strides = [1, 1]} : vector<8x512xf32> to vector<8x128xf32>
    %cst_345 = arith.constant 0.000000e+00 : f32
    %852 = vector.broadcast %cst_345 : f32 to vector<8x128xf32>
    %853 = arith.subf %852, %851 : vector<8x128xf32>
    %854 = math.exp %853 : vector<8x128xf32>
    %cst_346 = arith.constant 1.000000e+00 : f32
    %855 = vector.broadcast %cst_346 : f32 to vector<8x128xf32>
    %856 = arith.addf %855, %854 : vector<8x128xf32>
    %857 = tpu.reciprocal %856 {approx = true} : vector<8x128xf32> -> vector<8x128xf32>
    %858 = vector.extract_strided_slice %850 {offsets = [0, 128], sizes = [8, 128], strides = [1, 1]} : vector<8x512xf32> to vector<8x128xf32>
    %cst_347 = arith.constant 0.000000e+00 : f32
    %859 = vector.broadcast %cst_347 : f32 to vector<8x128xf32>
    %860 = arith.subf %859, %858 : vector<8x128xf32>
    %861 = math.exp %860 : vector<8x128xf32>
    %cst_348 = arith.constant 1.000000e+00 : f32
    %862 = vector.broadcast %cst_348 : f32 to vector<8x128xf32>
    %863 = arith.addf %862, %861 : vector<8x128xf32>
    %cst_349 = arith.constant 1.000000e+00 : f32
    %864 = vector.broadcast %cst_349 : f32 to vector<8x128xf32>
    %865 = arith.divf %864, %863 : vector<8x128xf32>
    %866 = vector.extract_strided_slice %850 {offsets = [0, 256], sizes = [8, 128], strides = [1, 1]} : vector<8x512xf32> to vector<8x128xf32>
    %867 = math.tanh %866 : vector<8x128xf32>
    %868 = vector.extract_strided_slice %850 {offsets = [0, 384], sizes = [8, 128], strides = [1, 1]} : vector<8x512xf32> to vector<8x128xf32>
    %cst_350 = arith.constant 0.000000e+00 : f32
    %869 = vector.broadcast %cst_350 : f32 to vector<8x128xf32>
    %870 = arith.subf %869, %868 : vector<8x128xf32>
    %871 = math.exp %870 : vector<8x128xf32>
    %cst_351 = arith.constant 1.000000e+00 : f32
    %872 = vector.broadcast %cst_351 : f32 to vector<8x128xf32>
    %873 = arith.addf %872, %871 : vector<8x128xf32>
    %874 = tpu.reciprocal %873 {approx = true} : vector<8x128xf32> -> vector<8x128xf32>
    %875 = arith.mulf %865, %758 : vector<8x128xf32>
    %876 = arith.mulf %857, %867 : vector<8x128xf32>
    %877 = arith.addf %875, %876 : vector<8x128xf32>
    %878 = math.tanh %877 : vector<8x128xf32>
    %879 = arith.mulf %874, %878 : vector<8x128xf32>
    %880 = arith.truncf %840 : vector<8x128xf32> to vector<8x128xbf16>
    %c0_352 = arith.constant 0 : index
    %c0_353 = arith.constant 0 : index
    %881 = vector.load %arg8[%c0_352, %c0_353] : memref<128x512xbf16, #tpu.memory_space<vmem>>, vector<128x512xbf16>
    %cst_354 = arith.constant dense<0.000000e+00> : vector<8x512xf32>
    %882 = tpu.matmul %880, %881, %cst_354 {dimension_numbers = #tpu.dot_dimension_numbers<[1], [0], [0], [1], [0, 0, 1, 1], [], []>} : vector<8x128xbf16>, vector<128x512xbf16>, vector<8x512xf32> -> vector<8x512xf32>
    %c0_355 = arith.constant 0 : index
    %c0_356 = arith.constant 0 : index
    %883 = vector.load %arg10[%c0_355, %c0_356] : memref<1x512xf32, #tpu.memory_space<vmem>>, vector<1x512xf32>
    %884 = vector.broadcast %883 : vector<1x512xf32> to vector<8x512xf32>
    %885 = arith.addf %882, %884 : vector<8x512xf32>
    %886 = arith.truncf %799 : vector<8x128xf32> to vector<8x128xbf16>
    %c0_357 = arith.constant 0 : index
    %c0_358 = arith.constant 0 : index
    %887 = vector.load %arg9[%c0_357, %c0_358] : memref<128x512xbf16, #tpu.memory_space<vmem>>, vector<128x512xbf16>
    %cst_359 = arith.constant dense<0.000000e+00> : vector<8x512xf32>
    %888 = tpu.matmul %886, %887, %cst_359 {dimension_numbers = #tpu.dot_dimension_numbers<[1], [0], [0], [1], [0, 0, 1, 1], [], []>} : vector<8x128xbf16>, vector<128x512xbf16>, vector<8x512xf32> -> vector<8x512xf32>
    %889 = arith.addf %888, %885 : vector<8x512xf32>
    %890 = vector.extract_strided_slice %889 {offsets = [0, 0], sizes = [8, 128], strides = [1, 1]} : vector<8x512xf32> to vector<8x128xf32>
    %cst_360 = arith.constant 0.000000e+00 : f32
    %891 = vector.broadcast %cst_360 : f32 to vector<8x128xf32>
    %892 = arith.subf %891, %890 : vector<8x128xf32>
    %893 = math.exp %892 : vector<8x128xf32>
    %cst_361 = arith.constant 1.000000e+00 : f32
    %894 = vector.broadcast %cst_361 : f32 to vector<8x128xf32>
    %895 = arith.addf %894, %893 : vector<8x128xf32>
    %896 = tpu.reciprocal %895 {approx = true} : vector<8x128xf32> -> vector<8x128xf32>
    %897 = vector.extract_strided_slice %889 {offsets = [0, 128], sizes = [8, 128], strides = [1, 1]} : vector<8x512xf32> to vector<8x128xf32>
    %cst_362 = arith.constant 0.000000e+00 : f32
    %898 = vector.broadcast %cst_362 : f32 to vector<8x128xf32>
    %899 = arith.subf %898, %897 : vector<8x128xf32>
    %900 = math.exp %899 : vector<8x128xf32>
    %cst_363 = arith.constant 1.000000e+00 : f32
    %901 = vector.broadcast %cst_363 : f32 to vector<8x128xf32>
    %902 = arith.addf %901, %900 : vector<8x128xf32>
    %cst_364 = arith.constant 1.000000e+00 : f32
    %903 = vector.broadcast %cst_364 : f32 to vector<8x128xf32>
    %904 = arith.divf %903, %902 : vector<8x128xf32>
    %905 = vector.extract_strided_slice %889 {offsets = [0, 256], sizes = [8, 128], strides = [1, 1]} : vector<8x512xf32> to vector<8x128xf32>
    %906 = math.tanh %905 : vector<8x128xf32>
    %907 = vector.extract_strided_slice %889 {offsets = [0, 384], sizes = [8, 128], strides = [1, 1]} : vector<8x512xf32> to vector<8x128xf32>
    %cst_365 = arith.constant 0.000000e+00 : f32
    %908 = vector.broadcast %cst_365 : f32 to vector<8x128xf32>
    %909 = arith.subf %908, %907 : vector<8x128xf32>
    %910 = math.exp %909 : vector<8x128xf32>
    %cst_366 = arith.constant 1.000000e+00 : f32
    %911 = vector.broadcast %cst_366 : f32 to vector<8x128xf32>
    %912 = arith.addf %911, %910 : vector<8x128xf32>
    %913 = tpu.reciprocal %912 {approx = true} : vector<8x128xf32> -> vector<8x128xf32>
    %914 = arith.mulf %904, %797 : vector<8x128xf32>
    %915 = arith.mulf %896, %906 : vector<8x128xf32>
    %916 = arith.addf %914, %915 : vector<8x128xf32>
    %917 = math.tanh %916 : vector<8x128xf32>
    %918 = arith.mulf %913, %917 : vector<8x128xf32>
    %919 = arith.truncf %918 : vector<8x128xf32> to vector<8x128xbf16>
    %c0_367 = arith.constant 0 : index
    %c0_368 = arith.constant 0 : index
    %920 = vector.load %arg11[%c0_367, %c0_368] : memref<128x512xbf16, #tpu.memory_space<vmem>>, vector<128x512xbf16>
    %cst_369 = arith.constant dense<0.000000e+00> : vector<8x512xf32>
    %921 = tpu.matmul %919, %920, %cst_369 {dimension_numbers = #tpu.dot_dimension_numbers<[1], [0], [0], [1], [0, 0, 1, 1], [], []>} : vector<8x128xbf16>, vector<128x512xbf16>, vector<8x512xf32> -> vector<8x512xf32>
    %c0_370 = arith.constant 0 : index
    %c0_371 = arith.constant 0 : index
    %922 = vector.load %arg13[%c0_370, %c0_371] : memref<1x512xf32, #tpu.memory_space<vmem>>, vector<1x512xf32>
    %923 = vector.broadcast %922 : vector<1x512xf32> to vector<8x512xf32>
    %924 = arith.addf %921, %923 : vector<8x512xf32>
    %925 = arith.truncf %879 : vector<8x128xf32> to vector<8x128xbf16>
    %c0_372 = arith.constant 0 : index
    %c0_373 = arith.constant 0 : index
    %926 = vector.load %arg12[%c0_372, %c0_373] : memref<128x512xbf16, #tpu.memory_space<vmem>>, vector<128x512xbf16>
    %cst_374 = arith.constant dense<0.000000e+00> : vector<8x512xf32>
    %927 = tpu.matmul %925, %926, %cst_374 {dimension_numbers = #tpu.dot_dimension_numbers<[1], [0], [0], [1], [0, 0, 1, 1], [], []>} : vector<8x128xbf16>, vector<128x512xbf16>, vector<8x512xf32> -> vector<8x512xf32>
    %928 = arith.addf %927, %924 : vector<8x512xf32>
    %929 = vector.extract_strided_slice %928 {offsets = [0, 0], sizes = [8, 128], strides = [1, 1]} : vector<8x512xf32> to vector<8x128xf32>
    %cst_375 = arith.constant 0.000000e+00 : f32
    %930 = vector.broadcast %cst_375 : f32 to vector<8x128xf32>
    %931 = arith.subf %930, %929 : vector<8x128xf32>
    %932 = math.exp %931 : vector<8x128xf32>
    %cst_376 = arith.constant 1.000000e+00 : f32
    %933 = vector.broadcast %cst_376 : f32 to vector<8x128xf32>
    %934 = arith.addf %933, %932 : vector<8x128xf32>
    %935 = tpu.reciprocal %934 {approx = true} : vector<8x128xf32> -> vector<8x128xf32>
    %936 = vector.extract_strided_slice %928 {offsets = [0, 128], sizes = [8, 128], strides = [1, 1]} : vector<8x512xf32> to vector<8x128xf32>
    %cst_377 = arith.constant 0.000000e+00 : f32
    %937 = vector.broadcast %cst_377 : f32 to vector<8x128xf32>
    %938 = arith.subf %937, %936 : vector<8x128xf32>
    %939 = math.exp %938 : vector<8x128xf32>
    %cst_378 = arith.constant 1.000000e+00 : f32
    %940 = vector.broadcast %cst_378 : f32 to vector<8x128xf32>
    %941 = arith.addf %940, %939 : vector<8x128xf32>
    %cst_379 = arith.constant 1.000000e+00 : f32
    %942 = vector.broadcast %cst_379 : f32 to vector<8x128xf32>
    %943 = arith.divf %942, %941 : vector<8x128xf32>
    %944 = vector.extract_strided_slice %928 {offsets = [0, 256], sizes = [8, 128], strides = [1, 1]} : vector<8x512xf32> to vector<8x128xf32>
    %945 = math.tanh %944 : vector<8x128xf32>
    %946 = vector.extract_strided_slice %928 {offsets = [0, 384], sizes = [8, 128], strides = [1, 1]} : vector<8x512xf32> to vector<8x128xf32>
    %cst_380 = arith.constant 0.000000e+00 : f32
    %947 = vector.broadcast %cst_380 : f32 to vector<8x128xf32>
    %948 = arith.subf %947, %946 : vector<8x128xf32>
    %949 = math.exp %948 : vector<8x128xf32>
    %cst_381 = arith.constant 1.000000e+00 : f32
    %950 = vector.broadcast %cst_381 : f32 to vector<8x128xf32>
    %951 = arith.addf %950, %949 : vector<8x128xf32>
    %952 = tpu.reciprocal %951 {approx = true} : vector<8x128xf32> -> vector<8x128xf32>
    %953 = arith.mulf %943, %877 : vector<8x128xf32>
    %954 = arith.mulf %935, %945 : vector<8x128xf32>
    %955 = arith.addf %953, %954 : vector<8x128xf32>
    %956 = math.tanh %955 : vector<8x128xf32>
    %957 = arith.mulf %952, %956 : vector<8x128xf32>
    %c0_382 = arith.constant 0 : index
    %c0_383 = arith.constant 0 : index
    %958 = vector.load %arg14[%c0_382, %c0_383] : memref<1x128xf32, #tpu.memory_space<vmem>>, vector<1x128xf32>
    %959 = vector.broadcast %958 : vector<1x128xf32> to vector<8x128xf32>
    %960 = arith.mulf %957, %959 : vector<8x128xf32>
    %cst_384 = arith.constant dense<0.000000e+00> : vector<8xf32>
    %961 = vector.multi_reduction <add>, %960, %cst_384 [1] : vector<8x128xf32> to vector<8xf32>
    %962 = vector.shape_cast %961 : vector<8xf32> to vector<8x1xf32>
    %c0_385 = arith.constant 0 : index
    %c0_386 = arith.constant 0 : index
    %963 = vector.load %arg15[%c0_385, %c0_386] : memref<1x1xf32, #tpu.memory_space<vmem>>, vector<1x1xf32>
    %964 = vector.broadcast %963 : vector<1x1xf32> to vector<8x1xf32>
    %965 = arith.addf %962, %964 : vector<8x1xf32>
    %cst_387 = arith.constant 0.000000e+00 : f32
    %966 = vector.broadcast %cst_387 : f32 to vector<8x1xf32>
    %967 = arith.subf %966, %965 : vector<8x1xf32>
    %968 = math.exp %967 : vector<8x1xf32>
    %cst_388 = arith.constant 1.000000e+00 : f32
    %969 = vector.broadcast %cst_388 : f32 to vector<8x1xf32>
    %970 = arith.addf %969, %968 : vector<8x1xf32>
    %cst_389 = arith.constant 1.000000e+00 : f32
    %971 = vector.broadcast %cst_389 : f32 to vector<8x1xf32>
    %972 = arith.divf %971, %970 : vector<8x1xf32>
    %c0_390 = arith.constant 0 : index
    %c0_391 = arith.constant 0 : index
    %973 = vector.load %arg16[%c0_390, %c0_391] : memref<8x1xf32, #tpu.memory_space<vmem>>, vector<8x1xf32>
    tpu.vector_store %arg16[%c0_390, %c0_391], %972 {strides = array<i32>} : memref<8x1xf32, #tpu.memory_space<vmem>>, vector<8x1xf32>,
    return
  }
  func.func @transform_0(%arg0: i32) -> (i32, i32, i32) {
    %c0_i32 = arith.constant 0 : i32
    %c0_i32_0 = arith.constant 0 : i32
    %c0_i32_1 = arith.constant 0 : i32
    return %c0_i32, %arg0, %c0_i32_0 : i32, i32, i32
  }
  func.func @transform_1(%arg0: i32) -> (i32, i32) {
    %c0_i32 = arith.constant 0 : i32
    %c0_i32_0 = arith.constant 0 : i32
    return %arg0, %c0_i32 : i32, i32
  }
  func.func @transform_2(%arg0: i32) -> (i32, i32) {
    %c0_i32 = arith.constant 0 : i32
    %c0_i32_0 = arith.constant 0 : i32
    %c0_i32_1 = arith.constant 0 : i32
    return %c0_i32, %c0_i32_0 : i32, i32
  }
  func.func @transform_3(%arg0: i32) -> (i32, i32) {
    %c0_i32 = arith.constant 0 : i32
    %c0_i32_0 = arith.constant 0 : i32
    %c0_i32_1 = arith.constant 0 : i32
    return %c0_i32, %c0_i32_0 : i32, i32
  }
  func.func @transform_4(%arg0: i32) -> (i32, i32) {
    %c0_i32 = arith.constant 0 : i32
    %c0_i32_0 = arith.constant 0 : i32
    %c0_i32_1 = arith.constant 0 : i32
    return %c0_i32, %c0_i32_0 : i32, i32
  }
  func.func @transform_5(%arg0: i32) -> (i32, i32) {
    %c0_i32 = arith.constant 0 : i32
    %c0_i32_0 = arith.constant 0 : i32
    %c0_i32_1 = arith.constant 0 : i32
    return %c0_i32, %c0_i32_0 : i32, i32
  }
  func.func @transform_6(%arg0: i32) -> (i32, i32) {
    %c0_i32 = arith.constant 0 : i32
    %c0_i32_0 = arith.constant 0 : i32
    %c0_i32_1 = arith.constant 0 : i32
    return %c0_i32, %c0_i32_0 : i32, i32
  }
  func.func @transform_7(%arg0: i32) -> (i32, i32) {
    %c0_i32 = arith.constant 0 : i32
    %c0_i32_0 = arith.constant 0 : i32
    %c0_i32_1 = arith.constant 0 : i32
    return %c0_i32, %c0_i32_0 : i32, i32
  }
  func.func @transform_8(%arg0: i32) -> (i32, i32) {
    %c0_i32 = arith.constant 0 : i32
    %c0_i32_0 = arith.constant 0 : i32
    %c0_i32_1 = arith.constant 0 : i32
    return %c0_i32, %c0_i32_0 : i32, i32
  }
  func.func @transform_9(%arg0: i32) -> (i32, i32) {
    %c0_i32 = arith.constant 0 : i32
    %c0_i32_0 = arith.constant 0 : i32
    %c0_i32_1 = arith.constant 0 : i32
    return %c0_i32, %c0_i32_0 : i32, i32
  }
  func.func @transform_10(%arg0: i32) -> (i32, i32) {
    %c0_i32 = arith.constant 0 : i32
    %c0_i32_0 = arith.constant 0 : i32
    %c0_i32_1 = arith.constant 0 : i32
    return %c0_i32, %c0_i32_0 : i32, i32
  }
  func.func @transform_11(%arg0: i32) -> (i32, i32) {
    %c0_i32 = arith.constant 0 : i32
    %c0_i32_0 = arith.constant 0 : i32
    %c0_i32_1 = arith.constant 0 : i32
    return %c0_i32, %c0_i32_0 : i32, i32
  }
  func.func @transform_12(%arg0: i32) -> (i32, i32) {
    %c0_i32 = arith.constant 0 : i32
    %c0_i32_0 = arith.constant 0 : i32
    %c0_i32_1 = arith.constant 0 : i32
    return %c0_i32, %c0_i32_0 : i32, i32
  }
  func.func @transform_13(%arg0: i32) -> (i32, i32) {
    %c0_i32 = arith.constant 0 : i32
    %c0_i32_0 = arith.constant 0 : i32
    %c0_i32_1 = arith.constant 0 : i32
    return %c0_i32, %c0_i32_0 : i32, i32
  }
  func.func @transform_14(%arg0: i32) -> (i32, i32) {
    %c0_i32 = arith.constant 0 : i32
    %c0_i32_0 = arith.constant 0 : i32
    %c0_i32_1 = arith.constant 0 : i32
    return %c0_i32, %c0_i32_0 : i32, i32
  }
  func.func @transform_15(%arg0: i32) -> (i32, i32) {
    %c0_i32 = arith.constant 0 : i32
    %c0_i32_0 = arith.constant 0 : i32
    return %arg0, %c0_i32 : i32, i32
  }
}

</mosaic_0001>

<bundles_post_ra>
// kernel: net_forward.1
= control target key start
LH: loop header
LB: loop body
LE: loop exit
PB: predicated region body
PF: predicated region fallthrough
CT: control target
= control target key end

     0   :  { %s10871_s0 = inlined_call_operand.vmem [shape: f32[8,8,3], index: 0, kind: input, shape index: {}]   ;;  %s10872_s1 = inlined_call_operand.vmem [shape: f32[8,3], index: 1, kind: input, shape index: {}]   ;;  %s10873_s2 = inlined_call_operand.vmem [shape: f32[3,128], index: 2, kind: input, shape index: {}]   ;;  %s10874_s3 = inlined_call_operand.vmem [shape: f32[1,128], index: 3, kind: input, shape index: {}]   ;;  %s10875_s4 = inlined_call_operand.vmem [shape: bf16[3,512], index: 4, kind: input, shape index: {}]   ;;  %s10876_s5 = inlined_call_operand.vmem [shape: f32[1,512], index: 5, kind: input, shape index: {}]   ;;  %s10877_s6 = inlined_call_operand.hbm [shape: bf16[128,512], index: 6, kind: input, shape index: {}]   ;;  %s10878_s7 = inlined_call_operand.hbm [shape: bf16[128,512], index: 7, kind: input, shape index: {}]   ;;  %s10879_s8 = inlined_call_operand.hbm [shape: bf16[128,512], index: 8, kind: input, shape index: {}]   ;;  %s10880_s9 = inlined_call_operand.vmem [shape: f32[1,512], index: 9, kind: input, shape index: {}]   ;;  %s10881_s10 = inlined_call_operand.hbm [shape: bf16[128,512], index: 10, kind: input, shape index: {}]   ;;  %s10882_s11 = inlined_call_operand.hbm [shape: bf16[128,512], index: 11, kind: input, shape index: {}]   ;;  %s10883_s12 = inlined_call_operand.vmem [shape: f32[1,512], index: 12, kind: input, shape index: {}]   ;;  %s10884_s13 = inlined_call_operand.vmem [shape: f32[1,128], index: 13, kind: input, shape index: {}]   ;;  %s10885_s14 = inlined_call_operand.<no memory space> [shape: f32[1,1], index: 14, kind: input, shape index: {}]   ;;  %s10886_s15 = inlined_call_operand.vmem [shape: f32[8,1], index: 15, kind: output, shape index: {}]  }
   0x1   :  { %v20_v0 = vstv %s10885_s14 }
   0x2   :  { %21 = vst [vmem:[#allocation2] sm:$0x1] %v20_v0 }
   0x3   :  { %22 = vsyncpa [#allocation4], 0 }
   0x4   :  { %23 = vsyncpa [#allocation6], 0 }
   0x5   :  { %24 = vsyncpa [#allocation9], 0  ;;  %s7557_s20 = smov [#allocation5]   ;;  %s7558_s22 = smov [#allocation8]  }
   0x6   :  { %s54_s21 = sshll.u32 %s7557_s20, 4  ;;  %s80_s23 = sshll.u32 %s7558_s22, 4  ;;  %s55_s21 = int_to_ptr.vmem [resolvable:$true] %s54_s21  ;;  %s7652_s23 = int_to_ptr.vmem [resolvable:$true] %s80_s23 }
   0x7   :  { %s7441_s26 = scalar_lea.hbm %s10878_s7, 4096 }
   0x8   :  { %p7442_p0 = scmp.ne.s32.totalorder %s10878_s7, %s7441_s26  ;;  %p7445_p1 = scmp.lt.u32.totalorder %s7441_s26, %s10878_s7 }
   0xa   :  { %p7447_p2 = pnand %p7445_p1, %p7442_p0 }
   0xc   :  { %7450 = shalt.err (!%p7447_p2)
}
   0xd   :  { %s7451_s30 = scalar_lea.vmem %s55_s21, 4096  ;;  %p7456_p4 = scmp.lt.s32.totalorder %s55_s21, %s55_s21 }
   0xe   :  { %p7452_p3 = scmp.ne.s32.totalorder %s55_s21, %s7451_s30  ;;  %p7457_p5 = scmp.lt.s32.totalorder %s7451_s30, %s7451_s30 }
  0x10   :  { %p7458_p6 = por %p7457_p5, %p7456_p4 }
  0x12   :  { %p7459_p7 = pnand %p7458_p6, %p7452_p3 }
  0x14   :  { %7462 = shalt.err (!%p7459_p7)
}
  0x15   :  { %s7559_s16 = smov 256   ;;  %s7560_s17 = smov 16  }
  0x16   :  { %60 = dma.hbm_to_vmem [thread:$0]  %s10878_s7, 4096, %s55_s21, [#allocation6], %s7559_s16, %s7559_s16, %s7560_s17  }
  0x17   :  { %s7463_s24 = scalar_lea.hbm %s10881_s10, 4096 }
  0x18   :  { %p7464_p8 = scmp.ne.s32.totalorder %s10881_s10, %s7463_s24  ;;  %p7467_p9 = scmp.lt.u32.totalorder %s7463_s24, %s10881_s10 }
  0x1a   :  { %p7469_p10 = pnand %p7467_p9, %p7464_p8 }
  0x1c   :  { %7472 = shalt.err (!%p7469_p10)
}
  0x1d   :  { %s7473_s14 = scalar_lea.vmem %s7652_s23, 4096  ;;  %p7478_p12 = scmp.lt.s32.totalorder %s7652_s23, %s7652_s23 }
  0x1e   :  { %p7474_p11 = scmp.ne.s32.totalorder %s7652_s23, %s7473_s14  ;;  %p7479_p13 = scmp.lt.s32.totalorder %s7473_s14, %s7473_s14 }
  0x20   :  { %p7480_p0 = por %p7479_p13, %p7478_p12 }
  0x22   :  { %p7481_p1 = pnand %p7480_p0, %p7474_p11 }
  0x24   :  { %7484 = shalt.err (!%p7481_p1)
}
  0x25   :  { %86 = dma.hbm_to_vmem [thread:$0]  %s10881_s10, 4096, %s7652_s23, [#allocation9], %s7559_s16, %s7559_s16, %s7560_s17  }
  0x26   :  { %s7561_s29 = smov [#allocation3]   ;;  %s7562_s18 = smov [#allocation7]  }
  0x27   :  { %s42_s30 = sshll.u32 %s7561_s29, 4  ;;  %s66_s19 = sshll.u32 %s7562_s18, 4  ;;  %s43_s30 = int_to_ptr.vmem [resolvable:$true] %s42_s30  ;;  %s7689_s19 = int_to_ptr.vmem [resolvable:$true] %s66_s19 }
  0x28   :  { %s7485_s24 = scalar_lea.hbm %s10877_s6, 4096 }
  0x29   :  { %p7486_p2 = scmp.ne.s32.totalorder %s10877_s6, %s7485_s24  ;;  %p7489_p3 = scmp.lt.u32.totalorder %s7485_s24, %s10877_s6 }
  0x2b   :  { %p7491_p4 = pnand %p7489_p3, %p7486_p2 }
  0x2d   :  { %7494 = shalt.err (!%p7491_p4)
}
  0x2e   :  { %s7495_s10 = scalar_lea.vmem %s43_s30, 4096  ;;  %p7500_p6 = scmp.lt.s32.totalorder %s43_s30, %s43_s30 }
  0x2f   :  { %p7496_p5 = scmp.ne.s32.totalorder %s43_s30, %s7495_s10  ;;  %p7501_p7 = scmp.lt.s32.totalorder %s7495_s10, %s7495_s10 }
  0x31   :  { %p7502_p8 = por %p7501_p7, %p7500_p6 }
  0x33   :  { %p7503_p9 = pnand %p7502_p8, %p7496_p5 }
  0x35   :  { %7506 = shalt.err (!%p7503_p9)
}
  0x36   :  { %48 = dma.hbm_to_vmem [thread:$0]  %s10877_s6, 4096, %s43_s30, [#allocation4], %s7559_s16, %s7559_s16, %s7560_s17  }
  0x37   :  { %s7507_s29 = scalar_lea.hbm %s10879_s8, 4096 }
  0x38   :  { %p7508_p10 = scmp.ne.s32.totalorder %s10879_s8, %s7507_s29  ;;  %p7511_p11 = scmp.lt.u32.totalorder %s7507_s29, %s10879_s8 }
  0x3a   :  { %p7513_p12 = pnand %p7511_p11, %p7508_p10 }
  0x3c   :  { %7516 = shalt.err (!%p7513_p12)
}
  0x3d   :  { %s7517_s25 = scalar_lea.vmem %s7689_s19, 4096  ;;  %p7522_p0 = scmp.lt.s32.totalorder %s7689_s19, %s7689_s19 }
  0x3e   :  { %p7518_p13 = scmp.ne.s32.totalorder %s7689_s19, %s7517_s25  ;;  %p7523_p1 = scmp.lt.s32.totalorder %s7517_s25, %s7517_s25 }
  0x40   :  { %p7524_p2 = por %p7523_p1, %p7522_p0 }
  0x42   :  { %p7525_p3 = pnand %p7524_p2, %p7518_p13 }
  0x44   :  { %7528 = shalt.err (!%p7525_p3)
}
  0x45   :  { %72 = dma.hbm_to_vmem [thread:$0]  %s10879_s8, 4096, %s7689_s19, [#allocation6], %s7559_s16, %s7559_s16, %s7560_s17  }
  0x46   :  { %s7563_s26 = smov [#allocation10]   ;;  %s7529_s23 = scalar_lea.hbm %s10882_s11, 4096 }
  0x47   :  { %s92_s27 = sshll.u32 %s7563_s26, 4  ;;  %p7530_p4 = scmp.ne.s32.totalorder %s10882_s11, %s7529_s23  ;;  %s93_s27 = int_to_ptr.vmem [resolvable:$true] %s92_s27 }
  0x48   :  { %p7533_p5 = scmp.lt.u32.totalorder %s7529_s23, %s10882_s11 }
  0x4a   :  { %p7535_p6 = pnand %p7533_p5, %p7530_p4 }
  0x4c   :  { %7538 = shalt.err (!%p7535_p6)
}
  0x4d   :  { %s7539_s18 = scalar_lea.vmem %s93_s27, 4096  ;;  %p7544_p8 = scmp.lt.s32.totalorder %s93_s27, %s93_s27 }
  0x4e   :  { %p7540_p7 = scmp.ne.s32.totalorder %s93_s27, %s7539_s18  ;;  %p7545_p9 = scmp.lt.s32.totalorder %s7539_s18, %s7539_s18 }
  0x50   :  { %p7546_p10 = por %p7545_p9, %p7544_p8 }
  0x52   :  { %p7547_p11 = pnand %p7546_p10, %p7540_p7 }
  0x54   :  { %7550 = shalt.err (!%p7547_p11)
}
  0x55   :  { %98 = dma.hbm_to_vmem [thread:$0]  %s10882_s11, 4096, %s93_s27, [#allocation9], %s7559_s16, %s7559_s16, %s7560_s17  }
  0x56   :  { %7551 = dma.done.wait [#allocation4], 4096  }
  0x57   :  { %7552 = vsyncadd [#allocation4], 4294963200 }
  0x58   :  { %7553 = dma.done.wait [#allocation6], 8192  }
  0x59   :  { %7554 = vsyncadd [#allocation6], 4294959104 }
  0x5a   :  { %7555 = dma.done.wait [#allocation9], 8192  }
  0x5b   :  { %7556 = vsyncadd [#allocation9], 4294959104  ;;  %v7564_v1 = vmov 0.0   ;;  %vm7565_vm0 = vmmov 0   ;;  %v213_v2 = vlaneseq  ;;  %v7566_v3 = vmov 1983009808  }
  0x5c   :  { %6027 = vmatprep.subr.mxu0 %v7564_v1  ;;  %6029 = vmatprep.mubr.msk.f32.mxu0 %vm7565_vm0, %v7564_v1  ;;  %v236_v4 = vunpack.c.l.s4 %v7566_v3  ;;  %vm254_vm1 = vcmask 1040384   ;;  %v10887_v6 = vmov 0   ;;  %vm134_vm2 = vcmask 1042432   ;;  %v122_v11 = vld [vmem:[%s10873_s2] sm:$0x7] }
  0x5d   :  { %v7741_v5 = vshrl.u32 %v213_v2, 7  ;;  %302 = vmatprep.mubr.bf16.mxu1 %v10887_v6  ;;  %vm255_vm3 = vcmask 1041408   ;;  %v7568_v8 = vmov 65535   ;;  %vm130_vm4 = vcmask 23552   ;;  %v121_v12 = vld [vmem:[%s10872_s1] sm:$0xff]  ;;  %6028 = vmatpush3.msk.msra.mxu0 %vm134_vm2, %v122_v11 }
  0x5e   :  { %v237_v7 = vunpack.c.0.s8 %v236_v4  ;;  %v256_v9 = vsel %vm254_vm1, 4294967295, %v7568_v8  ;;  %v210_v13 = vld [vmem:[%s10875_s4] sm:$0xff]  ;;  %6030 = vmatmul.mubr.msk.f32.vlgmr.msra.gmra.mrb[0].mxu0 %vm130_vm4, %v121_v12  ;;  %v7780_v30 = vld [vmem:[#allocation3 + $0x8] ss:$16 sps:$4 sm:$0xff]   ;;  %vm5828_vm5 = vcmask 7168  }
  0x5f   :  { %v257_v15 = vsel %vm255_vm3, %v256_v9, 0  ;;  %v234_v16 = vcombine.high %v210_v13, %v210_v13  ;;  %343 = vmatprep.mubr.bf16.mxu0 %v10887_v6  ;;  %v208_v20 = vld [vmem:[%s10871_s0] sm:$0xff]  ;;  %v7795_v34 = vld [vmem:[#allocation3 + $0x28] ss:$16 sps:$4 sm:$0xff]  }
  0x60   :  { %v240_v10 = vsub.s32 %v237_v7, %v7741_v5  ;;  %v7763_v23 = vld [vmem:[#allocation3 + $0x4] ss:$16 sps:$4 sm:$0xff]   ;;  %v7770_v26 = vld [vmem:[#allocation3 + $0xc] ss:$16 sps:$4 sm:$0xff]   ;;  %v209_v27 = vpack.c.bf16 %v208_v20, %v208_v20  ;;  %v7773_v28 = vld [vmem:[#allocation3] ss:$16 sps:$4 sm:$0xff]  }
  0x61   :  { %v7777_v29 = vld [vmem:[#allocation3 + $0x24] ss:$16 sps:$4 sm:$0xff]   ;;  %v7784_v31 = vld [vmem:[#allocation3 + $0x2c] ss:$16 sps:$4 sm:$0xff]   ;;  %v7787_v32 = vld [vmem:[#allocation3 + $0x20] ss:$16 sps:$4 sm:$0xff]  }
  0x62   :  { %v241_v14 = vrot.slane %v210_v13, %v240_v10  ;;  %v248_v18 = vrot.slane %v234_v16, %v240_v10  ;;  %v7792_v33 = vld [vmem:[#allocation3 + $0x44] ss:$16 sps:$4 sm:$0xff]   ;;  %v7799_v35 = vld [vmem:[#allocation3 + $0x4c] ss:$16 sps:$4 sm:$0xff]   ;;  %v7802_v36 = vld [vmem:[#allocation3 + $0x40] ss:$16 sps:$4 sm:$0xff]  }
  0x63   :  { %v7805_v37 = vld [vmem:[#allocation3 + $0x64] ss:$16 sps:$4 sm:$0xff]   ;;  %v7808_v38 = vld [vmem:[#allocation3 + $0x48] ss:$16 sps:$4 sm:$0xff]   ;;  %v7811_v39 = vld [vmem:[#allocation3 + $0x6c] ss:$16 sps:$4 sm:$0xff]  }
  0x64   :  { %v249_v17 = vcombine.high %v241_v14, %v241_v14  ;;  %v7756_v19 = vand.u32 %v257_v15, %v241_v14  ;;  %v250_v22 = vcombine.high %v248_v18, %v248_v18  ;;  %v7765_v24 = vand.u32 %v257_v15, %v248_v18  ;;  %v7813_v40 = vld [vmem:[#allocation3 + $0x60] ss:$16 sps:$4 sm:$0xff]   ;;  %v7816_v41 = vld [vmem:[#allocation3 + $0x68] ss:$16 sps:$4 sm:$0xff]   ;;  %v7818_v42 = vld [vmem:[#allocation3 + $0x84] ss:$16 sps:$4 sm:$0xff]  }
  0x65   :  { %v7821_v43 = vld [vmem:[#allocation3 + $0x8c] ss:$16 sps:$4 sm:$0xff]   ;;  %v7824_v44 = vld [vmem:[#allocation3 + $0x80] ss:$16 sps:$4 sm:$0xff]   ;;  %v7827_v45 = vld [vmem:[#allocation3 + $0xa4] ss:$16 sps:$4 sm:$0xff]  }
  0x66   :  { %11299 = vst [vmem:[#allocation14_spill] sm:$0xff] %v7756_v19  ;;  %v7761_v21 = vand.u32 %v257_v15, %v249_v17  ;;  %11301 = vst [vmem:[#allocation16_spill] sm:$0xff] %v7765_v24  ;;  %v7768_v25 = vand.u32 %v257_v15, %v250_v22  ;;  %v7830_v46 = vld [vmem:[#allocation3 + $0x88] ss:$16 sps:$4 sm:$0xff]   ;;  %v7833_v47 = vld [vmem:[#allocation3 + $0xac] ss:$16 sps:$4 sm:$0xff]  }
  0x67   :  { %v7836_v48 = vld [vmem:[#allocation3 + $0xa0] ss:$16 sps:$4 sm:$0xff]   ;;  %v7839_v49 = vld [vmem:[#allocation3 + $0xc4] ss:$16 sps:$4 sm:$0xff]   ;;  %v7842_v50 = vld [vmem:[#allocation3 + $0xa8] ss:$16 sps:$4 sm:$0xff]  }
  0x68   :  { %11300 = vst [vmem:[#allocation15_spill] sm:$0xff] %v7761_v21  ;;  %270 = vmatprep.subr.bf16.mxu1 %v7761_v21  ;;  %11302 = vst [vmem:[#allocation17_spill] sm:$0xff] %v7768_v25  ;;  %311 = vmatprep.subr.bf16.mxu0 %v7768_v25  ;;  %v7845_v51 = vld [vmem:[#allocation3 + $0xcc] ss:$16 sps:$4 sm:$0xff]   ;;  %v7848_v52 = vld [vmem:[#allocation3 + $0xc0] ss:$16 sps:$4 sm:$0xff]  }
  0x69   :  { %271 = vmatpush1.bf16.msra.mxu1 %v7756_v19  ;;  %312 = vmatpush1.bf16.msra.mxu0 %v7765_v24  ;;  %v7852_v53 = vld [vmem:[#allocation3 + $0xc8] ss:$16 sps:$4 sm:$0xff]   ;;  %v7859_v54 = vld [vmem:[#allocation3 + $0xe4] ss:$16 sps:$4 sm:$0xff]   ;;  %v7861_v55 = vld [vmem:[#allocation3 + $0xec] ss:$16 sps:$4 sm:$0xff]  }
  0x6a   :  { %545 = vmatprep.subr.bf16.mxu1 %v7763_v23  ;;  %586 = vmatprep.subr.bf16.mxu0 %v7770_v26  ;;  %v7863_v56 = vld [vmem:[#allocation3 + $0xe0] ss:$16 sps:$4 sm:$0xff]   ;;  %v7865_v57 = vld [vmem:[#allocation3 + $0xe8] ss:$16 sps:$4 sm:$0xff]   ;;  %v5837_v58 = vld [vmem:[%s10874_s3] ss:$0 sm:$0xff] }
  0x6b   :  { %v7884_v63 = vld [vmem:[#allocation5 + $0x4] ss:$16 sps:$4 sm:$0xff]   ;;  %v7886_v0 = vld [vmem:[#allocation5 + $0xc] ss:$16 sps:$4 sm:$0xff]   ;;  %v7888_v1 = vld [vmem:[#allocation5] ss:$16 sps:$4 sm:$0xff]  }
  0x6c   :  { %5840 = vmatmul.mubr.msk.bf16.vlgmr.msra.gmra.mrb[0].mxu1 %vm130_vm4, %v209_v27  ;;  %5841 = vmatmul.mubr.msk.bf16.vlgmr.msra.gmra.mrb[4].mxu0 %vm130_vm4, %v209_v27  ;;  %11303 = vst [vmem:[#allocation18_spill] sm:$0xff] %v7886_v0  ;;  %11304 = vst [vmem:[#allocation19_spill] sm:$0xff] %v7888_v1  ;;  %v7890_v2 = vld [vmem:[#allocation5 + $0x8] ss:$16 sps:$4 sm:$0xff]   ;;  %v7896_v3 = vld [vmem:[#allocation5 + $0x24] ss:$16 sps:$4 sm:$0xff]  }
  0x6d   :  { %546 = vmatpush1.bf16.msra.mxu1 %v7773_v28  ;;  %577 = vmatprep.mubr.bf16.mxu1 %v10887_v6  ;;  %11305 = vst [vmem:[#allocation20_spill] sm:$0xff] %v7890_v2  ;;  %11306 = vst [vmem:[#allocation21_spill] sm:$0xff] %v7896_v3  ;;  %v7898_v4 = vld [vmem:[#allocation5 + $0x2c] ss:$16 sps:$4 sm:$0xff]   ;;  %v7900_v7 = vld [vmem:[#allocation5 + $0x20] ss:$16 sps:$4 sm:$0xff]  }
  0x6e   :  { %547 = vmatprep.subr.bf16.mxu1 %v7777_v29  ;;  %587 = vmatpush1.bf16.msra.mxu0 %v7780_v30  ;;  %11307 = vst [vmem:[#allocation22_spill] sm:$0xff] %v7898_v4  ;;  %11308 = vst [vmem:[#allocation23_spill] sm:$0xff] %v7900_v7  ;;  %v7902_v8 = vld [vmem:[#allocation5 + $0x28] ss:$16 sps:$4 sm:$0xff]   ;;  %v7908_v9 = vld [vmem:[#allocation5 + $0x44] ss:$16 sps:$4 sm:$0xff]  }
  0x6f   :  { %618 = vmatprep.mubr.bf16.mxu0 %v10887_v6  ;;  %588 = vmatprep.subr.bf16.mxu0 %v7784_v31  ;;  %11309 = vst [vmem:[#allocation24_spill] sm:$0xff] %v7902_v8  ;;  %11310 = vst [vmem:[#allocation25_spill] sm:$0xff] %v7908_v9  ;;  %v7910_v10 = vld [vmem:[#allocation5 + $0x4c] ss:$16 sps:$4 sm:$0xff]   ;;  %v7912_v11 = vld [vmem:[#allocation5 + $0x40] ss:$16 sps:$4 sm:$0xff]  }
  0x70   :  { %11311 = vst [vmem:[#allocation26_spill] sm:$0xff] %v7910_v10  ;;  %11312 = vst [vmem:[#allocation27_spill] sm:$0xff] %v7912_v11  ;;  %v7914_v12 = vld [vmem:[#allocation5 + $0x48] ss:$16 sps:$4 sm:$0xff]   ;;  %v7920_v13 = vld [vmem:[#allocation5 + $0x64] ss:$16 sps:$4 sm:$0xff]  }
  0x71   :  { %548 = vmatpush1.bf16.msra.mxu1 %v7787_v32  ;;  %11313 = vst [vmem:[#allocation28_spill] sm:$0xff] %v7914_v12  ;;  %11314 = vst [vmem:[#allocation29_spill] sm:$0xff] %v7920_v13  ;;  %v7922_v14 = vld [vmem:[#allocation5 + $0x6c] ss:$16 sps:$4 sm:$0xff]   ;;  %v7924_v15 = vld [vmem:[#allocation5 + $0x60] ss:$16 sps:$4 sm:$0xff]  }
  0x72   :  { %549 = vmatprep.subr.bf16.mxu1 %v7792_v33  ;;  %589 = vmatpush1.bf16.msra.mxu0 %v7795_v34  ;;  %11315 = vst [vmem:[#allocation30_spill] sm:$0xff] %v7922_v14  ;;  %11316 = vst [vmem:[#allocation31_spill] sm:$0xff] %v7924_v15  ;;  %v7926_v16 = vld [vmem:[#allocation5 + $0x68] ss:$16 sps:$4 sm:$0xff]   ;;  %v7932_v17 = vld [vmem:[#allocation5 + $0x84] ss:$16 sps:$4 sm:$0xff]  }
  0x73   :  { %590 = vmatprep.subr.bf16.mxu0 %v7799_v35  ;;  %11317 = vst [vmem:[#allocation32_spill] sm:$0xff] %v7926_v16  ;;  %11318 = vst [vmem:[#allocation33_spill] sm:$0xff] %v7932_v17  ;;  %v7934_v18 = vld [vmem:[#allocation5 + $0x8c] ss:$16 sps:$4 sm:$0xff]   ;;  %v7936_v20 = vld [vmem:[#allocation5 + $0x80] ss:$16 sps:$4 sm:$0xff]  }
  0x74   :  { %11319 = vst [vmem:[#allocation34_spill] sm:$0xff] %v7934_v18  ;;  %11320 = vst [vmem:[#allocation35_spill] sm:$0xff] %v7936_v20  ;;  %v7938_v22 = vld [vmem:[#allocation5 + $0x88] ss:$16 sps:$4 sm:$0xff]   ;;  %v7940_v27 = vld [vmem:[#allocation5 + $0xa4] ss:$16 sps:$4 sm:$0xff]  }
  0x75   :  { %550 = vmatpush1.bf16.msra.mxu1 %v7802_v36  ;;  %11321 = vst [vmem:[#allocation36_spill] sm:$0xff] %v7938_v22  ;;  %11322 = vst [vmem:[#allocation37_spill] sm:$0xff] %v7940_v27 }
  0x76   :  { %551 = vmatprep.subr.bf16.mxu1 %v7805_v37  ;;  %591 = vmatpush1.bf16.msra.mxu0 %v7808_v38 }
  0x77   :  { %592 = vmatprep.subr.bf16.mxu0 %v7811_v39 }
  0x79   :  { %552 = vmatpush1.bf16.msra.mxu1 %v7813_v40 }
  0x7a   :  { %553 = vmatprep.subr.bf16.mxu1 %v7818_v42  ;;  %593 = vmatpush1.bf16.msra.mxu0 %v7816_v41 }
  0x7b   :  { %594 = vmatprep.subr.bf16.mxu0 %v7821_v43 }
  0x7d   :  { %554 = vmatpush1.bf16.msra.mxu1 %v7824_v44 }
  0x7e   :  { %555 = vmatprep.subr.bf16.mxu1 %v7827_v45  ;;  %595 = vmatpush1.bf16.msra.mxu0 %v7830_v46 }
  0x7f   :  { %596 = vmatprep.subr.bf16.mxu0 %v7833_v47 }
  0x81   :  { %556 = vmatpush1.bf16.msra.mxu1 %v7836_v48 }
  0x82   :  { %557 = vmatprep.subr.bf16.mxu1 %v7839_v49  ;;  %597 = vmatpush1.bf16.msra.mxu0 %v7842_v50 }
  0x83   :  { %598 = vmatprep.subr.bf16.mxu0 %v7845_v51 }
  0x85   :  { %558 = vmatpush1.bf16.msra.mxu1 %v7848_v52 }
  0x86   :  { %599 = vmatpush1.bf16.msra.mxu0 %v7852_v53  ;;  %559 = vmatprep.subr.bf16.mxu1 %v7859_v54 }
  0x87   :  { %600 = vmatprep.subr.bf16.mxu0 %v7861_v55 }
  0x89   :  { %560 = vmatpush1.bf16.msra.mxu1 %v7863_v56 }
  0x8a   :  { %601 = vmatpush1.bf16.msra.mxu0 %v7865_v57  ;;  %864 = vmatprep.subr.bf16.mxu1 %v7884_v63 }
  0x8b   :  { %905 = vmatprep.subr.bf16.mxu0 %v7886_v0 }
 0x131   :  { %v204_v59 = vpop.f32.mrb[0].mxu0 }
 0x132   :  { %v7874_v60 = vadd.f32 %v5837_v58, %v204_v59  ;;  %v6031_v61 = vpop.f32.mrb[1].mxu0  ;;  %v7944_v58 = vld [vmem:[#allocation5 + $0xac] ss:$16 sps:$4 sm:$0xff]   ;;  %v7948_v59 = vld [vmem:[#allocation5 + $0xa0] ss:$16 sps:$4 sm:$0xff]  }
 0x133   :  { %11323 = vst [vmem:[#allocation38_spill] sm:$0xff] %v7944_v58  ;;  %11324 = vst [vmem:[#allocation39_spill] sm:$0xff] %v7948_v59  ;;  %v7950_v61 = vld [vmem:[#allocation5 + $0xa8] ss:$16 sps:$4 sm:$0xff]  }
 0x134   :  { %v7878_v62 = vpack.c.bf16 %v7874_v60, %v7874_v60  ;;  %11325 = vst [vmem:[#allocation40_spill] sm:$0xff] %v7950_v61 }
 0x136   :  { %578 = vmatmul.mubr.bf16.vlgmr.msra.gmra.mrb[0].mxu1 %v7878_v62  ;;  %619 = vmatmul.mubr.bf16.vlgmr.msra.gmra.mrb[4].mxu0 %v7878_v62 }
 0x137   :  { %896 = vmatprep.mubr.bf16.mxu1 %v10887_v6  ;;  %937 = vmatprep.mubr.bf16.mxu0 %v10887_v6  ;;  %v7954_v6 = vld [vmem:[#allocation5 + $0xc4] ss:$16 sps:$4 sm:$0xff]  }
 0x138   :  { %865 = vmatpush1.bf16.msra.mxu1 %v7888_v1  ;;  %906 = vmatpush1.bf16.msra.mxu0 %v7890_v2  ;;  %11326 = vst [vmem:[#allocation41_spill] sm:$0xff] %v7954_v6 }
 0x139   :  { %866 = vmatprep.subr.bf16.mxu1 %v7896_v3  ;;  %907 = vmatprep.subr.bf16.mxu0 %v7898_v4 }
 0x13c   :  { %867 = vmatpush1.bf16.msra.mxu1 %v7900_v7  ;;  %908 = vmatpush1.bf16.msra.mxu0 %v7902_v8 }
 0x13d   :  { %868 = vmatprep.subr.bf16.mxu1 %v7908_v9  ;;  %909 = vmatprep.subr.bf16.mxu0 %v7910_v10 }
 0x140   :  { %869 = vmatpush1.bf16.msra.mxu1 %v7912_v11  ;;  %910 = vmatpush1.bf16.msra.mxu0 %v7914_v12 }
 0x141   :  { %870 = vmatprep.subr.bf16.mxu1 %v7920_v13  ;;  %911 = vmatprep.subr.bf16.mxu0 %v7922_v14 }
 0x144   :  { %871 = vmatpush1.bf16.msra.mxu1 %v7924_v15  ;;  %912 = vmatpush1.bf16.msra.mxu0 %v7926_v16  ;;  %v7956_v16 = vld [vmem:[#allocation5 + $0xcc] ss:$16 sps:$4 sm:$0xff]  }
 0x145   :  { %872 = vmatprep.subr.bf16.mxu1 %v7932_v17  ;;  %913 = vmatprep.subr.bf16.mxu0 %v7934_v18  ;;  %11327 = vst [vmem:[#allocation42_spill] sm:$0xff] %v7956_v16  ;;  %v7960_v18 = vld [vmem:[#allocation5 + $0xc0] ss:$16 sps:$4 sm:$0xff]  }
 0x146   :  { %11328 = vst [vmem:[#allocation43_spill] sm:$0xff] %v7960_v18 }
 0x148   :  { %873 = vmatpush1.bf16.msra.mxu1 %v7936_v20  ;;  %914 = vmatpush1.bf16.msra.mxu0 %v7938_v22  ;;  %v7962_v20 = vld [vmem:[#allocation5 + $0xc8] ss:$16 sps:$4 sm:$0xff]   ;;  %v7966_v22 = vld [vmem:[#allocation5 + $0xe4] ss:$16 sps:$4 sm:$0xff]  }
 0x149   :  { %874 = vmatprep.subr.bf16.mxu1 %v7940_v27  ;;  %915 = vmatprep.subr.bf16.mxu0 %v7944_v58  ;;  %11329 = vst [vmem:[#allocation44_spill] sm:$0xff] %v7962_v20  ;;  %11330 = vst [vmem:[#allocation45_spill] sm:$0xff] %v7966_v22  ;;  %v7968_v27 = vld [vmem:[#allocation5 + $0xec] ss:$16 sps:$4 sm:$0xff]   ;;  %v7972_v58 = vld [vmem:[#allocation5 + $0xe0] ss:$16 sps:$4 sm:$0xff]  }
 0x14a   :  { %11331 = vst [vmem:[#allocation46_spill] sm:$0xff] %v7968_v27  ;;  %11332 = vst [vmem:[#allocation47_spill] sm:$0xff] %v7972_v58 }
 0x14c   :  { %875 = vmatpush1.bf16.msra.mxu1 %v7948_v59  ;;  %916 = vmatpush1.bf16.msra.mxu0 %v7950_v61  ;;  %v7974_v59 = vld [vmem:[#allocation5 + $0xe8] ss:$16 sps:$4 sm:$0xff]   ;;  %v7978_v61 = vld [vmem:[#allocation7 + $0x4] ss:$16 sps:$4 sm:$0xff]  }
 0x14d   :  { %876 = vmatprep.subr.bf16.mxu1 %v7954_v6  ;;  %917 = vmatprep.subr.bf16.mxu0 %v7956_v16  ;;  %11333 = vst [vmem:[#allocation48_spill] sm:$0xff] %v7974_v59  ;;  %11334 = vst [vmem:[#allocation49_spill] sm:$0xff] %v7978_v61  ;;  %v7980_v6 = vld [vmem:[#allocation7 + $0xc] ss:$16 sps:$4 sm:$0xff]  }
 0x14e   :  { %11335 = vst [vmem:[#allocation50_spill] sm:$0xff] %v7980_v6 }
 0x150   :  { %877 = vmatpush1.bf16.msra.mxu1 %v7960_v18  ;;  %918 = vmatpush1.bf16.msra.mxu0 %v7962_v20  ;;  %v7987_v20 = vsub.s32 0, %v7741_v5 }
 0x151   :  { %878 = vmatprep.subr.bf16.mxu1 %v7966_v22  ;;  %919 = vmatprep.subr.bf16.mxu0 %v7968_v27  ;;  %v211_v22 = vld [vmem:[%s10876_s5] sm:$0xf]  ;;  %v7993_v27 = vsub.s32 1, %v7741_v5 }
 0x152   :  { %11336 = vst [vmem:[#allocation51_spill] sm:$0xff] %v7987_v20  ;;  %v7996_v18 = vrot.slane %v211_v22, %v7987_v20 }
 0x153   :  { %11337 = vst [vmem:[#allocation52_spill] sm:$0xff] %v7993_v27 }
 0x154   :  { %879 = vmatpush1.bf16.msra.mxu1 %v7972_v58  ;;  %920 = vmatpush1.bf16.msra.mxu0 %v7974_v59  ;;  %11338 = vst [vmem:[#allocation53_spill] sm:$0xff] %v7996_v18  ;;  %v7999_v58 = vrot.slane %v211_v22, %v7993_v27 }
 0x155   :  { %1138 = vmatprep.subr.bf16.mxu1 %v7978_v61  ;;  %1179 = vmatprep.subr.bf16.mxu0 %v7980_v6  ;;  %v8002_v61 = vsub.s32 3, %v7741_v5 }
 0x157   :  { %11339 = vst [vmem:[#allocation54_spill] sm:$0xff] %v8002_v61  ;;  %v8007_v13 = vrot.slane %v211_v22, %v8002_v61 }
 0x159   :  { %11340 = vst [vmem:[#allocation55_spill] sm:$0xff] %v8007_v13 }
 0x209   :  { %v579_v6 = vpop.f32.mrb[0].mxu1  ;;  %v620_v59 = vpop.f32.mrb[4].mxu0 }
 0x20a   :  { %v6032_v16 = vadd.f32 %v579_v6, %v7996_v18  ;;  %v581_v17 = vpop.f32.mrb[1].mxu1  ;;  %v622_v15 = vpop.f32.mrb[5].mxu0  ;;  %v8011_v6 = vsub.s32 2, %v7741_v5 }
 0x20b   :  { %v6033_v14 = vadd.f32 %v581_v17, %v7999_v58  ;;  %v583_v12 = vpop.f32.mrb[2].mxu1  ;;  %v624_v11 = vpop.f32.mrb[6].mxu0  ;;  %v6035_v2 = vadd.f32 %v622_v15, %v8007_v13 }
 0x20c   :  { %v627_v10 = vsub.f32 0.0, %v6032_v16  ;;  %v584_v9 = vpop.f32.mrb[3].mxu1  ;;  %v625_v8 = vpop.f32.mrb[7].mxu0  ;;  %v8014_v17 = vrot.slane %v211_v22, %v8011_v6 }
 0x20d   :  { %v632_v7 = vsub.f32 0.0, %v6033_v14  ;;  %v639_v1 = vsub.f32 0.0, %v6035_v2 }
 0x20e   :  { %v628_v4 = vmul.f32 1.442695, %v627_v10  ;;  %v6034_v11 = vadd.f32 %v620_v59, %v8014_v17  ;;  %v8021_v59 = vld [vmem:[#allocation7] ss:$16 sps:$4 sm:$0xff]  }
 0x20f   :  { %v633_v3 = vmul.f32 1.442695, %v632_v7  ;;  %v640_v0 = vmul.f32 1.442695, %v639_v1 }
 0x210   :  { %6573 = vpow2.f32 %v628_v4 }
 0x211   :  { %6575 = vpow2.f32 %v633_v3 }
 0x212   :  { %6577 = vpow2.f32 %v640_v0 }
 0x213   :  { %6579 = vtanh.f32 %v6034_v11  ;;  %v8023_v11 = vld [vmem:[#allocation7 + $0x8] ss:$16 sps:$4 sm:$0xff]  }
 0x21a   :  { %v6574_v12 = vpop.eup %6573 }
 0x21b   :  { %v6576_v9 = vpop.eup %6575  ;;  %v630_v8 = vadd.f32 1.0, %v6574_v12 }
 0x21c   :  { %v635_v7 = vadd.f32 1.0, %v6576_v9  ;;  %v6578_v4 = vpop.eup %6577  ;;  %v8027_v9 = vld [vmem:[#allocation7 + $0x24] ss:$16 sps:$4 sm:$0xff]  }
 0x21d   :  { %6581 = vrcp.f32 %v630_v8  ;;  %v6580_v10 = vpop.eup %6579  ;;  %v642_v2 = vadd.f32 1.0, %v6578_v4  ;;  %v8029_v8 = vld [vmem:[#allocation7 + $0x2c] ss:$16 sps:$4 sm:$0xff]   ;;  %v8037_v4 = vld [vmem:[#allocation7 + $0x28] ss:$16 sps:$4 sm:$0xff]  }
 0x21e   :  { %6583 = vrcp.f32 %v635_v7  ;;  %v8035_v7 = vld [vmem:[#allocation7 + $0x20] ss:$16 sps:$4 sm:$0xff]   ;;  %11341 = vst [vmem:[#allocation56_spill] sm:$0xff] %v8037_v4 }
 0x21f   :  { %6585 = vrcp.f32 %v642_v2  ;;  %v8051_v2 = vld [vmem:[#allocation7 + $0x48] ss:$16 sps:$4 sm:$0xff]  }
 0x220   :  { %11346 = vst [vmem:[#allocation60_spill] sm:$0xff] %v8051_v2 }
 0x227   :  { %v6582_v5 = vpop.eup %6581 }
 0x228   :  { %v6584_v14 = vpop.eup %6583  ;;  %v645_v3 = vmul.f32 %v6582_v5, %v6580_v10  ;;  %v8041_v10 = vld [vmem:[#allocation7 + $0x44] ss:$16 sps:$4 sm:$0xff]   ;;  %v8043_v5 = vld [vmem:[#allocation7 + $0x4c] ss:$16 sps:$4 sm:$0xff]  }
 0x229   :  { %v644_v15 = vmul.f32 %v6584_v14, %v7874_v60  ;;  %v6586_v1 = vpop.eup %6585  ;;  %11342 = vst [vmem:[#allocation57_spill] sm:$0xff] %v8041_v10  ;;  %11343 = vst [vmem:[#allocation58_spill] sm:$0xff] %v8043_v5  ;;  %v11344_v14 = vmov 0  }
 0x22b   :  { %v8018_v16 = vadd.f32 %v645_v3, %v644_v15  ;;  %v8049_v3 = vld [vmem:[#allocation7 + $0x40] ss:$16 sps:$4 sm:$0xff]   ;;  %v8055_v15 = vld [vmem:[#allocation7 + $0x64] ss:$16 sps:$4 sm:$0xff]  }
 0x22c   :  { %11345 = vst [vmem:[#allocation59_spill] sm:$0xff] %v8049_v3  ;;  %11347 = vst [vmem:[#allocation61_spill] sm:$0xff] %v8055_v15 }
 0x22d   :  { %6587 = vtanh.f32 %v8018_v16 }
 0x237   :  { %v6588_v22 = vpop.eup %6587 }
 0x238   :  { %v648_v0 = vmul.f32 %v6588_v22, %v6586_v1  ;;  %v8057_v1 = vld [vmem:[#allocation7 + $0x6c] ss:$16 sps:$4 sm:$0xff]   ;;  %v8061_v22 = vld [vmem:[#allocation7 + $0x60] ss:$16 sps:$4 sm:$0xff]  }
 0x239   :  { %11348 = vst [vmem:[#allocation62_spill] sm:$0xff] %v8057_v1  ;;  %11349 = vst [vmem:[#allocation63_spill] sm:$0xff] %v8061_v22 }
 0x23a   :  { %v8025_v12 = vpack.c.bf16 %v648_v0, %v648_v0  ;;  %v8063_v0 = vld [vmem:[#allocation7 + $0x68] ss:$16 sps:$4 sm:$0xff]  }
 0x23b   :  { %11350 = vst [vmem:[#allocation64_spill] sm:$0xff] %v8063_v0 }
 0x23c   :  { %897 = vmatmul.mubr.bf16.vlgmr.msra.gmra.mrb[4].mxu1 %v8025_v12  ;;  %938 = vmatmul.mubr.bf16.vlgmr.msra.gmra.mrb[8].mxu0 %v8025_v12 }
 0x23d   :  { %1139 = vmatpush1.bf16.msra.mxu1 %v8021_v59  ;;  %1180 = vmatpush1.bf16.msra.mxu0 %v8023_v11 }
 0x23e   :  { %1140 = vmatprep.subr.bf16.mxu1 %v8027_v9  ;;  %1181 = vmatprep.subr.bf16.mxu0 %v8029_v8 }
 0x23f   :  { %1170 = vmatprep.mubr.bf16.mxu1 %v11344_v14  ;;  %1211 = vmatprep.mubr.bf16.mxu0 %v11344_v14 }
 0x241   :  { %1141 = vmatpush1.bf16.msra.mxu1 %v8035_v7  ;;  %1182 = vmatpush1.bf16.msra.mxu0 %v8037_v4  ;;  %v8067_v4 = vld [vmem:[#allocation7 + $0x84] ss:$16 sps:$4 sm:$0xff]  }
 0x242   :  { %1142 = vmatprep.subr.bf16.mxu1 %v8041_v10  ;;  %1183 = vmatprep.subr.bf16.mxu0 %v8043_v5  ;;  %11351 = vst [vmem:[#allocation65_spill] sm:$0xff] %v8067_v4  ;;  %v8069_v10 = vld [vmem:[#allocation7 + $0x8c] ss:$16 sps:$4 sm:$0xff]   ;;  %v8073_v5 = vld [vmem:[#allocation7 + $0x80] ss:$16 sps:$4 sm:$0xff]  }
 0x243   :  { %11352 = vst [vmem:[#allocation66_spill] sm:$0xff] %v8069_v10  ;;  %11353 = vst [vmem:[#allocation67_spill] sm:$0xff] %v8073_v5 }
 0x245   :  { %1143 = vmatpush1.bf16.msra.mxu1 %v8049_v3  ;;  %1184 = vmatpush1.bf16.msra.mxu0 %v8051_v2  ;;  %v8075_v3 = vld [vmem:[#allocation7 + $0x88] ss:$16 sps:$4 sm:$0xff]   ;;  %v8079_v2 = vld [vmem:[#allocation7 + $0xa4] ss:$16 sps:$4 sm:$0xff]  }
 0x246   :  { %1144 = vmatprep.subr.bf16.mxu1 %v8055_v15  ;;  %1185 = vmatprep.subr.bf16.mxu0 %v8057_v1  ;;  %11354 = vst [vmem:[#allocation68_spill] sm:$0xff] %v8075_v3  ;;  %11355 = vst [vmem:[#allocation69_spill] sm:$0xff] %v8079_v2  ;;  %v8081_v15 = vld [vmem:[#allocation7 + $0xac] ss:$16 sps:$4 sm:$0xff]   ;;  %v8085_v1 = vld [vmem:[#allocation7 + $0xa0] ss:$16 sps:$4 sm:$0xff]  }
 0x247   :  { %11356 = vst [vmem:[#allocation70_spill] sm:$0xff] %v8081_v15  ;;  %11357 = vst [vmem:[#allocation71_spill] sm:$0xff] %v8085_v1 }
 0x249   :  { %1145 = vmatpush1.bf16.msra.mxu1 %v8061_v22  ;;  %1186 = vmatpush1.bf16.msra.mxu0 %v8063_v0  ;;  %v8087_v22 = vld [vmem:[#allocation7 + $0xa8] ss:$16 sps:$4 sm:$0xff]   ;;  %v8091_v0 = vld [vmem:[#allocation7 + $0xc4] ss:$16 sps:$4 sm:$0xff]  }
 0x24a   :  { %1146 = vmatprep.subr.bf16.mxu1 %v8067_v4  ;;  %1187 = vmatprep.subr.bf16.mxu0 %v8069_v10  ;;  %v8093_v4 = vld [vmem:[#allocation7 + $0xcc] ss:$16 sps:$4 sm:$0xff]   ;;  %v8097_v10 = vld [vmem:[#allocation7 + $0xc0] ss:$16 sps:$4 sm:$0xff]  }
 0x24d   :  { %1147 = vmatpush1.bf16.msra.mxu1 %v8073_v5  ;;  %1188 = vmatpush1.bf16.msra.mxu0 %v8075_v3  ;;  %v8099_v5 = vld [vmem:[#allocation7 + $0xc8] ss:$16 sps:$4 sm:$0xff]   ;;  %v8103_v3 = vld [vmem:[#allocation7 + $0xe4] ss:$16 sps:$4 sm:$0xff]  }
 0x24e   :  { %1148 = vmatprep.subr.bf16.mxu1 %v8079_v2  ;;  %1189 = vmatprep.subr.bf16.mxu0 %v8081_v15  ;;  %v8105_v2 = vld [vmem:[#allocation7 + $0xec] ss:$16 sps:$4 sm:$0xff]   ;;  %v8109_v15 = vld [vmem:[#allocation7 + $0xe0] ss:$16 sps:$4 sm:$0xff]  }
 0x24f   :  { %11358 = vst [vmem:[#allocation72_spill] sm:$0xff] %v8105_v2 }
 0x251   :  { %1149 = vmatpush1.bf16.msra.mxu1 %v8085_v1  ;;  %1190 = vmatpush1.bf16.msra.mxu0 %v8087_v22  ;;  %v8111_v1 = vld [vmem:[#allocation7 + $0xe8] ss:$16 sps:$4 sm:$0xff]  }
 0x252   :  { %1150 = vmatprep.subr.bf16.mxu1 %v8091_v0  ;;  %1191 = vmatprep.subr.bf16.mxu0 %v8093_v4 }
 0x255   :  { %1151 = vmatpush1.bf16.msra.mxu1 %v8097_v10  ;;  %1192 = vmatpush1.bf16.msra.mxu0 %v8099_v5 }
 0x256   :  { %1152 = vmatprep.subr.bf16.mxu1 %v8103_v3  ;;  %1193 = vmatprep.subr.bf16.mxu0 %v8105_v2  ;;  %v5938_v2 = vld [vmem:[%s10871_s0 + $0x8] sm:$0xff] }
 0x259   :  { %1153 = vmatpush1.bf16.msra.mxu1 %v8109_v15  ;;  %1194 = vmatpush1.bf16.msra.mxu0 %v8111_v1 }
 0x25a   :  { %1248 = vmatprep.subr.bf16.mxu1 %v7761_v21  ;;  %1289 = vmatprep.subr.bf16.mxu0 %v7768_v25  ;;  %v1244_v25 = vpack.c.bf16 %v5938_v2, %v5938_v2  ;;  %v682_v2 = vld [vmem:[%s10880_s9] sm:$0xf] }
 0x25c   :  { %1171 = vmatmul.mubr.bf16.vlgmr.msra.gmra.mrb[4].mxu1 %v7878_v62  ;;  %1212 = vmatmul.mubr.bf16.vlgmr.msra.gmra.mrb[8].mxu0 %v7878_v62 }
 0x25d   :  { %1249 = vmatpush1.bf16.msra.mxu1 %v7756_v19  ;;  %1290 = vmatpush1.bf16.msra.mxu0 %v7765_v24 }
 0x25e   :  { %1280 = vmatprep.mubr.bf16.mxu1 %v11344_v14  ;;  %1321 = vmatprep.mubr.bf16.mxu0 %v11344_v14 }
 0x25f   :  { %1330 = vmatprep.subr.bf16.mxu1 %v7763_v23  ;;  %1371 = vmatprep.subr.bf16.mxu0 %v7770_v26  ;;  %v8168_v23 = vld [vmem:[#allocation8 + $0x4] ss:$16 sps:$4 sm:$0xff]   ;;  %v8172_v26 = vld [vmem:[#allocation8] ss:$16 sps:$4 sm:$0xff]  }
 0x264   :  { %5939 = vmatmul.mubr.msk.bf16.vlgmr.msra.gmra.mrb[8].mxu1 %vm130_vm4, %v1244_v25  ;;  %5940 = vmatmul.mubr.msk.bf16.vlgmr.msra.gmra.mrb[12].mxu0 %vm130_vm4, %v1244_v25  ;;  %v8170_v25 = vld [vmem:[#allocation8 + $0xc] ss:$16 sps:$4 sm:$0xff]  }
 0x265   :  { %1331 = vmatpush1.bf16.msra.mxu1 %v7773_v28  ;;  %1372 = vmatpush1.bf16.msra.mxu0 %v7780_v30  ;;  %v8174_v28 = vld [vmem:[#allocation8 + $0x8] ss:$16 sps:$4 sm:$0xff]   ;;  %v8182_v30 = vld [vmem:[#allocation8 + $0x2c] ss:$16 sps:$4 sm:$0xff]  }
 0x266   :  { %1332 = vmatprep.subr.bf16.mxu1 %v7777_v29  ;;  %1373 = vmatprep.subr.bf16.mxu0 %v7784_v31  ;;  %v8180_v29 = vld [vmem:[#allocation8 + $0x24] ss:$16 sps:$4 sm:$0xff]   ;;  %v8184_v31 = vld [vmem:[#allocation8 + $0x20] ss:$16 sps:$4 sm:$0xff]  }
 0x267   :  { %1362 = vmatprep.mubr.bf16.mxu1 %v11344_v14  ;;  %1403 = vmatprep.mubr.bf16.mxu0 %v11344_v14 }
 0x269   :  { %1333 = vmatpush1.bf16.msra.mxu1 %v7787_v32  ;;  %1374 = vmatpush1.bf16.msra.mxu0 %v7795_v34  ;;  %v8186_v32 = vld [vmem:[#allocation8 + $0x28] ss:$16 sps:$4 sm:$0xff]   ;;  %v8194_v34 = vld [vmem:[#allocation8 + $0x4c] ss:$16 sps:$4 sm:$0xff]  }
 0x26a   :  { %1334 = vmatprep.subr.bf16.mxu1 %v7792_v33  ;;  %1375 = vmatprep.subr.bf16.mxu0 %v7799_v35  ;;  %v8192_v33 = vld [vmem:[#allocation8 + $0x44] ss:$16 sps:$4 sm:$0xff]   ;;  %v8196_v35 = vld [vmem:[#allocation8 + $0x40] ss:$16 sps:$4 sm:$0xff]  }
 0x26d   :  { %1335 = vmatpush1.bf16.msra.mxu1 %v7802_v36  ;;  %1376 = vmatpush1.bf16.msra.mxu0 %v7808_v38  ;;  %v8198_v36 = vld [vmem:[#allocation8 + $0x48] ss:$16 sps:$4 sm:$0xff]   ;;  %v8206_v38 = vld [vmem:[#allocation8 + $0x6c] ss:$16 sps:$4 sm:$0xff]  }
 0x26e   :  { %1336 = vmatprep.subr.bf16.mxu1 %v7805_v37  ;;  %1377 = vmatprep.subr.bf16.mxu0 %v7811_v39  ;;  %v8204_v37 = vld [vmem:[#allocation8 + $0x64] ss:$16 sps:$4 sm:$0xff]   ;;  %v8208_v39 = vld [vmem:[#allocation8 + $0x60] ss:$16 sps:$4 sm:$0xff]  }
 0x271   :  { %1337 = vmatpush1.bf16.msra.mxu1 %v7813_v40  ;;  %1378 = vmatpush1.bf16.msra.mxu0 %v7816_v41  ;;  %v8210_v40 = vld [vmem:[#allocation8 + $0x68] ss:$16 sps:$4 sm:$0xff]   ;;  %v8216_v41 = vld [vmem:[#allocation8 + $0x84] ss:$16 sps:$4 sm:$0xff]  }
 0x272   :  { %1338 = vmatprep.subr.bf16.mxu1 %v7818_v42  ;;  %1379 = vmatprep.subr.bf16.mxu0 %v7821_v43  ;;  %v8218_v42 = vld [vmem:[#allocation8 + $0x8c] ss:$16 sps:$4 sm:$0xff]   ;;  %v8220_v43 = vld [vmem:[#allocation8 + $0x80] ss:$16 sps:$4 sm:$0xff]  }
 0x273   :  { %11359 = vst [vmem:[#allocation73_spill] sm:$0xff] %v8220_v43 }
 0x275   :  { %1339 = vmatpush1.bf16.msra.mxu1 %v7824_v44  ;;  %1380 = vmatpush1.bf16.msra.mxu0 %v7830_v46  ;;  %v8222_v44 = vld [vmem:[#allocation8 + $0x88] ss:$16 sps:$4 sm:$0xff]   ;;  %v8228_v46 = vld [vmem:[#allocation8 + $0xac] ss:$16 sps:$4 sm:$0xff]  }
 0x276   :  { %1340 = vmatprep.subr.bf16.mxu1 %v7827_v45  ;;  %1381 = vmatprep.subr.bf16.mxu0 %v7833_v47  ;;  %11360 = vst [vmem:[#allocation74_spill] sm:$0xff] %v8222_v44  ;;  %v8224_v45 = vld [vmem:[#allocation8 + $0xa4] ss:$16 sps:$4 sm:$0xff]   ;;  %11362 = vst [vmem:[#allocation76_spill] sm:$0xff] %v8228_v46  ;;  %v8234_v47 = vld [vmem:[#allocation8 + $0xa0] ss:$16 sps:$4 sm:$0xff]  }
 0x277   :  { %11361 = vst [vmem:[#allocation75_spill] sm:$0xff] %v8224_v45  ;;  %11363 = vst [vmem:[#allocation77_spill] sm:$0xff] %v8234_v47 }
 0x279   :  { %1341 = vmatpush1.bf16.msra.mxu1 %v7836_v48  ;;  %1382 = vmatpush1.bf16.msra.mxu0 %v7842_v50  ;;  %v8236_v48 = vld [vmem:[#allocation8 + $0xa8] ss:$16 sps:$4 sm:$0xff]   ;;  %v8242_v50 = vld [vmem:[#allocation8 + $0xcc] ss:$16 sps:$4 sm:$0xff]  }
 0x27a   :  { %1342 = vmatprep.subr.bf16.mxu1 %v7839_v49  ;;  %1383 = vmatprep.subr.bf16.mxu0 %v7845_v51  ;;  %11364 = vst [vmem:[#allocation78_spill] sm:$0xff] %v8236_v48  ;;  %v8240_v49 = vld [vmem:[#allocation8 + $0xc4] ss:$16 sps:$4 sm:$0xff]   ;;  %11366 = vst [vmem:[#allocation80_spill] sm:$0xff] %v8242_v50  ;;  %v8244_v51 = vld [vmem:[#allocation8 + $0xc0] ss:$16 sps:$4 sm:$0xff]  }
 0x27b   :  { %11365 = vst [vmem:[#allocation79_spill] sm:$0xff] %v8240_v49  ;;  %11367 = vst [vmem:[#allocation81_spill] sm:$0xff] %v8244_v51 }
 0x27d   :  { %1343 = vmatpush1.bf16.msra.mxu1 %v7848_v52  ;;  %1384 = vmatpush1.bf16.msra.mxu0 %v7852_v53  ;;  %v8246_v52 = vld [vmem:[#allocation8 + $0xc8] ss:$16 sps:$4 sm:$0xff]   ;;  %v8252_v53 = vld [vmem:[#allocation8 + $0xe4] ss:$16 sps:$4 sm:$0xff]  }
 0x27e   :  { %1344 = vmatprep.subr.bf16.mxu1 %v7859_v54  ;;  %1385 = vmatprep.subr.bf16.mxu0 %v7861_v55  ;;  %11368 = vst [vmem:[#allocation82_spill] sm:$0xff] %v8246_v52  ;;  %11369 = vst [vmem:[#allocation83_spill] sm:$0xff] %v8252_v53  ;;  %v8254_v54 = vld [vmem:[#allocation8 + $0xec] ss:$16 sps:$4 sm:$0xff]   ;;  %v8256_v55 = vld [vmem:[#allocation8 + $0xe0] ss:$16 sps:$4 sm:$0xff]  }
 0x27f   :  { %11370 = vst [vmem:[#allocation84_spill] sm:$0xff] %v8254_v54  ;;  %11371 = vst [vmem:[#allocation85_spill] sm:$0xff] %v8256_v55 }
 0x281   :  { %1345 = vmatpush1.bf16.msra.mxu1 %v7863_v56  ;;  %1386 = vmatpush1.bf16.msra.mxu0 %v7865_v57  ;;  %v8258_v56 = vld [vmem:[#allocation8 + $0xe8] ss:$16 sps:$4 sm:$0xff]   ;;  %v8264_v57 = vld [vmem:[#allocation10 + $0x4] ss:$16 sps:$4 sm:$0xff]  }
 0x282   :  { %1649 = vmatprep.subr.bf16.mxu1 %v8168_v23  ;;  %1690 = vmatprep.subr.bf16.mxu0 %v8170_v25  ;;  %11372 = vst [vmem:[#allocation86_spill] sm:$0xff] %v8258_v56  ;;  %11373 = vst [vmem:[#allocation87_spill] sm:$0xff] %v8264_v57 }
 0x284   :  { %1363 = vmatmul.mubr.bf16.vlgmr.msra.gmra.mrb[8].mxu1 %v8025_v12  ;;  %1404 = vmatmul.mubr.bf16.vlgmr.msra.gmra.mrb[12].mxu0 %v8025_v12  ;;  %v8266_v12 = vld [vmem:[#allocation10 + $0xc] ss:$16 sps:$4 sm:$0xff]  }
 0x285   :  { %1681 = vmatprep.mubr.bf16.mxu1 %v11344_v14  ;;  %1722 = vmatprep.mubr.bf16.mxu0 %v11344_v14  ;;  %11374 = vst [vmem:[#allocation88_spill] sm:$0xff] %v8266_v12 }
 0x286   :  { %1650 = vmatpush1.bf16.msra.mxu1 %v8172_v26  ;;  %1691 = vmatpush1.bf16.msra.mxu0 %v8174_v28 }
 0x287   :  { %1651 = vmatprep.subr.bf16.mxu1 %v8180_v29  ;;  %1692 = vmatprep.subr.bf16.mxu0 %v8182_v30 }
 0x28a   :  { %1652 = vmatpush1.bf16.msra.mxu1 %v8184_v31  ;;  %1693 = vmatpush1.bf16.msra.mxu0 %v8186_v32 }
 0x28b   :  { %1653 = vmatprep.subr.bf16.mxu1 %v8192_v33  ;;  %1694 = vmatprep.subr.bf16.mxu0 %v8194_v34 }
 0x28e   :  { %1654 = vmatpush1.bf16.msra.mxu1 %v8196_v35  ;;  %1695 = vmatpush1.bf16.msra.mxu0 %v8198_v36 }
 0x28f   :  { %1655 = vmatprep.subr.bf16.mxu1 %v8204_v37  ;;  %1696 = vmatprep.subr.bf16.mxu0 %v8206_v38 }
 0x292   :  { %1656 = vmatpush1.bf16.msra.mxu1 %v8208_v39  ;;  %1697 = vmatpush1.bf16.msra.mxu0 %v8210_v40 }
 0x293   :  { %1657 = vmatprep.subr.bf16.mxu1 %v8216_v41  ;;  %1698 = vmatprep.subr.bf16.mxu0 %v8218_v42 }
 0x296   :  { %1658 = vmatpush1.bf16.msra.mxu1 %v8220_v43  ;;  %1699 = vmatpush1.bf16.msra.mxu0 %v8222_v44 }
 0x297   :  { %1659 = vmatprep.subr.bf16.mxu1 %v8224_v45  ;;  %1700 = vmatprep.subr.bf16.mxu0 %v8228_v46 }
 0x29a   :  { %1660 = vmatpush1.bf16.msra.mxu1 %v8234_v47  ;;  %1701 = vmatpush1.bf16.msra.mxu0 %v8236_v48 }
 0x29b   :  { %1661 = vmatprep.subr.bf16.mxu1 %v8240_v49  ;;  %1702 = vmatprep.subr.bf16.mxu0 %v8242_v50 }
 0x29e   :  { %1662 = vmatpush1.bf16.msra.mxu1 %v8244_v51  ;;  %1703 = vmatpush1.bf16.msra.mxu0 %v8246_v52 }
 0x29f   :  { %1663 = vmatprep.subr.bf16.mxu1 %v8252_v53  ;;  %1704 = vmatprep.subr.bf16.mxu0 %v8254_v54  ;;  %v8274_v53 = vrot.slane %v682_v2, %v7987_v20  ;;  %v8277_v54 = vrot.slane %v682_v2, %v7993_v27 }
 0x2a1   :  { %11375 = vst [vmem:[#allocation89_spill] sm:$0xff] %v8274_v53  ;;  %11376 = vst [vmem:[#allocation90_spill] sm:$0xff] %v8277_v54 }
 0x2a2   :  { %1664 = vmatpush1.bf16.msra.mxu1 %v8256_v55  ;;  %1705 = vmatpush1.bf16.msra.mxu0 %v8258_v56 }
 0x2a3   :  { %1923 = vmatprep.subr.bf16.mxu1 %v8264_v57  ;;  %1964 = vmatprep.subr.bf16.mxu0 %v8266_v12  ;;  %v8282_v12 = vrot.slane %v682_v2, %v8002_v61 }
 0x32f   :  { %v1172_v55 = vpop.f32.mrb[4].mxu1  ;;  %v1213_v56 = vpop.f32.mrb[8].mxu0 }
 0x330   :  { %v6036_v52 = vadd.f32 %v1172_v55, %v8274_v53  ;;  %v1174_v51 = vpop.f32.mrb[5].mxu1  ;;  %v1215_v50 = vpop.f32.mrb[9].mxu0  ;;  %v8286_v53 = vrot.slane %v682_v2, %v8011_v6 }
 0x331   :  { %v6037_v57 = vadd.f32 %v1174_v51, %v8277_v54  ;;  %v1176_v49 = vpop.f32.mrb[6].mxu1  ;;  %v1217_v48 = vpop.f32.mrb[10].mxu0  ;;  %v6039_v43 = vadd.f32 %v1215_v50, %v8282_v12 }
 0x332   :  { %v1220_v47 = vsub.f32 0.0, %v6036_v52  ;;  %v1177_v46 = vpop.f32.mrb[7].mxu1  ;;  %v1218_v20 = vpop.f32.mrb[11].mxu0  ;;  %v6038_v61 = vadd.f32 %v1213_v56, %v8286_v53 }
 0x333   :  { %v1225_v45 = vsub.f32 0.0, %v6037_v57  ;;  %v1232_v55 = vsub.f32 0.0, %v6039_v43 }
 0x334   :  { %v1221_v44 = vmul.f32 1.442695, %v1220_v47 }
 0x335   :  { %v1226_v27 = vmul.f32 1.442695, %v1225_v45  ;;  %v1233_v51 = vmul.f32 1.442695, %v1232_v55 }
 0x336   :  { %6589 = vpow2.f32 %v1221_v44 }
 0x337   :  { %6591 = vpow2.f32 %v1226_v27 }
 0x338   :  { %6593 = vpow2.f32 %v1233_v51 }
 0x339   :  { %6595 = vtanh.f32 %v6038_v61 }
 0x340   :  { %v6590_v54 = vpop.eup %6589 }
 0x341   :  { %v6592_v49 = vpop.eup %6591  ;;  %v1223_v48 = vadd.f32 1.0, %v6590_v54 }
 0x342   :  { %v1228_v20 = vadd.f32 1.0, %v6592_v49  ;;  %v6594_v45 = vpop.eup %6593 }
 0x343   :  { %6597 = vrcp.f32 %v1223_v48  ;;  %v6596_v46 = vpop.eup %6595  ;;  %v1235_v43 = vadd.f32 1.0, %v6594_v45 }
 0x344   :  { %6599 = vrcp.f32 %v1228_v20 }
 0x345   :  { %6601 = vrcp.f32 %v1235_v43 }
 0x34d   :  { %v6598_v47 = vpop.eup %6597 }
 0x34e   :  { %v6600_v44 = vpop.eup %6599  ;;  %v1238_v27 = vmul.f32 %v6598_v47, %v6596_v46 }
 0x34f   :  { %v1237_v50 = vmul.f32 %v6600_v44, %v7874_v60  ;;  %v6602_v47 = vpop.eup %6601 }
 0x351   :  { %v8290_v52 = vadd.f32 %v1238_v27, %v1237_v50 }
 0x353   :  { %11377 = vst [vmem:[#allocation91_spill] sm:$0xff] %v8290_v52  ;;  %6603 = vtanh.f32 %v8290_v52  ;;  %v8297_v52 = vld [vmem:[#allocation10] ss:$16 sps:$4 sm:$0xff]  }
 0x357   :  { %v1364_v56 = vpop.f32.mrb[8].mxu1  ;;  %v1405_v54 = vpop.f32.mrb[12].mxu0 }
 0x358   :  { %v6040_v61 = vadd.f32 %v1364_v56, %v7996_v18  ;;  %v1366_v57 = vpop.f32.mrb[9].mxu1  ;;  %v8294_v2 = vpop.f32.mrb[13].mxu0  ;;  %v8299_v56 = vld [vmem:[#allocation10 + $0x8] ss:$16 sps:$4 sm:$0xff]  }
 0x359   :  { %v6041_v55 = vadd.f32 %v1366_v57, %v7999_v58  ;;  %v1368_v51 = vpop.f32.mrb[10].mxu1  ;;  %v1409_v49 = vpop.f32.mrb[14].mxu0  ;;  %v8303_v57 = vld [vmem:[#allocation10 + $0x24] ss:$16 sps:$4 sm:$0xff]  }
 0x35a   :  { %v1412_v48 = vsub.f32 0.0, %v6040_v61  ;;  %v1369_v20 = vpop.f32.mrb[11].mxu1  ;;  %v1410_v45 = vpop.f32.mrb[15].mxu0  ;;  %v8305_v51 = vld [vmem:[#allocation10 + $0x2c] ss:$16 sps:$4 sm:$0xff]  }
 0x35b   :  { %v1417_v46 = vsub.f32 0.0, %v6041_v55  ;;  %v8311_v61 = vld [vmem:[#allocation10 + $0x20] ss:$16 sps:$4 sm:$0xff]   ;;  %v8313_v55 = vld [vmem:[#allocation10 + $0x28] ss:$16 sps:$4 sm:$0xff]   ;;  %v6042_v20 = vadd.f32 %v1405_v54, %v8014_v17 }
 0x35c   :  { %v1413_v44 = vmul.f32 1.442695, %v1412_v48  ;;  %11378 = vst [vmem:[#allocation92_spill] sm:$0xff] %v8311_v61  ;;  %11379 = vst [vmem:[#allocation93_spill] sm:$0xff] %v8313_v55  ;;  %v8317_v49 = vld [vmem:[#allocation10 + $0x44] ss:$16 sps:$4 sm:$0xff]  }
 0x35d   :  { %v6604_v27 = vpop.eup %6603  ;;  %v1418_v43 = vmul.f32 1.442695, %v1417_v46  ;;  %11380 = vst [vmem:[#allocation94_spill] sm:$0xff] %v8317_v49  ;;  %v8319_v48 = vld [vmem:[#allocation10 + $0x4c] ss:$16 sps:$4 sm:$0xff]  }
 0x35e   :  { %6605 = vpow2.f32 %v1413_v44  ;;  %v1241_v50 = vmul.f32 %v6604_v27, %v6602_v47  ;;  %11381 = vst [vmem:[#allocation95_spill] sm:$0xff] %v8319_v48  ;;  %v8326_v45 = vld [vmem:[#allocation10 + $0x40] ss:$16 sps:$4 sm:$0xff]   ;;  %v8328_v46 = vld [vmem:[#allocation10 + $0x48] ss:$16 sps:$4 sm:$0xff]  }
 0x35f   :  { %6607 = vpow2.f32 %v1418_v43  ;;  %11382 = vst [vmem:[#allocation96_spill] sm:$0xff] %v8326_v45  ;;  %11383 = vst [vmem:[#allocation97_spill] sm:$0xff] %v8328_v46  ;;  %v8332_v44 = vld [vmem:[#allocation10 + $0x64] ss:$16 sps:$4 sm:$0xff]   ;;  %v8334_v27 = vld [vmem:[#allocation10 + $0x6c] ss:$16 sps:$4 sm:$0xff]  }
 0x360   :  { %v8301_v18 = vpack.c.bf16 %v1241_v50, %v1241_v50  ;;  %11384 = vst [vmem:[#allocation98_spill] sm:$0xff] %v8332_v44  ;;  %11385 = vst [vmem:[#allocation99_spill] sm:$0xff] %v8334_v27  ;;  %6609 = vtanh.f32 %v6042_v20  ;;  %v8350_v20 = vld [vmem:[#allocation10 + $0x80] ss:$16 sps:$4 sm:$0xff]  }
 0x361   :  { %11390 = vst [vmem:[#allocation104_spill] sm:$0xff] %v8350_v20 }
 0x362   :  { %1682 = vmatmul.mubr.bf16.vlgmr.msra.gmra.mrb[12].mxu1 %v8301_v18  ;;  %1723 = vmatmul.mubr.bf16.vlgmr.msra.gmra.mrb[16].mxu0 %v8301_v18 }
 0x363   :  { %1924 = vmatpush1.bf16.msra.mxu1 %v8297_v52  ;;  %1965 = vmatpush1.bf16.msra.mxu0 %v8299_v56 }
 0x364   :  { %1925 = vmatprep.subr.bf16.mxu1 %v8303_v57  ;;  %1966 = vmatprep.subr.bf16.mxu0 %v8305_v51 }
 0x365   :  { %1955 = vmatprep.mubr.bf16.mxu1 %v11344_v14  ;;  %1996 = vmatprep.mubr.bf16.mxu0 %v11344_v14 }
 0x367   :  { %1926 = vmatpush1.bf16.msra.mxu1 %v8311_v61  ;;  %1967 = vmatpush1.bf16.msra.mxu0 %v8313_v55  ;;  %v8338_v55 = vld [vmem:[#allocation10 + $0x60] ss:$16 sps:$4 sm:$0xff]   ;;  %v8340_v61 = vld [vmem:[#allocation10 + $0x68] ss:$16 sps:$4 sm:$0xff]  }
 0x368   :  { %v6606_v47 = vpop.eup %6605  ;;  %1927 = vmatprep.subr.bf16.mxu1 %v8317_v49  ;;  %1968 = vmatprep.subr.bf16.mxu0 %v8319_v48  ;;  %11386 = vst [vmem:[#allocation100_spill] sm:$0xff] %v8338_v55  ;;  %11387 = vst [vmem:[#allocation101_spill] sm:$0xff] %v8340_v61  ;;  %v8344_v48 = vld [vmem:[#allocation10 + $0x84] ss:$16 sps:$4 sm:$0xff]   ;;  %v8346_v49 = vld [vmem:[#allocation10 + $0x8c] ss:$16 sps:$4 sm:$0xff]  }
 0x369   :  { %v6608_v43 = vpop.eup %6607  ;;  %v1415_v50 = vadd.f32 1.0, %v6606_v47  ;;  %11388 = vst [vmem:[#allocation102_spill] sm:$0xff] %v8344_v48  ;;  %11389 = vst [vmem:[#allocation103_spill] sm:$0xff] %v8346_v49  ;;  %v8352_v47 = vld [vmem:[#allocation10 + $0x88] ss:$16 sps:$4 sm:$0xff]  }
 0x36a   :  { %v1420_v54 = vadd.f32 1.0, %v6608_v43  ;;  %11391 = vst [vmem:[#allocation105_spill] sm:$0xff] %v8352_v47  ;;  %v8356_v43 = vld [vmem:[#allocation10 + $0xa4] ss:$16 sps:$4 sm:$0xff]  }
 0x36b   :  { %6611 = vrcp.f32 %v1415_v50  ;;  %1928 = vmatpush1.bf16.msra.mxu1 %v8326_v45  ;;  %1969 = vmatpush1.bf16.msra.mxu0 %v8328_v46  ;;  %11392 = vst [vmem:[#allocation106_spill] sm:$0xff] %v8356_v43  ;;  %v8358_v50 = vld [vmem:[#allocation10 + $0xac] ss:$16 sps:$4 sm:$0xff]   ;;  %v8377_v45 = vld [vmem:[#allocation10 + $0xc0] ss:$16 sps:$4 sm:$0xff]  }
 0x36c   :  { %6613 = vrcp.f32 %v1420_v54  ;;  %1929 = vmatprep.subr.bf16.mxu1 %v8332_v44  ;;  %1970 = vmatprep.subr.bf16.mxu0 %v8334_v27  ;;  %11393 = vst [vmem:[#allocation107_spill] sm:$0xff] %v8358_v50  ;;  %v8362_v54 = vld [vmem:[#allocation10 + $0xa0] ss:$16 sps:$4 sm:$0xff]   ;;  %v6043_v27 = vadd.f32 %v8294_v2, %v8007_v13  ;;  %v8379_v2 = vld [vmem:[#allocation10 + $0xc8] ss:$16 sps:$4 sm:$0xff]  }
 0x36d   :  { %11394 = vst [vmem:[#allocation108_spill] sm:$0xff] %v8379_v2  ;;  %v8385_v13 = vld [vmem:[#allocation10 + $0xec] ss:$16 sps:$4 sm:$0xff]  }
 0x36e   :  { %11396 = vst [vmem:[#allocation110_spill] sm:$0xff] %v8385_v13 }
 0x36f   :  { %1930 = vmatpush1.bf16.msra.mxu1 %v8338_v55  ;;  %1971 = vmatpush1.bf16.msra.mxu0 %v8340_v61  ;;  %v8364_v55 = vld [vmem:[#allocation10 + $0xa8] ss:$16 sps:$4 sm:$0xff]   ;;  %v6610_v61 = vpop.eup %6609 }
 0x370   :  { %1931 = vmatprep.subr.bf16.mxu1 %v8344_v48  ;;  %1972 = vmatprep.subr.bf16.mxu0 %v8346_v49  ;;  %v8370_v49 = vld [vmem:[#allocation10 + $0xc4] ss:$16 sps:$4 sm:$0xff]   ;;  %v8372_v48 = vld [vmem:[#allocation10 + $0xcc] ss:$16 sps:$4 sm:$0xff]  }
 0x373   :  { %1932 = vmatpush1.bf16.msra.mxu1 %v8350_v20  ;;  %1973 = vmatpush1.bf16.msra.mxu0 %v8352_v47 }
 0x374   :  { %1933 = vmatprep.subr.bf16.mxu1 %v8356_v43  ;;  %1974 = vmatprep.subr.bf16.mxu0 %v8358_v50  ;;  %v1424_v43 = vsub.f32 0.0, %v6043_v27  ;;  %v8383_v50 = vld [vmem:[#allocation10 + $0xe4] ss:$16 sps:$4 sm:$0xff]   ;;  %v11400_v27 = vld [vmem:[#allocation19_spill] sm:$0xff] }
 0x375   :  { %v6612_v44 = vpop.eup %6611  ;;  %11395 = vst [vmem:[#allocation109_spill] sm:$0xff] %v8383_v50 }
 0x376   :  { %v6614_v20 = vpop.eup %6613  ;;  %v1430_v46 = vmul.f32 %v6612_v44, %v6610_v61  ;;  %v8393_v44 = vld [vmem:[#allocation10 + $0xe8] ss:$16 sps:$4 sm:$0xff]  }
 0x377   :  { %v1429_v47 = vmul.f32 %v6614_v20, %v8018_v16  ;;  %1934 = vmatpush1.bf16.msra.mxu1 %v8362_v54  ;;  %1975 = vmatpush1.bf16.msra.mxu0 %v8364_v55  ;;  %v8391_v16 = vld [vmem:[#allocation10 + $0xe0] ss:$16 sps:$4 sm:$0xff]   ;;  %11398 = vst [vmem:[#allocation112_spill] sm:$0xff] %v8393_v44  ;;  %v1425_v20 = vmul.f32 1.442695, %v1424_v43  ;;  %v11402_v43 = vld [vmem:[#allocation21_spill] sm:$0xff] }
 0x378   :  { %1935 = vmatprep.subr.bf16.mxu1 %v8370_v49  ;;  %1976 = vmatprep.subr.bf16.mxu0 %v8372_v48  ;;  %11397 = vst [vmem:[#allocation111_spill] sm:$0xff] %v8391_v16 }
 0x379   :  { %v8387_v61 = vadd.f32 %v1430_v46, %v1429_v47  ;;  %6615 = vpow2.f32 %v1425_v20  ;;  %v11399_v46 = vld [vmem:[#allocation18_spill] sm:$0xff]  ;;  %v11401_v47 = vld [vmem:[#allocation20_spill] sm:$0xff]  ;;  %v11404_v20 = vld [vmem:[#allocation23_spill] sm:$0xff] }
 0x37b   :  { %1936 = vmatpush1.bf16.msra.mxu1 %v8377_v45  ;;  %1977 = vmatpush1.bf16.msra.mxu0 %v8379_v2  ;;  %v11413_v2 = vld [vmem:[#allocation32_spill] sm:$0xff]  ;;  %6617 = vtanh.f32 %v8387_v61 }
 0x37c   :  { %1937 = vmatprep.subr.bf16.mxu1 %v8383_v50  ;;  %1978 = vmatprep.subr.bf16.mxu0 %v8385_v13  ;;  %v11403_v13 = vld [vmem:[#allocation22_spill] sm:$0xff]  ;;  %v11412_v50 = vld [vmem:[#allocation31_spill] sm:$0xff] }
 0x37f   :  { %1938 = vmatpush1.bf16.msra.mxu1 %v8391_v16  ;;  %1979 = vmatpush1.bf16.msra.mxu0 %v8393_v44  ;;  %v11407_v44 = vld [vmem:[#allocation26_spill] sm:$0xff] }
 0x380   :  { %2028 = vmatprep.subr.bf16.mxu1 %v7884_v63  ;;  %2069 = vmatprep.subr.bf16.mxu0 %v11399_v46  ;;  %v11405_v63 = vld [vmem:[#allocation24_spill] sm:$0xff]  ;;  %v11406_v46 = vld [vmem:[#allocation25_spill] sm:$0xff] }
 0x382   :  { %1956 = vmatmul.mubr.bf16.vlgmr.msra.gmra.mrb[12].mxu1 %v7878_v62  ;;  %1997 = vmatmul.mubr.bf16.vlgmr.msra.gmra.mrb[16].mxu0 %v7878_v62 }
 0x383   :  { %2029 = vmatpush1.bf16.msra.mxu1 %v11400_v27  ;;  %2070 = vmatpush1.bf16.msra.mxu0 %v11401_v47  ;;  %v6616_v62 = vpop.eup %6615  ;;  %v11408_v27 = vld [vmem:[#allocation27_spill] sm:$0xff]  ;;  %v11409_v47 = vld [vmem:[#allocation28_spill] sm:$0xff] }
 0x384   :  { %2030 = vmatprep.subr.bf16.mxu1 %v11402_v43  ;;  %2071 = vmatprep.subr.bf16.mxu0 %v11403_v13  ;;  %v11410_v43 = vld [vmem:[#allocation29_spill] sm:$0xff]  ;;  %v11411_v13 = vld [vmem:[#allocation30_spill] sm:$0xff]  ;;  %v1427_v16 = vadd.f32 1.0, %v6616_v62  ;;  %v11420_v62 = vld [vmem:[#allocation39_spill] sm:$0xff] }
 0x385   :  { %2060 = vmatprep.mubr.bf16.mxu1 %v11344_v14  ;;  %2101 = vmatprep.mubr.bf16.mxu0 %v11344_v14 }
 0x386   :  { %6619 = vrcp.f32 %v1427_v16  ;;  %v11425_v16 = vld [vmem:[#allocation44_spill] sm:$0xff] }
 0x387   :  { %2031 = vmatpush1.bf16.msra.mxu1 %v11404_v20  ;;  %2072 = vmatpush1.bf16.msra.mxu0 %v11405_v63  ;;  %v11414_v20 = vld [vmem:[#allocation33_spill] sm:$0xff]  ;;  %v11415_v63 = vld [vmem:[#allocation34_spill] sm:$0xff] }
 0x388   :  { %2032 = vmatprep.subr.bf16.mxu1 %v11406_v46  ;;  %2073 = vmatprep.subr.bf16.mxu0 %v11407_v44  ;;  %v11416_v44 = vld [vmem:[#allocation35_spill] sm:$0xff]  ;;  %v11417_v46 = vld [vmem:[#allocation36_spill] sm:$0xff] }
 0x38b   :  { %2033 = vmatpush1.bf16.msra.mxu1 %v11408_v27  ;;  %2074 = vmatpush1.bf16.msra.mxu0 %v11409_v47  ;;  %v11418_v27 = vld [vmem:[#allocation37_spill] sm:$0xff]  ;;  %v11419_v47 = vld [vmem:[#allocation38_spill] sm:$0xff] }
 0x38c   :  { %2034 = vmatprep.subr.bf16.mxu1 %v11410_v43  ;;  %2075 = vmatprep.subr.bf16.mxu0 %v11411_v13  ;;  %v11423_v43 = vld [vmem:[#allocation42_spill] sm:$0xff]  ;;  %v6618_v13 = vpop.eup %6617 }
 0x38f   :  { %2035 = vmatpush1.bf16.msra.mxu1 %v11412_v50  ;;  %2076 = vmatpush1.bf16.msra.mxu0 %v11413_v2  ;;  %v11421_v50 = vld [vmem:[#allocation40_spill] sm:$0xff]  ;;  %v11422_v2 = vld [vmem:[#allocation41_spill] sm:$0xff] }
 0x390   :  { %2036 = vmatprep.subr.bf16.mxu1 %v11414_v20  ;;  %2077 = vmatprep.subr.bf16.mxu0 %v11415_v63  ;;  %v6620_v20 = vpop.eup %6619  ;;  %v11424_v63 = vld [vmem:[#allocation43_spill] sm:$0xff] }
 0x393   :  { %2037 = vmatpush1.bf16.msra.mxu1 %v11416_v44  ;;  %2078 = vmatpush1.bf16.msra.mxu0 %v11417_v46  ;;  %v11426_v44 = vld [vmem:[#allocation45_spill] sm:$0xff]  ;;  %v11427_v46 = vld [vmem:[#allocation46_spill] sm:$0xff] }
 0x394   :  { %2038 = vmatprep.subr.bf16.mxu1 %v11418_v27  ;;  %2079 = vmatprep.subr.bf16.mxu0 %v11419_v47  ;;  %v1433_v27 = vmul.f32 %v6620_v20, %v6618_v13  ;;  %v11428_v47 = vld [vmem:[#allocation47_spill] sm:$0xff]  ;;  %v11432_v13 = vld [vmem:[#allocation56_spill] sm:$0xff]  ;;  %v11433_v20 = vld [vmem:[#allocation57_spill] sm:$0xff] }
 0x397   :  { %2039 = vmatpush1.bf16.msra.mxu1 %v11420_v62  ;;  %2080 = vmatpush1.bf16.msra.mxu0 %v11421_v50  ;;  %v11429_v62 = vld [vmem:[#allocation48_spill] sm:$0xff]  ;;  %v8436_v50 = vpack.c.bf16 %v1433_v27, %v1433_v27  ;;  %v11443_v27 = vld [vmem:[#allocation67_spill] sm:$0xff] }
 0x398   :  { %2040 = vmatprep.subr.bf16.mxu1 %v11422_v2  ;;  %2081 = vmatprep.subr.bf16.mxu0 %v11423_v43  ;;  %v11430_v2 = vld [vmem:[#allocation49_spill] sm:$0xff]  ;;  %v11431_v43 = vld [vmem:[#allocation50_spill] sm:$0xff] }
 0x39b   :  { %2041 = vmatpush1.bf16.msra.mxu1 %v11424_v63  ;;  %2082 = vmatpush1.bf16.msra.mxu0 %v11425_v16  ;;  %v11434_v63 = vld [vmem:[#allocation58_spill] sm:$0xff]  ;;  %v11435_v16 = vld [vmem:[#allocation59_spill] sm:$0xff] }
 0x39c   :  { %2042 = vmatprep.subr.bf16.mxu1 %v11426_v44  ;;  %2083 = vmatprep.subr.bf16.mxu0 %v11427_v46  ;;  %v11440_v44 = vld [vmem:[#allocation64_spill] sm:$0xff]  ;;  %v11441_v46 = vld [vmem:[#allocation65_spill] sm:$0xff] }
 0x39f   :  { %2043 = vmatpush1.bf16.msra.mxu1 %v11428_v47  ;;  %2084 = vmatpush1.bf16.msra.mxu0 %v11429_v62  ;;  %v11444_v47 = vld [vmem:[#allocation68_spill] sm:$0xff]  ;;  %v11445_v62 = vld [vmem:[#allocation69_spill] sm:$0xff] }
 0x3a0   :  { %2110 = vmatprep.subr.bf16.mxu1 %v11430_v2  ;;  %2151 = vmatprep.subr.bf16.mxu0 %v11431_v43  ;;  %v11446_v2 = vld [vmem:[#allocation70_spill] sm:$0xff]  ;;  %v11447_v43 = vld [vmem:[#allocation71_spill] sm:$0xff] }
 0x3a2   :  { %2061 = vmatmul.mubr.bf16.vlgmr.msra.gmra.mrb[16].mxu1 %v8436_v50  ;;  %2102 = vmatmul.mubr.bf16.vlgmr.msra.gmra.mrb[20].mxu0 %v8436_v50 }
 0x3a3   :  { %2111 = vmatpush1.bf16.msra.mxu1 %v8021_v59  ;;  %2152 = vmatpush1.bf16.msra.mxu0 %v8023_v11  ;;  %v11436_v59 = vld [vmem:[#allocation60_spill] sm:$0xff]  ;;  %v11437_v11 = vld [vmem:[#allocation61_spill] sm:$0xff] }
 0x3a4   :  { %2112 = vmatprep.subr.bf16.mxu1 %v8027_v9  ;;  %2153 = vmatprep.subr.bf16.mxu0 %v8029_v8  ;;  %v11438_v9 = vld [vmem:[#allocation62_spill] sm:$0xff]  ;;  %v11439_v8 = vld [vmem:[#allocation63_spill] sm:$0xff] }
 0x3a5   :  { %2142 = vmatprep.mubr.bf16.mxu1 %v11344_v14  ;;  %2183 = vmatprep.mubr.bf16.mxu0 %v11344_v14 }
 0x3a7   :  { %2113 = vmatpush1.bf16.msra.mxu1 %v8035_v7  ;;  %2154 = vmatpush1.bf16.msra.mxu0 %v11432_v13  ;;  %v11442_v7 = vld [vmem:[#allocation66_spill] sm:$0xff]  ;;  %v11448_v13 = vld [vmem:[#allocation72_spill] sm:$0xff] }
 0x3a8   :  { %2114 = vmatprep.subr.bf16.mxu1 %v11433_v20  ;;  %2155 = vmatprep.subr.bf16.mxu0 %v11434_v63  ;;  %v11449_v20 = vld [vmem:[#allocation17_spill] sm:$0xff] }
 0x3a9   :  { %v8510_v63 = vld [vmem:[#allocation3 + $0x28] ss:$16 sps:$4 sm:$0xff]  }
 0x3ab   :  { %2115 = vmatpush1.bf16.msra.mxu1 %v11435_v16  ;;  %2156 = vmatpush1.bf16.msra.mxu0 %v11436_v59  ;;  %v8513_v16 = vld [vmem:[#allocation3 + $0x44] ss:$16 sps:$4 sm:$0xff]   ;;  %v8516_v59 = vld [vmem:[#allocation3 + $0x4c] ss:$16 sps:$4 sm:$0xff]  }
 0x3ac   :  { %2116 = vmatprep.subr.bf16.mxu1 %v11437_v11  ;;  %2157 = vmatprep.subr.bf16.mxu0 %v11438_v9  ;;  %v8519_v11 = vld [vmem:[#allocation3 + $0x40] ss:$16 sps:$4 sm:$0xff]   ;;  %v8522_v9 = vld [vmem:[#allocation3 + $0x48] ss:$16 sps:$4 sm:$0xff]  }
 0x3af   :  { %2117 = vmatpush1.bf16.msra.mxu1 %v11439_v8  ;;  %2158 = vmatpush1.bf16.msra.mxu0 %v11440_v44  ;;  %v8525_v8 = vld [vmem:[#allocation3 + $0x64] ss:$16 sps:$4 sm:$0xff]   ;;  %v8528_v44 = vld [vmem:[#allocation3 + $0x6c] ss:$16 sps:$4 sm:$0xff]  }
 0x3b0   :  { %2118 = vmatprep.subr.bf16.mxu1 %v11441_v46  ;;  %2159 = vmatprep.subr.bf16.mxu0 %v11442_v7  ;;  %v8531_v46 = vld [vmem:[#allocation3 + $0x60] ss:$16 sps:$4 sm:$0xff]   ;;  %v8534_v7 = vld [vmem:[#allocation3 + $0x68] ss:$16 sps:$4 sm:$0xff]  }
 0x3b3   :  { %2119 = vmatpush1.bf16.msra.mxu1 %v11443_v27  ;;  %2160 = vmatpush1.bf16.msra.mxu0 %v11444_v47  ;;  %v8537_v27 = vld [vmem:[#allocation3 + $0x84] ss:$16 sps:$4 sm:$0xff]   ;;  %v8540_v47 = vld [vmem:[#allocation3 + $0x8c] ss:$16 sps:$4 sm:$0xff]  }
 0x3b4   :  { %2120 = vmatprep.subr.bf16.mxu1 %v11445_v62  ;;  %2161 = vmatprep.subr.bf16.mxu0 %v11446_v2  ;;  %v8543_v62 = vld [vmem:[#allocation3 + $0x80] ss:$16 sps:$4 sm:$0xff]   ;;  %v8546_v2 = vld [vmem:[#allocation3 + $0x88] ss:$16 sps:$4 sm:$0xff]  }
 0x3b5   :  { %11450 = vst [vmem:[#allocation18_spill] sm:$0xff] %v8543_v62  ;;  %11451 = vst [vmem:[#allocation19_spill] sm:$0xff] %v8546_v2 }
 0x3b7   :  { %2121 = vmatpush1.bf16.msra.mxu1 %v11447_v43  ;;  %2162 = vmatpush1.bf16.msra.mxu0 %v8087_v22  ;;  %v8502_v22 = vld [vmem:[#allocation3 + $0x2c] ss:$16 sps:$4 sm:$0xff]   ;;  %v8549_v43 = vld [vmem:[#allocation3 + $0xa4] ss:$16 sps:$4 sm:$0xff]  }
 0x3b8   :  { %2122 = vmatprep.subr.bf16.mxu1 %v8091_v0  ;;  %2163 = vmatprep.subr.bf16.mxu0 %v8093_v4  ;;  %v6005_v4 = vld [vmem:[%s10871_s0 + $0x10] sm:$0xff]  ;;  %11452 = vst [vmem:[#allocation20_spill] sm:$0xff] %v8549_v43 }
 0x3b9   :  { %v8507_v0 = vld [vmem:[#allocation3 + $0x20] ss:$16 sps:$4 sm:$0xff]  }
 0x3bb   :  { %2123 = vmatpush1.bf16.msra.mxu1 %v8097_v10  ;;  %2164 = vmatpush1.bf16.msra.mxu0 %v8099_v5  ;;  %v8485_v10 = vld [vmem:[#allocation3 + $0x4] ss:$16 sps:$4 sm:$0xff]   ;;  %v8488_v5 = vld [vmem:[#allocation3 + $0xc] ss:$16 sps:$4 sm:$0xff]  }
 0x3bc   :  { %2124 = vmatprep.subr.bf16.mxu1 %v8103_v3  ;;  %2165 = vmatprep.subr.bf16.mxu0 %v11448_v13  ;;  %v8493_v3 = vld [vmem:[#allocation3] ss:$16 sps:$4 sm:$0xff]   ;;  %v8552_v13 = vld [vmem:[#allocation3 + $0xac] ss:$16 sps:$4 sm:$0xff]  }
 0x3bd   :  { %11453 = vst [vmem:[#allocation21_spill] sm:$0xff] %v8552_v13 }
 0x3bf   :  { %2125 = vmatpush1.bf16.msra.mxu1 %v8109_v15  ;;  %2166 = vmatpush1.bf16.msra.mxu0 %v8111_v1  ;;  %v8496_v15 = vld [vmem:[#allocation3 + $0x8] ss:$16 sps:$4 sm:$0xff]   ;;  %v8499_v1 = vld [vmem:[#allocation3 + $0x24] ss:$16 sps:$4 sm:$0xff]  }
 0x3c0   :  { %2220 = vmatprep.subr.bf16.mxu1 %v7761_v21  ;;  %2261 = vmatprep.subr.bf16.mxu0 %v11449_v20 }
 0x3c2   :  { %2143 = vmatmul.mubr.bf16.vlgmr.msra.gmra.mrb[16].mxu1 %v8301_v18  ;;  %2184 = vmatmul.mubr.bf16.vlgmr.msra.gmra.mrb[20].mxu0 %v8301_v18  ;;  %v2216_v18 = vpack.c.bf16 %v6005_v4, %v6005_v4  ;;  %v8555_v4 = vld [vmem:[#allocation3 + $0xa0] ss:$16 sps:$4 sm:$0xff]  }
 0x3c3   :  { %2221 = vmatpush1.bf16.msra.mxu1 %v7756_v19  ;;  %2262 = vmatpush1.bf16.msra.mxu0 %v7765_v24  ;;  %11454 = vst [vmem:[#allocation22_spill] sm:$0xff] %v8555_v4 }
 0x3c4   :  { %2252 = vmatprep.mubr.bf16.mxu1 %v11344_v14  ;;  %2293 = vmatprep.mubr.bf16.mxu0 %v11344_v14 }
 0x3c5   :  { %2302 = vmatprep.subr.bf16.mxu1 %v8485_v10  ;;  %2343 = vmatprep.subr.bf16.mxu0 %v8488_v5 }
 0x3ca   :  { %6006 = vmatmul.mubr.msk.bf16.vlgmr.msra.gmra.mrb[20].mxu1 %vm130_vm4, %v2216_v18  ;;  %6007 = vmatmul.mubr.msk.bf16.vlgmr.msra.gmra.mrb[24].mxu0 %vm130_vm4, %v2216_v18  ;;  %v8558_v18 = vld [vmem:[#allocation3 + $0xa8] ss:$16 sps:$4 sm:$0xff]  }
 0x3cb   :  { %2303 = vmatpush1.bf16.msra.mxu1 %v8493_v3  ;;  %2344 = vmatpush1.bf16.msra.mxu0 %v8496_v15  ;;  %11455 = vst [vmem:[#allocation23_spill] sm:$0xff] %v8558_v18 }
 0x3cc   :  { %2304 = vmatprep.subr.bf16.mxu1 %v8499_v1  ;;  %2345 = vmatprep.subr.bf16.mxu0 %v8502_v22 }
 0x3cd   :  { %2334 = vmatprep.mubr.bf16.mxu1 %v11344_v14  ;;  %2375 = vmatprep.mubr.bf16.mxu0 %v11344_v14 }
 0x3cf   :  { %2305 = vmatpush1.bf16.msra.mxu1 %v8507_v0  ;;  %2346 = vmatpush1.bf16.msra.mxu0 %v8510_v63 }
 0x3d0   :  { %2306 = vmatprep.subr.bf16.mxu1 %v8513_v16  ;;  %2347 = vmatprep.subr.bf16.mxu0 %v8516_v59 }
 0x3d3   :  { %2307 = vmatpush1.bf16.msra.mxu1 %v8519_v11  ;;  %2348 = vmatpush1.bf16.msra.mxu0 %v8522_v9 }
 0x3d4   :  { %2308 = vmatprep.subr.bf16.mxu1 %v8525_v8  ;;  %2349 = vmatprep.subr.bf16.mxu0 %v8528_v44 }
 0x3d7   :  { %2309 = vmatpush1.bf16.msra.mxu1 %v8531_v46  ;;  %2350 = vmatpush1.bf16.msra.mxu0 %v8534_v7 }
 0x3d8   :  { %2310 = vmatprep.subr.bf16.mxu1 %v8537_v27  ;;  %2351 = vmatprep.subr.bf16.mxu0 %v8540_v47 }
 0x3db   :  { %2311 = vmatpush1.bf16.msra.mxu1 %v8543_v62  ;;  %2352 = vmatpush1.bf16.msra.mxu0 %v8546_v2  ;;  %v8561_v62 = vld [vmem:[#allocation3 + $0xc4] ss:$16 sps:$4 sm:$0xff]   ;;  %v8564_v2 = vld [vmem:[#allocation3 + $0xcc] ss:$16 sps:$4 sm:$0xff]  }
 0x3dc   :  { %2312 = vmatprep.subr.bf16.mxu1 %v8549_v43  ;;  %2353 = vmatprep.subr.bf16.mxu0 %v8552_v13  ;;  %11456 = vst [vmem:[#allocation24_spill] sm:$0xff] %v8561_v62  ;;  %11457 = vst [vmem:[#allocation25_spill] sm:$0xff] %v8564_v2  ;;  %v8567_v43 = vld [vmem:[#allocation3 + $0xc0] ss:$16 sps:$4 sm:$0xff]   ;;  %v8570_v13 = vld [vmem:[#allocation3 + $0xc8] ss:$16 sps:$4 sm:$0xff]  }
 0x3df   :  { %2313 = vmatpush1.bf16.msra.mxu1 %v8555_v4  ;;  %2354 = vmatpush1.bf16.msra.mxu0 %v8558_v18  ;;  %v8573_v4 = vld [vmem:[#allocation3 + $0xe4] ss:$16 sps:$4 sm:$0xff]   ;;  %v8576_v18 = vld [vmem:[#allocation3 + $0xec] ss:$16 sps:$4 sm:$0xff]  }
 0x3e0   :  { %2314 = vmatprep.subr.bf16.mxu1 %v8561_v62  ;;  %2355 = vmatprep.subr.bf16.mxu0 %v8564_v2  ;;  %11458 = vst [vmem:[#allocation26_spill] sm:$0xff] %v8576_v18  ;;  %v8579_v62 = vld [vmem:[#allocation3 + $0xe0] ss:$16 sps:$4 sm:$0xff]   ;;  %v8582_v2 = vld [vmem:[#allocation3 + $0xe8] ss:$16 sps:$4 sm:$0xff]  }
 0x3e1   :  { %11459 = vst [vmem:[#allocation27_spill] sm:$0xff] %v8579_v62  ;;  %11460 = vst [vmem:[#allocation28_spill] sm:$0xff] %v8582_v2 }
 0x3e3   :  { %2315 = vmatpush1.bf16.msra.mxu1 %v8567_v43  ;;  %2356 = vmatpush1.bf16.msra.mxu0 %v8570_v13 }
 0x3e4   :  { %2316 = vmatprep.subr.bf16.mxu1 %v8573_v4  ;;  %2357 = vmatprep.subr.bf16.mxu0 %v8576_v18 }
 0x3e7   :  { %2317 = vmatpush1.bf16.msra.mxu1 %v8579_v62  ;;  %2358 = vmatpush1.bf16.msra.mxu0 %v8582_v2 }
 0x3e8   :  { %2407 = vmatprep.subr.bf16.mxu1 %v8168_v23  ;;  %2448 = vmatprep.subr.bf16.mxu0 %v8170_v25  ;;  %v11461_v23 = vld [vmem:[#allocation73_spill] sm:$0xff]  ;;  %v11462_v25 = vld [vmem:[#allocation74_spill] sm:$0xff] }
 0x3ea   :  { %2335 = vmatmul.mubr.bf16.vlgmr.msra.gmra.mrb[20].mxu1 %v8436_v50  ;;  %2376 = vmatmul.mubr.bf16.vlgmr.msra.gmra.mrb[24].mxu0 %v8436_v50 }
 0x3eb   :  { %2408 = vmatpush1.bf16.msra.mxu1 %v8172_v26  ;;  %2449 = vmatpush1.bf16.msra.mxu0 %v8174_v28  ;;  %v11463_v26 = vld [vmem:[#allocation75_spill] sm:$0xff]  ;;  %v11464_v28 = vld [vmem:[#allocation76_spill] sm:$0xff] }
 0x3ec   :  { %2409 = vmatprep.subr.bf16.mxu1 %v8180_v29  ;;  %2450 = vmatprep.subr.bf16.mxu0 %v8182_v30  ;;  %v11465_v29 = vld [vmem:[#allocation77_spill] sm:$0xff]  ;;  %v11466_v30 = vld [vmem:[#allocation78_spill] sm:$0xff] }
 0x3ed   :  { %2439 = vmatprep.mubr.bf16.mxu1 %v11344_v14  ;;  %2480 = vmatprep.mubr.bf16.mxu0 %v11344_v14 }
 0x3ef   :  { %2410 = vmatpush1.bf16.msra.mxu1 %v8184_v31  ;;  %2451 = vmatpush1.bf16.msra.mxu0 %v8186_v32  ;;  %v11467_v31 = vld [vmem:[#allocation79_spill] sm:$0xff]  ;;  %v11468_v32 = vld [vmem:[#allocation80_spill] sm:$0xff] }
 0x3f0   :  { %2411 = vmatprep.subr.bf16.mxu1 %v8192_v33  ;;  %2452 = vmatprep.subr.bf16.mxu0 %v8194_v34  ;;  %v11469_v33 = vld [vmem:[#allocation81_spill] sm:$0xff]  ;;  %v11470_v34 = vld [vmem:[#allocation82_spill] sm:$0xff] }
 0x3f3   :  { %2412 = vmatpush1.bf16.msra.mxu1 %v8196_v35  ;;  %2453 = vmatpush1.bf16.msra.mxu0 %v8198_v36  ;;  %v11471_v35 = vld [vmem:[#allocation83_spill] sm:$0xff]  ;;  %v11472_v36 = vld [vmem:[#allocation84_spill] sm:$0xff] }
 0x3f4   :  { %2413 = vmatprep.subr.bf16.mxu1 %v8204_v37  ;;  %2454 = vmatprep.subr.bf16.mxu0 %v8206_v38  ;;  %v11473_v37 = vld [vmem:[#allocation85_spill] sm:$0xff]  ;;  %v11474_v38 = vld [vmem:[#allocation86_spill] sm:$0xff] }
 0x3f7   :  { %2414 = vmatpush1.bf16.msra.mxu1 %v8208_v39  ;;  %2455 = vmatpush1.bf16.msra.mxu0 %v8210_v40  ;;  %v11475_v39 = vld [vmem:[#allocation87_spill] sm:$0xff]  ;;  %v11476_v40 = vld [vmem:[#allocation88_spill] sm:$0xff] }
 0x3f8   :  { %2415 = vmatprep.subr.bf16.mxu1 %v8216_v41  ;;  %2456 = vmatprep.subr.bf16.mxu0 %v8218_v42  ;;  %v8626_v41 = vld [vmem:[%s10883_s12] sm:$0xf]  ;;  %v11477_v42 = vld [vmem:[#allocation51_spill] sm:$0xff] }
 0x3f9   :  { %v8630_v50 = vrot.slane %v8626_v41, %v11477_v42  ;;  %v8642_v42 = vrot.slane %v8626_v41, %v8011_v6 }
 0x3fb   :  { %2416 = vmatpush1.bf16.msra.mxu1 %v11461_v23  ;;  %2457 = vmatpush1.bf16.msra.mxu0 %v11462_v25  ;;  %11478 = vst [vmem:[#allocation29_spill] sm:$0xff] %v8630_v50  ;;  %v11479_v23 = vld [vmem:[#allocation52_spill] sm:$0xff]  ;;  %11481 = vst [vmem:[#allocation31_spill] sm:$0xff] %v8642_v42 }
 0x3fc   :  { %2417 = vmatprep.subr.bf16.mxu1 %v11463_v26  ;;  %2458 = vmatprep.subr.bf16.mxu0 %v11464_v28  ;;  %v8634_v25 = vrot.slane %v8626_v41, %v11479_v23 }
 0x3fe   :  { %11480 = vst [vmem:[#allocation30_spill] sm:$0xff] %v8634_v25 }
 0x3ff   :  { %2418 = vmatpush1.bf16.msra.mxu1 %v11465_v29  ;;  %2459 = vmatpush1.bf16.msra.mxu0 %v11466_v30 }
 0x400   :  { %2419 = vmatprep.subr.bf16.mxu1 %v11467_v31  ;;  %2460 = vmatprep.subr.bf16.mxu0 %v11468_v32 }
 0x403   :  { %2420 = vmatpush1.bf16.msra.mxu1 %v11469_v33  ;;  %2461 = vmatpush1.bf16.msra.mxu0 %v11470_v34 }
 0x404   :  { %2421 = vmatprep.subr.bf16.mxu1 %v11471_v35  ;;  %2462 = vmatprep.subr.bf16.mxu0 %v11472_v36 }
 0x407   :  { %2422 = vmatpush1.bf16.msra.mxu1 %v11473_v37  ;;  %2463 = vmatpush1.bf16.msra.mxu0 %v11474_v38 }
 0x408   :  { %2490 = vmatprep.subr.bf16.mxu1 %v11475_v39  ;;  %2531 = vmatprep.subr.bf16.mxu0 %v11476_v40 }
 0x455   :  { %v1957_v26 = vpop.f32.mrb[12].mxu1  ;;  %v1998_v28 = vpop.f32.mrb[16].mxu0 }
 0x456   :  { %v6044_v29 = vadd.f32 %v1957_v26, %v8630_v50  ;;  %v1959_v30 = vpop.f32.mrb[13].mxu1  ;;  %v8637_v31 = vpop.f32.mrb[17].mxu0  ;;  %v6046_v23 = vadd.f32 %v1998_v28, %v8642_v42  ;;  %v11483_v42 = vld [vmem:[#allocation90_spill] sm:$0xff] }
 0x457   :  { %v6045_v32 = vadd.f32 %v1959_v30, %v8634_v25  ;;  %v1961_v33 = vpop.f32.mrb[14].mxu1  ;;  %v2002_v34 = vpop.f32.mrb[18].mxu0 }
 0x458   :  { %v2005_v35 = vsub.f32 0.0, %v6044_v29  ;;  %v1962_v36 = vpop.f32.mrb[15].mxu1  ;;  %v2003_v37 = vpop.f32.mrb[19].mxu0 }
 0x459   :  { %v2010_v38 = vsub.f32 0.0, %v6045_v32 }
 0x45a   :  { %v2006_v39 = vmul.f32 1.442695, %v2005_v35 }
 0x45b   :  { %v2011_v40 = vmul.f32 1.442695, %v2010_v38  ;;  %v11482_v38 = vld [vmem:[#allocation89_spill] sm:$0xff] }
 0x45c   :  { %6621 = vpow2.f32 %v2006_v39 }
 0x45d   :  { %6623 = vpow2.f32 %v2011_v40 }
 0x45e   :  { %6625 = vtanh.f32 %v6046_v23 }
 0x466   :  { %v6622_v26 = vpop.eup %6621 }
 0x467   :  { %v6624_v50 = vpop.eup %6623  ;;  %v2008_v2 = vadd.f32 1.0, %v6622_v26 }
 0x468   :  { %v2013_v30 = vadd.f32 1.0, %v6624_v50  ;;  %v6626_v29 = vpop.eup %6625 }
 0x469   :  { %6627 = vrcp.f32 %v2008_v2 }
 0x46a   :  { %6629 = vrcp.f32 %v2013_v30 }
 0x473   :  { %v6628_v33 = vpop.eup %6627 }
 0x474   :  { %v6630_v32 = vpop.eup %6629  ;;  %v2023_v34 = vmul.f32 %v6628_v33, %v6626_v29 }
 0x475   :  { %v2022_v35 = vmul.f32 %v6630_v32, %v7874_v60 }
 0x477   :  { %v8646_v36 = vadd.f32 %v2023_v34, %v2022_v35 }
 0x495   :  { %v2144_v37 = vpop.f32.mrb[16].mxu1  ;;  %v2185_v6 = vpop.f32.mrb[20].mxu0 }
 0x496   :  { %v6048_v39 = vadd.f32 %v2144_v37, %v11482_v38  ;;  %v2146_v28 = vpop.f32.mrb[17].mxu1  ;;  %v2187_v40 = vpop.f32.mrb[21].mxu0  ;;  %v6050_v34 = vadd.f32 %v2185_v6, %v8286_v53 }
 0x497   :  { %v6049_v26 = vadd.f32 %v2146_v28, %v11483_v42  ;;  %v2148_v23 = vpop.f32.mrb[18].mxu1  ;;  %v2189_v50 = vpop.f32.mrb[22].mxu0  ;;  %v6051_v60 = vadd.f32 %v2187_v40, %v8282_v12 }
 0x498   :  { %v2192_v2 = vsub.f32 0.0, %v6048_v39  ;;  %v2149_v30 = vpop.f32.mrb[19].mxu1  ;;  %v2190_v25 = vpop.f32.mrb[23].mxu0 }
 0x499   :  { %v2197_v62 = vsub.f32 0.0, %v6049_v26  ;;  %v2204_v33 = vsub.f32 0.0, %v6051_v60 }
 0x49a   :  { %v2193_v18 = vmul.f32 1.442695, %v2192_v2  ;;  %v11485_v2 = vld [vmem:[#allocation54_spill] sm:$0xff] }
 0x49b   :  { %v2198_v29 = vmul.f32 1.442695, %v2197_v62  ;;  %v2205_v32 = vmul.f32 1.442695, %v2204_v33  ;;  %v8655_v30 = vrot.slane %v8626_v41, %v11485_v2 }
 0x49c   :  { %6631 = vpow2.f32 %v2193_v18  ;;  %v11484_v18 = vld [vmem:[#allocation91_spill] sm:$0xff] }
 0x49d   :  { %6633 = vpow2.f32 %v2198_v29  ;;  %11486 = vst [vmem:[#allocation32_spill] sm:$0xff] %v8655_v30 }
 0x49e   :  { %6635 = vpow2.f32 %v2205_v32  ;;  %v11487_v32 = vld [vmem:[#allocation53_spill] sm:$0xff] }
 0x49f   :  { %6637 = vtanh.f32 %v6050_v34 }
 0x4a6   :  { %v6632_v35 = vpop.eup %6631 }
 0x4a7   :  { %v6634_v37 = vpop.eup %6633  ;;  %v2195_v38 = vadd.f32 1.0, %v6632_v35 }
 0x4a8   :  { %v2200_v28 = vadd.f32 1.0, %v6634_v37  ;;  %v6636_v25 = vpop.eup %6635 }
 0x4a9   :  { %6639 = vrcp.f32 %v2195_v38  ;;  %v6638_v39 = vpop.eup %6637  ;;  %v2207_v40 = vadd.f32 1.0, %v6636_v25  ;;  %v6047_v38 = vadd.f32 %v8637_v31, %v8655_v30 }
 0x4aa   :  { %6641 = vrcp.f32 %v2200_v28 }
 0x4ab   :  { %6643 = vrcp.f32 %v2207_v40  ;;  %v2017_v33 = vsub.f32 0.0, %v6047_v38 }
 0x4b3   :  { %v6640_v26 = vpop.eup %6639 }
 0x4b4   :  { %v6642_v62 = vpop.eup %6641  ;;  %v2210_v23 = vmul.f32 %v6640_v26, %v6638_v39 }
 0x4b5   :  { %v2209_v50 = vmul.f32 %v6642_v62, %v11484_v18  ;;  %v6644_v40 = vpop.eup %6643  ;;  %v2018_v18 = vmul.f32 1.442695, %v2017_v33  ;;  %v11489_v33 = vld [vmem:[#allocation93_spill] sm:$0xff] }
 0x4b7   :  { %v8657_v6 = vadd.f32 %v2210_v23, %v2209_v50 }
 0x4b9   :  { %6645 = vtanh.f32 %v8657_v6 }
 0x4bd   :  { %v2336_v29 = vpop.f32.mrb[20].mxu1  ;;  %v2377_v60 = vpop.f32.mrb[24].mxu0 }
 0x4be   :  { %v6052_v34 = vadd.f32 %v2336_v29, %v11487_v32  ;;  %v2338_v35 = vpop.f32.mrb[21].mxu1  ;;  %v2379_v37 = vpop.f32.mrb[25].mxu0  ;;  %v6054_v29 = vadd.f32 %v2377_v60, %v8014_v17  ;;  %v11494_v60 = vld [vmem:[#allocation98_spill] sm:$0xff] }
 0x4bf   :  { %v6053_v28 = vadd.f32 %v2338_v35, %v7999_v58  ;;  %v2340_v25 = vpop.f32.mrb[22].mxu1  ;;  %v2381_v41 = vpop.f32.mrb[26].mxu0  ;;  %v11490_v35 = vld [vmem:[#allocation94_spill] sm:$0xff] }
 0x4c0   :  { %v2384_v39 = vsub.f32 0.0, %v6052_v34  ;;  %v2341_v26 = vpop.f32.mrb[23].mxu1  ;;  %v2382_v62 = vpop.f32.mrb[27].mxu0  ;;  %v11492_v25 = vld [vmem:[#allocation96_spill] sm:$0xff]  ;;  %v11493_v41 = vld [vmem:[#allocation97_spill] sm:$0xff] }
 0x4c1   :  { %v2389_v23 = vsub.f32 0.0, %v6053_v28  ;;  %v11496_v62 = vld [vmem:[#allocation100_spill] sm:$0xff] }
 0x4c2   :  { %v2385_v50 = vmul.f32 1.442695, %v2384_v39  ;;  %v11495_v39 = vld [vmem:[#allocation99_spill] sm:$0xff] }
 0x4c3   :  { %v6646_v2 = vpop.eup %6645  ;;  %v2390_v31 = vmul.f32 1.442695, %v2389_v23  ;;  %v11497_v23 = vld [vmem:[#allocation101_spill] sm:$0xff] }
 0x4c4   :  { %6647 = vpow2.f32 %v2385_v50  ;;  %v2213_v30 = vmul.f32 %v6646_v2, %v6644_v40  ;;  %v11498_v40 = vld [vmem:[#allocation102_spill] sm:$0xff]  ;;  %v11500_v50 = vld [vmem:[#allocation104_spill] sm:$0xff]  ;;  %v11501_v2 = vld [vmem:[#allocation105_spill] sm:$0xff] }
 0x4c5   :  { %6649 = vpow2.f32 %v2390_v31 }
 0x4c6   :  { %6651 = vpow2.f32 %v2018_v18  ;;  %v8664_v38 = vpack.c.bf16 %v2213_v30, %v2213_v30  ;;  %v11488_v30 = vld [vmem:[#allocation92_spill] sm:$0xff]  ;;  %v11499_v18 = vld [vmem:[#allocation103_spill] sm:$0xff] }
 0x4c7   :  { %6653 = vtanh.f32 %v6054_v29  ;;  %v11502_v29 = vld [vmem:[#allocation55_spill] sm:$0xff] }
 0x4c8   :  { %2440 = vmatmul.mubr.bf16.vlgmr.msra.gmra.mrb[24].mxu1 %v8664_v38  ;;  %2481 = vmatmul.mubr.bf16.vlgmr.msra.gmra.mrb[28].mxu0 %v8664_v38 }
 0x4c9   :  { %2491 = vmatpush1.bf16.msra.mxu1 %v8297_v52  ;;  %2532 = vmatpush1.bf16.msra.mxu0 %v8299_v56  ;;  %v11491_v52 = vld [vmem:[#allocation95_spill] sm:$0xff] }
 0x4ca   :  { %2492 = vmatprep.subr.bf16.mxu1 %v8303_v57  ;;  %2533 = vmatprep.subr.bf16.mxu0 %v8305_v51 }
 0x4cb   :  { %2522 = vmatprep.mubr.bf16.mxu1 %v11344_v14  ;;  %2563 = vmatprep.mubr.bf16.mxu0 %v11344_v14 }
 0x4cd   :  { %2493 = vmatpush1.bf16.msra.mxu1 %v11488_v30  ;;  %2534 = vmatpush1.bf16.msra.mxu0 %v11489_v33  ;;  %v6055_v30 = vadd.f32 %v2379_v37, %v11502_v29  ;;  %v11503_v33 = vld [vmem:[#allocation106_spill] sm:$0xff] }
 0x4ce   :  { %v6648_v34 = vpop.eup %6647  ;;  %2494 = vmatprep.subr.bf16.mxu1 %v11490_v35  ;;  %2535 = vmatprep.subr.bf16.mxu0 %v11491_v52 }
 0x4cf   :  { %v6650_v56 = vpop.eup %6649  ;;  %v2387_v28 = vadd.f32 1.0, %v6648_v34  ;;  %v11504_v34 = vld [vmem:[#allocation107_spill] sm:$0xff] }
 0x4d0   :  { %v6652_v57 = vpop.eup %6651  ;;  %v2392_v51 = vadd.f32 1.0, %v6650_v56 }
 0x4d1   :  { %6655 = vrcp.f32 %v2387_v28  ;;  %2495 = vmatpush1.bf16.msra.mxu1 %v11492_v25  ;;  %2536 = vmatpush1.bf16.msra.mxu0 %v11493_v41  ;;  %v2020_v26 = vadd.f32 1.0, %v6652_v57  ;;  %v6654_v31 = vpop.eup %6653  ;;  %v2396_v57 = vsub.f32 0.0, %v6055_v30  ;;  %v11505_v41 = vld [vmem:[#allocation108_spill] sm:$0xff]  ;;  %v8735_v30 = vld [vmem:[#allocation5 + $0x4c] ss:$16 sps:$4 sm:$0xff]  }
 0x4d2   :  { %6657 = vrcp.f32 %v2392_v51  ;;  %2496 = vmatprep.subr.bf16.mxu1 %v11494_v60  ;;  %2537 = vmatprep.subr.bf16.mxu0 %v11495_v39  ;;  %v11506_v39 = vld [vmem:[#allocation109_spill] sm:$0xff] }
 0x4d3   :  { %6659 = vtanh.f32 %v8646_v36  ;;  %v2397_v60 = vmul.f32 1.442695, %v2396_v57  ;;  %v8750_v57 = vld [vmem:[#allocation5 + $0x60] ss:$16 sps:$4 sm:$0xff]  }
 0x4d4   :  { %6661 = vrcp.f32 %v2020_v26  ;;  %v11509_v26 = vld [vmem:[#allocation112_spill] sm:$0xff] }
 0x4d5   :  { %2497 = vmatpush1.bf16.msra.mxu1 %v11496_v62  ;;  %2538 = vmatpush1.bf16.msra.mxu0 %v11497_v23  ;;  %6663 = vpow2.f32 %v2397_v60  ;;  %v8709_v62 = vld [vmem:[#allocation5 + $0xc] ss:$16 sps:$4 sm:$0xff]   ;;  %v8715_v23 = vld [vmem:[#allocation5 + $0x8] ss:$16 sps:$4 sm:$0xff]   ;;  %v8763_v60 = vld [vmem:[#allocation5 + $0x80] ss:$16 sps:$4 sm:$0xff]  }
 0x4d6   :  { %2498 = vmatprep.subr.bf16.mxu1 %v11498_v40  ;;  %2539 = vmatprep.subr.bf16.mxu0 %v11499_v18  ;;  %v8718_v40 = vld [vmem:[#allocation5 + $0x24] ss:$16 sps:$4 sm:$0xff]   ;;  %v8721_v18 = vld [vmem:[#allocation5 + $0x2c] ss:$16 sps:$4 sm:$0xff]   ;;  %11510 = vst [vmem:[#allocation33_spill] sm:$0xff] %v8763_v60 }
 0x4d9   :  { %2499 = vmatpush1.bf16.msra.mxu1 %v11500_v50  ;;  %2540 = vmatpush1.bf16.msra.mxu0 %v11501_v2  ;;  %v8726_v50 = vld [vmem:[#allocation5 + $0x20] ss:$16 sps:$4 sm:$0xff]   ;;  %v8729_v2 = vld [vmem:[#allocation5 + $0x28] ss:$16 sps:$4 sm:$0xff]  }
 0x4da   :  { %2500 = vmatprep.subr.bf16.mxu1 %v11503_v33  ;;  %2541 = vmatprep.subr.bf16.mxu0 %v11504_v34  ;;  %v8738_v34 = vld [vmem:[#allocation5 + $0x40] ss:$16 sps:$4 sm:$0xff]  }
 0x4db   :  { %v6656_v35 = vpop.eup %6655 }
 0x4dc   :  { %v6658_v52 = vpop.eup %6657  ;;  %v2402_v56 = vmul.f32 %v6656_v35, %v6654_v31  ;;  %v8732_v31 = vld [vmem:[#allocation5 + $0x44] ss:$16 sps:$4 sm:$0xff]   ;;  %v8741_v35 = vld [vmem:[#allocation5 + $0x48] ss:$16 sps:$4 sm:$0xff]  }
 0x4dd   :  { %v2401_v28 = vmul.f32 %v6658_v52, %v8387_v61  ;;  %2501 = vmatpush1.bf16.msra.mxu1 %v8362_v54  ;;  %2542 = vmatpush1.bf16.msra.mxu0 %v8364_v55  ;;  %v6660_v51 = vpop.eup %6659  ;;  %v11507_v61 = vld [vmem:[#allocation110_spill] sm:$0xff]  ;;  %v11508_v55 = vld [vmem:[#allocation111_spill] sm:$0xff] }
 0x4de   :  { %2502 = vmatprep.subr.bf16.mxu1 %v8370_v49  ;;  %2543 = vmatprep.subr.bf16.mxu0 %v8372_v48  ;;  %v6662_v25 = vpop.eup %6661  ;;  %v8706_v48 = vld [vmem:[#allocation5 + $0x4] ss:$16 sps:$4 sm:$0xff]  }
 0x4df   :  { %v8698_v37 = vadd.f32 %v2402_v56, %v2401_v28  ;;  %v2026_v54 = vmul.f32 %v6662_v25, %v6660_v51  ;;  %v6664_v33 = vpop.eup %6663  ;;  %v8744_v52 = vld [vmem:[#allocation5 + $0x64] ss:$16 sps:$4 sm:$0xff]   ;;  %v8747_v56 = vld [vmem:[#allocation5 + $0x6c] ss:$16 sps:$4 sm:$0xff]   ;;  %v8753_v51 = vld [vmem:[#allocation5 + $0x68] ss:$16 sps:$4 sm:$0xff]  }
 0x4e0   :  { %v2399_v28 = vadd.f32 1.0, %v6664_v33  ;;  %v8757_v25 = vld [vmem:[#allocation5 + $0x84] ss:$16 sps:$4 sm:$0xff]   ;;  %v8784_v33 = vld [vmem:[#allocation5 + $0xcc] ss:$16 sps:$4 sm:$0xff]  }
 0x4e1   :  { %2503 = vmatpush1.bf16.msra.mxu1 %v8377_v45  ;;  %2544 = vmatpush1.bf16.msra.mxu0 %v11505_v41  ;;  %v2489_v49 = vpack.c.bf16 %v2026_v54, %v2026_v54  ;;  %v8712_v45 = vld [vmem:[#allocation5] ss:$16 sps:$4 sm:$0xff]   ;;  %6665 = vtanh.f32 %v8698_v37  ;;  %v8760_v41 = vld [vmem:[#allocation5 + $0x8c] ss:$16 sps:$4 sm:$0xff]   ;;  %11517 = vst [vmem:[#allocation40_spill] sm:$0xff] %v8784_v33 }
 0x4e2   :  { %2504 = vmatprep.subr.bf16.mxu1 %v11506_v39  ;;  %2545 = vmatprep.subr.bf16.mxu0 %v11507_v61  ;;  %6667 = vrcp.f32 %v2399_v28  ;;  %v8766_v39 = vld [vmem:[#allocation5 + $0x88] ss:$16 sps:$4 sm:$0xff]   ;;  %v8769_v61 = vld [vmem:[#allocation5 + $0xa4] ss:$16 sps:$4 sm:$0xff]   ;;  %v8772_v54 = vld [vmem:[#allocation5 + $0xac] ss:$16 sps:$4 sm:$0xff]  }
 0x4e3   :  { %11511 = vst [vmem:[#allocation34_spill] sm:$0xff] %v8766_v39  ;;  %11512 = vst [vmem:[#allocation35_spill] sm:$0xff] %v8769_v61 }
 0x4e4   :  { %11513 = vst [vmem:[#allocation36_spill] sm:$0xff] %v8772_v54 }
 0x4e5   :  { %2505 = vmatpush1.bf16.msra.mxu1 %v11508_v55  ;;  %2546 = vmatpush1.bf16.msra.mxu0 %v11509_v26  ;;  %v8775_v55 = vld [vmem:[#allocation5 + $0xa0] ss:$16 sps:$4 sm:$0xff]   ;;  %v8778_v26 = vld [vmem:[#allocation5 + $0xa8] ss:$16 sps:$4 sm:$0xff]  }
 0x4e6   :  { %2595 = vmatprep.subr.bf16.mxu1 %v8706_v48  ;;  %2636 = vmatprep.subr.bf16.mxu0 %v8709_v62  ;;  %11514 = vst [vmem:[#allocation37_spill] sm:$0xff] %v8775_v55  ;;  %11515 = vst [vmem:[#allocation38_spill] sm:$0xff] %v8778_v26 }
 0x4e8   :  { %2523 = vmatmul.mubr.bf16.vlgmr.msra.gmra.mrb[24].mxu1 %v2489_v49  ;;  %2564 = vmatmul.mubr.bf16.vlgmr.msra.gmra.mrb[28].mxu0 %v2489_v49  ;;  %v8781_v49 = vld [vmem:[#allocation5 + $0xc4] ss:$16 sps:$4 sm:$0xff]  }
 0x4e9   :  { %2596 = vmatpush1.bf16.msra.mxu1 %v8712_v45  ;;  %2637 = vmatpush1.bf16.msra.mxu0 %v8715_v23  ;;  %11516 = vst [vmem:[#allocation39_spill] sm:$0xff] %v8781_v49 }
 0x4ea   :  { %2597 = vmatprep.subr.bf16.mxu1 %v8718_v40  ;;  %2638 = vmatprep.subr.bf16.mxu0 %v8721_v18 }
 0x4eb   :  { %2627 = vmatprep.mubr.bf16.mxu1 %v11344_v14  ;;  %2668 = vmatprep.mubr.bf16.mxu0 %v11344_v14  ;;  %v6666_v28 = vpop.eup %6665 }
 0x4ed   :  { %2598 = vmatpush1.bf16.msra.mxu1 %v8726_v50  ;;  %2639 = vmatpush1.bf16.msra.mxu0 %v8729_v2 }
 0x4ee   :  { %2599 = vmatprep.subr.bf16.mxu1 %v8732_v31  ;;  %2640 = vmatprep.subr.bf16.mxu0 %v8735_v30 }
 0x4f1   :  { %2600 = vmatpush1.bf16.msra.mxu1 %v8738_v34  ;;  %2641 = vmatpush1.bf16.msra.mxu0 %v8741_v35 }
 0x4f2   :  { %2601 = vmatprep.subr.bf16.mxu1 %v8744_v52  ;;  %2642 = vmatprep.subr.bf16.mxu0 %v8747_v56 }
 0x4f5   :  { %2602 = vmatpush1.bf16.msra.mxu1 %v8750_v57  ;;  %2643 = vmatpush1.bf16.msra.mxu0 %v8753_v51 }
 0x4f6   :  { %2603 = vmatprep.subr.bf16.mxu1 %v8757_v25  ;;  %2644 = vmatprep.subr.bf16.mxu0 %v8760_v41 }
 0x4f9   :  { %2604 = vmatpush1.bf16.msra.mxu1 %v8763_v60  ;;  %2645 = vmatpush1.bf16.msra.mxu0 %v8766_v39  ;;  %v8787_v39 = vld [vmem:[#allocation5 + $0xc0] ss:$16 sps:$4 sm:$0xff]   ;;  %v8802_v60 = vld [vmem:[#allocation5 + $0xe8] ss:$16 sps:$4 sm:$0xff]  }
 0x4fa   :  { %2605 = vmatprep.subr.bf16.mxu1 %v8769_v61  ;;  %2646 = vmatprep.subr.bf16.mxu0 %v8772_v54  ;;  %v6668_v61 = vpop.eup %6667  ;;  %11518 = vst [vmem:[#allocation41_spill] sm:$0xff] %v8787_v39  ;;  %v8790_v54 = vld [vmem:[#allocation5 + $0xc8] ss:$16 sps:$4 sm:$0xff]   ;;  %11521 = vst [vmem:[#allocation44_spill] sm:$0xff] %v8802_v60 }
 0x4fb   :  { %11519 = vst [vmem:[#allocation42_spill] sm:$0xff] %v8790_v54 }
 0x4fd   :  { %2606 = vmatpush1.bf16.msra.mxu1 %v8775_v55  ;;  %2647 = vmatpush1.bf16.msra.mxu0 %v8778_v26  ;;  %v8793_v55 = vld [vmem:[#allocation5 + $0xe4] ss:$16 sps:$4 sm:$0xff]   ;;  %v8796_v26 = vld [vmem:[#allocation5 + $0xec] ss:$16 sps:$4 sm:$0xff]  }
 0x4fe   :  { %2607 = vmatprep.subr.bf16.mxu1 %v8781_v49  ;;  %2648 = vmatprep.subr.bf16.mxu0 %v8784_v33  ;;  %11520 = vst [vmem:[#allocation43_spill] sm:$0xff] %v8793_v55  ;;  %v2405_v49 = vmul.f32 %v6668_v61, %v6666_v28  ;;  %v8799_v33 = vld [vmem:[#allocation5 + $0xe0] ss:$16 sps:$4 sm:$0xff]   ;;  %v8818_v28 = vld [vmem:[#allocation7 + $0x8] ss:$16 sps:$4 sm:$0xff]  }
 0x4ff   :  { %v8815_v61 = vld [vmem:[#allocation7] ss:$16 sps:$4 sm:$0xff]   ;;  %11525 = vst [vmem:[#allocation48_spill] sm:$0xff] %v8818_v28 }
 0x500   :  { %11524 = vst [vmem:[#allocation47_spill] sm:$0xff] %v8815_v61 }
 0x501   :  { %2608 = vmatpush1.bf16.msra.mxu1 %v8787_v39  ;;  %2649 = vmatpush1.bf16.msra.mxu0 %v8790_v54  ;;  %v8805_v39 = vpack.c.bf16 %v2405_v49, %v2405_v49  ;;  %v8807_v54 = vld [vmem:[#allocation7 + $0x4] ss:$16 sps:$4 sm:$0xff]  }
 0x502   :  { %2609 = vmatprep.subr.bf16.mxu1 %v8793_v55  ;;  %2650 = vmatprep.subr.bf16.mxu0 %v8796_v26  ;;  %11522 = vst [vmem:[#allocation45_spill] sm:$0xff] %v8807_v54  ;;  %v8810_v55 = vld [vmem:[#allocation7 + $0xc] ss:$16 sps:$4 sm:$0xff]   ;;  %v8821_v49 = vld [vmem:[#allocation7 + $0x24] ss:$16 sps:$4 sm:$0xff]  }
 0x503   :  { %11523 = vst [vmem:[#allocation46_spill] sm:$0xff] %v8810_v55  ;;  %11526 = vst [vmem:[#allocation49_spill] sm:$0xff] %v8821_v49 }
 0x505   :  { %2610 = vmatpush1.bf16.msra.mxu1 %v8799_v33  ;;  %2651 = vmatpush1.bf16.msra.mxu0 %v8802_v60  ;;  %v8844_v60 = vld [vmem:[#allocation7 + $0x48] ss:$16 sps:$4 sm:$0xff]  }
 0x506   :  { %2677 = vmatprep.subr.bf16.mxu1 %v8807_v54  ;;  %2718 = vmatprep.subr.bf16.mxu0 %v8810_v55  ;;  %v8824_v54 = vld [vmem:[#allocation7 + $0x2c] ss:$16 sps:$4 sm:$0xff]   ;;  %v8829_v55 = vld [vmem:[#allocation7 + $0x20] ss:$16 sps:$4 sm:$0xff]   ;;  %11533 = vst [vmem:[#allocation61_spill] sm:$0xff] %v8844_v60 }
 0x507   :  { %11527 = vst [vmem:[#allocation50_spill] sm:$0xff] %v8824_v54  ;;  %11528 = vst [vmem:[#allocation56_spill] sm:$0xff] %v8829_v55 }
 0x508   :  { %2628 = vmatmul.mubr.bf16.vlgmr.msra.gmra.mrb[28].mxu1 %v8805_v39  ;;  %2669 = vmatmul.mubr.bf16.vlgmr.msra.gmra.mrb[32].mxu0 %v8805_v39 }
 0x509   :  { %2678 = vmatpush1.bf16.msra.mxu1 %v8815_v61  ;;  %2719 = vmatpush1.bf16.msra.mxu0 %v8818_v28  ;;  %v8832_v61 = vld [vmem:[#allocation7 + $0x28] ss:$16 sps:$4 sm:$0xff]   ;;  %v8835_v28 = vld [vmem:[#allocation7 + $0x44] ss:$16 sps:$4 sm:$0xff]  }
 0x50a   :  { %2679 = vmatprep.subr.bf16.mxu1 %v8821_v49  ;;  %2720 = vmatprep.subr.bf16.mxu0 %v8824_v54  ;;  %11529 = vst [vmem:[#allocation57_spill] sm:$0xff] %v8832_v61  ;;  %11530 = vst [vmem:[#allocation58_spill] sm:$0xff] %v8835_v28  ;;  %v8838_v49 = vld [vmem:[#allocation7 + $0x4c] ss:$16 sps:$4 sm:$0xff]   ;;  %v8841_v54 = vld [vmem:[#allocation7 + $0x40] ss:$16 sps:$4 sm:$0xff]  }
 0x50b   :  { %2709 = vmatprep.mubr.bf16.mxu1 %v11344_v14  ;;  %2750 = vmatprep.mubr.bf16.mxu0 %v11344_v14  ;;  %11531 = vst [vmem:[#allocation59_spill] sm:$0xff] %v8838_v49  ;;  %11532 = vst [vmem:[#allocation60_spill] sm:$0xff] %v8841_v54 }
 0x50d   :  { %2680 = vmatpush1.bf16.msra.mxu1 %v8829_v55  ;;  %2721 = vmatpush1.bf16.msra.mxu0 %v8832_v61  ;;  %v8847_v55 = vld [vmem:[#allocation7 + $0x64] ss:$16 sps:$4 sm:$0xff]   ;;  %v8850_v61 = vld [vmem:[#allocation7 + $0x6c] ss:$16 sps:$4 sm:$0xff]  }
 0x50e   :  { %2681 = vmatprep.subr.bf16.mxu1 %v8835_v28  ;;  %2722 = vmatprep.subr.bf16.mxu0 %v8838_v49  ;;  %11534 = vst [vmem:[#allocation62_spill] sm:$0xff] %v8847_v55  ;;  %11535 = vst [vmem:[#allocation63_spill] sm:$0xff] %v8850_v61  ;;  %v8853_v28 = vld [vmem:[#allocation7 + $0x60] ss:$16 sps:$4 sm:$0xff]   ;;  %v8856_v49 = vld [vmem:[#allocation7 + $0x68] ss:$16 sps:$4 sm:$0xff]  }
 0x50f   :  { %11536 = vst [vmem:[#allocation64_spill] sm:$0xff] %v8853_v28  ;;  %11537 = vst [vmem:[#allocation65_spill] sm:$0xff] %v8856_v49 }
 0x511   :  { %2682 = vmatpush1.bf16.msra.mxu1 %v8841_v54  ;;  %2723 = vmatpush1.bf16.msra.mxu0 %v8844_v60  ;;  %v8859_v54 = vld [vmem:[#allocation7 + $0x84] ss:$16 sps:$4 sm:$0xff]   ;;  %v8862_v60 = vld [vmem:[#allocation7 + $0x8c] ss:$16 sps:$4 sm:$0xff]  }
 0x512   :  { %2683 = vmatprep.subr.bf16.mxu1 %v8847_v55  ;;  %2724 = vmatprep.subr.bf16.mxu0 %v8850_v61  ;;  %11538 = vst [vmem:[#allocation66_spill] sm:$0xff] %v8859_v54  ;;  %11539 = vst [vmem:[#allocation67_spill] sm:$0xff] %v8862_v60  ;;  %v8865_v55 = vld [vmem:[#allocation7 + $0x80] ss:$16 sps:$4 sm:$0xff]   ;;  %v8868_v61 = vld [vmem:[#allocation7 + $0x88] ss:$16 sps:$4 sm:$0xff]  }
 0x513   :  { %11540 = vst [vmem:[#allocation68_spill] sm:$0xff] %v8865_v55  ;;  %11541 = vst [vmem:[#allocation69_spill] sm:$0xff] %v8868_v61 }
 0x515   :  { %2684 = vmatpush1.bf16.msra.mxu1 %v8853_v28  ;;  %2725 = vmatpush1.bf16.msra.mxu0 %v8856_v49  ;;  %v8871_v28 = vld [vmem:[#allocation7 + $0xa4] ss:$16 sps:$4 sm:$0xff]   ;;  %v8874_v49 = vld [vmem:[#allocation7 + $0xac] ss:$16 sps:$4 sm:$0xff]  }
 0x516   :  { %2685 = vmatprep.subr.bf16.mxu1 %v8859_v54  ;;  %2726 = vmatprep.subr.bf16.mxu0 %v8862_v60  ;;  %11542 = vst [vmem:[#allocation70_spill] sm:$0xff] %v8871_v28  ;;  %11543 = vst [vmem:[#allocation71_spill] sm:$0xff] %v8874_v49  ;;  %v8877_v54 = vld [vmem:[#allocation7 + $0xa0] ss:$16 sps:$4 sm:$0xff]   ;;  %v8880_v60 = vld [vmem:[#allocation7 + $0xa8] ss:$16 sps:$4 sm:$0xff]  }
 0x517   :  { %11544 = vst [vmem:[#allocation72_spill] sm:$0xff] %v8877_v54  ;;  %11545 = vst [vmem:[#allocation73_spill] sm:$0xff] %v8880_v60 }
 0x519   :  { %2686 = vmatpush1.bf16.msra.mxu1 %v8865_v55  ;;  %2727 = vmatpush1.bf16.msra.mxu0 %v8868_v61  ;;  %v8883_v55 = vld [vmem:[#allocation7 + $0xc4] ss:$16 sps:$4 sm:$0xff]   ;;  %v8886_v61 = vld [vmem:[#allocation7 + $0xcc] ss:$16 sps:$4 sm:$0xff]  }
 0x51a   :  { %2687 = vmatprep.subr.bf16.mxu1 %v8871_v28  ;;  %2728 = vmatprep.subr.bf16.mxu0 %v8874_v49  ;;  %11546 = vst [vmem:[#allocation74_spill] sm:$0xff] %v8883_v55  ;;  %11547 = vst [vmem:[#allocation75_spill] sm:$0xff] %v8886_v61  ;;  %v8889_v28 = vld [vmem:[#allocation7 + $0xc0] ss:$16 sps:$4 sm:$0xff]   ;;  %v8892_v49 = vld [vmem:[#allocation7 + $0xc8] ss:$16 sps:$4 sm:$0xff]  }
 0x51d   :  { %2688 = vmatpush1.bf16.msra.mxu1 %v8877_v54  ;;  %2729 = vmatpush1.bf16.msra.mxu0 %v8880_v60  ;;  %v8895_v54 = vld [vmem:[#allocation7 + $0xe4] ss:$16 sps:$4 sm:$0xff]   ;;  %v8898_v60 = vld [vmem:[#allocation7 + $0xec] ss:$16 sps:$4 sm:$0xff]  }
 0x51e   :  { %2689 = vmatprep.subr.bf16.mxu1 %v8883_v55  ;;  %2730 = vmatprep.subr.bf16.mxu0 %v8886_v61  ;;  %v8901_v55 = vld [vmem:[#allocation7 + $0xe0] ss:$16 sps:$4 sm:$0xff]   ;;  %v8904_v61 = vld [vmem:[#allocation7 + $0xe8] ss:$16 sps:$4 sm:$0xff]  }
 0x51f   :  { %11548 = vst [vmem:[#allocation76_spill] sm:$0xff] %v8901_v55 }
 0x521   :  { %2690 = vmatpush1.bf16.msra.mxu1 %v8889_v28  ;;  %2731 = vmatpush1.bf16.msra.mxu0 %v8892_v49 }
 0x522   :  { %2691 = vmatprep.subr.bf16.mxu1 %v8895_v54  ;;  %2732 = vmatprep.subr.bf16.mxu0 %v8898_v60 }
 0x525   :  { %2692 = vmatpush1.bf16.msra.mxu1 %v8901_v55  ;;  %2733 = vmatpush1.bf16.msra.mxu0 %v8904_v61  ;;  %v6008_v55 = vld [vmem:[%s10871_s0 + $0x18] sm:$0xff] }
 0x526   :  { %2787 = vmatprep.subr.bf16.mxu1 %v7761_v21  ;;  %2828 = vmatprep.subr.bf16.mxu0 %v11449_v20  ;;  %v2783_v20 = vpack.c.bf16 %v6008_v55, %v6008_v55  ;;  %v8997_v55 = vld [vmem:[#allocation8 + $0x6c] ss:$16 sps:$4 sm:$0xff]  }
 0x527   :  { %11569 = vst [vmem:[#allocation86_spill] sm:$0xff] %v8997_v55 }
 0x528   :  { %2710 = vmatmul.mubr.bf16.vlgmr.msra.gmra.mrb[28].mxu1 %v8664_v38  ;;  %2751 = vmatmul.mubr.bf16.vlgmr.msra.gmra.mrb[32].mxu0 %v8664_v38  ;;  %v8991_v38 = vld [vmem:[#allocation8 + $0x48] ss:$16 sps:$4 sm:$0xff]  }
 0x529   :  { %2788 = vmatpush1.bf16.msra.mxu1 %v7756_v19  ;;  %2829 = vmatpush1.bf16.msra.mxu0 %v7765_v24  ;;  %11567 = vst [vmem:[#allocation84_spill] sm:$0xff] %v8991_v38 }
 0x52a   :  { %2819 = vmatprep.mubr.bf16.mxu1 %v11344_v14  ;;  %2860 = vmatprep.mubr.bf16.mxu0 %v11344_v14 }
 0x52b   :  { %2869 = vmatprep.subr.bf16.mxu1 %v8485_v10  ;;  %2910 = vmatprep.subr.bf16.mxu0 %v8488_v5  ;;  %v11550_v10 = vld [vmem:[#allocation19_spill] sm:$0xff]  ;;  %v11551_v5 = vld [vmem:[#allocation20_spill] sm:$0xff] }
 0x530   :  { %6009 = vmatmul.mubr.msk.bf16.vlgmr.msra.gmra.mrb[32].mxu1 %vm130_vm4, %v2783_v20  ;;  %6010 = vmatmul.mubr.msk.bf16.vlgmr.msra.gmra.mrb[36].mxu0 %vm130_vm4, %v2783_v20  ;;  %v11549_v20 = vld [vmem:[#allocation18_spill] sm:$0xff] }
 0x531   :  { %2870 = vmatpush1.bf16.msra.mxu1 %v8493_v3  ;;  %2911 = vmatpush1.bf16.msra.mxu0 %v8496_v15  ;;  %v11552_v3 = vld [vmem:[#allocation21_spill] sm:$0xff]  ;;  %v11553_v15 = vld [vmem:[#allocation22_spill] sm:$0xff] }
 0x532   :  { %2871 = vmatprep.subr.bf16.mxu1 %v8499_v1  ;;  %2912 = vmatprep.subr.bf16.mxu0 %v8502_v22  ;;  %v11554_v1 = vld [vmem:[#allocation23_spill] sm:$0xff]  ;;  %v11555_v22 = vld [vmem:[#allocation24_spill] sm:$0xff] }
 0x533   :  { %2901 = vmatprep.mubr.bf16.mxu1 %v11344_v14  ;;  %2942 = vmatprep.mubr.bf16.mxu0 %v11344_v14 }
 0x535   :  { %2872 = vmatpush1.bf16.msra.mxu1 %v8507_v0  ;;  %2913 = vmatpush1.bf16.msra.mxu0 %v8510_v63  ;;  %v11556_v0 = vld [vmem:[#allocation25_spill] sm:$0xff]  ;;  %v11557_v63 = vld [vmem:[#allocation26_spill] sm:$0xff] }
 0x536   :  { %2873 = vmatprep.subr.bf16.mxu1 %v8513_v16  ;;  %2914 = vmatprep.subr.bf16.mxu0 %v8516_v59  ;;  %v11558_v16 = vld [vmem:[#allocation27_spill] sm:$0xff]  ;;  %v11559_v59 = vld [vmem:[#allocation28_spill] sm:$0xff] }
 0x539   :  { %2874 = vmatpush1.bf16.msra.mxu1 %v8519_v11  ;;  %2915 = vmatpush1.bf16.msra.mxu0 %v8522_v9  ;;  %v8954_v11 = vld [vmem:[#allocation8 + $0x4] ss:$16 sps:$4 sm:$0xff]   ;;  %v8957_v9 = vld [vmem:[#allocation8 + $0xc] ss:$16 sps:$4 sm:$0xff]  }
 0x53a   :  { %2875 = vmatprep.subr.bf16.mxu1 %v8525_v8  ;;  %2916 = vmatprep.subr.bf16.mxu0 %v8528_v44  ;;  %v8962_v8 = vld [vmem:[#allocation8] ss:$16 sps:$4 sm:$0xff]   ;;  %v8965_v44 = vld [vmem:[#allocation8 + $0x8] ss:$16 sps:$4 sm:$0xff]  }
 0x53d   :  { %2876 = vmatpush1.bf16.msra.mxu1 %v8531_v46  ;;  %2917 = vmatpush1.bf16.msra.mxu0 %v8534_v7  ;;  %v8968_v46 = vld [vmem:[#allocation8 + $0x24] ss:$16 sps:$4 sm:$0xff]   ;;  %v8971_v7 = vld [vmem:[#allocation8 + $0x2c] ss:$16 sps:$4 sm:$0xff]  }
 0x53e   :  { %2877 = vmatprep.subr.bf16.mxu1 %v8537_v27  ;;  %2918 = vmatprep.subr.bf16.mxu0 %v8540_v47  ;;  %11560 = vst [vmem:[#allocation77_spill] sm:$0xff] %v8968_v46  ;;  %11561 = vst [vmem:[#allocation78_spill] sm:$0xff] %v8971_v7  ;;  %v8976_v27 = vld [vmem:[#allocation8 + $0x20] ss:$16 sps:$4 sm:$0xff]   ;;  %v8979_v47 = vld [vmem:[#allocation8 + $0x28] ss:$16 sps:$4 sm:$0xff]  }
 0x53f   :  { %11562 = vst [vmem:[#allocation79_spill] sm:$0xff] %v8976_v27  ;;  %11563 = vst [vmem:[#allocation80_spill] sm:$0xff] %v8979_v47 }
 0x541   :  { %2878 = vmatpush1.bf16.msra.mxu1 %v11549_v20  ;;  %2919 = vmatpush1.bf16.msra.mxu0 %v11550_v10  ;;  %v9000_v20 = vld [vmem:[#allocation8 + $0x60] ss:$16 sps:$4 sm:$0xff]   ;;  %v9003_v10 = vld [vmem:[#allocation8 + $0x68] ss:$16 sps:$4 sm:$0xff]  }
 0x542   :  { %2879 = vmatprep.subr.bf16.mxu1 %v11551_v5  ;;  %2920 = vmatprep.subr.bf16.mxu0 %v11552_v3  ;;  %11570 = vst [vmem:[#allocation87_spill] sm:$0xff] %v9000_v20  ;;  %11571 = vst [vmem:[#allocation88_spill] sm:$0xff] %v9003_v10  ;;  %v9006_v5 = vld [vmem:[#allocation8 + $0x84] ss:$16 sps:$4 sm:$0xff]   ;;  %v9009_v3 = vld [vmem:[#allocation8 + $0x8c] ss:$16 sps:$4 sm:$0xff]  }
 0x543   :  { %11572 = vst [vmem:[#allocation51_spill] sm:$0xff] %v9006_v5  ;;  %11573 = vst [vmem:[#allocation52_spill] sm:$0xff] %v9009_v3 }
 0x545   :  { %2880 = vmatpush1.bf16.msra.mxu1 %v11553_v15  ;;  %2921 = vmatpush1.bf16.msra.mxu0 %v11554_v1  ;;  %v9012_v15 = vld [vmem:[#allocation8 + $0x80] ss:$16 sps:$4 sm:$0xff]   ;;  %v9015_v1 = vld [vmem:[#allocation8 + $0x88] ss:$16 sps:$4 sm:$0xff]  }
 0x546   :  { %2881 = vmatprep.subr.bf16.mxu1 %v11555_v22  ;;  %2922 = vmatprep.subr.bf16.mxu0 %v11556_v0  ;;  %11574 = vst [vmem:[#allocation90_spill] sm:$0xff] %v9012_v15  ;;  %11575 = vst [vmem:[#allocation91_spill] sm:$0xff] %v9015_v1  ;;  %v9018_v22 = vld [vmem:[#allocation8 + $0xa4] ss:$16 sps:$4 sm:$0xff]   ;;  %v9021_v0 = vld [vmem:[#allocation8 + $0xac] ss:$16 sps:$4 sm:$0xff]  }
 0x547   :  { %11576 = vst [vmem:[#allocation54_spill] sm:$0xff] %v9018_v22  ;;  %11577 = vst [vmem:[#allocation53_spill] sm:$0xff] %v9021_v0 }
 0x549   :  { %2882 = vmatpush1.bf16.msra.mxu1 %v8567_v43  ;;  %2923 = vmatpush1.bf16.msra.mxu0 %v8570_v13  ;;  %v8982_v43 = vld [vmem:[#allocation8 + $0x44] ss:$16 sps:$4 sm:$0xff]   ;;  %v8985_v13 = vld [vmem:[#allocation8 + $0x4c] ss:$16 sps:$4 sm:$0xff]  }
 0x54a   :  { %2883 = vmatprep.subr.bf16.mxu1 %v8573_v4  ;;  %2924 = vmatprep.subr.bf16.mxu0 %v11557_v63  ;;  %11564 = vst [vmem:[#allocation81_spill] sm:$0xff] %v8982_v43  ;;  %11565 = vst [vmem:[#allocation82_spill] sm:$0xff] %v8985_v13  ;;  %v8988_v4 = vld [vmem:[#allocation8 + $0x40] ss:$16 sps:$4 sm:$0xff]  }
 0x54b   :  { %11566 = vst [vmem:[#allocation83_spill] sm:$0xff] %v8988_v4  ;;  %v9024_v63 = vld [vmem:[#allocation8 + $0xa0] ss:$16 sps:$4 sm:$0xff]  }
 0x54c   :  { %11578 = vst [vmem:[#allocation92_spill] sm:$0xff] %v9024_v63 }
 0x54d   :  { %2884 = vmatpush1.bf16.msra.mxu1 %v11558_v16  ;;  %2925 = vmatpush1.bf16.msra.mxu0 %v11559_v59  ;;  %v9027_v16 = vld [vmem:[#allocation8 + $0xa8] ss:$16 sps:$4 sm:$0xff]   ;;  %v9030_v59 = vld [vmem:[#allocation8 + $0xc4] ss:$16 sps:$4 sm:$0xff]  }
 0x54e   :  { %2974 = vmatprep.subr.bf16.mxu1 %v8954_v11  ;;  %3015 = vmatprep.subr.bf16.mxu0 %v8957_v9  ;;  %11579 = vst [vmem:[#allocation93_spill] sm:$0xff] %v9027_v16  ;;  %11580 = vst [vmem:[#allocation94_spill] sm:$0xff] %v9030_v59 }
 0x550   :  { %2902 = vmatmul.mubr.bf16.vlgmr.msra.gmra.mrb[32].mxu1 %v8805_v39  ;;  %2943 = vmatmul.mubr.bf16.vlgmr.msra.gmra.mrb[36].mxu0 %v8805_v39  ;;  %v8994_v39 = vld [vmem:[#allocation8 + $0x64] ss:$16 sps:$4 sm:$0xff]  }
 0x551   :  { %2975 = vmatpush1.bf16.msra.mxu1 %v8962_v8  ;;  %3016 = vmatpush1.bf16.msra.mxu0 %v8965_v44  ;;  %11568 = vst [vmem:[#allocation85_spill] sm:$0xff] %v8994_v39 }
 0x552   :  { %2976 = vmatprep.subr.bf16.mxu1 %v8968_v46  ;;  %3017 = vmatprep.subr.bf16.mxu0 %v8971_v7 }
 0x553   :  { %3006 = vmatprep.mubr.bf16.mxu1 %v11344_v14  ;;  %3047 = vmatprep.mubr.bf16.mxu0 %v11344_v14 }
 0x555   :  { %2977 = vmatpush1.bf16.msra.mxu1 %v8976_v27  ;;  %3018 = vmatpush1.bf16.msra.mxu0 %v8979_v47 }
 0x556   :  { %2978 = vmatprep.subr.bf16.mxu1 %v8982_v43  ;;  %3019 = vmatprep.subr.bf16.mxu0 %v8985_v13 }
 0x559   :  { %2979 = vmatpush1.bf16.msra.mxu1 %v8988_v4  ;;  %3020 = vmatpush1.bf16.msra.mxu0 %v8991_v38 }
 0x55a   :  { %2980 = vmatprep.subr.bf16.mxu1 %v8994_v39  ;;  %3021 = vmatprep.subr.bf16.mxu0 %v8997_v55 }
 0x55d   :  { %2981 = vmatpush1.bf16.msra.mxu1 %v9000_v20  ;;  %3022 = vmatpush1.bf16.msra.mxu0 %v9003_v10 }
 0x55e   :  { %2982 = vmatprep.subr.bf16.mxu1 %v9006_v5  ;;  %3023 = vmatprep.subr.bf16.mxu0 %v9009_v3  ;;  %v11590_v3 = vld [vmem:[#allocation29_spill] sm:$0xff] }
 0x561   :  { %2983 = vmatpush1.bf16.msra.mxu1 %v9012_v15  ;;  %3024 = vmatpush1.bf16.msra.mxu0 %v9015_v1  ;;  %v9033_v1 = vld [vmem:[#allocation8 + $0xcc] ss:$16 sps:$4 sm:$0xff]  }
 0x562   :  { %2984 = vmatprep.subr.bf16.mxu1 %v9018_v22  ;;  %3025 = vmatprep.subr.bf16.mxu0 %v9021_v0  ;;  %11581 = vst [vmem:[#allocation95_spill] sm:$0xff] %v9033_v1  ;;  %v9036_v22 = vld [vmem:[#allocation8 + $0xc0] ss:$16 sps:$4 sm:$0xff]   ;;  %v9039_v0 = vld [vmem:[#allocation8 + $0xc8] ss:$16 sps:$4 sm:$0xff]  }
 0x563   :  { %11582 = vst [vmem:[#allocation96_spill] sm:$0xff] %v9036_v22  ;;  %11583 = vst [vmem:[#allocation97_spill] sm:$0xff] %v9039_v0 }
 0x565   :  { %2985 = vmatpush1.bf16.msra.mxu1 %v9024_v63  ;;  %3026 = vmatpush1.bf16.msra.mxu0 %v9027_v16  ;;  %v9042_v63 = vld [vmem:[#allocation8 + $0xe4] ss:$16 sps:$4 sm:$0xff]   ;;  %v9045_v16 = vld [vmem:[#allocation8 + $0xec] ss:$16 sps:$4 sm:$0xff]  }
 0x566   :  { %2986 = vmatprep.subr.bf16.mxu1 %v9030_v59  ;;  %3027 = vmatprep.subr.bf16.mxu0 %v9033_v1  ;;  %11584 = vst [vmem:[#allocation98_spill] sm:$0xff] %v9042_v63  ;;  %11585 = vst [vmem:[#allocation99_spill] sm:$0xff] %v9045_v16  ;;  %v9048_v59 = vld [vmem:[#allocation8 + $0xe0] ss:$16 sps:$4 sm:$0xff]   ;;  %v9051_v1 = vld [vmem:[#allocation8 + $0xe8] ss:$16 sps:$4 sm:$0xff]  }
 0x567   :  { %11586 = vst [vmem:[#allocation100_spill] sm:$0xff] %v9048_v59  ;;  %11587 = vst [vmem:[#allocation101_spill] sm:$0xff] %v9051_v1 }
 0x569   :  { %2987 = vmatpush1.bf16.msra.mxu1 %v9036_v22  ;;  %3028 = vmatpush1.bf16.msra.mxu0 %v9039_v0  ;;  %v9054_v22 = vld [vmem:[#allocation10 + $0x4] ss:$16 sps:$4 sm:$0xff]   ;;  %v9057_v0 = vld [vmem:[#allocation10 + $0xc] ss:$16 sps:$4 sm:$0xff]  }
 0x56a   :  { %2988 = vmatprep.subr.bf16.mxu1 %v9042_v63  ;;  %3029 = vmatprep.subr.bf16.mxu0 %v9045_v16  ;;  %11588 = vst [vmem:[#allocation102_spill] sm:$0xff] %v9054_v22  ;;  %11589 = vst [vmem:[#allocation103_spill] sm:$0xff] %v9057_v0 }
 0x56d   :  { %2989 = vmatpush1.bf16.msra.mxu1 %v9048_v59  ;;  %3030 = vmatpush1.bf16.msra.mxu0 %v9051_v1  ;;  %v11591_v59 = vld [vmem:[#allocation30_spill] sm:$0xff] }
 0x56e   :  { %3057 = vmatprep.subr.bf16.mxu1 %v9054_v22  ;;  %3098 = vmatprep.subr.bf16.mxu0 %v9057_v0  ;;  %v11592_v0 = vld [vmem:[#allocation31_spill] sm:$0xff] }
 0x5bb   :  { %v2524_v63 = vpop.f32.mrb[24].mxu1  ;;  %v2565_v15 = vpop.f32.mrb[28].mxu0 }
 0x5bc   :  { %v6056_v16 = vadd.f32 %v2524_v63, %v11590_v3  ;;  %v2526_v5 = vpop.f32.mrb[25].mxu1  ;;  %v9061_v10 = vpop.f32.mrb[29].mxu0  ;;  %v6058_v47 = vadd.f32 %v2565_v15, %v11592_v0 }
 0x5bd   :  { %v6057_v20 = vadd.f32 %v2526_v5, %v11591_v59  ;;  %v2528_v55 = vpop.f32.mrb[26].mxu1  ;;  %v2569_v39 = vpop.f32.mrb[30].mxu0 }
 0x5be   :  { %v2572_v1 = vsub.f32 0.0, %v6056_v16  ;;  %v2529_v38 = vpop.f32.mrb[27].mxu1  ;;  %v2570_v4 = vpop.f32.mrb[31].mxu0 }
 0x5bf   :  { %v2577_v13 = vsub.f32 0.0, %v6057_v20 }
 0x5c0   :  { %v2573_v22 = vmul.f32 1.442695, %v2572_v1 }
 0x5c1   :  { %v2578_v43 = vmul.f32 1.442695, %v2577_v13 }
 0x5c2   :  { %6669 = vpow2.f32 %v2573_v22 }
 0x5c3   :  { %6671 = vpow2.f32 %v2578_v43  ;;  %v11593_v43 = vld [vmem:[#allocation89_spill] sm:$0xff] }
 0x5c4   :  { %6673 = vtanh.f32 %v6058_v47 }
 0x5cc   :  { %v6670_v27 = vpop.eup %6669 }
 0x5cd   :  { %v6672_v7 = vpop.eup %6671  ;;  %v2575_v63 = vadd.f32 1.0, %v6670_v27 }
 0x5ce   :  { %v2580_v3 = vadd.f32 1.0, %v6672_v7  ;;  %v6674_v5 = vpop.eup %6673 }
 0x5cf   :  { %6675 = vrcp.f32 %v2575_v63 }
 0x5d0   :  { %6677 = vrcp.f32 %v2580_v3 }
 0x5d9   :  { %v6676_v55 = vpop.eup %6675 }
 0x5da   :  { %v6678_v39 = vpop.eup %6677  ;;  %v2590_v16 = vmul.f32 %v6676_v55, %v6674_v5 }
 0x5db   :  { %v2589_v4 = vmul.f32 %v6678_v39, %v8646_v36 }
 0x5dd   :  { %v9066_v38 = vadd.f32 %v2590_v16, %v2589_v4 }
 0x5fb   :  { %v2711_v13 = vpop.f32.mrb[28].mxu1  ;;  %v2752_v20 = vpop.f32.mrb[32].mxu0 }
 0x5fc   :  { %v6060_v1 = vadd.f32 %v2711_v13, %v11593_v43  ;;  %v2713_v15 = vpop.f32.mrb[29].mxu1  ;;  %v2754_v22 = vpop.f32.mrb[33].mxu0  ;;  %v6062_v16 = vadd.f32 %v2752_v20, %v8286_v53  ;;  %v11594_v20 = vld [vmem:[#allocation32_spill] sm:$0xff] }
 0x5fd   :  { %v6061_v27 = vadd.f32 %v2713_v15, %v11483_v42  ;;  %v2715_v47 = vpop.f32.mrb[30].mxu1  ;;  %v2756_v7 = vpop.f32.mrb[34].mxu0  ;;  %v6063_v36 = vadd.f32 %v2754_v22, %v8282_v12 }
 0x5fe   :  { %v2759_v63 = vsub.f32 0.0, %v6060_v1  ;;  %v2716_v3 = vpop.f32.mrb[31].mxu1  ;;  %v2757_v0 = vpop.f32.mrb[35].mxu0 }
 0x5ff   :  { %v2764_v59 = vsub.f32 0.0, %v6061_v27  ;;  %v2771_v55 = vsub.f32 0.0, %v6063_v36 }
 0x600   :  { %v2760_v46 = vmul.f32 1.442695, %v2759_v63  ;;  %v6059_v63 = vadd.f32 %v9061_v10, %v11594_v20 }
 0x601   :  { %v2765_v5 = vmul.f32 1.442695, %v2764_v59  ;;  %v2772_v39 = vmul.f32 1.442695, %v2771_v55 }
 0x602   :  { %6679 = vpow2.f32 %v2760_v46 }
 0x603   :  { %6681 = vpow2.f32 %v2765_v5 }
 0x604   :  { %6683 = vpow2.f32 %v2772_v39 }
 0x605   :  { %6685 = vtanh.f32 %v6062_v16 }
 0x60c   :  { %v6680_v4 = vpop.eup %6679 }
 0x60d   :  { %v6682_v13 = vpop.eup %6681  ;;  %v2762_v43 = vadd.f32 1.0, %v6680_v4 }
 0x60e   :  { %v2767_v15 = vadd.f32 1.0, %v6682_v13  ;;  %v6684_v0 = vpop.eup %6683 }
 0x60f   :  { %6687 = vrcp.f32 %v2762_v43  ;;  %v6686_v1 = vpop.eup %6685  ;;  %v2774_v22 = vadd.f32 1.0, %v6684_v0  ;;  %v2584_v43 = vsub.f32 0.0, %v6059_v63 }
 0x610   :  { %6689 = vrcp.f32 %v2767_v15 }
 0x611   :  { %6691 = vrcp.f32 %v2774_v22 }
 0x619   :  { %v6688_v27 = vpop.eup %6687 }
 0x61a   :  { %v6690_v59 = vpop.eup %6689  ;;  %v2777_v47 = vmul.f32 %v6688_v27, %v6686_v1 }
 0x61b   :  { %v2776_v46 = vmul.f32 %v6690_v59, %v8657_v6  ;;  %v6692_v27 = vpop.eup %6691  ;;  %v2585_v59 = vmul.f32 1.442695, %v2584_v43  ;;  %v9092_v43 = vld [vmem:[#allocation10 + $0x24] ss:$16 sps:$4 sm:$0xff]  }
 0x61d   :  { %v9073_v7 = vadd.f32 %v2777_v47, %v2776_v46 }
 0x61f   :  { %6693 = vtanh.f32 %v9073_v7 }
 0x623   :  { %v2903_v3 = vpop.f32.mrb[32].mxu1  ;;  %v2944_v5 = vpop.f32.mrb[36].mxu0 }
 0x624   :  { %v6064_v36 = vadd.f32 %v2903_v3, %v11487_v32  ;;  %v2905_v55 = vpop.f32.mrb[33].mxu1  ;;  %v9079_v39 = vpop.f32.mrb[37].mxu0  ;;  %v9086_v3 = vld [vmem:[#allocation10] ss:$16 sps:$4 sm:$0xff]  }
 0x625   :  { %v6065_v16 = vadd.f32 %v2905_v55, %v7999_v58  ;;  %v2907_v4 = vpop.f32.mrb[34].mxu1  ;;  %v2948_v6 = vpop.f32.mrb[38].mxu0  ;;  %v9095_v55 = vld [vmem:[#allocation10 + $0x2c] ss:$16 sps:$4 sm:$0xff]  }
 0x626   :  { %v2951_v13 = vsub.f32 0.0, %v6064_v36  ;;  %v2908_v15 = vpop.f32.mrb[35].mxu1  ;;  %v2949_v0 = vpop.f32.mrb[39].mxu0  ;;  %v9089_v36 = vld [vmem:[#allocation10 + $0x8] ss:$16 sps:$4 sm:$0xff]  }
 0x627   :  { %v2956_v1 = vsub.f32 0.0, %v6065_v16  ;;  %v6066_v16 = vadd.f32 %v2944_v5, %v8014_v17  ;;  %v9101_v4 = vld [vmem:[#allocation10 + $0x20] ss:$16 sps:$4 sm:$0xff]   ;;  %v9104_v6 = vld [vmem:[#allocation10 + $0x28] ss:$16 sps:$4 sm:$0xff]  }
 0x628   :  { %v2952_v47 = vmul.f32 1.442695, %v2951_v13  ;;  %v9107_v15 = vld [vmem:[#allocation10 + $0x44] ss:$16 sps:$4 sm:$0xff]   ;;  %v9110_v0 = vld [vmem:[#allocation10 + $0x4c] ss:$16 sps:$4 sm:$0xff]  }
 0x629   :  { %v6694_v10 = vpop.eup %6693  ;;  %v2957_v22 = vmul.f32 1.442695, %v2956_v1 }
 0x62a   :  { %6695 = vpow2.f32 %v2952_v47  ;;  %v2780_v46 = vmul.f32 %v6694_v10, %v6692_v27  ;;  %v9113_v47 = vld [vmem:[#allocation10 + $0x40] ss:$16 sps:$4 sm:$0xff]   ;;  %v9116_v10 = vld [vmem:[#allocation10 + $0x48] ss:$16 sps:$4 sm:$0xff]  }
 0x62b   :  { %6697 = vpow2.f32 %v2957_v22  ;;  %11595 = vst [vmem:[#allocation104_spill] sm:$0xff] %v9113_v47  ;;  %11596 = vst [vmem:[#allocation105_spill] sm:$0xff] %v9116_v10  ;;  %v9119_v22 = vld [vmem:[#allocation10 + $0x64] ss:$16 sps:$4 sm:$0xff]  }
 0x62c   :  { %6699 = vpow2.f32 %v2585_v59  ;;  %v9082_v63 = vpack.c.bf16 %v2780_v46, %v2780_v46  ;;  %11597 = vst [vmem:[#allocation106_spill] sm:$0xff] %v9119_v22  ;;  %v9122_v46 = vld [vmem:[#allocation10 + $0x6c] ss:$16 sps:$4 sm:$0xff]  }
 0x62d   :  { %6701 = vtanh.f32 %v6066_v16  ;;  %11598 = vst [vmem:[#allocation107_spill] sm:$0xff] %v9122_v46 }
 0x62e   :  { %3007 = vmatmul.mubr.bf16.vlgmr.msra.gmra.mrb[36].mxu1 %v9082_v63  ;;  %3048 = vmatmul.mubr.bf16.vlgmr.msra.gmra.mrb[40].mxu0 %v9082_v63 }
 0x62f   :  { %3058 = vmatpush1.bf16.msra.mxu1 %v9086_v3  ;;  %3099 = vmatpush1.bf16.msra.mxu0 %v9089_v36 }
 0x630   :  { %3059 = vmatprep.subr.bf16.mxu1 %v9092_v43  ;;  %3100 = vmatprep.subr.bf16.mxu0 %v9095_v55 }
 0x631   :  { %3089 = vmatprep.mubr.bf16.mxu1 %v11344_v14  ;;  %3130 = vmatprep.mubr.bf16.mxu0 %v11344_v14 }
 0x633   :  { %3060 = vmatpush1.bf16.msra.mxu1 %v9101_v4  ;;  %3101 = vmatpush1.bf16.msra.mxu0 %v9104_v6 }
 0x634   :  { %v6696_v13 = vpop.eup %6695  ;;  %3061 = vmatprep.subr.bf16.mxu1 %v9107_v15  ;;  %3102 = vmatprep.subr.bf16.mxu0 %v9110_v0 }
 0x635   :  { %v6698_v1 = vpop.eup %6697  ;;  %v2954_v27 = vadd.f32 1.0, %v6696_v13  ;;  %v9125_v13 = vld [vmem:[#allocation10 + $0x60] ss:$16 sps:$4 sm:$0xff]  }
 0x636   :  { %v6700_v5 = vpop.eup %6699  ;;  %v2959_v59 = vadd.f32 1.0, %v6698_v1  ;;  %11599 = vst [vmem:[#allocation108_spill] sm:$0xff] %v9125_v13  ;;  %v9128_v1 = vld [vmem:[#allocation10 + $0x68] ss:$16 sps:$4 sm:$0xff]  }
 0x637   :  { %6703 = vrcp.f32 %v2954_v27  ;;  %3062 = vmatpush1.bf16.msra.mxu1 %v9113_v47  ;;  %3103 = vmatpush1.bf16.msra.mxu0 %v9116_v10  ;;  %v2587_v16 = vadd.f32 1.0, %v6700_v5  ;;  %11600 = vst [vmem:[#allocation109_spill] sm:$0xff] %v9128_v1  ;;  %v9132_v27 = vld [vmem:[#allocation10 + $0x84] ss:$16 sps:$4 sm:$0xff]   ;;  %v9138_v5 = vld [vmem:[#allocation10 + $0x80] ss:$16 sps:$4 sm:$0xff]  }
 0x638   :  { %6705 = vrcp.f32 %v2959_v59  ;;  %3063 = vmatprep.subr.bf16.mxu1 %v9119_v22  ;;  %3104 = vmatprep.subr.bf16.mxu0 %v9122_v46  ;;  %11601 = vst [vmem:[#allocation110_spill] sm:$0xff] %v9132_v27  ;;  %v9135_v59 = vld [vmem:[#allocation10 + $0x8c] ss:$16 sps:$4 sm:$0xff]   ;;  %11603 = vst [vmem:[#allocation112_spill] sm:$0xff] %v9138_v5  ;;  %v6067_v46 = vadd.f32 %v9079_v39, %v11502_v29  ;;  %v9146_v22 = vld [vmem:[#allocation10 + $0xa4] ss:$16 sps:$4 sm:$0xff]  }
 0x639   :  { %6707 = vtanh.f32 %v9066_v38  ;;  %11602 = vst [vmem:[#allocation111_spill] sm:$0xff] %v9135_v59  ;;  %11605 = vst [vmem:[#allocation19_spill] sm:$0xff] %v9146_v22  ;;  %v9153_v47 = vld [vmem:[#allocation10 + $0xa0] ss:$16 sps:$4 sm:$0xff]   ;;  %v9159_v29 = vld [vmem:[#allocation10 + $0xc4] ss:$16 sps:$4 sm:$0xff]  }
 0x63a   :  { %6709 = vrcp.f32 %v2587_v16  ;;  %11606 = vst [vmem:[#allocation20_spill] sm:$0xff] %v9153_v47  ;;  %v2963_v39 = vsub.f32 0.0, %v6067_v46  ;;  %11608 = vst [vmem:[#allocation22_spill] sm:$0xff] %v9159_v29 }
 0x63b   :  { %3064 = vmatpush1.bf16.msra.mxu1 %v9125_v13  ;;  %3105 = vmatpush1.bf16.msra.mxu0 %v9128_v1  ;;  %v9141_v13 = vld [vmem:[#allocation10 + $0x88] ss:$16 sps:$4 sm:$0xff]   ;;  %v6702_v1 = vpop.eup %6701 }
 0x63c   :  { %3065 = vmatprep.subr.bf16.mxu1 %v9132_v27  ;;  %3106 = vmatprep.subr.bf16.mxu0 %v9135_v59  ;;  %11604 = vst [vmem:[#allocation18_spill] sm:$0xff] %v9141_v13  ;;  %v9149_v27 = vld [vmem:[#allocation10 + $0xac] ss:$16 sps:$4 sm:$0xff]   ;;  %v2964_v46 = vmul.f32 1.442695, %v2963_v39  ;;  %v11624_v39 = vld [vmem:[#allocation46_spill] sm:$0xff] }
 0x63e   :  { %6711 = vpow2.f32 %v2964_v46  ;;  %v11628_v46 = vld [vmem:[#allocation50_spill] sm:$0xff] }
 0x63f   :  { %3066 = vmatpush1.bf16.msra.mxu1 %v9138_v5  ;;  %3107 = vmatpush1.bf16.msra.mxu0 %v9141_v13  ;;  %v9156_v13 = vld [vmem:[#allocation10 + $0xa8] ss:$16 sps:$4 sm:$0xff]  }
 0x640   :  { %3067 = vmatprep.subr.bf16.mxu1 %v9146_v22  ;;  %3108 = vmatprep.subr.bf16.mxu0 %v9149_v27  ;;  %11607 = vst [vmem:[#allocation21_spill] sm:$0xff] %v9156_v13  ;;  %v9162_v22 = vld [vmem:[#allocation10 + $0xcc] ss:$16 sps:$4 sm:$0xff]  }
 0x641   :  { %v6704_v16 = vpop.eup %6703  ;;  %11609 = vst [vmem:[#allocation23_spill] sm:$0xff] %v9162_v22 }
 0x642   :  { %v6706_v59 = vpop.eup %6705  ;;  %v2969_v10 = vmul.f32 %v6704_v16, %v6702_v1 }
 0x643   :  { %v2968_v5 = vmul.f32 %v6706_v59, %v8698_v37  ;;  %3068 = vmatpush1.bf16.msra.mxu1 %v9153_v47  ;;  %3109 = vmatpush1.bf16.msra.mxu0 %v9156_v13  ;;  %v6708_v1 = vpop.eup %6707  ;;  %v9167_v59 = vld [vmem:[#allocation10 + $0xc0] ss:$16 sps:$4 sm:$0xff]   ;;  %v9170_v47 = vld [vmem:[#allocation10 + $0xc8] ss:$16 sps:$4 sm:$0xff]   ;;  %v9173_v13 = vld [vmem:[#allocation10 + $0xe4] ss:$16 sps:$4 sm:$0xff]  }
 0x644   :  { %3069 = vmatprep.subr.bf16.mxu1 %v9159_v29  ;;  %3110 = vmatprep.subr.bf16.mxu0 %v9162_v22  ;;  %v6710_v37 = vpop.eup %6709  ;;  %11610 = vst [vmem:[#allocation24_spill] sm:$0xff] %v9170_v47  ;;  %v9176_v29 = vld [vmem:[#allocation10 + $0xec] ss:$16 sps:$4 sm:$0xff]   ;;  %v9182_v22 = vld [vmem:[#allocation10 + $0xe8] ss:$16 sps:$4 sm:$0xff]  }
 0x645   :  { %v9165_v16 = vadd.f32 %v2969_v10, %v2968_v5  ;;  %v2593_v10 = vmul.f32 %v6710_v37, %v6708_v1  ;;  %v9179_v5 = vld [vmem:[#allocation10 + $0xe0] ss:$16 sps:$4 sm:$0xff]   ;;  %v11625_v1 = vld [vmem:[#allocation47_spill] sm:$0xff] }
 0x646   :  { %v11626_v37 = vld [vmem:[#allocation48_spill] sm:$0xff] }
 0x647   :  { %3070 = vmatpush1.bf16.msra.mxu1 %v9167_v59  ;;  %3111 = vmatpush1.bf16.msra.mxu0 %v9170_v47  ;;  %v3056_v47 = vpack.c.bf16 %v2593_v10, %v2593_v10  ;;  %6713 = vtanh.f32 %v9165_v16  ;;  %v11630_v10 = vld [vmem:[#allocation57_spill] sm:$0xff] }
 0x648   :  { %3071 = vmatprep.subr.bf16.mxu1 %v9173_v13  ;;  %3112 = vmatprep.subr.bf16.mxu0 %v9176_v29 }
 0x64b   :  { %3072 = vmatpush1.bf16.msra.mxu1 %v9179_v5  ;;  %3113 = vmatpush1.bf16.msra.mxu0 %v9182_v22 }
 0x64c   :  { %3162 = vmatprep.subr.bf16.mxu1 %v8706_v48  ;;  %3203 = vmatprep.subr.bf16.mxu0 %v8709_v62  ;;  %v6712_v48 = vpop.eup %6711 }
 0x64d   :  { %v2966_v62 = vadd.f32 1.0, %v6712_v48  ;;  %v11631_v48 = vld [vmem:[#allocation58_spill] sm:$0xff] }
 0x64e   :  { %3090 = vmatmul.mubr.bf16.vlgmr.msra.gmra.mrb[36].mxu1 %v3056_v47  ;;  %3131 = vmatmul.mubr.bf16.vlgmr.msra.gmra.mrb[40].mxu0 %v3056_v47  ;;  %v11623_v47 = vld [vmem:[#allocation45_spill] sm:$0xff] }
 0x64f   :  { %3163 = vmatpush1.bf16.msra.mxu1 %v8712_v45  ;;  %3204 = vmatpush1.bf16.msra.mxu0 %v8715_v23  ;;  %6715 = vrcp.f32 %v2966_v62  ;;  %v11611_v45 = vld [vmem:[#allocation33_spill] sm:$0xff]  ;;  %v11612_v23 = vld [vmem:[#allocation34_spill] sm:$0xff]  ;;  %v11632_v62 = vld [vmem:[#allocation59_spill] sm:$0xff] }
 0x650   :  { %3164 = vmatprep.subr.bf16.mxu1 %v8718_v40  ;;  %3205 = vmatprep.subr.bf16.mxu0 %v8721_v18  ;;  %v11613_v40 = vld [vmem:[#allocation35_spill] sm:$0xff]  ;;  %v11614_v18 = vld [vmem:[#allocation36_spill] sm:$0xff] }
 0x651   :  { %3194 = vmatprep.mubr.bf16.mxu1 %v11344_v14  ;;  %3235 = vmatprep.mubr.bf16.mxu0 %v11344_v14 }
 0x653   :  { %3165 = vmatpush1.bf16.msra.mxu1 %v8726_v50  ;;  %3206 = vmatpush1.bf16.msra.mxu0 %v8729_v2  ;;  %v11615_v50 = vld [vmem:[#allocation37_spill] sm:$0xff]  ;;  %v11616_v2 = vld [vmem:[#allocation38_spill] sm:$0xff] }
 0x654   :  { %3166 = vmatprep.subr.bf16.mxu1 %v8732_v31  ;;  %3207 = vmatprep.subr.bf16.mxu0 %v8735_v30  ;;  %v11617_v31 = vld [vmem:[#allocation39_spill] sm:$0xff]  ;;  %v11618_v30 = vld [vmem:[#allocation40_spill] sm:$0xff] }
 0x657   :  { %3167 = vmatpush1.bf16.msra.mxu1 %v8738_v34  ;;  %3208 = vmatpush1.bf16.msra.mxu0 %v8741_v35  ;;  %v6714_v34 = vpop.eup %6713 }
 0x658   :  { %3168 = vmatprep.subr.bf16.mxu1 %v8744_v52  ;;  %3209 = vmatprep.subr.bf16.mxu0 %v8747_v56  ;;  %v11619_v52 = vld [vmem:[#allocation41_spill] sm:$0xff]  ;;  %v11620_v56 = vld [vmem:[#allocation42_spill] sm:$0xff] }
 0x659   :  { %v6716_v35 = vpop.eup %6715 }
 0x65b   :  { %3169 = vmatpush1.bf16.msra.mxu1 %v8750_v57  ;;  %3210 = vmatpush1.bf16.msra.mxu0 %v8753_v51  ;;  %v11621_v57 = vld [vmem:[#allocation43_spill] sm:$0xff]  ;;  %v2972_v51 = vmul.f32 %v6716_v35, %v6714_v34  ;;  %v11641_v34 = vld [vmem:[#allocation68_spill] sm:$0xff]  ;;  %v11642_v35 = vld [vmem:[#allocation69_spill] sm:$0xff] }
 0x65c   :  { %3170 = vmatprep.subr.bf16.mxu1 %v8757_v25  ;;  %3211 = vmatprep.subr.bf16.mxu0 %v8760_v41  ;;  %v11622_v25 = vld [vmem:[#allocation44_spill] sm:$0xff] }
 0x65d   :  { %v9220_v41 = vpack.c.bf16 %v2972_v51, %v2972_v51  ;;  %v11646_v51 = vld [vmem:[#allocation73_spill] sm:$0xff] }
 0x65f   :  { %3171 = vmatpush1.bf16.msra.mxu1 %v11611_v45  ;;  %3212 = vmatpush1.bf16.msra.mxu0 %v11612_v23  ;;  %v11633_v45 = vld [vmem:[#allocation60_spill] sm:$0xff]  ;;  %v11634_v23 = vld [vmem:[#allocation61_spill] sm:$0xff] }
 0x660   :  { %3172 = vmatprep.subr.bf16.mxu1 %v11613_v40  ;;  %3213 = vmatprep.subr.bf16.mxu0 %v11614_v18  ;;  %v11635_v40 = vld [vmem:[#allocation62_spill] sm:$0xff]  ;;  %v11636_v18 = vld [vmem:[#allocation63_spill] sm:$0xff] }
 0x663   :  { %3173 = vmatpush1.bf16.msra.mxu1 %v11615_v50  ;;  %3214 = vmatpush1.bf16.msra.mxu0 %v11616_v2  ;;  %v11637_v50 = vld [vmem:[#allocation64_spill] sm:$0xff]  ;;  %v11638_v2 = vld [vmem:[#allocation65_spill] sm:$0xff] }
 0x664   :  { %3174 = vmatprep.subr.bf16.mxu1 %v11617_v31  ;;  %3215 = vmatprep.subr.bf16.mxu0 %v11618_v30  ;;  %v11639_v31 = vld [vmem:[#allocation66_spill] sm:$0xff]  ;;  %v11640_v30 = vld [vmem:[#allocation67_spill] sm:$0xff] }
 0x667   :  { %3175 = vmatpush1.bf16.msra.mxu1 %v11619_v52  ;;  %3216 = vmatpush1.bf16.msra.mxu0 %v11620_v56  ;;  %v11643_v52 = vld [vmem:[#allocation70_spill] sm:$0xff]  ;;  %v11644_v56 = vld [vmem:[#allocation71_spill] sm:$0xff] }
 0x668   :  { %3176 = vmatprep.subr.bf16.mxu1 %v11621_v57  ;;  %3217 = vmatprep.subr.bf16.mxu0 %v8796_v26  ;;  %v11627_v26 = vld [vmem:[#allocation49_spill] sm:$0xff]  ;;  %v11645_v57 = vld [vmem:[#allocation72_spill] sm:$0xff] }
 0x66b   :  { %3177 = vmatpush1.bf16.msra.mxu1 %v8799_v33  ;;  %3218 = vmatpush1.bf16.msra.mxu0 %v11622_v25  ;;  %v11629_v33 = vld [vmem:[#allocation56_spill] sm:$0xff]  ;;  %v11647_v25 = vld [vmem:[#allocation74_spill] sm:$0xff] }
 0x66c   :  { %3244 = vmatprep.subr.bf16.mxu1 %v11623_v47  ;;  %3285 = vmatprep.subr.bf16.mxu0 %v11624_v39  ;;  %v11648_v47 = vld [vmem:[#allocation75_spill] sm:$0xff]  ;;  %v11649_v39 = vld [vmem:[#allocation76_spill] sm:$0xff] }
 0x66e   :  { %3195 = vmatmul.mubr.bf16.vlgmr.msra.gmra.mrb[40].mxu1 %v9220_v41  ;;  %3236 = vmatmul.mubr.bf16.vlgmr.msra.gmra.mrb[44].mxu0 %v9220_v41 }
 0x66f   :  { %3245 = vmatpush1.bf16.msra.mxu1 %v11625_v1  ;;  %3286 = vmatpush1.bf16.msra.mxu0 %v11626_v37  ;;  %v11650_v1 = vld [vmem:[#allocation17_spill] sm:$0xff]  ;;  %v9283_v37 = vld [vmem:[#allocation3 + $0x24] ss:$16 sps:$4 sm:$0xff]  }
 0x670   :  { %3246 = vmatprep.subr.bf16.mxu1 %v11627_v26  ;;  %3287 = vmatprep.subr.bf16.mxu0 %v11628_v46  ;;  %v9286_v26 = vld [vmem:[#allocation3 + $0x2c] ss:$16 sps:$4 sm:$0xff]   ;;  %v9291_v46 = vld [vmem:[#allocation3 + $0x20] ss:$16 sps:$4 sm:$0xff]  }
 0x671   :  { %3276 = vmatprep.mubr.bf16.mxu1 %v11344_v14  ;;  %3317 = vmatprep.mubr.bf16.mxu0 %v11344_v14 }
 0x673   :  { %3247 = vmatpush1.bf16.msra.mxu1 %v11629_v33  ;;  %3288 = vmatpush1.bf16.msra.mxu0 %v11630_v10  ;;  %v9294_v33 = vld [vmem:[#allocation3 + $0x28] ss:$16 sps:$4 sm:$0xff]   ;;  %v9297_v10 = vld [vmem:[#allocation3 + $0x44] ss:$16 sps:$4 sm:$0xff]  }
 0x674   :  { %3248 = vmatprep.subr.bf16.mxu1 %v11631_v48  ;;  %3289 = vmatprep.subr.bf16.mxu0 %v11632_v62  ;;  %v9300_v48 = vld [vmem:[#allocation3 + $0x4c] ss:$16 sps:$4 sm:$0xff]   ;;  %v9303_v62 = vld [vmem:[#allocation3 + $0x40] ss:$16 sps:$4 sm:$0xff]  }
 0x677   :  { %3249 = vmatpush1.bf16.msra.mxu1 %v11633_v45  ;;  %3290 = vmatpush1.bf16.msra.mxu0 %v11634_v23  ;;  %v9306_v45 = vld [vmem:[#allocation3 + $0x48] ss:$16 sps:$4 sm:$0xff]   ;;  %v9309_v23 = vld [vmem:[#allocation3 + $0x64] ss:$16 sps:$4 sm:$0xff]  }
 0x678   :  { %3250 = vmatprep.subr.bf16.mxu1 %v11635_v40  ;;  %3291 = vmatprep.subr.bf16.mxu0 %v11636_v18  ;;  %v9312_v40 = vld [vmem:[#allocation3 + $0x6c] ss:$16 sps:$4 sm:$0xff]   ;;  %v9315_v18 = vld [vmem:[#allocation3 + $0x60] ss:$16 sps:$4 sm:$0xff]  }
 0x679   :  { %11651 = vst [vmem:[#allocation25_spill] sm:$0xff] %v9315_v18 }
 0x67b   :  { %3251 = vmatpush1.bf16.msra.mxu1 %v11637_v50  ;;  %3292 = vmatpush1.bf16.msra.mxu0 %v11638_v2  ;;  %v9318_v50 = vld [vmem:[#allocation3 + $0x68] ss:$16 sps:$4 sm:$0xff]   ;;  %v9321_v2 = vld [vmem:[#allocation3 + $0x84] ss:$16 sps:$4 sm:$0xff]  }
 0x67c   :  { %3252 = vmatprep.subr.bf16.mxu1 %v11639_v31  ;;  %3293 = vmatprep.subr.bf16.mxu0 %v11640_v30  ;;  %11652 = vst [vmem:[#allocation26_spill] sm:$0xff] %v9318_v50  ;;  %11653 = vst [vmem:[#allocation27_spill] sm:$0xff] %v9321_v2  ;;  %v9324_v31 = vld [vmem:[#allocation3 + $0x8c] ss:$16 sps:$4 sm:$0xff]   ;;  %v9327_v30 = vld [vmem:[#allocation3 + $0x80] ss:$16 sps:$4 sm:$0xff]  }
 0x67d   :  { %11654 = vst [vmem:[#allocation28_spill] sm:$0xff] %v9324_v31  ;;  %11655 = vst [vmem:[#allocation32_spill] sm:$0xff] %v9327_v30 }
 0x67f   :  { %3253 = vmatpush1.bf16.msra.mxu1 %v11641_v34  ;;  %3294 = vmatpush1.bf16.msra.mxu0 %v11642_v35  ;;  %v9330_v34 = vld [vmem:[#allocation3 + $0x88] ss:$16 sps:$4 sm:$0xff]   ;;  %v9333_v35 = vld [vmem:[#allocation3 + $0xa4] ss:$16 sps:$4 sm:$0xff]  }
 0x680   :  { %3254 = vmatprep.subr.bf16.mxu1 %v11643_v52  ;;  %3295 = vmatprep.subr.bf16.mxu0 %v11644_v56  ;;  %11656 = vst [vmem:[#allocation33_spill] sm:$0xff] %v9330_v34  ;;  %11657 = vst [vmem:[#allocation34_spill] sm:$0xff] %v9333_v35  ;;  %v9336_v52 = vld [vmem:[#allocation3 + $0xac] ss:$16 sps:$4 sm:$0xff]   ;;  %v9339_v56 = vld [vmem:[#allocation3 + $0xa0] ss:$16 sps:$4 sm:$0xff]  }
 0x681   :  { %11658 = vst [vmem:[#allocation35_spill] sm:$0xff] %v9336_v52  ;;  %11659 = vst [vmem:[#allocation36_spill] sm:$0xff] %v9339_v56 }
 0x683   :  { %3255 = vmatpush1.bf16.msra.mxu1 %v11645_v57  ;;  %3296 = vmatpush1.bf16.msra.mxu0 %v11646_v51  ;;  %v9342_v57 = vld [vmem:[#allocation3 + $0xa8] ss:$16 sps:$4 sm:$0xff]   ;;  %v9345_v51 = vld [vmem:[#allocation3 + $0xc4] ss:$16 sps:$4 sm:$0xff]  }
 0x684   :  { %3256 = vmatprep.subr.bf16.mxu1 %v11647_v25  ;;  %3297 = vmatprep.subr.bf16.mxu0 %v11648_v47  ;;  %11660 = vst [vmem:[#allocation37_spill] sm:$0xff] %v9342_v57  ;;  %11661 = vst [vmem:[#allocation38_spill] sm:$0xff] %v9345_v51  ;;  %v9348_v25 = vld [vmem:[#allocation3 + $0xcc] ss:$16 sps:$4 sm:$0xff]   ;;  %v9351_v47 = vld [vmem:[#allocation3 + $0xc0] ss:$16 sps:$4 sm:$0xff]  }
 0x685   :  { %11662 = vst [vmem:[#allocation39_spill] sm:$0xff] %v9348_v25  ;;  %11663 = vst [vmem:[#allocation40_spill] sm:$0xff] %v9351_v47 }
 0x687   :  { %3257 = vmatpush1.bf16.msra.mxu1 %v8889_v28  ;;  %3298 = vmatpush1.bf16.msra.mxu0 %v8892_v49  ;;  %v9277_v49 = vld [vmem:[#allocation3] ss:$16 sps:$4 sm:$0xff]  }
 0x688   :  { %3258 = vmatprep.subr.bf16.mxu1 %v8895_v54  ;;  %3299 = vmatprep.subr.bf16.mxu0 %v8898_v60  ;;  %v6011_v60 = vld [vmem:[%s10871_s0 + $0x20] sm:$0xff] }
 0x689   :  { %v9269_v54 = vld [vmem:[#allocation3 + $0x4] ss:$16 sps:$4 sm:$0xff]   ;;  %v3350_v28 = vpack.c.bf16 %v6011_v60, %v6011_v60 }
 0x68a   :  { %v9357_v60 = vld [vmem:[#allocation3 + $0xe4] ss:$16 sps:$4 sm:$0xff]  }
 0x68b   :  { %3259 = vmatpush1.bf16.msra.mxu1 %v11649_v39  ;;  %3300 = vmatpush1.bf16.msra.mxu0 %v8904_v61  ;;  %v9272_v61 = vld [vmem:[#allocation3 + $0xc] ss:$16 sps:$4 sm:$0xff]   ;;  %v9354_v39 = vld [vmem:[#allocation3 + $0xc8] ss:$16 sps:$4 sm:$0xff]   ;;  %11665 = vst [vmem:[#allocation42_spill] sm:$0xff] %v9357_v60 }
 0x68c   :  { %3354 = vmatprep.subr.bf16.mxu1 %v7761_v21  ;;  %3395 = vmatprep.subr.bf16.mxu0 %v11650_v1  ;;  %11664 = vst [vmem:[#allocation41_spill] sm:$0xff] %v9354_v39 }
 0x68e   :  { %3277 = vmatmul.mubr.bf16.vlgmr.msra.gmra.mrb[40].mxu1 %v9082_v63  ;;  %3318 = vmatmul.mubr.bf16.vlgmr.msra.gmra.mrb[44].mxu0 %v9082_v63  ;;  %v9280_v63 = vld [vmem:[#allocation3 + $0x8] ss:$16 sps:$4 sm:$0xff]  }
 0x68f   :  { %3355 = vmatpush1.bf16.msra.mxu1 %v7756_v19  ;;  %3396 = vmatpush1.bf16.msra.mxu0 %v7765_v24 }
 0x690   :  { %3386 = vmatprep.mubr.bf16.mxu1 %v11344_v14  ;;  %3427 = vmatprep.mubr.bf16.mxu0 %v11344_v14 }
 0x691   :  { %3436 = vmatprep.subr.bf16.mxu1 %v9269_v54  ;;  %3477 = vmatprep.subr.bf16.mxu0 %v9272_v61 }
 0x696   :  { %6012 = vmatmul.mubr.msk.bf16.vlgmr.msra.gmra.mrb[44].mxu1 %vm130_vm4, %v3350_v28  ;;  %6013 = vmatmul.mubr.msk.bf16.vlgmr.msra.gmra.mrb[48].mxu0 %vm130_vm4, %v3350_v28  ;;  %v9360_v28 = vld [vmem:[#allocation3 + $0xec] ss:$16 sps:$4 sm:$0xff]  }
 0x697   :  { %3437 = vmatpush1.bf16.msra.mxu1 %v9277_v49  ;;  %3478 = vmatpush1.bf16.msra.mxu0 %v9280_v63  ;;  %11666 = vst [vmem:[#allocation43_spill] sm:$0xff] %v9360_v28 }
 0x698   :  { %3438 = vmatprep.subr.bf16.mxu1 %v9283_v37  ;;  %3479 = vmatprep.subr.bf16.mxu0 %v9286_v26 }
 0x699   :  { %3468 = vmatprep.mubr.bf16.mxu1 %v11344_v14  ;;  %3509 = vmatprep.mubr.bf16.mxu0 %v11344_v14 }
 0x69b   :  { %3439 = vmatpush1.bf16.msra.mxu1 %v9291_v46  ;;  %3480 = vmatpush1.bf16.msra.mxu0 %v9294_v33 }
 0x69c   :  { %3440 = vmatprep.subr.bf16.mxu1 %v9297_v10  ;;  %3481 = vmatprep.subr.bf16.mxu0 %v9300_v48 }
 0x69f   :  { %3441 = vmatpush1.bf16.msra.mxu1 %v9303_v62  ;;  %3482 = vmatpush1.bf16.msra.mxu0 %v9306_v45 }
 0x6a0   :  { %3442 = vmatprep.subr.bf16.mxu1 %v9309_v23  ;;  %3483 = vmatprep.subr.bf16.mxu0 %v9312_v40 }
 0x6a3   :  { %3443 = vmatpush1.bf16.msra.mxu1 %v9315_v18  ;;  %3484 = vmatpush1.bf16.msra.mxu0 %v9318_v50 }
 0x6a4   :  { %3444 = vmatprep.subr.bf16.mxu1 %v9321_v2  ;;  %3485 = vmatprep.subr.bf16.mxu0 %v9324_v31 }
 0x6a7   :  { %3445 = vmatpush1.bf16.msra.mxu1 %v9327_v30  ;;  %3486 = vmatpush1.bf16.msra.mxu0 %v9330_v34 }
 0x6a8   :  { %3446 = vmatprep.subr.bf16.mxu1 %v9333_v35  ;;  %3487 = vmatprep.subr.bf16.mxu0 %v9336_v52 }
 0x6ab   :  { %3447 = vmatpush1.bf16.msra.mxu1 %v9339_v56  ;;  %3488 = vmatpush1.bf16.msra.mxu0 %v9342_v57  ;;  %v11699_v57 = vld [vmem:[#allocation29_spill] sm:$0xff] }
 0x6ac   :  { %3448 = vmatprep.subr.bf16.mxu1 %v9345_v51  ;;  %3489 = vmatprep.subr.bf16.mxu0 %v9348_v25  ;;  %v9363_v51 = vld [vmem:[#allocation3 + $0xe0] ss:$16 sps:$4 sm:$0xff]   ;;  %v9366_v25 = vld [vmem:[#allocation3 + $0xe8] ss:$16 sps:$4 sm:$0xff]  }
 0x6ad   :  { %11667 = vst [vmem:[#allocation44_spill] sm:$0xff] %v9363_v51  ;;  %11668 = vst [vmem:[#allocation45_spill] sm:$0xff] %v9366_v25 }
 0x6af   :  { %3449 = vmatpush1.bf16.msra.mxu1 %v9351_v47  ;;  %3490 = vmatpush1.bf16.msra.mxu0 %v9354_v39  ;;  %v11680_v39 = vld [vmem:[#allocation88_spill] sm:$0xff]  ;;  %v11681_v47 = vld [vmem:[#allocation51_spill] sm:$0xff] }
 0x6b0   :  { %3450 = vmatprep.subr.bf16.mxu1 %v9357_v60  ;;  %3491 = vmatprep.subr.bf16.mxu0 %v9360_v28  ;;  %v11669_v28 = vld [vmem:[#allocation77_spill] sm:$0xff]  ;;  %v11670_v60 = vld [vmem:[#allocation78_spill] sm:$0xff] }
 0x6b3   :  { %3451 = vmatpush1.bf16.msra.mxu1 %v9363_v51  ;;  %3492 = vmatpush1.bf16.msra.mxu0 %v9366_v25  ;;  %v11671_v25 = vld [vmem:[#allocation79_spill] sm:$0xff]  ;;  %v11674_v51 = vld [vmem:[#allocation82_spill] sm:$0xff] }
 0x6b4   :  { %3541 = vmatprep.subr.bf16.mxu1 %v8954_v11  ;;  %3582 = vmatprep.subr.bf16.mxu0 %v8957_v9  ;;  %v11672_v11 = vld [vmem:[#allocation80_spill] sm:$0xff]  ;;  %v11673_v9 = vld [vmem:[#allocation81_spill] sm:$0xff] }
 0x6b6   :  { %3469 = vmatmul.mubr.bf16.vlgmr.msra.gmra.mrb[44].mxu1 %v9220_v41  ;;  %3510 = vmatmul.mubr.bf16.vlgmr.msra.gmra.mrb[48].mxu0 %v9220_v41  ;;  %v11675_v41 = vld [vmem:[#allocation83_spill] sm:$0xff] }
 0x6b7   :  { %3542 = vmatpush1.bf16.msra.mxu1 %v8962_v8  ;;  %3583 = vmatpush1.bf16.msra.mxu0 %v8965_v44  ;;  %v11676_v8 = vld [vmem:[#allocation84_spill] sm:$0xff]  ;;  %v11677_v44 = vld [vmem:[#allocation85_spill] sm:$0xff] }
 0x6b8   :  { %3543 = vmatprep.subr.bf16.mxu1 %v11669_v28  ;;  %3584 = vmatprep.subr.bf16.mxu0 %v11670_v60  ;;  %v11678_v28 = vld [vmem:[#allocation86_spill] sm:$0xff]  ;;  %v11679_v60 = vld [vmem:[#allocation87_spill] sm:$0xff] }
 0x6b9   :  { %3573 = vmatprep.mubr.bf16.mxu1 %v11344_v14  ;;  %3614 = vmatprep.mubr.bf16.mxu0 %v11344_v14 }
 0x6bb   :  { %3544 = vmatpush1.bf16.msra.mxu1 %v11671_v25  ;;  %3585 = vmatpush1.bf16.msra.mxu0 %v11672_v11  ;;  %v11682_v25 = vld [vmem:[#allocation52_spill] sm:$0xff]  ;;  %v11683_v11 = vld [vmem:[#allocation90_spill] sm:$0xff] }
 0x6bc   :  { %3545 = vmatprep.subr.bf16.mxu1 %v11673_v9  ;;  %3586 = vmatprep.subr.bf16.mxu0 %v11674_v51  ;;  %v11684_v9 = vld [vmem:[#allocation91_spill] sm:$0xff]  ;;  %v11685_v51 = vld [vmem:[#allocation54_spill] sm:$0xff] }
 0x6bf   :  { %3546 = vmatpush1.bf16.msra.mxu1 %v11675_v41  ;;  %3587 = vmatpush1.bf16.msra.mxu0 %v11676_v8  ;;  %v11686_v41 = vld [vmem:[#allocation53_spill] sm:$0xff]  ;;  %v11687_v8 = vld [vmem:[#allocation92_spill] sm:$0xff] }
 0x6c0   :  { %3547 = vmatprep.subr.bf16.mxu1 %v11677_v44  ;;  %3588 = vmatprep.subr.bf16.mxu0 %v11678_v28  ;;  %v11688_v44 = vld [vmem:[#allocation93_spill] sm:$0xff]  ;;  %v11689_v28 = vld [vmem:[#allocation94_spill] sm:$0xff] }
 0x6c3   :  { %3548 = vmatpush1.bf16.msra.mxu1 %v11679_v60  ;;  %3589 = vmatpush1.bf16.msra.mxu0 %v11680_v39  ;;  %v11690_v60 = vld [vmem:[#allocation95_spill] sm:$0xff]  ;;  %v11691_v39 = vld [vmem:[#allocation96_spill] sm:$0xff] }
 0x6c4   :  { %3549 = vmatprep.subr.bf16.mxu1 %v11681_v47  ;;  %3590 = vmatprep.subr.bf16.mxu0 %v11682_v25  ;;  %v11692_v47 = vld [vmem:[#allocation97_spill] sm:$0xff]  ;;  %v11693_v25 = vld [vmem:[#allocation98_spill] sm:$0xff] }
 0x6c7   :  { %3550 = vmatpush1.bf16.msra.mxu1 %v11683_v11  ;;  %3591 = vmatpush1.bf16.msra.mxu0 %v11684_v9  ;;  %v11694_v11 = vld [vmem:[#allocation99_spill] sm:$0xff]  ;;  %v11695_v9 = vld [vmem:[#allocation100_spill] sm:$0xff] }
 0x6c8   :  { %3551 = vmatprep.subr.bf16.mxu1 %v11685_v51  ;;  %3592 = vmatprep.subr.bf16.mxu0 %v11686_v41  ;;  %v11696_v51 = vld [vmem:[#allocation101_spill] sm:$0xff]  ;;  %v11697_v41 = vld [vmem:[#allocation102_spill] sm:$0xff] }
 0x6cb   :  { %3552 = vmatpush1.bf16.msra.mxu1 %v11687_v8  ;;  %3593 = vmatpush1.bf16.msra.mxu0 %v11688_v44  ;;  %v11698_v8 = vld [vmem:[#allocation103_spill] sm:$0xff] }
 0x6cc   :  { %3553 = vmatprep.subr.bf16.mxu1 %v11689_v28  ;;  %3594 = vmatprep.subr.bf16.mxu0 %v11690_v60 }
 0x6cf   :  { %3554 = vmatpush1.bf16.msra.mxu1 %v11691_v39  ;;  %3595 = vmatpush1.bf16.msra.mxu0 %v11692_v47  ;;  %v11700_v47 = vld [vmem:[#allocation30_spill] sm:$0xff] }
 0x6d0   :  { %3555 = vmatprep.subr.bf16.mxu1 %v11693_v25  ;;  %3596 = vmatprep.subr.bf16.mxu0 %v11694_v11 }
 0x6d3   :  { %3556 = vmatpush1.bf16.msra.mxu1 %v11695_v9  ;;  %3597 = vmatpush1.bf16.msra.mxu0 %v11696_v51 }
 0x6d4   :  { %3624 = vmatprep.subr.bf16.mxu1 %v11697_v41  ;;  %3665 = vmatprep.subr.bf16.mxu0 %v11698_v8  ;;  %v11701_v41 = vld [vmem:[#allocation31_spill] sm:$0xff] }
 0x721   :  { %v3091_v44 = vpop.f32.mrb[36].mxu1  ;;  %v3132_v28 = vpop.f32.mrb[40].mxu0 }
 0x722   :  { %v6068_v60 = vadd.f32 %v3091_v44, %v11699_v57  ;;  %v3093_v56 = vpop.f32.mrb[37].mxu1  ;;  %v9408_v39 = vpop.f32.mrb[41].mxu0  ;;  %v6070_v8 = vadd.f32 %v3132_v28, %v11701_v41 }
 0x723   :  { %v6069_v52 = vadd.f32 %v3093_v56, %v11700_v47  ;;  %v3095_v25 = vpop.f32.mrb[38].mxu1  ;;  %v3136_v35 = vpop.f32.mrb[42].mxu0 }
 0x724   :  { %v3139_v11 = vsub.f32 0.0, %v6068_v60  ;;  %v3096_v34 = vpop.f32.mrb[39].mxu1  ;;  %v3137_v9 = vpop.f32.mrb[43].mxu0 }
 0x725   :  { %v3144_v30 = vsub.f32 0.0, %v6069_v52 }
 0x726   :  { %v3140_v51 = vmul.f32 1.442695, %v3139_v11 }
 0x727   :  { %v3145_v31 = vmul.f32 1.442695, %v3144_v30 }
 0x728   :  { %6717 = vpow2.f32 %v3140_v51 }
 0x729   :  { %6719 = vpow2.f32 %v3145_v31  ;;  %v11702_v31 = vld [vmem:[#allocation89_spill] sm:$0xff] }
 0x72a   :  { %6721 = vtanh.f32 %v6070_v8 }
 0x732   :  { %v6718_v2 = vpop.eup %6717 }
 0x733   :  { %v6720_v50 = vpop.eup %6719  ;;  %v3142_v44 = vadd.f32 1.0, %v6718_v2 }
 0x734   :  { %v3147_v57 = vadd.f32 1.0, %v6720_v50  ;;  %v6722_v56 = vpop.eup %6721 }
 0x735   :  { %6723 = vrcp.f32 %v3142_v44 }
 0x736   :  { %6725 = vrcp.f32 %v3147_v57 }
 0x73f   :  { %v6724_v25 = vpop.eup %6723 }
 0x740   :  { %v6726_v35 = vpop.eup %6725  ;;  %v3157_v60 = vmul.f32 %v6724_v25, %v6722_v56 }
 0x741   :  { %v3156_v34 = vmul.f32 %v6726_v35, %v9066_v38 }
 0x743   :  { %v9413_v52 = vadd.f32 %v3157_v60, %v3156_v34 }
 0x761   :  { %v3278_v30 = vpop.f32.mrb[40].mxu1  ;;  %v3319_v11 = vpop.f32.mrb[44].mxu0 }
 0x762   :  { %v6072_v9 = vadd.f32 %v3278_v30, %v11702_v31  ;;  %v3280_v28 = vpop.f32.mrb[41].mxu1  ;;  %v3321_v51 = vpop.f32.mrb[45].mxu0  ;;  %v6074_v60 = vadd.f32 %v3319_v11, %v8286_v53  ;;  %v6071_v11 = vadd.f32 %v9408_v39, %v11594_v20 }
 0x763   :  { %v6073_v2 = vadd.f32 %v3280_v28, %v11483_v42  ;;  %v3282_v8 = vpop.f32.mrb[42].mxu1  ;;  %v3323_v50 = vpop.f32.mrb[46].mxu0  ;;  %v6075_v38 = vadd.f32 %v3321_v51, %v8282_v12 }
 0x764   :  { %v3326_v44 = vsub.f32 0.0, %v6072_v9  ;;  %v3283_v57 = vpop.f32.mrb[43].mxu1  ;;  %v3324_v41 = vpop.f32.mrb[47].mxu0 }
 0x765   :  { %v3331_v47 = vsub.f32 0.0, %v6073_v2  ;;  %v3338_v25 = vsub.f32 0.0, %v6075_v38 }
 0x766   :  { %v3327_v18 = vmul.f32 1.442695, %v3326_v44 }
 0x767   :  { %v3332_v56 = vmul.f32 1.442695, %v3331_v47  ;;  %v3339_v35 = vmul.f32 1.442695, %v3338_v25 }
 0x768   :  { %6727 = vpow2.f32 %v3327_v18 }
 0x769   :  { %6729 = vpow2.f32 %v3332_v56 }
 0x76a   :  { %6731 = vpow2.f32 %v3339_v35 }
 0x76b   :  { %6733 = vtanh.f32 %v6074_v60 }
 0x772   :  { %v6728_v34 = vpop.eup %6727 }
 0x773   :  { %v6730_v30 = vpop.eup %6729  ;;  %v3329_v31 = vadd.f32 1.0, %v6728_v34 }
 0x774   :  { %v3334_v28 = vadd.f32 1.0, %v6730_v30  ;;  %v6732_v41 = vpop.eup %6731 }
 0x775   :  { %6735 = vrcp.f32 %v3329_v31  ;;  %v6734_v9 = vpop.eup %6733  ;;  %v3341_v51 = vadd.f32 1.0, %v6732_v41  ;;  %v3151_v31 = vsub.f32 0.0, %v6071_v11 }
 0x776   :  { %6737 = vrcp.f32 %v3334_v28 }
 0x777   :  { %6739 = vrcp.f32 %v3341_v51 }
 0x77f   :  { %v6736_v2 = vpop.eup %6735 }
 0x780   :  { %v6738_v47 = vpop.eup %6737  ;;  %v3344_v8 = vmul.f32 %v6736_v2, %v6734_v9  ;;  %v3152_v2 = vmul.f32 1.442695, %v3151_v31  ;;  %v11703_v31 = vld [vmem:[#allocation104_spill] sm:$0xff] }
 0x781   :  { %v3343_v18 = vmul.f32 %v6738_v47, %v9073_v7  ;;  %v6740_v9 = vpop.eup %6739 }
 0x783   :  { %v9420_v50 = vadd.f32 %v3344_v8, %v3343_v18 }
 0x785   :  { %6741 = vtanh.f32 %v9420_v50 }
 0x789   :  { %v3470_v44 = vpop.f32.mrb[44].mxu1  ;;  %v3511_v57 = vpop.f32.mrb[48].mxu0 }
 0x78a   :  { %v6076_v56 = vadd.f32 %v3470_v44, %v11487_v32  ;;  %v3472_v38 = vpop.f32.mrb[45].mxu1  ;;  %v3513_v25 = vpop.f32.mrb[49].mxu0  ;;  %v6078_v11 = vadd.f32 %v3511_v57, %v8014_v17  ;;  %v11705_v57 = vld [vmem:[#allocation106_spill] sm:$0xff] }
 0x78b   :  { %v6077_v35 = vadd.f32 %v3472_v38, %v7999_v58  ;;  %v3474_v60 = vpop.f32.mrb[46].mxu1  ;;  %v3515_v34 = vpop.f32.mrb[50].mxu0  ;;  %v11707_v38 = vld [vmem:[#allocation108_spill] sm:$0xff] }
 0x78c   :  { %v3518_v7 = vsub.f32 0.0, %v6076_v56  ;;  %v3475_v30 = vpop.f32.mrb[47].mxu1  ;;  %v3516_v28 = vpop.f32.mrb[51].mxu0  ;;  %v11704_v56 = vld [vmem:[#allocation105_spill] sm:$0xff]  ;;  %v11711_v60 = vld [vmem:[#allocation112_spill] sm:$0xff]  ;;  %v11712_v34 = vld [vmem:[#allocation18_spill] sm:$0xff] }
 0x78d   :  { %v3523_v41 = vsub.f32 0.0, %v6077_v35  ;;  %v11710_v35 = vld [vmem:[#allocation111_spill] sm:$0xff] }
 0x78e   :  { %v3519_v47 = vmul.f32 1.442695, %v3518_v7  ;;  %v11713_v30 = vld [vmem:[#allocation55_spill] sm:$0xff] }
 0x78f   :  { %v6742_v8 = vpop.eup %6741  ;;  %v3524_v39 = vmul.f32 1.442695, %v3523_v41  ;;  %v6079_v28 = vadd.f32 %v3513_v25, %v11713_v30  ;;  %v11714_v41 = vld [vmem:[#allocation19_spill] sm:$0xff] }
 0x790   :  { %6743 = vpow2.f32 %v3519_v47  ;;  %v3347_v51 = vmul.f32 %v6742_v8, %v6740_v9 }
 0x791   :  { %6745 = vpow2.f32 %v3524_v39  ;;  %v11715_v39 = vld [vmem:[#allocation20_spill] sm:$0xff] }
 0x792   :  { %6747 = vpow2.f32 %v3152_v2  ;;  %v9427_v18 = vpack.c.bf16 %v3347_v51, %v3347_v51  ;;  %v11716_v51 = vld [vmem:[#allocation21_spill] sm:$0xff] }
 0x793   :  { %6749 = vtanh.f32 %v6078_v11  ;;  %v3530_v11 = vsub.f32 0.0, %v6079_v28  ;;  %v9513_v28 = vld [vmem:[#allocation5 + $0x60] ss:$16 sps:$4 sm:$0xff]  }
 0x794   :  { %3574 = vmatmul.mubr.bf16.vlgmr.msra.gmra.mrb[48].mxu1 %v9427_v18  ;;  %3615 = vmatmul.mubr.bf16.vlgmr.msra.gmra.mrb[52].mxu0 %v9427_v18 }
 0x795   :  { %3625 = vmatpush1.bf16.msra.mxu1 %v9086_v3  ;;  %3666 = vmatpush1.bf16.msra.mxu0 %v9089_v36 }
 0x796   :  { %3626 = vmatprep.subr.bf16.mxu1 %v9092_v43  ;;  %3667 = vmatprep.subr.bf16.mxu0 %v9095_v55 }
 0x797   :  { %3656 = vmatprep.mubr.bf16.mxu1 %v11344_v14  ;;  %3697 = vmatprep.mubr.bf16.mxu0 %v11344_v14 }
 0x799   :  { %3627 = vmatpush1.bf16.msra.mxu1 %v9101_v4  ;;  %3668 = vmatpush1.bf16.msra.mxu0 %v9104_v6  ;;  %v11706_v4 = vld [vmem:[#allocation107_spill] sm:$0xff] }
 0x79a   :  { %v6744_v44 = vpop.eup %6743  ;;  %3628 = vmatprep.subr.bf16.mxu1 %v9107_v15  ;;  %3669 = vmatprep.subr.bf16.mxu0 %v9110_v0  ;;  %v11708_v15 = vld [vmem:[#allocation109_spill] sm:$0xff]  ;;  %v11709_v0 = vld [vmem:[#allocation110_spill] sm:$0xff] }
 0x79b   :  { %v6746_v3 = vpop.eup %6745  ;;  %v3521_v36 = vadd.f32 1.0, %v6744_v44  ;;  %v11717_v44 = vld [vmem:[#allocation22_spill] sm:$0xff] }
 0x79c   :  { %v6748_v43 = vpop.eup %6747  ;;  %v3526_v55 = vadd.f32 1.0, %v6746_v3  ;;  %v11718_v3 = vld [vmem:[#allocation23_spill] sm:$0xff] }
 0x79d   :  { %6751 = vrcp.f32 %v3521_v36  ;;  %3629 = vmatpush1.bf16.msra.mxu1 %v11703_v31  ;;  %3670 = vmatpush1.bf16.msra.mxu0 %v11704_v56  ;;  %v3154_v6 = vadd.f32 1.0, %v6748_v43  ;;  %v6750_v7 = vpop.eup %6749  ;;  %v9469_v56 = vld [vmem:[#allocation5 + $0x4] ss:$16 sps:$4 sm:$0xff]  }
 0x79e   :  { %6753 = vrcp.f32 %v3526_v55  ;;  %3630 = vmatprep.subr.bf16.mxu1 %v11705_v57  ;;  %3671 = vmatprep.subr.bf16.mxu0 %v11706_v4  ;;  %v3531_v55 = vmul.f32 1.442695, %v3530_v11  ;;  %v9472_v57 = vld [vmem:[#allocation5 + $0xc] ss:$16 sps:$4 sm:$0xff]   ;;  %v9492_v4 = vld [vmem:[#allocation5 + $0x28] ss:$16 sps:$4 sm:$0xff]  }
 0x79f   :  { %6755 = vtanh.f32 %v9413_v52  ;;  %v9538_v11 = vld [vmem:[#allocation5 + $0xa0] ss:$16 sps:$4 sm:$0xff]  }
 0x7a0   :  { %6757 = vrcp.f32 %v3154_v6  ;;  %v9495_v6 = vld [vmem:[#allocation5 + $0x44] ss:$16 sps:$4 sm:$0xff]  }
 0x7a1   :  { %3631 = vmatpush1.bf16.msra.mxu1 %v11707_v38  ;;  %3672 = vmatpush1.bf16.msra.mxu0 %v11708_v15  ;;  %6759 = vpow2.f32 %v3531_v55  ;;  %v9498_v38 = vld [vmem:[#allocation5 + $0x4c] ss:$16 sps:$4 sm:$0xff]   ;;  %v9550_v55 = vld [vmem:[#allocation5 + $0xc0] ss:$16 sps:$4 sm:$0xff]  }
 0x7a2   :  { %3632 = vmatprep.subr.bf16.mxu1 %v11709_v0  ;;  %3673 = vmatprep.subr.bf16.mxu0 %v11710_v35  ;;  %v9501_v0 = vld [vmem:[#allocation5 + $0x40] ss:$16 sps:$4 sm:$0xff]   ;;  %v9504_v35 = vld [vmem:[#allocation5 + $0x48] ss:$16 sps:$4 sm:$0xff]   ;;  %11722 = vst [vmem:[#allocation48_spill] sm:$0xff] %v9550_v55 }
 0x7a5   :  { %3633 = vmatpush1.bf16.msra.mxu1 %v11711_v60  ;;  %3674 = vmatpush1.bf16.msra.mxu0 %v11712_v34  ;;  %v9507_v60 = vld [vmem:[#allocation5 + $0x64] ss:$16 sps:$4 sm:$0xff]   ;;  %v9510_v34 = vld [vmem:[#allocation5 + $0x6c] ss:$16 sps:$4 sm:$0xff]  }
 0x7a6   :  { %3634 = vmatprep.subr.bf16.mxu1 %v11714_v41  ;;  %3675 = vmatprep.subr.bf16.mxu0 %v9149_v27  ;;  %v11719_v27 = vld [vmem:[#allocation24_spill] sm:$0xff]  ;;  %v9516_v41 = vld [vmem:[#allocation5 + $0x68] ss:$16 sps:$4 sm:$0xff]  }
 0x7a7   :  { %v6752_v9 = vpop.eup %6751 }
 0x7a8   :  { %v6754_v2 = vpop.eup %6753  ;;  %v3536_v47 = vmul.f32 %v6752_v9, %v6750_v7  ;;  %v9520_v9 = vld [vmem:[#allocation5 + $0x84] ss:$16 sps:$4 sm:$0xff]  }
 0x7a9   :  { %v3535_v8 = vmul.f32 %v6754_v2, %v9165_v16  ;;  %3635 = vmatpush1.bf16.msra.mxu1 %v11715_v39  ;;  %3676 = vmatpush1.bf16.msra.mxu0 %v11716_v51  ;;  %v6756_v36 = vpop.eup %6755  ;;  %v9523_v2 = vld [vmem:[#allocation5 + $0x8c] ss:$16 sps:$4 sm:$0xff]   ;;  %v9532_v39 = vld [vmem:[#allocation5 + $0xa4] ss:$16 sps:$4 sm:$0xff]  }
 0x7aa   :  { %3636 = vmatprep.subr.bf16.mxu1 %v11717_v44  ;;  %3677 = vmatprep.subr.bf16.mxu0 %v11718_v3  ;;  %v6758_v43 = vpop.eup %6757  ;;  %v9535_v51 = vld [vmem:[#allocation5 + $0xac] ss:$16 sps:$4 sm:$0xff]   ;;  %v9541_v44 = vld [vmem:[#allocation5 + $0xa8] ss:$16 sps:$4 sm:$0xff]   ;;  %v9544_v3 = vld [vmem:[#allocation5 + $0xc4] ss:$16 sps:$4 sm:$0xff]  }
 0x7ab   :  { %v9461_v25 = vadd.f32 %v3536_v47, %v3535_v8  ;;  %v3160_v16 = vmul.f32 %v6758_v43, %v6756_v36  ;;  %v6760_v15 = vpop.eup %6759  ;;  %v9526_v47 = vld [vmem:[#allocation5 + $0x80] ss:$16 sps:$4 sm:$0xff]   ;;  %v9529_v8 = vld [vmem:[#allocation5 + $0x88] ss:$16 sps:$4 sm:$0xff]   ;;  %11720 = vst [vmem:[#allocation46_spill] sm:$0xff] %v9544_v3 }
 0x7ac   :  { %v3533_v7 = vadd.f32 1.0, %v6760_v15  ;;  %v9547_v36 = vld [vmem:[#allocation5 + $0xcc] ss:$16 sps:$4 sm:$0xff]  }
 0x7ad   :  { %3637 = vmatpush1.bf16.msra.mxu1 %v9167_v59  ;;  %3678 = vmatpush1.bf16.msra.mxu0 %v11719_v27  ;;  %v3623_v31 = vpack.c.bf16 %v3160_v16, %v3160_v16  ;;  %v9484_v59 = vld [vmem:[#allocation5 + $0x2c] ss:$16 sps:$4 sm:$0xff]   ;;  %6761 = vtanh.f32 %v9461_v25  ;;  %11721 = vst [vmem:[#allocation47_spill] sm:$0xff] %v9547_v36  ;;  %v9553_v16 = vld [vmem:[#allocation5 + $0xc8] ss:$16 sps:$4 sm:$0xff]  }
 0x7ae   :  { %3638 = vmatprep.subr.bf16.mxu1 %v9173_v13  ;;  %3679 = vmatprep.subr.bf16.mxu0 %v9176_v29  ;;  %v9475_v13 = vld [vmem:[#allocation5] ss:$16 sps:$4 sm:$0xff]   ;;  %v9478_v29 = vld [vmem:[#allocation5 + $0x8] ss:$16 sps:$4 sm:$0xff]   ;;  %6763 = vrcp.f32 %v3533_v7  ;;  %11723 = vst [vmem:[#allocation49_spill] sm:$0xff] %v9553_v16 }
 0x7af   :  { %v9559_v15 = vld [vmem:[#allocation5 + $0xec] ss:$16 sps:$4 sm:$0xff]  }
 0x7b1   :  { %3639 = vmatpush1.bf16.msra.mxu1 %v9179_v5  ;;  %3680 = vmatpush1.bf16.msra.mxu0 %v9182_v22  ;;  %v9481_v22 = vld [vmem:[#allocation5 + $0x24] ss:$16 sps:$4 sm:$0xff]   ;;  %v9489_v5 = vld [vmem:[#allocation5 + $0x20] ss:$16 sps:$4 sm:$0xff]  }
 0x7b2   :  { %3729 = vmatprep.subr.bf16.mxu1 %v9469_v56  ;;  %3770 = vmatprep.subr.bf16.mxu0 %v9472_v57 }
 0x7b4   :  { %3657 = vmatmul.mubr.bf16.vlgmr.msra.gmra.mrb[48].mxu1 %v3623_v31  ;;  %3698 = vmatmul.mubr.bf16.vlgmr.msra.gmra.mrb[52].mxu0 %v3623_v31  ;;  %v9556_v31 = vld [vmem:[#allocation5 + $0xe4] ss:$16 sps:$4 sm:$0xff]  }
 0x7b5   :  { %3730 = vmatpush1.bf16.msra.mxu1 %v9475_v13  ;;  %3771 = vmatpush1.bf16.msra.mxu0 %v9478_v29  ;;  %11724 = vst [vmem:[#allocation50_spill] sm:$0xff] %v9556_v31 }
 0x7b6   :  { %3731 = vmatprep.subr.bf16.mxu1 %v9481_v22  ;;  %3772 = vmatprep.subr.bf16.mxu0 %v9484_v59 }
 0x7b7   :  { %3761 = vmatprep.mubr.bf16.mxu1 %v11344_v14  ;;  %3802 = vmatprep.mubr.bf16.mxu0 %v11344_v14  ;;  %v6762_v43 = vpop.eup %6761 }
 0x7b8   :  { %v6764_v27 = vpop.eup %6763 }
 0x7b9   :  { %3732 = vmatpush1.bf16.msra.mxu1 %v9489_v5  ;;  %3773 = vmatpush1.bf16.msra.mxu0 %v9492_v4  ;;  %v3539_v7 = vmul.f32 %v6764_v27, %v6762_v43  ;;  %v9578_v43 = vld [vmem:[#allocation7] ss:$16 sps:$4 sm:$0xff]   ;;  %v9581_v27 = vld [vmem:[#allocation7 + $0x8] ss:$16 sps:$4 sm:$0xff]  }
 0x7ba   :  { %3733 = vmatprep.subr.bf16.mxu1 %v9495_v6  ;;  %3774 = vmatprep.subr.bf16.mxu0 %v9498_v38  ;;  %11728 = vst [vmem:[#allocation59_spill] sm:$0xff] %v9578_v43  ;;  %11729 = vst [vmem:[#allocation60_spill] sm:$0xff] %v9581_v27 }
 0x7bd   :  { %3734 = vmatpush1.bf16.msra.mxu1 %v9501_v0  ;;  %3775 = vmatpush1.bf16.msra.mxu0 %v9504_v35 }
 0x7be   :  { %3735 = vmatprep.subr.bf16.mxu1 %v9507_v60  ;;  %3776 = vmatprep.subr.bf16.mxu0 %v9510_v34 }
 0x7c1   :  { %3736 = vmatpush1.bf16.msra.mxu1 %v9513_v28  ;;  %3777 = vmatpush1.bf16.msra.mxu0 %v9516_v41 }
 0x7c2   :  { %3737 = vmatprep.subr.bf16.mxu1 %v9520_v9  ;;  %3778 = vmatprep.subr.bf16.mxu0 %v9523_v2 }
 0x7c5   :  { %3738 = vmatpush1.bf16.msra.mxu1 %v9526_v47  ;;  %3779 = vmatpush1.bf16.msra.mxu0 %v9529_v8 }
 0x7c6   :  { %3739 = vmatprep.subr.bf16.mxu1 %v9532_v39  ;;  %3780 = vmatprep.subr.bf16.mxu0 %v9535_v51 }
 0x7c9   :  { %3740 = vmatpush1.bf16.msra.mxu1 %v9538_v11  ;;  %3781 = vmatpush1.bf16.msra.mxu0 %v9541_v44 }
 0x7ca   :  { %3741 = vmatprep.subr.bf16.mxu1 %v9544_v3  ;;  %3782 = vmatprep.subr.bf16.mxu0 %v9547_v36  ;;  %v9562_v36 = vld [vmem:[#allocation5 + $0xe0] ss:$16 sps:$4 sm:$0xff]   ;;  %v9565_v3 = vld [vmem:[#allocation5 + $0xe8] ss:$16 sps:$4 sm:$0xff]  }
 0x7cb   :  { %11725 = vst [vmem:[#allocation56_spill] sm:$0xff] %v9565_v3 }
 0x7cd   :  { %3742 = vmatpush1.bf16.msra.mxu1 %v9550_v55  ;;  %3783 = vmatpush1.bf16.msra.mxu0 %v9553_v16  ;;  %v9568_v55 = vpack.c.bf16 %v3539_v7, %v3539_v7  ;;  %v9570_v16 = vld [vmem:[#allocation7 + $0x4] ss:$16 sps:$4 sm:$0xff]  }
 0x7ce   :  { %3743 = vmatprep.subr.bf16.mxu1 %v9556_v31  ;;  %3784 = vmatprep.subr.bf16.mxu0 %v9559_v15  ;;  %11726 = vst [vmem:[#allocation57_spill] sm:$0xff] %v9570_v16  ;;  %v9573_v31 = vld [vmem:[#allocation7 + $0xc] ss:$16 sps:$4 sm:$0xff]   ;;  %v9584_v7 = vld [vmem:[#allocation7 + $0x24] ss:$16 sps:$4 sm:$0xff]  }
 0x7cf   :  { %11727 = vst [vmem:[#allocation58_spill] sm:$0xff] %v9573_v31  ;;  %11730 = vst [vmem:[#allocation61_spill] sm:$0xff] %v9584_v7 }
 0x7d1   :  { %3744 = vmatpush1.bf16.msra.mxu1 %v9562_v36  ;;  %3785 = vmatpush1.bf16.msra.mxu0 %v9565_v3  ;;  %v9607_v3 = vld [vmem:[#allocation7 + $0x48] ss:$16 sps:$4 sm:$0xff]  }
 0x7d2   :  { %3811 = vmatprep.subr.bf16.mxu1 %v9570_v16  ;;  %3852 = vmatprep.subr.bf16.mxu0 %v9573_v31  ;;  %v9587_v16 = vld [vmem:[#allocation7 + $0x2c] ss:$16 sps:$4 sm:$0xff]   ;;  %v9592_v31 = vld [vmem:[#allocation7 + $0x20] ss:$16 sps:$4 sm:$0xff]   ;;  %11737 = vst [vmem:[#allocation68_spill] sm:$0xff] %v9607_v3 }
 0x7d3   :  { %11731 = vst [vmem:[#allocation62_spill] sm:$0xff] %v9587_v16  ;;  %11732 = vst [vmem:[#allocation63_spill] sm:$0xff] %v9592_v31 }
 0x7d4   :  { %3762 = vmatmul.mubr.bf16.vlgmr.msra.gmra.mrb[52].mxu1 %v9568_v55  ;;  %3803 = vmatmul.mubr.bf16.vlgmr.msra.gmra.mrb[56].mxu0 %v9568_v55 }
 0x7d5   :  { %3812 = vmatpush1.bf16.msra.mxu1 %v9578_v43  ;;  %3853 = vmatpush1.bf16.msra.mxu0 %v9581_v27  ;;  %v9595_v43 = vld [vmem:[#allocation7 + $0x28] ss:$16 sps:$4 sm:$0xff]   ;;  %v9598_v27 = vld [vmem:[#allocation7 + $0x44] ss:$16 sps:$4 sm:$0xff]  }
 0x7d6   :  { %3813 = vmatprep.subr.bf16.mxu1 %v9584_v7  ;;  %3854 = vmatprep.subr.bf16.mxu0 %v9587_v16  ;;  %11733 = vst [vmem:[#allocation64_spill] sm:$0xff] %v9595_v43  ;;  %11734 = vst [vmem:[#allocation65_spill] sm:$0xff] %v9598_v27  ;;  %v9601_v7 = vld [vmem:[#allocation7 + $0x4c] ss:$16 sps:$4 sm:$0xff]   ;;  %v9604_v16 = vld [vmem:[#allocation7 + $0x40] ss:$16 sps:$4 sm:$0xff]  }
 0x7d7   :  { %3843 = vmatprep.mubr.bf16.mxu1 %v11344_v14  ;;  %3884 = vmatprep.mubr.bf16.mxu0 %v11344_v14  ;;  %11735 = vst [vmem:[#allocation66_spill] sm:$0xff] %v9601_v7  ;;  %11736 = vst [vmem:[#allocation67_spill] sm:$0xff] %v9604_v16 }
 0x7d9   :  { %3814 = vmatpush1.bf16.msra.mxu1 %v9592_v31  ;;  %3855 = vmatpush1.bf16.msra.mxu0 %v9595_v43  ;;  %v9610_v31 = vld [vmem:[#allocation7 + $0x64] ss:$16 sps:$4 sm:$0xff]   ;;  %v9613_v43 = vld [vmem:[#allocation7 + $0x6c] ss:$16 sps:$4 sm:$0xff]  }
 0x7da   :  { %3815 = vmatprep.subr.bf16.mxu1 %v9598_v27  ;;  %3856 = vmatprep.subr.bf16.mxu0 %v9601_v7  ;;  %11738 = vst [vmem:[#allocation69_spill] sm:$0xff] %v9610_v31  ;;  %11739 = vst [vmem:[#allocation70_spill] sm:$0xff] %v9613_v43  ;;  %v9616_v27 = vld [vmem:[#allocation7 + $0x60] ss:$16 sps:$4 sm:$0xff]   ;;  %v9619_v7 = vld [vmem:[#allocation7 + $0x68] ss:$16 sps:$4 sm:$0xff]  }
 0x7db   :  { %11740 = vst [vmem:[#allocation71_spill] sm:$0xff] %v9616_v27  ;;  %11741 = vst [vmem:[#allocation72_spill] sm:$0xff] %v9619_v7 }
 0x7dd   :  { %3816 = vmatpush1.bf16.msra.mxu1 %v9604_v16  ;;  %3857 = vmatpush1.bf16.msra.mxu0 %v9607_v3  ;;  %v9622_v16 = vld [vmem:[#allocation7 + $0x84] ss:$16 sps:$4 sm:$0xff]   ;;  %v9625_v3 = vld [vmem:[#allocation7 + $0x8c] ss:$16 sps:$4 sm:$0xff]  }
 0x7de   :  { %3817 = vmatprep.subr.bf16.mxu1 %v9610_v31  ;;  %3858 = vmatprep.subr.bf16.mxu0 %v9613_v43  ;;  %11742 = vst [vmem:[#allocation73_spill] sm:$0xff] %v9622_v16  ;;  %11743 = vst [vmem:[#allocation74_spill] sm:$0xff] %v9625_v3  ;;  %v9628_v31 = vld [vmem:[#allocation7 + $0x80] ss:$16 sps:$4 sm:$0xff]   ;;  %v9631_v43 = vld [vmem:[#allocation7 + $0x88] ss:$16 sps:$4 sm:$0xff]  }
 0x7df   :  { %11744 = vst [vmem:[#allocation75_spill] sm:$0xff] %v9628_v31  ;;  %11745 = vst [vmem:[#allocation76_spill] sm:$0xff] %v9631_v43 }
 0x7e1   :  { %3818 = vmatpush1.bf16.msra.mxu1 %v9616_v27  ;;  %3859 = vmatpush1.bf16.msra.mxu0 %v9619_v7  ;;  %v9634_v27 = vld [vmem:[#allocation7 + $0xa4] ss:$16 sps:$4 sm:$0xff]   ;;  %v9637_v7 = vld [vmem:[#allocation7 + $0xac] ss:$16 sps:$4 sm:$0xff]  }
 0x7e2   :  { %3819 = vmatprep.subr.bf16.mxu1 %v9622_v16  ;;  %3860 = vmatprep.subr.bf16.mxu0 %v9625_v3  ;;  %11746 = vst [vmem:[#allocation77_spill] sm:$0xff] %v9634_v27  ;;  %11747 = vst [vmem:[#allocation78_spill] sm:$0xff] %v9637_v7  ;;  %v9640_v16 = vld [vmem:[#allocation7 + $0xa0] ss:$16 sps:$4 sm:$0xff]   ;;  %v9643_v3 = vld [vmem:[#allocation7 + $0xa8] ss:$16 sps:$4 sm:$0xff]  }
 0x7e3   :  { %11748 = vst [vmem:[#allocation79_spill] sm:$0xff] %v9640_v16  ;;  %11749 = vst [vmem:[#allocation80_spill] sm:$0xff] %v9643_v3 }
 0x7e5   :  { %3820 = vmatpush1.bf16.msra.mxu1 %v9628_v31  ;;  %3861 = vmatpush1.bf16.msra.mxu0 %v9631_v43  ;;  %v9646_v31 = vld [vmem:[#allocation7 + $0xc4] ss:$16 sps:$4 sm:$0xff]   ;;  %v9649_v43 = vld [vmem:[#allocation7 + $0xcc] ss:$16 sps:$4 sm:$0xff]  }
 0x7e6   :  { %3821 = vmatprep.subr.bf16.mxu1 %v9634_v27  ;;  %3862 = vmatprep.subr.bf16.mxu0 %v9637_v7  ;;  %11750 = vst [vmem:[#allocation81_spill] sm:$0xff] %v9646_v31  ;;  %11751 = vst [vmem:[#allocation82_spill] sm:$0xff] %v9649_v43  ;;  %v9652_v27 = vld [vmem:[#allocation7 + $0xc0] ss:$16 sps:$4 sm:$0xff]   ;;  %v9655_v7 = vld [vmem:[#allocation7 + $0xc8] ss:$16 sps:$4 sm:$0xff]  }
 0x7e9   :  { %3822 = vmatpush1.bf16.msra.mxu1 %v9640_v16  ;;  %3863 = vmatpush1.bf16.msra.mxu0 %v9643_v3  ;;  %v9658_v16 = vld [vmem:[#allocation7 + $0xe4] ss:$16 sps:$4 sm:$0xff]   ;;  %v9661_v3 = vld [vmem:[#allocation7 + $0xec] ss:$16 sps:$4 sm:$0xff]  }
 0x7ea   :  { %3823 = vmatprep.subr.bf16.mxu1 %v9646_v31  ;;  %3864 = vmatprep.subr.bf16.mxu0 %v9649_v43  ;;  %v9664_v31 = vld [vmem:[#allocation7 + $0xe0] ss:$16 sps:$4 sm:$0xff]   ;;  %v9667_v43 = vld [vmem:[#allocation7 + $0xe8] ss:$16 sps:$4 sm:$0xff]  }
 0x7eb   :  { %11752 = vst [vmem:[#allocation83_spill] sm:$0xff] %v9664_v31 }
 0x7ed   :  { %3824 = vmatpush1.bf16.msra.mxu1 %v9652_v27  ;;  %3865 = vmatpush1.bf16.msra.mxu0 %v9655_v7 }
 0x7ee   :  { %3825 = vmatprep.subr.bf16.mxu1 %v9658_v16  ;;  %3866 = vmatprep.subr.bf16.mxu0 %v9661_v3 }
 0x7f1   :  { %3826 = vmatpush1.bf16.msra.mxu1 %v9664_v31  ;;  %3867 = vmatpush1.bf16.msra.mxu0 %v9667_v43  ;;  %v6014_v31 = vld [vmem:[%s10871_s0 + $0x28] sm:$0xff] }
 0x7f2   :  { %3921 = vmatprep.subr.bf16.mxu1 %v7761_v21  ;;  %3962 = vmatprep.subr.bf16.mxu0 %v11650_v1  ;;  %v3917_v1 = vpack.c.bf16 %v6014_v31, %v6014_v31  ;;  %v11769_v31 = vld [vmem:[#allocation44_spill] sm:$0xff] }
 0x7f4   :  { %3844 = vmatmul.mubr.bf16.vlgmr.msra.gmra.mrb[52].mxu1 %v9427_v18  ;;  %3885 = vmatmul.mubr.bf16.vlgmr.msra.gmra.mrb[56].mxu0 %v9427_v18  ;;  %v11768_v18 = vld [vmem:[#allocation43_spill] sm:$0xff] }
 0x7f5   :  { %3922 = vmatpush1.bf16.msra.mxu1 %v7756_v19  ;;  %3963 = vmatpush1.bf16.msra.mxu0 %v7765_v24 }
 0x7f6   :  { %3953 = vmatprep.mubr.bf16.mxu1 %v11344_v14  ;;  %3994 = vmatprep.mubr.bf16.mxu0 %v11344_v14 }
 0x7f7   :  { %4003 = vmatprep.subr.bf16.mxu1 %v9269_v54  ;;  %4044 = vmatprep.subr.bf16.mxu0 %v9272_v61  ;;  %v11754_v54 = vld [vmem:[#allocation26_spill] sm:$0xff]  ;;  %v11755_v61 = vld [vmem:[#allocation27_spill] sm:$0xff] }
 0x7fc   :  { %6015 = vmatmul.mubr.msk.bf16.vlgmr.msra.gmra.mrb[56].mxu1 %vm130_vm4, %v3917_v1  ;;  %6016 = vmatmul.mubr.msk.bf16.vlgmr.msra.gmra.mrb[60].mxu0 %vm130_vm4, %v3917_v1  ;;  %v11753_v1 = vld [vmem:[#allocation25_spill] sm:$0xff] }
 0x7fd   :  { %4004 = vmatpush1.bf16.msra.mxu1 %v9277_v49  ;;  %4045 = vmatpush1.bf16.msra.mxu0 %v9280_v63  ;;  %v11756_v49 = vld [vmem:[#allocation28_spill] sm:$0xff] }
 0x7fe   :  { %4005 = vmatprep.subr.bf16.mxu1 %v9283_v37  ;;  %4046 = vmatprep.subr.bf16.mxu0 %v9286_v26  ;;  %v11757_v63 = vld [vmem:[#allocation32_spill] sm:$0xff]  ;;  %v11758_v37 = vld [vmem:[#allocation33_spill] sm:$0xff]  ;;  %v11759_v26 = vld [vmem:[#allocation34_spill] sm:$0xff] }
 0x7ff   :  { %4035 = vmatprep.mubr.bf16.mxu1 %v11344_v14  ;;  %4076 = vmatprep.mubr.bf16.mxu0 %v11344_v14 }
 0x801   :  { %4006 = vmatpush1.bf16.msra.mxu1 %v9291_v46  ;;  %4047 = vmatpush1.bf16.msra.mxu0 %v9294_v33  ;;  %v11760_v46 = vld [vmem:[#allocation35_spill] sm:$0xff]  ;;  %v11761_v33 = vld [vmem:[#allocation36_spill] sm:$0xff] }
 0x802   :  { %4007 = vmatprep.subr.bf16.mxu1 %v9297_v10  ;;  %4048 = vmatprep.subr.bf16.mxu0 %v9300_v48  ;;  %v11762_v10 = vld [vmem:[#allocation37_spill] sm:$0xff]  ;;  %v11763_v48 = vld [vmem:[#allocation38_spill] sm:$0xff] }
 0x805   :  { %4008 = vmatpush1.bf16.msra.mxu1 %v9303_v62  ;;  %4049 = vmatpush1.bf16.msra.mxu0 %v9306_v45  ;;  %v11764_v62 = vld [vmem:[#allocation39_spill] sm:$0xff]  ;;  %v11765_v45 = vld [vmem:[#allocation40_spill] sm:$0xff] }
 0x806   :  { %4009 = vmatprep.subr.bf16.mxu1 %v9309_v23  ;;  %4050 = vmatprep.subr.bf16.mxu0 %v9312_v40  ;;  %v11766_v23 = vld [vmem:[#allocation41_spill] sm:$0xff]  ;;  %v11767_v40 = vld [vmem:[#allocation42_spill] sm:$0xff] }
 0x809   :  { %4010 = vmatpush1.bf16.msra.mxu1 %v11753_v1  ;;  %4051 = vmatpush1.bf16.msra.mxu0 %v11754_v54  ;;  %v11770_v1 = vld [vmem:[#allocation45_spill] sm:$0xff]  ;;  %v9717_v54 = vld [vmem:[#allocation8 + $0x4] ss:$16 sps:$4 sm:$0xff]  }
 0x80a   :  { %4011 = vmatprep.subr.bf16.mxu1 %v11755_v61  ;;  %4052 = vmatprep.subr.bf16.mxu0 %v11756_v49  ;;  %11771 = vst [vmem:[#allocation84_spill] sm:$0xff] %v9717_v54  ;;  %v9720_v61 = vld [vmem:[#allocation8 + $0xc] ss:$16 sps:$4 sm:$0xff]   ;;  %v9725_v49 = vld [vmem:[#allocation8] ss:$16 sps:$4 sm:$0xff]  }
 0x80b   :  { %11772 = vst [vmem:[#allocation85_spill] sm:$0xff] %v9720_v61  ;;  %11773 = vst [vmem:[#allocation86_spill] sm:$0xff] %v9725_v49 }
 0x80d   :  { %4012 = vmatpush1.bf16.msra.mxu1 %v11757_v63  ;;  %4053 = vmatpush1.bf16.msra.mxu0 %v11758_v37  ;;  %v9728_v63 = vld [vmem:[#allocation8 + $0x8] ss:$16 sps:$4 sm:$0xff]   ;;  %v9731_v37 = vld [vmem:[#allocation8 + $0x24] ss:$16 sps:$4 sm:$0xff]  }
 0x80e   :  { %4013 = vmatprep.subr.bf16.mxu1 %v11759_v26  ;;  %4054 = vmatprep.subr.bf16.mxu0 %v11760_v46  ;;  %11774 = vst [vmem:[#allocation87_spill] sm:$0xff] %v9728_v63  ;;  %11775 = vst [vmem:[#allocation88_spill] sm:$0xff] %v9731_v37  ;;  %v9734_v26 = vld [vmem:[#allocation8 + $0x2c] ss:$16 sps:$4 sm:$0xff]   ;;  %v9742_v46 = vld [vmem:[#allocation8 + $0x28] ss:$16 sps:$4 sm:$0xff]  }
 0x80f   :  { %11776 = vst [vmem:[#allocation51_spill] sm:$0xff] %v9734_v26  ;;  %11778 = vst [vmem:[#allocation90_spill] sm:$0xff] %v9742_v46 }
 0x811   :  { %4014 = vmatpush1.bf16.msra.mxu1 %v11761_v33  ;;  %4055 = vmatpush1.bf16.msra.mxu0 %v11762_v10  ;;  %v9745_v33 = vld [vmem:[#allocation8 + $0x44] ss:$16 sps:$4 sm:$0xff]   ;;  %v9748_v10 = vld [vmem:[#allocation8 + $0x4c] ss:$16 sps:$4 sm:$0xff]  }
 0x812   :  { %4015 = vmatprep.subr.bf16.mxu1 %v11763_v48  ;;  %4056 = vmatprep.subr.bf16.mxu0 %v11764_v62  ;;  %11779 = vst [vmem:[#allocation91_spill] sm:$0xff] %v9745_v33  ;;  %11780 = vst [vmem:[#allocation54_spill] sm:$0xff] %v9748_v10  ;;  %v9751_v48 = vld [vmem:[#allocation8 + $0x40] ss:$16 sps:$4 sm:$0xff]   ;;  %v9754_v62 = vld [vmem:[#allocation8 + $0x48] ss:$16 sps:$4 sm:$0xff]  }
 0x813   :  { %11781 = vst [vmem:[#allocation53_spill] sm:$0xff] %v9751_v48  ;;  %11782 = vst [vmem:[#allocation92_spill] sm:$0xff] %v9754_v62 }
 0x815   :  { %4016 = vmatpush1.bf16.msra.mxu1 %v11765_v45  ;;  %4057 = vmatpush1.bf16.msra.mxu0 %v11766_v23  ;;  %v9757_v45 = vld [vmem:[#allocation8 + $0x64] ss:$16 sps:$4 sm:$0xff]   ;;  %v9760_v23 = vld [vmem:[#allocation8 + $0x6c] ss:$16 sps:$4 sm:$0xff]  }
 0x816   :  { %4017 = vmatprep.subr.bf16.mxu1 %v11767_v40  ;;  %4058 = vmatprep.subr.bf16.mxu0 %v11768_v18  ;;  %11783 = vst [vmem:[#allocation93_spill] sm:$0xff] %v9757_v45  ;;  %11784 = vst [vmem:[#allocation94_spill] sm:$0xff] %v9760_v23  ;;  %v9763_v40 = vld [vmem:[#allocation8 + $0x60] ss:$16 sps:$4 sm:$0xff]   ;;  %v9766_v18 = vld [vmem:[#allocation8 + $0x68] ss:$16 sps:$4 sm:$0xff]  }
 0x817   :  { %11785 = vst [vmem:[#allocation95_spill] sm:$0xff] %v9763_v40  ;;  %11786 = vst [vmem:[#allocation96_spill] sm:$0xff] %v9766_v18 }
 0x819   :  { %4018 = vmatpush1.bf16.msra.mxu1 %v11769_v31  ;;  %4059 = vmatpush1.bf16.msra.mxu0 %v11770_v1  ;;  %v9769_v31 = vld [vmem:[#allocation8 + $0x84] ss:$16 sps:$4 sm:$0xff]   ;;  %v9772_v1 = vld [vmem:[#allocation8 + $0x8c] ss:$16 sps:$4 sm:$0xff]  }
 0x81a   :  { %4108 = vmatprep.subr.bf16.mxu1 %v9717_v54  ;;  %4149 = vmatprep.subr.bf16.mxu0 %v9720_v61  ;;  %11787 = vst [vmem:[#allocation97_spill] sm:$0xff] %v9769_v31  ;;  %11788 = vst [vmem:[#allocation98_spill] sm:$0xff] %v9772_v1 }
 0x81c   :  { %4036 = vmatmul.mubr.bf16.vlgmr.msra.gmra.mrb[56].mxu1 %v9568_v55  ;;  %4077 = vmatmul.mubr.bf16.vlgmr.msra.gmra.mrb[60].mxu0 %v9568_v55  ;;  %v9739_v55 = vld [vmem:[#allocation8 + $0x20] ss:$16 sps:$4 sm:$0xff]  }
 0x81d   :  { %4109 = vmatpush1.bf16.msra.mxu1 %v9725_v49  ;;  %4150 = vmatpush1.bf16.msra.mxu0 %v9728_v63  ;;  %11777 = vst [vmem:[#allocation52_spill] sm:$0xff] %v9739_v55 }
 0x81e   :  { %4110 = vmatprep.subr.bf16.mxu1 %v9731_v37  ;;  %4151 = vmatprep.subr.bf16.mxu0 %v9734_v26 }
 0x81f   :  { %4140 = vmatprep.mubr.bf16.mxu1 %v11344_v14  ;;  %4181 = vmatprep.mubr.bf16.mxu0 %v11344_v14 }
 0x821   :  { %4111 = vmatpush1.bf16.msra.mxu1 %v9739_v55  ;;  %4152 = vmatpush1.bf16.msra.mxu0 %v9742_v46 }
 0x822   :  { %4112 = vmatprep.subr.bf16.mxu1 %v9745_v33  ;;  %4153 = vmatprep.subr.bf16.mxu0 %v9748_v10 }
 0x825   :  { %4113 = vmatpush1.bf16.msra.mxu1 %v9751_v48  ;;  %4154 = vmatpush1.bf16.msra.mxu0 %v9754_v62  ;;  %v11805_v48 = vld [vmem:[#allocation29_spill] sm:$0xff] }
 0x826   :  { %4114 = vmatprep.subr.bf16.mxu1 %v9757_v45  ;;  %4155 = vmatprep.subr.bf16.mxu0 %v9760_v23  ;;  %v9775_v45 = vld [vmem:[#allocation8 + $0x80] ss:$16 sps:$4 sm:$0xff]   ;;  %v9778_v23 = vld [vmem:[#allocation8 + $0x88] ss:$16 sps:$4 sm:$0xff]  }
 0x827   :  { %11789 = vst [vmem:[#allocation99_spill] sm:$0xff] %v9775_v45  ;;  %11790 = vst [vmem:[#allocation100_spill] sm:$0xff] %v9778_v23 }
 0x829   :  { %4115 = vmatpush1.bf16.msra.mxu1 %v9763_v40  ;;  %4156 = vmatpush1.bf16.msra.mxu0 %v9766_v18  ;;  %v9781_v40 = vld [vmem:[#allocation8 + $0xa4] ss:$16 sps:$4 sm:$0xff]   ;;  %v9784_v18 = vld [vmem:[#allocation8 + $0xac] ss:$16 sps:$4 sm:$0xff]  }
 0x82a   :  { %4116 = vmatprep.subr.bf16.mxu1 %v9769_v31  ;;  %4157 = vmatprep.subr.bf16.mxu0 %v9772_v1  ;;  %11791 = vst [vmem:[#allocation101_spill] sm:$0xff] %v9781_v40  ;;  %11792 = vst [vmem:[#allocation102_spill] sm:$0xff] %v9784_v18  ;;  %v9787_v31 = vld [vmem:[#allocation8 + $0xa0] ss:$16 sps:$4 sm:$0xff]   ;;  %v9790_v1 = vld [vmem:[#allocation8 + $0xa8] ss:$16 sps:$4 sm:$0xff]  }
 0x82b   :  { %11793 = vst [vmem:[#allocation103_spill] sm:$0xff] %v9787_v31  ;;  %11794 = vst [vmem:[#allocation104_spill] sm:$0xff] %v9790_v1 }
 0x82d   :  { %4117 = vmatpush1.bf16.msra.mxu1 %v9775_v45  ;;  %4158 = vmatpush1.bf16.msra.mxu0 %v9778_v23  ;;  %v9793_v45 = vld [vmem:[#allocation8 + $0xc4] ss:$16 sps:$4 sm:$0xff]   ;;  %v9796_v23 = vld [vmem:[#allocation8 + $0xcc] ss:$16 sps:$4 sm:$0xff]  }
 0x82e   :  { %4118 = vmatprep.subr.bf16.mxu1 %v9781_v40  ;;  %4159 = vmatprep.subr.bf16.mxu0 %v9784_v18  ;;  %11795 = vst [vmem:[#allocation105_spill] sm:$0xff] %v9793_v45  ;;  %11796 = vst [vmem:[#allocation106_spill] sm:$0xff] %v9796_v23  ;;  %v9799_v40 = vld [vmem:[#allocation8 + $0xc0] ss:$16 sps:$4 sm:$0xff]   ;;  %v9802_v18 = vld [vmem:[#allocation8 + $0xc8] ss:$16 sps:$4 sm:$0xff]  }
 0x82f   :  { %11797 = vst [vmem:[#allocation107_spill] sm:$0xff] %v9799_v40  ;;  %11798 = vst [vmem:[#allocation108_spill] sm:$0xff] %v9802_v18 }
 0x831   :  { %4119 = vmatpush1.bf16.msra.mxu1 %v9787_v31  ;;  %4160 = vmatpush1.bf16.msra.mxu0 %v9790_v1  ;;  %v9805_v31 = vld [vmem:[#allocation8 + $0xe4] ss:$16 sps:$4 sm:$0xff]   ;;  %v9808_v1 = vld [vmem:[#allocation8 + $0xec] ss:$16 sps:$4 sm:$0xff]  }
 0x832   :  { %4120 = vmatprep.subr.bf16.mxu1 %v9793_v45  ;;  %4161 = vmatprep.subr.bf16.mxu0 %v9796_v23  ;;  %11799 = vst [vmem:[#allocation109_spill] sm:$0xff] %v9805_v31  ;;  %11800 = vst [vmem:[#allocation110_spill] sm:$0xff] %v9808_v1  ;;  %v9811_v45 = vld [vmem:[#allocation8 + $0xe0] ss:$16 sps:$4 sm:$0xff]   ;;  %v9814_v23 = vld [vmem:[#allocation8 + $0xe8] ss:$16 sps:$4 sm:$0xff]  }
 0x833   :  { %11801 = vst [vmem:[#allocation111_spill] sm:$0xff] %v9811_v45  ;;  %11802 = vst [vmem:[#allocation112_spill] sm:$0xff] %v9814_v23 }
 0x835   :  { %4121 = vmatpush1.bf16.msra.mxu1 %v9799_v40  ;;  %4162 = vmatpush1.bf16.msra.mxu0 %v9802_v18  ;;  %v9817_v40 = vld [vmem:[#allocation10 + $0x4] ss:$16 sps:$4 sm:$0xff]   ;;  %v9820_v18 = vld [vmem:[#allocation10 + $0xc] ss:$16 sps:$4 sm:$0xff]  }
 0x836   :  { %4122 = vmatprep.subr.bf16.mxu1 %v9805_v31  ;;  %4163 = vmatprep.subr.bf16.mxu0 %v9808_v1  ;;  %11803 = vst [vmem:[#allocation18_spill] sm:$0xff] %v9817_v40  ;;  %11804 = vst [vmem:[#allocation19_spill] sm:$0xff] %v9820_v18 }
 0x839   :  { %4123 = vmatpush1.bf16.msra.mxu1 %v9811_v45  ;;  %4164 = vmatpush1.bf16.msra.mxu0 %v9814_v23  ;;  %v11806_v45 = vld [vmem:[#allocation30_spill] sm:$0xff] }
 0x83a   :  { %4191 = vmatprep.subr.bf16.mxu1 %v9817_v40  ;;  %4232 = vmatprep.subr.bf16.mxu0 %v9820_v18  ;;  %v11807_v18 = vld [vmem:[#allocation31_spill] sm:$0xff] }
 0x887   :  { %v3658_v31 = vpop.f32.mrb[48].mxu1  ;;  %v3699_v62 = vpop.f32.mrb[52].mxu0 }
 0x888   :  { %v6080_v1 = vadd.f32 %v3658_v31, %v11805_v48  ;;  %v3660_v10 = vpop.f32.mrb[49].mxu1  ;;  %v9824_v33 = vpop.f32.mrb[53].mxu0  ;;  %v6082_v54 = vadd.f32 %v3699_v62, %v11807_v18 }
 0x889   :  { %v6081_v46 = vadd.f32 %v3660_v10, %v11806_v45  ;;  %v3662_v55 = vpop.f32.mrb[50].mxu1  ;;  %v3703_v26 = vpop.f32.mrb[54].mxu0 }
 0x88a   :  { %v3706_v23 = vsub.f32 0.0, %v6080_v1  ;;  %v3663_v37 = vpop.f32.mrb[51].mxu1  ;;  %v3704_v63 = vpop.f32.mrb[55].mxu0 }
 0x88b   :  { %v3711_v49 = vsub.f32 0.0, %v6081_v46 }
 0x88c   :  { %v3707_v40 = vmul.f32 1.442695, %v3706_v23 }
 0x88d   :  { %v3712_v61 = vmul.f32 1.442695, %v3711_v49 }
 0x88e   :  { %6765 = vpow2.f32 %v3707_v40 }
 0x88f   :  { %6767 = vpow2.f32 %v3712_v61  ;;  %v11808_v61 = vld [vmem:[#allocation89_spill] sm:$0xff] }
 0x890   :  { %6769 = vtanh.f32 %v6082_v54 }
 0x898   :  { %v6766_v24 = vpop.eup %6765 }
 0x899   :  { %v6768_v19 = vpop.eup %6767  ;;  %v3709_v31 = vadd.f32 1.0, %v6766_v24 }
 0x89a   :  { %v3714_v48 = vadd.f32 1.0, %v6768_v19  ;;  %v6770_v10 = vpop.eup %6769 }
 0x89b   :  { %6771 = vrcp.f32 %v3709_v31 }
 0x89c   :  { %6773 = vrcp.f32 %v3714_v48 }
 0x8a5   :  { %v6772_v55 = vpop.eup %6771 }
 0x8a6   :  { %v6774_v26 = vpop.eup %6773  ;;  %v3724_v1 = vmul.f32 %v6772_v55, %v6770_v10 }
 0x8a7   :  { %v3723_v63 = vmul.f32 %v6774_v26, %v9413_v52 }
 0x8a9   :  { %v9829_v37 = vadd.f32 %v3724_v1, %v3723_v63 }
 0x8c7   :  { %v3845_v49 = vpop.f32.mrb[52].mxu1  ;;  %v3886_v46 = vpop.f32.mrb[56].mxu0 }
 0x8c8   :  { %v6084_v23 = vadd.f32 %v3845_v49, %v11808_v61  ;;  %v3847_v62 = vpop.f32.mrb[53].mxu1  ;;  %v3888_v40 = vpop.f32.mrb[57].mxu0  ;;  %v6086_v1 = vadd.f32 %v3886_v46, %v8286_v53  ;;  %v6083_v46 = vadd.f32 %v9824_v33, %v11594_v20 }
 0x8c9   :  { %v6085_v24 = vadd.f32 %v3847_v62, %v11483_v42  ;;  %v3849_v54 = vpop.f32.mrb[54].mxu1  ;;  %v3890_v19 = vpop.f32.mrb[58].mxu0  ;;  %v6087_v52 = vadd.f32 %v3888_v40, %v8282_v12 }
 0x8ca   :  { %v3893_v31 = vsub.f32 0.0, %v6084_v23  ;;  %v3850_v48 = vpop.f32.mrb[55].mxu1  ;;  %v3891_v18 = vpop.f32.mrb[59].mxu0 }
 0x8cb   :  { %v3898_v45 = vsub.f32 0.0, %v6085_v24  ;;  %v3905_v55 = vsub.f32 0.0, %v6087_v52 }
 0x8cc   :  { %v3894_v21 = vmul.f32 1.442695, %v3893_v31 }
 0x8cd   :  { %v3899_v10 = vmul.f32 1.442695, %v3898_v45  ;;  %v3906_v26 = vmul.f32 1.442695, %v3905_v55 }
 0x8ce   :  { %6775 = vpow2.f32 %v3894_v21 }
 0x8cf   :  { %6777 = vpow2.f32 %v3899_v10 }
 0x8d0   :  { %6779 = vpow2.f32 %v3906_v26 }
 0x8d1   :  { %6781 = vtanh.f32 %v6086_v1 }
 0x8d8   :  { %v6776_v63 = vpop.eup %6775 }
 0x8d9   :  { %v6778_v49 = vpop.eup %6777  ;;  %v3896_v61 = vadd.f32 1.0, %v6776_v63 }
 0x8da   :  { %v3901_v62 = vadd.f32 1.0, %v6778_v49  ;;  %v6780_v18 = vpop.eup %6779 }
 0x8db   :  { %6783 = vrcp.f32 %v3896_v61  ;;  %v6782_v23 = vpop.eup %6781  ;;  %v3908_v40 = vadd.f32 1.0, %v6780_v18  ;;  %v3718_v61 = vsub.f32 0.0, %v6083_v46  ;;  %v9849_v46 = vld [vmem:[#allocation10] ss:$16 sps:$4 sm:$0xff]  }
 0x8dc   :  { %6785 = vrcp.f32 %v3901_v62 }
 0x8dd   :  { %6787 = vrcp.f32 %v3908_v40 }
 0x8e5   :  { %v6784_v24 = vpop.eup %6783 }
 0x8e6   :  { %v6786_v45 = vpop.eup %6785  ;;  %v3911_v54 = vmul.f32 %v6784_v24, %v6782_v23  ;;  %v3719_v24 = vmul.f32 1.442695, %v3718_v61  ;;  %v9855_v61 = vld [vmem:[#allocation10 + $0x24] ss:$16 sps:$4 sm:$0xff]  }
 0x8e7   :  { %v3910_v21 = vmul.f32 %v6786_v45, %v9420_v50  ;;  %v6788_v23 = vpop.eup %6787 }
 0x8e9   :  { %v9836_v19 = vadd.f32 %v3911_v54, %v3910_v21 }
 0x8eb   :  { %6789 = vtanh.f32 %v9836_v19 }
 0x8ef   :  { %v4037_v31 = vpop.f32.mrb[56].mxu1  ;;  %v4078_v48 = vpop.f32.mrb[60].mxu0 }
 0x8f0   :  { %v6088_v10 = vadd.f32 %v4037_v31, %v11487_v32  ;;  %v4039_v52 = vpop.f32.mrb[57].mxu1  ;;  %v9842_v55 = vpop.f32.mrb[61].mxu0  ;;  %v9852_v31 = vld [vmem:[#allocation10 + $0x8] ss:$16 sps:$4 sm:$0xff]  }
 0x8f1   :  { %v6089_v26 = vadd.f32 %v4039_v52, %v7999_v58  ;;  %v4041_v1 = vpop.f32.mrb[58].mxu1  ;;  %v4082_v50 = vpop.f32.mrb[62].mxu0  ;;  %v6090_v52 = vadd.f32 %v4078_v48, %v8014_v17 }
 0x8f2   :  { %v4085_v63 = vsub.f32 0.0, %v6088_v10  ;;  %v4042_v49 = vpop.f32.mrb[59].mxu1  ;;  %v4083_v62 = vpop.f32.mrb[63].mxu0  ;;  %v9858_v10 = vld [vmem:[#allocation10 + $0x2c] ss:$16 sps:$4 sm:$0xff]  }
 0x8f3   :  { %v4090_v18 = vsub.f32 0.0, %v6089_v26  ;;  %v9864_v26 = vld [vmem:[#allocation10 + $0x20] ss:$16 sps:$4 sm:$0xff]   ;;  %v9867_v1 = vld [vmem:[#allocation10 + $0x28] ss:$16 sps:$4 sm:$0xff]  }
 0x8f4   :  { %v4086_v45 = vmul.f32 1.442695, %v4085_v63  ;;  %v9870_v63 = vld [vmem:[#allocation10 + $0x44] ss:$16 sps:$4 sm:$0xff]   ;;  %v9873_v49 = vld [vmem:[#allocation10 + $0x4c] ss:$16 sps:$4 sm:$0xff]  }
 0x8f5   :  { %v6790_v33 = vpop.eup %6789  ;;  %v4091_v54 = vmul.f32 1.442695, %v4090_v18 }
 0x8f6   :  { %6791 = vpow2.f32 %v4086_v45  ;;  %v3914_v40 = vmul.f32 %v6790_v33, %v6788_v23  ;;  %v9879_v45 = vld [vmem:[#allocation10 + $0x48] ss:$16 sps:$4 sm:$0xff]   ;;  %v9882_v33 = vld [vmem:[#allocation10 + $0x64] ss:$16 sps:$4 sm:$0xff]  }
 0x8f7   :  { %6793 = vpow2.f32 %v4091_v54  ;;  %11809 = vst [vmem:[#allocation20_spill] sm:$0xff] %v9879_v45  ;;  %11810 = vst [vmem:[#allocation21_spill] sm:$0xff] %v9882_v33  ;;  %v9885_v54 = vld [vmem:[#allocation10 + $0x6c] ss:$16 sps:$4 sm:$0xff]  }
 0x8f8   :  { %6795 = vpow2.f32 %v3719_v24  ;;  %v9845_v21 = vpack.c.bf16 %v3914_v40, %v3914_v40  ;;  %v9876_v24 = vld [vmem:[#allocation10 + $0x40] ss:$16 sps:$4 sm:$0xff]   ;;  %11811 = vst [vmem:[#allocation22_spill] sm:$0xff] %v9885_v54 }
 0x8f9   :  { %6797 = vtanh.f32 %v6090_v52  ;;  %v9888_v52 = vld [vmem:[#allocation10 + $0x60] ss:$16 sps:$4 sm:$0xff]  }
 0x8fa   :  { %4141 = vmatmul.mubr.bf16.vlgmr.msra.gmra.mrb[60].mxu1 %v9845_v21  ;;  %4182 = vmatmul.mubr.bf16.vlgmr.msra.gmra.mrb[64].mxu0 %v9845_v21  ;;  %11812 = vst [vmem:[#allocation23_spill] sm:$0xff] %v9888_v52 }
 0x8fb   :  { %4192 = vmatpush1.bf16.msra.mxu1 %v9849_v46  ;;  %4233 = vmatpush1.bf16.msra.mxu0 %v9852_v31 }
 0x8fc   :  { %4193 = vmatprep.subr.bf16.mxu1 %v9855_v61  ;;  %4234 = vmatprep.subr.bf16.mxu0 %v9858_v10 }
 0x8fd   :  { %4223 = vmatprep.mubr.bf16.mxu1 %v11344_v14  ;;  %4264 = vmatprep.mubr.bf16.mxu0 %v11344_v14 }
 0x8ff   :  { %4194 = vmatpush1.bf16.msra.mxu1 %v9864_v26  ;;  %4235 = vmatpush1.bf16.msra.mxu0 %v9867_v1 }
 0x900   :  { %v6792_v50 = vpop.eup %6791  ;;  %4195 = vmatprep.subr.bf16.mxu1 %v9870_v63  ;;  %4236 = vmatprep.subr.bf16.mxu0 %v9873_v49 }
 0x901   :  { %v6794_v62 = vpop.eup %6793  ;;  %v4088_v18 = vadd.f32 1.0, %v6792_v50  ;;  %v9891_v50 = vld [vmem:[#allocation10 + $0x68] ss:$16 sps:$4 sm:$0xff]  }
 0x902   :  { %v6796_v48 = vpop.eup %6795  ;;  %v4093_v23 = vadd.f32 1.0, %v6794_v62  ;;  %11813 = vst [vmem:[#allocation24_spill] sm:$0xff] %v9891_v50  ;;  %v9895_v62 = vld [vmem:[#allocation10 + $0x84] ss:$16 sps:$4 sm:$0xff]  }
 0x903   :  { %6799 = vrcp.f32 %v4088_v18  ;;  %4196 = vmatpush1.bf16.msra.mxu1 %v9876_v24  ;;  %4237 = vmatpush1.bf16.msra.mxu0 %v9879_v45  ;;  %v3721_v40 = vadd.f32 1.0, %v6796_v48  ;;  %11814 = vst [vmem:[#allocation25_spill] sm:$0xff] %v9895_v62  ;;  %v9898_v18 = vld [vmem:[#allocation10 + $0x8c] ss:$16 sps:$4 sm:$0xff]   ;;  %v9901_v48 = vld [vmem:[#allocation10 + $0x80] ss:$16 sps:$4 sm:$0xff]  }
 0x904   :  { %6801 = vrcp.f32 %v4093_v23  ;;  %4197 = vmatprep.subr.bf16.mxu1 %v9882_v33  ;;  %4238 = vmatprep.subr.bf16.mxu0 %v9885_v54  ;;  %11815 = vst [vmem:[#allocation26_spill] sm:$0xff] %v9898_v18  ;;  %11816 = vst [vmem:[#allocation27_spill] sm:$0xff] %v9901_v48  ;;  %v9904_v23 = vld [vmem:[#allocation10 + $0x88] ss:$16 sps:$4 sm:$0xff]   ;;  %v9909_v54 = vld [vmem:[#allocation10 + $0xa4] ss:$16 sps:$4 sm:$0xff]  }
 0x905   :  { %6803 = vtanh.f32 %v9829_v37  ;;  %11817 = vst [vmem:[#allocation28_spill] sm:$0xff] %v9904_v23  ;;  %11818 = vst [vmem:[#allocation32_spill] sm:$0xff] %v9909_v54  ;;  %v9916_v45 = vld [vmem:[#allocation10 + $0xa0] ss:$16 sps:$4 sm:$0xff]  }
 0x906   :  { %6805 = vrcp.f32 %v3721_v40  ;;  %11819 = vst [vmem:[#allocation33_spill] sm:$0xff] %v9916_v45 }
 0x907   :  { %4198 = vmatpush1.bf16.msra.mxu1 %v9888_v52  ;;  %4239 = vmatpush1.bf16.msra.mxu0 %v9891_v50  ;;  %v6798_v50 = vpop.eup %6797  ;;  %v6091_v52 = vadd.f32 %v9842_v55, %v11713_v30  ;;  %v9922_v30 = vld [vmem:[#allocation10 + $0xc4] ss:$16 sps:$4 sm:$0xff]  }
 0x908   :  { %4199 = vmatprep.subr.bf16.mxu1 %v9895_v62  ;;  %4240 = vmatprep.subr.bf16.mxu0 %v9898_v18  ;;  %v9912_v62 = vld [vmem:[#allocation10 + $0xac] ss:$16 sps:$4 sm:$0xff]   ;;  %11821 = vst [vmem:[#allocation35_spill] sm:$0xff] %v9922_v30 }
 0x909   :  { %v4097_v55 = vsub.f32 0.0, %v6091_v52 }
 0x90b   :  { %4200 = vmatpush1.bf16.msra.mxu1 %v9901_v48  ;;  %4241 = vmatpush1.bf16.msra.mxu0 %v9904_v23  ;;  %v9919_v23 = vld [vmem:[#allocation10 + $0xa8] ss:$16 sps:$4 sm:$0xff]   ;;  %v4098_v52 = vmul.f32 1.442695, %v4097_v55  ;;  %v11845_v55 = vld [vmem:[#allocation72_spill] sm:$0xff] }
 0x90c   :  { %4201 = vmatprep.subr.bf16.mxu1 %v9909_v54  ;;  %4242 = vmatprep.subr.bf16.mxu0 %v9912_v62  ;;  %11820 = vst [vmem:[#allocation34_spill] sm:$0xff] %v9919_v23  ;;  %v9925_v54 = vld [vmem:[#allocation10 + $0xcc] ss:$16 sps:$4 sm:$0xff]  }
 0x90d   :  { %v6800_v40 = vpop.eup %6799  ;;  %11822 = vst [vmem:[#allocation36_spill] sm:$0xff] %v9925_v54  ;;  %6807 = vpow2.f32 %v4098_v52  ;;  %v11848_v52 = vld [vmem:[#allocation75_spill] sm:$0xff] }
 0x90e   :  { %v6802_v18 = vpop.eup %6801  ;;  %v4103_v33 = vmul.f32 %v6800_v40, %v6798_v50 }
 0x90f   :  { %v4102_v48 = vmul.f32 %v6802_v18, %v9461_v25  ;;  %4202 = vmatpush1.bf16.msra.mxu1 %v9916_v45  ;;  %4243 = vmatpush1.bf16.msra.mxu0 %v9919_v23  ;;  %v6804_v50 = vpop.eup %6803  ;;  %v9930_v18 = vld [vmem:[#allocation10 + $0xc0] ss:$16 sps:$4 sm:$0xff]   ;;  %v9933_v45 = vld [vmem:[#allocation10 + $0xc8] ss:$16 sps:$4 sm:$0xff]   ;;  %v9936_v23 = vld [vmem:[#allocation10 + $0xe4] ss:$16 sps:$4 sm:$0xff]  }
 0x910   :  { %4203 = vmatprep.subr.bf16.mxu1 %v9922_v30  ;;  %4244 = vmatprep.subr.bf16.mxu0 %v9925_v54  ;;  %v6806_v25 = vpop.eup %6805  ;;  %11823 = vst [vmem:[#allocation37_spill] sm:$0xff] %v9933_v45  ;;  %v9939_v30 = vld [vmem:[#allocation10 + $0xec] ss:$16 sps:$4 sm:$0xff]   ;;  %v9945_v54 = vld [vmem:[#allocation10 + $0xe8] ss:$16 sps:$4 sm:$0xff]  }
 0x911   :  { %v9928_v40 = vadd.f32 %v4103_v33, %v4102_v48  ;;  %v3727_v33 = vmul.f32 %v6806_v25, %v6804_v50  ;;  %v9942_v48 = vld [vmem:[#allocation10 + $0xe0] ss:$16 sps:$4 sm:$0xff]   ;;  %v11846_v50 = vld [vmem:[#allocation73_spill] sm:$0xff] }
 0x912   :  { %v11847_v25 = vld [vmem:[#allocation74_spill] sm:$0xff] }
 0x913   :  { %4204 = vmatpush1.bf16.msra.mxu1 %v9930_v18  ;;  %4245 = vmatpush1.bf16.msra.mxu0 %v9933_v45  ;;  %v4190_v45 = vpack.c.bf16 %v3727_v33, %v3727_v33  ;;  %6809 = vtanh.f32 %v9928_v40  ;;  %v11849_v33 = vld [vmem:[#allocation76_spill] sm:$0xff] }
 0x914   :  { %4205 = vmatprep.subr.bf16.mxu1 %v9936_v23  ;;  %4246 = vmatprep.subr.bf16.mxu0 %v9939_v30 }
 0x917   :  { %4206 = vmatpush1.bf16.msra.mxu1 %v9942_v48  ;;  %4247 = vmatpush1.bf16.msra.mxu0 %v9945_v54 }
 0x918   :  { %4296 = vmatprep.subr.bf16.mxu1 %v9469_v56  ;;  %4337 = vmatprep.subr.bf16.mxu0 %v9472_v57  ;;  %v6808_v56 = vpop.eup %6807 }
 0x919   :  { %v4100_v57 = vadd.f32 1.0, %v6808_v56  ;;  %v11850_v56 = vld [vmem:[#allocation77_spill] sm:$0xff] }
 0x91a   :  { %4224 = vmatmul.mubr.bf16.vlgmr.msra.gmra.mrb[60].mxu1 %v4190_v45  ;;  %4265 = vmatmul.mubr.bf16.vlgmr.msra.gmra.mrb[64].mxu0 %v4190_v45  ;;  %v11844_v45 = vld [vmem:[#allocation71_spill] sm:$0xff] }
 0x91b   :  { %4297 = vmatpush1.bf16.msra.mxu1 %v9475_v13  ;;  %4338 = vmatpush1.bf16.msra.mxu0 %v9478_v29  ;;  %6811 = vrcp.f32 %v4100_v57  ;;  %v11824_v13 = vld [vmem:[#allocation46_spill] sm:$0xff]  ;;  %v11825_v29 = vld [vmem:[#allocation47_spill] sm:$0xff] }
 0x91c   :  { %4298 = vmatprep.subr.bf16.mxu1 %v9481_v22  ;;  %4339 = vmatprep.subr.bf16.mxu0 %v9484_v59  ;;  %v11851_v57 = vld [vmem:[#allocation78_spill] sm:$0xff] }
 0x91d   :  { %4328 = vmatprep.mubr.bf16.mxu1 %v11344_v14  ;;  %4369 = vmatprep.mubr.bf16.mxu0 %v11344_v14  ;;  %v6810_v22 = vpop.eup %6809 }
 0x91f   :  { %4299 = vmatpush1.bf16.msra.mxu1 %v9489_v5  ;;  %4340 = vmatpush1.bf16.msra.mxu0 %v9492_v4  ;;  %v11826_v5 = vld [vmem:[#allocation48_spill] sm:$0xff]  ;;  %v11827_v4 = vld [vmem:[#allocation49_spill] sm:$0xff] }
 0x920   :  { %4300 = vmatprep.subr.bf16.mxu1 %v9495_v6  ;;  %4341 = vmatprep.subr.bf16.mxu0 %v9498_v38  ;;  %v11828_v6 = vld [vmem:[#allocation50_spill] sm:$0xff] }
 0x923   :  { %4301 = vmatpush1.bf16.msra.mxu1 %v9501_v0  ;;  %4342 = vmatpush1.bf16.msra.mxu0 %v9504_v35  ;;  %v11829_v0 = vld [vmem:[#allocation56_spill] sm:$0xff] }
 0x924   :  { %4302 = vmatprep.subr.bf16.mxu1 %v9507_v60  ;;  %4343 = vmatprep.subr.bf16.mxu0 %v9510_v34  ;;  %v11830_v60 = vld [vmem:[#allocation57_spill] sm:$0xff]  ;;  %v11831_v34 = vld [vmem:[#allocation58_spill] sm:$0xff] }
 0x925   :  { %v6812_v59 = vpop.eup %6811 }
 0x926   :  { %v4106_v38 = vmul.f32 %v6812_v59, %v6810_v22  ;;  %v11854_v22 = vld [vmem:[#allocation81_spill] sm:$0xff]  ;;  %v11855_v59 = vld [vmem:[#allocation82_spill] sm:$0xff] }
 0x927   :  { %4303 = vmatpush1.bf16.msra.mxu1 %v9513_v28  ;;  %4344 = vmatpush1.bf16.msra.mxu0 %v9516_v41  ;;  %v11832_v28 = vld [vmem:[#allocation59_spill] sm:$0xff]  ;;  %v11833_v41 = vld [vmem:[#allocation60_spill] sm:$0xff] }
 0x928   :  { %4304 = vmatprep.subr.bf16.mxu1 %v9520_v9  ;;  %4345 = vmatprep.subr.bf16.mxu0 %v9523_v2  ;;  %v9983_v35 = vpack.c.bf16 %v4106_v38, %v4106_v38  ;;  %v11834_v9 = vld [vmem:[#allocation61_spill] sm:$0xff]  ;;  %v11835_v2 = vld [vmem:[#allocation62_spill] sm:$0xff] }
 0x929   :  { %v11859_v38 = vld [vmem:[#allocation14_spill] sm:$0xff] }
 0x92b   :  { %4305 = vmatpush1.bf16.msra.mxu1 %v9526_v47  ;;  %4346 = vmatpush1.bf16.msra.mxu0 %v9529_v8  ;;  %v11836_v47 = vld [vmem:[#allocation63_spill] sm:$0xff]  ;;  %v11837_v8 = vld [vmem:[#allocation64_spill] sm:$0xff] }
 0x92c   :  { %4306 = vmatprep.subr.bf16.mxu1 %v9532_v39  ;;  %4347 = vmatprep.subr.bf16.mxu0 %v9535_v51  ;;  %v11838_v39 = vld [vmem:[#allocation65_spill] sm:$0xff]  ;;  %v11839_v51 = vld [vmem:[#allocation66_spill] sm:$0xff] }
 0x92f   :  { %4307 = vmatpush1.bf16.msra.mxu1 %v9538_v11  ;;  %4348 = vmatpush1.bf16.msra.mxu0 %v9541_v44  ;;  %v11840_v11 = vld [vmem:[#allocation67_spill] sm:$0xff]  ;;  %v11841_v44 = vld [vmem:[#allocation68_spill] sm:$0xff] }
 0x930   :  { %4308 = vmatprep.subr.bf16.mxu1 %v11824_v13  ;;  %4349 = vmatprep.subr.bf16.mxu0 %v11825_v29  ;;  %v11852_v13 = vld [vmem:[#allocation79_spill] sm:$0xff]  ;;  %v11853_v29 = vld [vmem:[#allocation80_spill] sm:$0xff] }
 0x933   :  { %4309 = vmatpush1.bf16.msra.mxu1 %v11826_v5  ;;  %4350 = vmatpush1.bf16.msra.mxu0 %v11827_v4  ;;  %v11856_v5 = vld [vmem:[#allocation83_spill] sm:$0xff] }
 0x934   :  { %4310 = vmatprep.subr.bf16.mxu1 %v11828_v6  ;;  %4351 = vmatprep.subr.bf16.mxu0 %v9559_v15  ;;  %v11843_v15 = vld [vmem:[#allocation70_spill] sm:$0xff]  ;;  %v11857_v4 = vld [vmem:[#allocation15_spill] sm:$0xff]  ;;  %v11858_v6 = vld [vmem:[#allocation17_spill] sm:$0xff] }
 0x937   :  { %4311 = vmatpush1.bf16.msra.mxu1 %v9562_v36  ;;  %4352 = vmatpush1.bf16.msra.mxu0 %v11829_v0  ;;  %v11842_v36 = vld [vmem:[#allocation69_spill] sm:$0xff] }
 0x938   :  { %4378 = vmatprep.subr.bf16.mxu1 %v11830_v60  ;;  %4419 = vmatprep.subr.bf16.mxu0 %v11831_v34  ;;  %v10043_v0 = vld [vmem:[#allocation3 + $0x8] ss:$16 sps:$4 sm:$0xff]   ;;  %v10046_v60 = vld [vmem:[#allocation3 + $0x24] ss:$16 sps:$4 sm:$0xff]   ;;  %v10049_v34 = vld [vmem:[#allocation3 + $0x2c] ss:$16 sps:$4 sm:$0xff]  }
 0x93a   :  { %4329 = vmatmul.mubr.bf16.vlgmr.msra.gmra.mrb[64].mxu1 %v9983_v35  ;;  %4370 = vmatmul.mubr.bf16.vlgmr.msra.gmra.mrb[68].mxu0 %v9983_v35 }
 0x93b   :  { %4379 = vmatpush1.bf16.msra.mxu1 %v11832_v28  ;;  %4420 = vmatpush1.bf16.msra.mxu0 %v11833_v41  ;;  %v10054_v28 = vld [vmem:[#allocation3 + $0x20] ss:$16 sps:$4 sm:$0xff]   ;;  %v10057_v41 = vld [vmem:[#allocation3 + $0x28] ss:$16 sps:$4 sm:$0xff]  }
 0x93c   :  { %4380 = vmatprep.subr.bf16.mxu1 %v11834_v9  ;;  %4421 = vmatprep.subr.bf16.mxu0 %v11835_v2  ;;  %v10060_v9 = vld [vmem:[#allocation3 + $0x44] ss:$16 sps:$4 sm:$0xff]   ;;  %v10063_v2 = vld [vmem:[#allocation3 + $0x4c] ss:$16 sps:$4 sm:$0xff]  }
 0x93d   :  { %4410 = vmatprep.mubr.bf16.mxu1 %v11344_v14  ;;  %4451 = vmatprep.mubr.bf16.mxu0 %v11344_v14 }
 0x93f   :  { %4381 = vmatpush1.bf16.msra.mxu1 %v11836_v47  ;;  %4422 = vmatpush1.bf16.msra.mxu0 %v11837_v8  ;;  %v10066_v47 = vld [vmem:[#allocation3 + $0x40] ss:$16 sps:$4 sm:$0xff]   ;;  %v10069_v8 = vld [vmem:[#allocation3 + $0x48] ss:$16 sps:$4 sm:$0xff]  }
 0x940   :  { %4382 = vmatprep.subr.bf16.mxu1 %v11838_v39  ;;  %4423 = vmatprep.subr.bf16.mxu0 %v11839_v51  ;;  %v10072_v39 = vld [vmem:[#allocation3 + $0x64] ss:$16 sps:$4 sm:$0xff]   ;;  %v10075_v51 = vld [vmem:[#allocation3 + $0x6c] ss:$16 sps:$4 sm:$0xff]  }
 0x941   :  { %11861 = vst [vmem:[#allocation38_spill] sm:$0xff] %v10075_v51 }
 0x943   :  { %4383 = vmatpush1.bf16.msra.mxu1 %v11840_v11  ;;  %4424 = vmatpush1.bf16.msra.mxu0 %v11841_v44  ;;  %v10078_v11 = vld [vmem:[#allocation3 + $0x60] ss:$16 sps:$4 sm:$0xff]   ;;  %v10081_v44 = vld [vmem:[#allocation3 + $0x68] ss:$16 sps:$4 sm:$0xff]  }
 0x944   :  { %4384 = vmatprep.subr.bf16.mxu1 %v11842_v36  ;;  %4425 = vmatprep.subr.bf16.mxu0 %v11843_v15  ;;  %11862 = vst [vmem:[#allocation39_spill] sm:$0xff] %v10078_v11  ;;  %11863 = vst [vmem:[#allocation40_spill] sm:$0xff] %v10081_v44  ;;  %v10084_v36 = vld [vmem:[#allocation3 + $0x84] ss:$16 sps:$4 sm:$0xff]   ;;  %v10087_v15 = vld [vmem:[#allocation3 + $0x8c] ss:$16 sps:$4 sm:$0xff]  }
 0x945   :  { %11864 = vst [vmem:[#allocation41_spill] sm:$0xff] %v10084_v36  ;;  %11865 = vst [vmem:[#allocation42_spill] sm:$0xff] %v10087_v15 }
 0x947   :  { %4385 = vmatpush1.bf16.msra.mxu1 %v11844_v45  ;;  %4426 = vmatpush1.bf16.msra.mxu0 %v11845_v55  ;;  %v10090_v45 = vld [vmem:[#allocation3 + $0x80] ss:$16 sps:$4 sm:$0xff]   ;;  %v10093_v55 = vld [vmem:[#allocation3 + $0x88] ss:$16 sps:$4 sm:$0xff]  }
 0x948   :  { %4386 = vmatprep.subr.bf16.mxu1 %v11846_v50  ;;  %4427 = vmatprep.subr.bf16.mxu0 %v11847_v25  ;;  %11866 = vst [vmem:[#allocation43_spill] sm:$0xff] %v10090_v45  ;;  %11867 = vst [vmem:[#allocation44_spill] sm:$0xff] %v10093_v55  ;;  %v10096_v50 = vld [vmem:[#allocation3 + $0xa4] ss:$16 sps:$4 sm:$0xff]   ;;  %v10099_v25 = vld [vmem:[#allocation3 + $0xac] ss:$16 sps:$4 sm:$0xff]  }
 0x949   :  { %11868 = vst [vmem:[#allocation45_spill] sm:$0xff] %v10096_v50  ;;  %11869 = vst [vmem:[#allocation46_spill] sm:$0xff] %v10099_v25 }
 0x94b   :  { %4387 = vmatpush1.bf16.msra.mxu1 %v11848_v52  ;;  %4428 = vmatpush1.bf16.msra.mxu0 %v11849_v33  ;;  %v10102_v52 = vld [vmem:[#allocation3 + $0xa0] ss:$16 sps:$4 sm:$0xff]   ;;  %v10105_v33 = vld [vmem:[#allocation3 + $0xa8] ss:$16 sps:$4 sm:$0xff]  }
 0x94c   :  { %4388 = vmatprep.subr.bf16.mxu1 %v11850_v56  ;;  %4429 = vmatprep.subr.bf16.mxu0 %v11851_v57  ;;  %11870 = vst [vmem:[#allocation47_spill] sm:$0xff] %v10102_v52  ;;  %11871 = vst [vmem:[#allocation48_spill] sm:$0xff] %v10105_v33  ;;  %v10108_v56 = vld [vmem:[#allocation3 + $0xc4] ss:$16 sps:$4 sm:$0xff]   ;;  %v10111_v57 = vld [vmem:[#allocation3 + $0xcc] ss:$16 sps:$4 sm:$0xff]  }
 0x94d   :  { %11872 = vst [vmem:[#allocation49_spill] sm:$0xff] %v10108_v56  ;;  %11873 = vst [vmem:[#allocation50_spill] sm:$0xff] %v10111_v57 }
 0x94f   :  { %4389 = vmatpush1.bf16.msra.mxu1 %v11852_v13  ;;  %4430 = vmatpush1.bf16.msra.mxu0 %v11853_v29  ;;  %v10114_v13 = vld [vmem:[#allocation3 + $0xc0] ss:$16 sps:$4 sm:$0xff]   ;;  %v10117_v29 = vld [vmem:[#allocation3 + $0xc8] ss:$16 sps:$4 sm:$0xff]  }
 0x950   :  { %4390 = vmatprep.subr.bf16.mxu1 %v11854_v22  ;;  %4431 = vmatprep.subr.bf16.mxu0 %v11855_v59  ;;  %11874 = vst [vmem:[#allocation56_spill] sm:$0xff] %v10114_v13  ;;  %11875 = vst [vmem:[#allocation57_spill] sm:$0xff] %v10117_v29  ;;  %v10120_v22 = vld [vmem:[#allocation3 + $0xe4] ss:$16 sps:$4 sm:$0xff]   ;;  %v10123_v59 = vld [vmem:[#allocation3 + $0xec] ss:$16 sps:$4 sm:$0xff]  }
 0x951   :  { %11876 = vst [vmem:[#allocation58_spill] sm:$0xff] %v10120_v22  ;;  %11877 = vst [vmem:[#allocation59_spill] sm:$0xff] %v10123_v59 }
 0x953   :  { %4391 = vmatpush1.bf16.msra.mxu1 %v9652_v27  ;;  %4432 = vmatpush1.bf16.msra.mxu0 %v9655_v7  ;;  %v11860_v27 = vld [vmem:[#allocation16_spill] sm:$0xff] }
 0x954   :  { %4392 = vmatprep.subr.bf16.mxu1 %v9658_v16  ;;  %4433 = vmatprep.subr.bf16.mxu0 %v9661_v3  ;;  %v6017_v3 = vld [vmem:[%s10871_s0 + $0x30] sm:$0xff] }
 0x955   :  { %v10032_v16 = vld [vmem:[#allocation3 + $0x4] ss:$16 sps:$4 sm:$0xff]   ;;  %v4484_v7 = vpack.c.bf16 %v6017_v3, %v6017_v3  ;;  %v10129_v3 = vld [vmem:[#allocation3 + $0xe8] ss:$16 sps:$4 sm:$0xff]  }
 0x956   :  { %11879 = vst [vmem:[#allocation61_spill] sm:$0xff] %v10129_v3 }
 0x957   :  { %4393 = vmatpush1.bf16.msra.mxu1 %v11856_v5  ;;  %4434 = vmatpush1.bf16.msra.mxu0 %v9667_v43  ;;  %v10035_v43 = vld [vmem:[#allocation3 + $0xc] ss:$16 sps:$4 sm:$0xff]   ;;  %v10126_v5 = vld [vmem:[#allocation3 + $0xe0] ss:$16 sps:$4 sm:$0xff]  }
 0x958   :  { %4488 = vmatprep.subr.bf16.mxu1 %v11857_v4  ;;  %4529 = vmatprep.subr.bf16.mxu0 %v11858_v6  ;;  %11878 = vst [vmem:[#allocation60_spill] sm:$0xff] %v10126_v5 }
 0x95a   :  { %4411 = vmatmul.mubr.bf16.vlgmr.msra.gmra.mrb[64].mxu1 %v9845_v21  ;;  %4452 = vmatmul.mubr.bf16.vlgmr.msra.gmra.mrb[68].mxu0 %v9845_v21  ;;  %v10040_v21 = vld [vmem:[#allocation3] ss:$16 sps:$4 sm:$0xff]  }
 0x95b   :  { %4489 = vmatpush1.bf16.msra.mxu1 %v11859_v38  ;;  %4530 = vmatpush1.bf16.msra.mxu0 %v11860_v27 }
 0x95c   :  { %4520 = vmatprep.mubr.bf16.mxu1 %v11344_v14  ;;  %4561 = vmatprep.mubr.bf16.mxu0 %v11344_v14 }
 0x95d   :  { %4570 = vmatprep.subr.bf16.mxu1 %v10032_v16  ;;  %4611 = vmatprep.subr.bf16.mxu0 %v10035_v43 }
 0x962   :  { %6018 = vmatmul.mubr.msk.bf16.vlgmr.msra.gmra.mrb[68].mxu1 %vm130_vm4, %v4484_v7  ;;  %6019 = vmatmul.mubr.msk.bf16.vlgmr.msra.gmra.mrb[72].mxu0 %vm130_vm4, %v4484_v7  ;;  %v11880_v7 = vld [vmem:[#allocation84_spill] sm:$0xff] }
 0x963   :  { %4571 = vmatpush1.bf16.msra.mxu1 %v10040_v21  ;;  %4612 = vmatpush1.bf16.msra.mxu0 %v10043_v0 }
 0x964   :  { %4572 = vmatprep.subr.bf16.mxu1 %v10046_v60  ;;  %4613 = vmatprep.subr.bf16.mxu0 %v10049_v34 }
 0x965   :  { %4602 = vmatprep.mubr.bf16.mxu1 %v11344_v14  ;;  %4643 = vmatprep.mubr.bf16.mxu0 %v11344_v14 }
 0x967   :  { %4573 = vmatpush1.bf16.msra.mxu1 %v10054_v28  ;;  %4614 = vmatpush1.bf16.msra.mxu0 %v10057_v41 }
 0x968   :  { %4574 = vmatprep.subr.bf16.mxu1 %v10060_v9  ;;  %4615 = vmatprep.subr.bf16.mxu0 %v10063_v2 }
 0x96b   :  { %4575 = vmatpush1.bf16.msra.mxu1 %v10066_v47  ;;  %4616 = vmatpush1.bf16.msra.mxu0 %v10069_v8 }
 0x96c   :  { %4576 = vmatprep.subr.bf16.mxu1 %v10072_v39  ;;  %4617 = vmatprep.subr.bf16.mxu0 %v10075_v51 }
 0x96f   :  { %4577 = vmatpush1.bf16.msra.mxu1 %v10078_v11  ;;  %4618 = vmatpush1.bf16.msra.mxu0 %v10081_v44 }
 0x970   :  { %4578 = vmatprep.subr.bf16.mxu1 %v10084_v36  ;;  %4619 = vmatprep.subr.bf16.mxu0 %v10087_v15 }
 0x973   :  { %4579 = vmatpush1.bf16.msra.mxu1 %v10090_v45  ;;  %4620 = vmatpush1.bf16.msra.mxu0 %v10093_v55 }
 0x974   :  { %4580 = vmatprep.subr.bf16.mxu1 %v10096_v50  ;;  %4621 = vmatprep.subr.bf16.mxu0 %v10099_v25 }
 0x977   :  { %4581 = vmatpush1.bf16.msra.mxu1 %v10102_v52  ;;  %4622 = vmatpush1.bf16.msra.mxu0 %v10105_v33  ;;  %v11896_v33 = vld [vmem:[#allocation97_spill] sm:$0xff] }
 0x978   :  { %4582 = vmatprep.subr.bf16.mxu1 %v10108_v56  ;;  %4623 = vmatprep.subr.bf16.mxu0 %v10111_v57  ;;  %v11885_v57 = vld [vmem:[#allocation51_spill] sm:$0xff]  ;;  %v11895_v56 = vld [vmem:[#allocation96_spill] sm:$0xff]  ;;  %v11914_v52 = vld [vmem:[#allocation29_spill] sm:$0xff] }
 0x97b   :  { %4583 = vmatpush1.bf16.msra.mxu1 %v10114_v13  ;;  %4624 = vmatpush1.bf16.msra.mxu0 %v10117_v29  ;;  %v11881_v13 = vld [vmem:[#allocation85_spill] sm:$0xff]  ;;  %v11883_v29 = vld [vmem:[#allocation87_spill] sm:$0xff] }
 0x97c   :  { %4584 = vmatprep.subr.bf16.mxu1 %v10120_v22  ;;  %4625 = vmatprep.subr.bf16.mxu0 %v10123_v59  ;;  %v11882_v22 = vld [vmem:[#allocation86_spill] sm:$0xff]  ;;  %v11884_v59 = vld [vmem:[#allocation88_spill] sm:$0xff] }
 0x97f   :  { %4585 = vmatpush1.bf16.msra.mxu1 %v10126_v5  ;;  %4626 = vmatpush1.bf16.msra.mxu0 %v10129_v3  ;;  %v11886_v3 = vld [vmem:[#allocation52_spill] sm:$0xff]  ;;  %v11889_v5 = vld [vmem:[#allocation54_spill] sm:$0xff] }
 0x980   :  { %4675 = vmatprep.subr.bf16.mxu1 %v11880_v7  ;;  %4716 = vmatprep.subr.bf16.mxu0 %v11881_v13  ;;  %v11887_v7 = vld [vmem:[#allocation90_spill] sm:$0xff]  ;;  %v11888_v13 = vld [vmem:[#allocation91_spill] sm:$0xff] }
 0x982   :  { %4603 = vmatmul.mubr.bf16.vlgmr.msra.gmra.mrb[68].mxu1 %v9983_v35  ;;  %4644 = vmatmul.mubr.bf16.vlgmr.msra.gmra.mrb[72].mxu0 %v9983_v35  ;;  %v11890_v35 = vld [vmem:[#allocation53_spill] sm:$0xff] }
 0x983   :  { %4676 = vmatpush1.bf16.msra.mxu1 %v11882_v22  ;;  %4717 = vmatpush1.bf16.msra.mxu0 %v11883_v29  ;;  %v11891_v22 = vld [vmem:[#allocation92_spill] sm:$0xff]  ;;  %v11892_v29 = vld [vmem:[#allocation93_spill] sm:$0xff] }
 0x984   :  { %4677 = vmatprep.subr.bf16.mxu1 %v11884_v59  ;;  %4718 = vmatprep.subr.bf16.mxu0 %v11885_v57  ;;  %v11893_v59 = vld [vmem:[#allocation94_spill] sm:$0xff]  ;;  %v11894_v57 = vld [vmem:[#allocation95_spill] sm:$0xff] }
 0x985   :  { %4707 = vmatprep.mubr.bf16.mxu1 %v11344_v14  ;;  %4748 = vmatprep.mubr.bf16.mxu0 %v11344_v14 }
 0x987   :  { %4678 = vmatpush1.bf16.msra.mxu1 %v11886_v3  ;;  %4719 = vmatpush1.bf16.msra.mxu0 %v11887_v7  ;;  %v11897_v3 = vld [vmem:[#allocation98_spill] sm:$0xff]  ;;  %v11898_v7 = vld [vmem:[#allocation99_spill] sm:$0xff] }
 0x988   :  { %4679 = vmatprep.subr.bf16.mxu1 %v11888_v13  ;;  %4720 = vmatprep.subr.bf16.mxu0 %v11889_v5  ;;  %v11899_v13 = vld [vmem:[#allocation100_spill] sm:$0xff]  ;;  %v11900_v5 = vld [vmem:[#allocation101_spill] sm:$0xff] }
 0x98b   :  { %4680 = vmatpush1.bf16.msra.mxu1 %v11890_v35  ;;  %4721 = vmatpush1.bf16.msra.mxu0 %v11891_v22  ;;  %v11901_v35 = vld [vmem:[#allocation102_spill] sm:$0xff]  ;;  %v11902_v22 = vld [vmem:[#allocation103_spill] sm:$0xff] }
 0x98c   :  { %4681 = vmatprep.subr.bf16.mxu1 %v11892_v29  ;;  %4722 = vmatprep.subr.bf16.mxu0 %v11893_v59  ;;  %v11903_v29 = vld [vmem:[#allocation104_spill] sm:$0xff]  ;;  %v11904_v59 = vld [vmem:[#allocation105_spill] sm:$0xff] }
 0x98f   :  { %4682 = vmatpush1.bf16.msra.mxu1 %v11894_v57  ;;  %4723 = vmatpush1.bf16.msra.mxu0 %v11895_v56  ;;  %v11905_v57 = vld [vmem:[#allocation106_spill] sm:$0xff]  ;;  %v11906_v56 = vld [vmem:[#allocation107_spill] sm:$0xff] }
 0x990   :  { %4683 = vmatprep.subr.bf16.mxu1 %v11896_v33  ;;  %4724 = vmatprep.subr.bf16.mxu0 %v11897_v3  ;;  %v11907_v33 = vld [vmem:[#allocation108_spill] sm:$0xff]  ;;  %v11908_v3 = vld [vmem:[#allocation109_spill] sm:$0xff] }
 0x993   :  { %4684 = vmatpush1.bf16.msra.mxu1 %v11898_v7  ;;  %4725 = vmatpush1.bf16.msra.mxu0 %v11899_v13  ;;  %v11909_v7 = vld [vmem:[#allocation110_spill] sm:$0xff]  ;;  %v11910_v13 = vld [vmem:[#allocation111_spill] sm:$0xff] }
 0x994   :  { %4685 = vmatprep.subr.bf16.mxu1 %v11900_v5  ;;  %4726 = vmatprep.subr.bf16.mxu0 %v11901_v35  ;;  %v11911_v5 = vld [vmem:[#allocation112_spill] sm:$0xff]  ;;  %v11912_v35 = vld [vmem:[#allocation18_spill] sm:$0xff] }
 0x997   :  { %4686 = vmatpush1.bf16.msra.mxu1 %v11902_v22  ;;  %4727 = vmatpush1.bf16.msra.mxu0 %v11903_v29  ;;  %v11913_v22 = vld [vmem:[#allocation19_spill] sm:$0xff] }
 0x998   :  { %4687 = vmatprep.subr.bf16.mxu1 %v11904_v59  ;;  %4728 = vmatprep.subr.bf16.mxu0 %v11905_v57 }
 0x99b   :  { %4688 = vmatpush1.bf16.msra.mxu1 %v11906_v56  ;;  %4729 = vmatpush1.bf16.msra.mxu0 %v11907_v33  ;;  %v11915_v33 = vld [vmem:[#allocation30_spill] sm:$0xff] }
 0x99c   :  { %4689 = vmatprep.subr.bf16.mxu1 %v11908_v3  ;;  %4730 = vmatprep.subr.bf16.mxu0 %v11909_v7 }
 0x99f   :  { %4690 = vmatpush1.bf16.msra.mxu1 %v11910_v13  ;;  %4731 = vmatpush1.bf16.msra.mxu0 %v11911_v5 }
 0x9a0   :  { %4758 = vmatprep.subr.bf16.mxu1 %v11912_v35  ;;  %4799 = vmatprep.subr.bf16.mxu0 %v11913_v22  ;;  %v11916_v35 = vld [vmem:[#allocation31_spill] sm:$0xff] }
 0x9ed   :  { %v4225_v29 = vpop.f32.mrb[60].mxu1  ;;  %v4266_v59 = vpop.f32.mrb[64].mxu0 }
 0x9ee   :  { %v6092_v57 = vadd.f32 %v4225_v29, %v11914_v52  ;;  %v4227_v25 = vpop.f32.mrb[61].mxu1  ;;  %v10171_v56 = vpop.f32.mrb[65].mxu0  ;;  %v6094_v22 = vadd.f32 %v4266_v59, %v11916_v35 }
 0x9ef   :  { %v6093_v50 = vadd.f32 %v4227_v25, %v11915_v33  ;;  %v4229_v3 = vpop.f32.mrb[62].mxu1  ;;  %v4270_v55 = vpop.f32.mrb[66].mxu0 }
 0x9f0   :  { %v4273_v7 = vsub.f32 0.0, %v6092_v57  ;;  %v4230_v45 = vpop.f32.mrb[63].mxu1  ;;  %v4271_v13 = vpop.f32.mrb[67].mxu0 }
 0x9f1   :  { %v4278_v15 = vsub.f32 0.0, %v6093_v50 }
 0x9f2   :  { %v4274_v5 = vmul.f32 1.442695, %v4273_v7 }
 0x9f3   :  { %v4279_v36 = vmul.f32 1.442695, %v4278_v15 }
 0x9f4   :  { %6813 = vpow2.f32 %v4274_v5 }
 0x9f5   :  { %6815 = vpow2.f32 %v4279_v36  ;;  %v11917_v36 = vld [vmem:[#allocation89_spill] sm:$0xff] }
 0x9f6   :  { %6817 = vtanh.f32 %v6094_v22 }
 0x9fe   :  { %v6814_v44 = vpop.eup %6813 }
 0x9ff   :  { %v6816_v11 = vpop.eup %6815  ;;  %v4276_v29 = vadd.f32 1.0, %v6814_v44 }
 0xa00   :  { %v4281_v52 = vadd.f32 1.0, %v6816_v11  ;;  %v6818_v25 = vpop.eup %6817 }
 0xa01   :  { %6819 = vrcp.f32 %v4276_v29 }
 0xa02   :  { %6821 = vrcp.f32 %v4281_v52 }
 0xa0b   :  { %v6820_v3 = vpop.eup %6819 }
 0xa0c   :  { %v6822_v55 = vpop.eup %6821  ;;  %v4291_v57 = vmul.f32 %v6820_v3, %v6818_v25 }
 0xa0d   :  { %v4290_v45 = vmul.f32 %v6822_v55, %v9829_v37 }
 0xa0f   :  { %v10176_v50 = vadd.f32 %v4291_v57, %v4290_v45 }
 0xa2d   :  { %v4412_v15 = vpop.f32.mrb[64].mxu1  ;;  %v4453_v7 = vpop.f32.mrb[68].mxu0 }
 0xa2e   :  { %v6096_v13 = vadd.f32 %v4412_v15, %v11917_v36  ;;  %v4414_v59 = vpop.f32.mrb[65].mxu1  ;;  %v4455_v5 = vpop.f32.mrb[69].mxu0  ;;  %v6098_v57 = vadd.f32 %v4453_v7, %v8286_v53  ;;  %v6095_v7 = vadd.f32 %v10171_v56, %v11594_v20 }
 0xa2f   :  { %v6097_v44 = vadd.f32 %v4414_v59, %v11483_v42  ;;  %v4416_v22 = vpop.f32.mrb[66].mxu1  ;;  %v4457_v11 = vpop.f32.mrb[70].mxu0  ;;  %v6099_v37 = vadd.f32 %v4455_v5, %v8282_v12 }
 0xa30   :  { %v4460_v29 = vsub.f32 0.0, %v6096_v13  ;;  %v4417_v52 = vpop.f32.mrb[67].mxu1  ;;  %v4458_v35 = vpop.f32.mrb[71].mxu0 }
 0xa31   :  { %v4465_v33 = vsub.f32 0.0, %v6097_v44  ;;  %v4472_v3 = vsub.f32 0.0, %v6099_v37 }
 0xa32   :  { %v4461_v51 = vmul.f32 1.442695, %v4460_v29 }
 0xa33   :  { %v4466_v25 = vmul.f32 1.442695, %v4465_v33  ;;  %v4473_v55 = vmul.f32 1.442695, %v4472_v3 }
 0xa34   :  { %6823 = vpow2.f32 %v4461_v51 }
 0xa35   :  { %6825 = vpow2.f32 %v4466_v25 }
 0xa36   :  { %6827 = vpow2.f32 %v4473_v55 }
 0xa37   :  { %6829 = vtanh.f32 %v6098_v57 }
 0xa3e   :  { %v6824_v45 = vpop.eup %6823 }
 0xa3f   :  { %v6826_v15 = vpop.eup %6825  ;;  %v4463_v36 = vadd.f32 1.0, %v6824_v45 }
 0xa40   :  { %v4468_v59 = vadd.f32 1.0, %v6826_v15  ;;  %v6828_v35 = vpop.eup %6827 }
 0xa41   :  { %6831 = vrcp.f32 %v4463_v36  ;;  %v6830_v13 = vpop.eup %6829  ;;  %v4475_v5 = vadd.f32 1.0, %v6828_v35  ;;  %v4285_v36 = vsub.f32 0.0, %v6095_v7 }
 0xa42   :  { %6833 = vrcp.f32 %v4468_v59 }
 0xa43   :  { %6835 = vrcp.f32 %v4475_v5 }
 0xa4b   :  { %v6832_v44 = vpop.eup %6831 }
 0xa4c   :  { %v6834_v33 = vpop.eup %6833  ;;  %v4478_v22 = vmul.f32 %v6832_v44, %v6830_v13  ;;  %v4286_v44 = vmul.f32 1.442695, %v4285_v36  ;;  %v11918_v36 = vld [vmem:[#allocation20_spill] sm:$0xff] }
 0xa4d   :  { %v4477_v51 = vmul.f32 %v6834_v33, %v9836_v19  ;;  %v6836_v13 = vpop.eup %6835 }
 0xa4f   :  { %v10183_v11 = vadd.f32 %v4478_v22, %v4477_v51 }
 0xa51   :  { %6837 = vtanh.f32 %v10183_v11 }
 0xa55   :  { %v4604_v29 = vpop.f32.mrb[68].mxu1  ;;  %v4645_v52 = vpop.f32.mrb[72].mxu0 }
 0xa56   :  { %v6100_v25 = vadd.f32 %v4604_v29, %v11487_v32  ;;  %v4606_v37 = vpop.f32.mrb[69].mxu1  ;;  %v4647_v3 = vpop.f32.mrb[73].mxu0  ;;  %v6102_v7 = vadd.f32 %v4645_v52, %v8014_v17  ;;  %v11919_v52 = vld [vmem:[#allocation21_spill] sm:$0xff] }
 0xa57   :  { %v6101_v55 = vadd.f32 %v4606_v37, %v7999_v58  ;;  %v4608_v57 = vpop.f32.mrb[70].mxu1  ;;  %v4649_v45 = vpop.f32.mrb[74].mxu0  ;;  %v11924_v37 = vld [vmem:[#allocation26_spill] sm:$0xff] }
 0xa58   :  { %v4652_v19 = vsub.f32 0.0, %v6100_v25  ;;  %v4609_v15 = vpop.f32.mrb[71].mxu1  ;;  %v4650_v59 = vpop.f32.mrb[75].mxu0  ;;  %v11921_v25 = vld [vmem:[#allocation23_spill] sm:$0xff] }
 0xa59   :  { %v4657_v35 = vsub.f32 0.0, %v6101_v55  ;;  %v11926_v55 = vld [vmem:[#allocation28_spill] sm:$0xff]  ;;  %v11927_v45 = vld [vmem:[#allocation55_spill] sm:$0xff] }
 0xa5a   :  { %v4653_v33 = vmul.f32 1.442695, %v4652_v19  ;;  %v6103_v19 = vadd.f32 %v4647_v3, %v11927_v45  ;;  %v11928_v15 = vld [vmem:[#allocation32_spill] sm:$0xff] }
 0xa5b   :  { %v6838_v22 = vpop.eup %6837  ;;  %v4658_v56 = vmul.f32 1.442695, %v4657_v35 }
 0xa5c   :  { %6839 = vpow2.f32 %v4653_v33  ;;  %v4481_v5 = vmul.f32 %v6838_v22, %v6836_v13  ;;  %v11929_v33 = vld [vmem:[#allocation33_spill] sm:$0xff]  ;;  %v11930_v22 = vld [vmem:[#allocation34_spill] sm:$0xff] }
 0xa5d   :  { %6841 = vpow2.f32 %v4658_v56  ;;  %v4664_v56 = vsub.f32 0.0, %v6103_v19  ;;  %v10279_v19 = vld [vmem:[#allocation5 + $0x68] ss:$16 sps:$4 sm:$0xff]  }
 0xa5e   :  { %6843 = vpow2.f32 %v4286_v44  ;;  %v10190_v51 = vpack.c.bf16 %v4481_v5, %v4481_v5  ;;  %v11931_v5 = vld [vmem:[#allocation35_spill] sm:$0xff] }
 0xa5f   :  { %6845 = vtanh.f32 %v6102_v7  ;;  %v11932_v7 = vld [vmem:[#allocation36_spill] sm:$0xff] }
 0xa60   :  { %4708 = vmatmul.mubr.bf16.vlgmr.msra.gmra.mrb[72].mxu1 %v10190_v51  ;;  %4749 = vmatmul.mubr.bf16.vlgmr.msra.gmra.mrb[76].mxu0 %v10190_v51 }
 0xa61   :  { %4759 = vmatpush1.bf16.msra.mxu1 %v9849_v46  ;;  %4800 = vmatpush1.bf16.msra.mxu0 %v9852_v31 }
 0xa62   :  { %4760 = vmatprep.subr.bf16.mxu1 %v9855_v61  ;;  %4801 = vmatprep.subr.bf16.mxu0 %v9858_v10 }
 0xa63   :  { %4790 = vmatprep.mubr.bf16.mxu1 %v11344_v14  ;;  %4831 = vmatprep.mubr.bf16.mxu0 %v11344_v14 }
 0xa65   :  { %4761 = vmatpush1.bf16.msra.mxu1 %v9864_v26  ;;  %4802 = vmatpush1.bf16.msra.mxu0 %v9867_v1  ;;  %v11920_v26 = vld [vmem:[#allocation22_spill] sm:$0xff] }
 0xa66   :  { %v6840_v29 = vpop.eup %6839  ;;  %4762 = vmatprep.subr.bf16.mxu1 %v9870_v63  ;;  %4803 = vmatprep.subr.bf16.mxu0 %v9873_v49  ;;  %v11922_v63 = vld [vmem:[#allocation24_spill] sm:$0xff]  ;;  %v11923_v49 = vld [vmem:[#allocation25_spill] sm:$0xff] }
 0xa67   :  { %v6842_v46 = vpop.eup %6841  ;;  %v4655_v31 = vadd.f32 1.0, %v6840_v29 }
 0xa68   :  { %v6844_v61 = vpop.eup %6843  ;;  %v4660_v10 = vadd.f32 1.0, %v6842_v46 }
 0xa69   :  { %6847 = vrcp.f32 %v4655_v31  ;;  %4763 = vmatpush1.bf16.msra.mxu1 %v9876_v24  ;;  %4804 = vmatpush1.bf16.msra.mxu0 %v11918_v36  ;;  %v4288_v1 = vadd.f32 1.0, %v6844_v61  ;;  %v11925_v24 = vld [vmem:[#allocation27_spill] sm:$0xff]  ;;  %v6846_v57 = vpop.eup %6845  ;;  %v4665_v31 = vmul.f32 1.442695, %v4664_v56 }
 0xa6a   :  { %6849 = vrcp.f32 %v4660_v10  ;;  %4764 = vmatprep.subr.bf16.mxu1 %v11919_v52  ;;  %4805 = vmatprep.subr.bf16.mxu0 %v11920_v26  ;;  %v10232_v10 = vld [vmem:[#allocation5 + $0x4] ss:$16 sps:$4 sm:$0xff]   ;;  %v10235_v36 = vld [vmem:[#allocation5 + $0xc] ss:$16 sps:$4 sm:$0xff]   ;;  %v10255_v52 = vld [vmem:[#allocation5 + $0x28] ss:$16 sps:$4 sm:$0xff]  }
 0xa6b   :  { %6851 = vtanh.f32 %v10176_v50  ;;  %v10258_v26 = vld [vmem:[#allocation5 + $0x44] ss:$16 sps:$4 sm:$0xff]   ;;  %v10304_v56 = vld [vmem:[#allocation5 + $0xa8] ss:$16 sps:$4 sm:$0xff]  }
 0xa6c   :  { %6853 = vrcp.f32 %v4288_v1  ;;  %v10261_v1 = vld [vmem:[#allocation5 + $0x4c] ss:$16 sps:$4 sm:$0xff]  }
 0xa6d   :  { %4765 = vmatpush1.bf16.msra.mxu1 %v11921_v25  ;;  %4806 = vmatpush1.bf16.msra.mxu0 %v11922_v63  ;;  %6855 = vpow2.f32 %v4665_v31  ;;  %v10264_v63 = vld [vmem:[#allocation5 + $0x40] ss:$16 sps:$4 sm:$0xff]   ;;  %v10316_v31 = vld [vmem:[#allocation5 + $0xc8] ss:$16 sps:$4 sm:$0xff]  }
 0xa6e   :  { %4766 = vmatprep.subr.bf16.mxu1 %v11923_v49  ;;  %4807 = vmatprep.subr.bf16.mxu0 %v11924_v37  ;;  %v10267_v49 = vld [vmem:[#allocation5 + $0x48] ss:$16 sps:$4 sm:$0xff]   ;;  %v10270_v37 = vld [vmem:[#allocation5 + $0x64] ss:$16 sps:$4 sm:$0xff]   ;;  %11936 = vst [vmem:[#allocation64_spill] sm:$0xff] %v10316_v31 }
 0xa71   :  { %4767 = vmatpush1.bf16.msra.mxu1 %v11925_v24  ;;  %4808 = vmatpush1.bf16.msra.mxu0 %v11926_v55  ;;  %v10273_v24 = vld [vmem:[#allocation5 + $0x6c] ss:$16 sps:$4 sm:$0xff]  }
 0xa72   :  { %4768 = vmatprep.subr.bf16.mxu1 %v11928_v15  ;;  %4809 = vmatprep.subr.bf16.mxu0 %v9912_v62  ;;  %v11933_v62 = vld [vmem:[#allocation37_spill] sm:$0xff]  ;;  %v10283_v15 = vld [vmem:[#allocation5 + $0x84] ss:$16 sps:$4 sm:$0xff]  }
 0xa73   :  { %v6848_v59 = vpop.eup %6847 }
 0xa74   :  { %v6850_v35 = vpop.eup %6849  ;;  %v4670_v13 = vmul.f32 %v6848_v59, %v6846_v57  ;;  %v10276_v57 = vld [vmem:[#allocation5 + $0x60] ss:$16 sps:$4 sm:$0xff]   ;;  %v10286_v59 = vld [vmem:[#allocation5 + $0x8c] ss:$16 sps:$4 sm:$0xff]  }
 0xa75   :  { %v4669_v44 = vmul.f32 %v6850_v35, %v9928_v40  ;;  %4769 = vmatpush1.bf16.msra.mxu1 %v11929_v33  ;;  %4810 = vmatpush1.bf16.msra.mxu0 %v11930_v22  ;;  %v6852_v29 = vpop.eup %6851  ;;  %v10289_v35 = vld [vmem:[#allocation5 + $0x80] ss:$16 sps:$4 sm:$0xff]   ;;  %v10298_v33 = vld [vmem:[#allocation5 + $0xac] ss:$16 sps:$4 sm:$0xff]  }
 0xa76   :  { %4770 = vmatprep.subr.bf16.mxu1 %v11931_v5  ;;  %4811 = vmatprep.subr.bf16.mxu0 %v11932_v7  ;;  %v6854_v46 = vpop.eup %6853  ;;  %v10301_v22 = vld [vmem:[#allocation5 + $0xa0] ss:$16 sps:$4 sm:$0xff]   ;;  %v10307_v5 = vld [vmem:[#allocation5 + $0xc4] ss:$16 sps:$4 sm:$0xff]   ;;  %v10310_v7 = vld [vmem:[#allocation5 + $0xcc] ss:$16 sps:$4 sm:$0xff]  }
 0xa77   :  { %v10224_v3 = vadd.f32 %v4670_v13, %v4669_v44  ;;  %v4294_v40 = vmul.f32 %v6854_v46, %v6852_v29  ;;  %v6856_v25 = vpop.eup %6855  ;;  %v10292_v13 = vld [vmem:[#allocation5 + $0x88] ss:$16 sps:$4 sm:$0xff]   ;;  %v10295_v44 = vld [vmem:[#allocation5 + $0xa4] ss:$16 sps:$4 sm:$0xff]   ;;  %11934 = vst [vmem:[#allocation62_spill] sm:$0xff] %v10310_v7 }
 0xa78   :  { %v4667_v55 = vadd.f32 1.0, %v6856_v25 }
 0xa79   :  { %4771 = vmatpush1.bf16.msra.mxu1 %v9930_v18  ;;  %4812 = vmatpush1.bf16.msra.mxu0 %v11933_v62  ;;  %v4757_v61 = vpack.c.bf16 %v4294_v40, %v4294_v40  ;;  %v10247_v18 = vld [vmem:[#allocation5 + $0x2c] ss:$16 sps:$4 sm:$0xff]   ;;  %6857 = vtanh.f32 %v10224_v3  ;;  %v10313_v62 = vld [vmem:[#allocation5 + $0xc0] ss:$16 sps:$4 sm:$0xff]   ;;  %v10319_v40 = vld [vmem:[#allocation5 + $0xe4] ss:$16 sps:$4 sm:$0xff]  }
 0xa7a   :  { %4772 = vmatprep.subr.bf16.mxu1 %v9936_v23  ;;  %4813 = vmatprep.subr.bf16.mxu0 %v9939_v30  ;;  %v10238_v23 = vld [vmem:[#allocation5] ss:$16 sps:$4 sm:$0xff]   ;;  %v10241_v30 = vld [vmem:[#allocation5 + $0x8] ss:$16 sps:$4 sm:$0xff]   ;;  %6859 = vrcp.f32 %v4667_v55  ;;  %11935 = vst [vmem:[#allocation63_spill] sm:$0xff] %v10313_v62  ;;  %11937 = vst [vmem:[#allocation65_spill] sm:$0xff] %v10319_v40 }
 0xa7b   :  { %v10325_v55 = vld [vmem:[#allocation5 + $0xe0] ss:$16 sps:$4 sm:$0xff]  }
 0xa7d   :  { %4773 = vmatpush1.bf16.msra.mxu1 %v9942_v48  ;;  %4814 = vmatpush1.bf16.msra.mxu0 %v9945_v54  ;;  %v10244_v54 = vld [vmem:[#allocation5 + $0x24] ss:$16 sps:$4 sm:$0xff]   ;;  %v10252_v48 = vld [vmem:[#allocation5 + $0x20] ss:$16 sps:$4 sm:$0xff]  }
 0xa7e   :  { %4863 = vmatprep.subr.bf16.mxu1 %v10232_v10  ;;  %4904 = vmatprep.subr.bf16.mxu0 %v10235_v36 }
 0xa80   :  { %4791 = vmatmul.mubr.bf16.vlgmr.msra.gmra.mrb[72].mxu1 %v4757_v61  ;;  %4832 = vmatmul.mubr.bf16.vlgmr.msra.gmra.mrb[76].mxu0 %v4757_v61  ;;  %v10322_v61 = vld [vmem:[#allocation5 + $0xec] ss:$16 sps:$4 sm:$0xff]  }
 0xa81   :  { %4864 = vmatpush1.bf16.msra.mxu1 %v10238_v23  ;;  %4905 = vmatpush1.bf16.msra.mxu0 %v10241_v30 }
 0xa82   :  { %4865 = vmatprep.subr.bf16.mxu1 %v10244_v54  ;;  %4906 = vmatprep.subr.bf16.mxu0 %v10247_v18 }
 0xa83   :  { %4895 = vmatprep.mubr.bf16.mxu1 %v11344_v14  ;;  %4936 = vmatprep.mubr.bf16.mxu0 %v11344_v14  ;;  %v6858_v29 = vpop.eup %6857 }
 0xa84   :  { %v6860_v46 = vpop.eup %6859 }
 0xa85   :  { %4866 = vmatpush1.bf16.msra.mxu1 %v10252_v48  ;;  %4907 = vmatpush1.bf16.msra.mxu0 %v10255_v52  ;;  %v4673_v25 = vmul.f32 %v6860_v46, %v6858_v29  ;;  %v10341_v29 = vld [vmem:[#allocation7] ss:$16 sps:$4 sm:$0xff]   ;;  %v10344_v46 = vld [vmem:[#allocation7 + $0x8] ss:$16 sps:$4 sm:$0xff]  }
 0xa86   :  { %4867 = vmatprep.subr.bf16.mxu1 %v10258_v26  ;;  %4908 = vmatprep.subr.bf16.mxu0 %v10261_v1  ;;  %11941 = vst [vmem:[#allocation69_spill] sm:$0xff] %v10341_v29  ;;  %11942 = vst [vmem:[#allocation70_spill] sm:$0xff] %v10344_v46 }
 0xa89   :  { %4868 = vmatpush1.bf16.msra.mxu1 %v10264_v63  ;;  %4909 = vmatpush1.bf16.msra.mxu0 %v10267_v49 }
 0xa8a   :  { %4869 = vmatprep.subr.bf16.mxu1 %v10270_v37  ;;  %4910 = vmatprep.subr.bf16.mxu0 %v10273_v24 }
 0xa8d   :  { %4870 = vmatpush1.bf16.msra.mxu1 %v10276_v57  ;;  %4911 = vmatpush1.bf16.msra.mxu0 %v10279_v19 }
 0xa8e   :  { %4871 = vmatprep.subr.bf16.mxu1 %v10283_v15  ;;  %4912 = vmatprep.subr.bf16.mxu0 %v10286_v59 }
 0xa91   :  { %4872 = vmatpush1.bf16.msra.mxu1 %v10289_v35  ;;  %4913 = vmatpush1.bf16.msra.mxu0 %v10292_v13 }
 0xa92   :  { %4873 = vmatprep.subr.bf16.mxu1 %v10295_v44  ;;  %4914 = vmatprep.subr.bf16.mxu0 %v10298_v33 }
 0xa95   :  { %4874 = vmatpush1.bf16.msra.mxu1 %v10301_v22  ;;  %4915 = vmatpush1.bf16.msra.mxu0 %v10304_v56 }
 0xa96   :  { %4875 = vmatprep.subr.bf16.mxu1 %v10307_v5  ;;  %4916 = vmatprep.subr.bf16.mxu0 %v10310_v7  ;;  %v10328_v7 = vld [vmem:[#allocation5 + $0xe8] ss:$16 sps:$4 sm:$0xff]  }
 0xa97   :  { %11938 = vst [vmem:[#allocation66_spill] sm:$0xff] %v10328_v7 }
 0xa99   :  { %4876 = vmatpush1.bf16.msra.mxu1 %v10313_v62  ;;  %4917 = vmatpush1.bf16.msra.mxu0 %v10316_v31  ;;  %v10331_v62 = vpack.c.bf16 %v4673_v25, %v4673_v25  ;;  %v10333_v31 = vld [vmem:[#allocation7 + $0x4] ss:$16 sps:$4 sm:$0xff]  }
 0xa9a   :  { %4877 = vmatprep.subr.bf16.mxu1 %v10319_v40  ;;  %4918 = vmatprep.subr.bf16.mxu0 %v10322_v61  ;;  %11939 = vst [vmem:[#allocation67_spill] sm:$0xff] %v10333_v31  ;;  %v10336_v40 = vld [vmem:[#allocation7 + $0xc] ss:$16 sps:$4 sm:$0xff]   ;;  %v10347_v25 = vld [vmem:[#allocation7 + $0x24] ss:$16 sps:$4 sm:$0xff]  }
 0xa9b   :  { %11940 = vst [vmem:[#allocation68_spill] sm:$0xff] %v10336_v40  ;;  %11943 = vst [vmem:[#allocation71_spill] sm:$0xff] %v10347_v25 }
 0xa9d   :  { %4878 = vmatpush1.bf16.msra.mxu1 %v10325_v55  ;;  %4919 = vmatpush1.bf16.msra.mxu0 %v10328_v7  ;;  %v10370_v7 = vld [vmem:[#allocation7 + $0x48] ss:$16 sps:$4 sm:$0xff]  }
 0xa9e   :  { %4945 = vmatprep.subr.bf16.mxu1 %v10333_v31  ;;  %4986 = vmatprep.subr.bf16.mxu0 %v10336_v40  ;;  %v10350_v31 = vld [vmem:[#allocation7 + $0x2c] ss:$16 sps:$4 sm:$0xff]   ;;  %v10355_v40 = vld [vmem:[#allocation7 + $0x20] ss:$16 sps:$4 sm:$0xff]   ;;  %11950 = vst [vmem:[#allocation78_spill] sm:$0xff] %v10370_v7 }
 0xa9f   :  { %11944 = vst [vmem:[#allocation72_spill] sm:$0xff] %v10350_v31  ;;  %11945 = vst [vmem:[#allocation73_spill] sm:$0xff] %v10355_v40 }
 0xaa0   :  { %4896 = vmatmul.mubr.bf16.vlgmr.msra.gmra.mrb[76].mxu1 %v10331_v62  ;;  %4937 = vmatmul.mubr.bf16.vlgmr.msra.gmra.mrb[80].mxu0 %v10331_v62 }
 0xaa1   :  { %4946 = vmatpush1.bf16.msra.mxu1 %v10341_v29  ;;  %4987 = vmatpush1.bf16.msra.mxu0 %v10344_v46  ;;  %v10358_v29 = vld [vmem:[#allocation7 + $0x28] ss:$16 sps:$4 sm:$0xff]   ;;  %v10361_v46 = vld [vmem:[#allocation7 + $0x44] ss:$16 sps:$4 sm:$0xff]  }
 0xaa2   :  { %4947 = vmatprep.subr.bf16.mxu1 %v10347_v25  ;;  %4988 = vmatprep.subr.bf16.mxu0 %v10350_v31  ;;  %11946 = vst [vmem:[#allocation74_spill] sm:$0xff] %v10358_v29  ;;  %11947 = vst [vmem:[#allocation75_spill] sm:$0xff] %v10361_v46  ;;  %v10364_v25 = vld [vmem:[#allocation7 + $0x4c] ss:$16 sps:$4 sm:$0xff]   ;;  %v10367_v31 = vld [vmem:[#allocation7 + $0x40] ss:$16 sps:$4 sm:$0xff]  }
 0xaa3   :  { %4977 = vmatprep.mubr.bf16.mxu1 %v11344_v14  ;;  %5018 = vmatprep.mubr.bf16.mxu0 %v11344_v14  ;;  %11948 = vst [vmem:[#allocation76_spill] sm:$0xff] %v10364_v25  ;;  %11949 = vst [vmem:[#allocation77_spill] sm:$0xff] %v10367_v31 }
 0xaa5   :  { %4948 = vmatpush1.bf16.msra.mxu1 %v10355_v40  ;;  %4989 = vmatpush1.bf16.msra.mxu0 %v10358_v29  ;;  %v10373_v40 = vld [vmem:[#allocation7 + $0x64] ss:$16 sps:$4 sm:$0xff]   ;;  %v10376_v29 = vld [vmem:[#allocation7 + $0x6c] ss:$16 sps:$4 sm:$0xff]  }
 0xaa6   :  { %4949 = vmatprep.subr.bf16.mxu1 %v10361_v46  ;;  %4990 = vmatprep.subr.bf16.mxu0 %v10364_v25  ;;  %11951 = vst [vmem:[#allocation79_spill] sm:$0xff] %v10373_v40  ;;  %11952 = vst [vmem:[#allocation80_spill] sm:$0xff] %v10376_v29  ;;  %v10379_v46 = vld [vmem:[#allocation7 + $0x60] ss:$16 sps:$4 sm:$0xff]   ;;  %v10382_v25 = vld [vmem:[#allocation7 + $0x68] ss:$16 sps:$4 sm:$0xff]  }
 0xaa7   :  { %11953 = vst [vmem:[#allocation81_spill] sm:$0xff] %v10379_v46  ;;  %11954 = vst [vmem:[#allocation82_spill] sm:$0xff] %v10382_v25 }
 0xaa9   :  { %4950 = vmatpush1.bf16.msra.mxu1 %v10367_v31  ;;  %4991 = vmatpush1.bf16.msra.mxu0 %v10370_v7  ;;  %v10385_v31 = vld [vmem:[#allocation7 + $0x84] ss:$16 sps:$4 sm:$0xff]   ;;  %v10388_v7 = vld [vmem:[#allocation7 + $0x8c] ss:$16 sps:$4 sm:$0xff]  }
 0xaaa   :  { %4951 = vmatprep.subr.bf16.mxu1 %v10373_v40  ;;  %4992 = vmatprep.subr.bf16.mxu0 %v10376_v29  ;;  %11955 = vst [vmem:[#allocation83_spill] sm:$0xff] %v10385_v31  ;;  %11956 = vst [vmem:[#allocation15_spill] sm:$0xff] %v10388_v7  ;;  %v10391_v40 = vld [vmem:[#allocation7 + $0x80] ss:$16 sps:$4 sm:$0xff]   ;;  %v10394_v29 = vld [vmem:[#allocation7 + $0x88] ss:$16 sps:$4 sm:$0xff]  }
 0xaab   :  { %11957 = vst [vmem:[#allocation17_spill] sm:$0xff] %v10391_v40  ;;  %11958 = vst [vmem:[#allocation14_spill] sm:$0xff] %v10394_v29 }
 0xaad   :  { %4952 = vmatpush1.bf16.msra.mxu1 %v10379_v46  ;;  %4993 = vmatpush1.bf16.msra.mxu0 %v10382_v25  ;;  %v10397_v46 = vld [vmem:[#allocation7 + $0xa4] ss:$16 sps:$4 sm:$0xff]   ;;  %v10400_v25 = vld [vmem:[#allocation7 + $0xac] ss:$16 sps:$4 sm:$0xff]  }
 0xaae   :  { %4953 = vmatprep.subr.bf16.mxu1 %v10385_v31  ;;  %4994 = vmatprep.subr.bf16.mxu0 %v10388_v7  ;;  %11959 = vst [vmem:[#allocation16_spill] sm:$0xff] %v10397_v46  ;;  %11960 = vst [vmem:[#allocation84_spill] sm:$0xff] %v10400_v25  ;;  %v10403_v31 = vld [vmem:[#allocation7 + $0xa0] ss:$16 sps:$4 sm:$0xff]   ;;  %v10406_v7 = vld [vmem:[#allocation7 + $0xa8] ss:$16 sps:$4 sm:$0xff]  }
 0xaaf   :  { %11961 = vst [vmem:[#allocation85_spill] sm:$0xff] %v10403_v31  ;;  %11962 = vst [vmem:[#allocation86_spill] sm:$0xff] %v10406_v7 }
 0xab1   :  { %4954 = vmatpush1.bf16.msra.mxu1 %v10391_v40  ;;  %4995 = vmatpush1.bf16.msra.mxu0 %v10394_v29  ;;  %v10409_v40 = vld [vmem:[#allocation7 + $0xc4] ss:$16 sps:$4 sm:$0xff]   ;;  %v10412_v29 = vld [vmem:[#allocation7 + $0xcc] ss:$16 sps:$4 sm:$0xff]  }
 0xab2   :  { %4955 = vmatprep.subr.bf16.mxu1 %v10397_v46  ;;  %4996 = vmatprep.subr.bf16.mxu0 %v10400_v25  ;;  %11963 = vst [vmem:[#allocation87_spill] sm:$0xff] %v10409_v40  ;;  %11964 = vst [vmem:[#allocation88_spill] sm:$0xff] %v10412_v29  ;;  %v10415_v46 = vld [vmem:[#allocation7 + $0xc0] ss:$16 sps:$4 sm:$0xff]   ;;  %v10418_v25 = vld [vmem:[#allocation7 + $0xc8] ss:$16 sps:$4 sm:$0xff]  }
 0xab5   :  { %4956 = vmatpush1.bf16.msra.mxu1 %v10403_v31  ;;  %4997 = vmatpush1.bf16.msra.mxu0 %v10406_v7  ;;  %v10421_v31 = vld [vmem:[#allocation7 + $0xe4] ss:$16 sps:$4 sm:$0xff]   ;;  %v10424_v7 = vld [vmem:[#allocation7 + $0xec] ss:$16 sps:$4 sm:$0xff]  }
 0xab6   :  { %4957 = vmatprep.subr.bf16.mxu1 %v10409_v40  ;;  %4998 = vmatprep.subr.bf16.mxu0 %v10412_v29  ;;  %v10427_v40 = vld [vmem:[#allocation7 + $0xe0] ss:$16 sps:$4 sm:$0xff]   ;;  %v10430_v29 = vld [vmem:[#allocation7 + $0xe8] ss:$16 sps:$4 sm:$0xff]  }
 0xab7   :  { %11965 = vst [vmem:[#allocation51_spill] sm:$0xff] %v10427_v40  ;;  %11966 = vst [vmem:[#allocation52_spill] sm:$0xff] %v10430_v29 }
 0xab9   :  { %4958 = vmatpush1.bf16.msra.mxu1 %v10415_v46  ;;  %4999 = vmatpush1.bf16.msra.mxu0 %v10418_v25 }
 0xaba   :  { %4959 = vmatprep.subr.bf16.mxu1 %v10421_v31  ;;  %5000 = vmatprep.subr.bf16.mxu0 %v10424_v7 }
 0xabd   :  { %4960 = vmatpush1.bf16.msra.mxu1 %v10427_v40  ;;  %5001 = vmatpush1.bf16.msra.mxu0 %v10430_v29  ;;  %v6020_v40 = vld [vmem:[%s10871_s0 + $0x38] sm:$0xff] }
 0xabe   :  { %5055 = vmatprep.subr.bf16.mxu1 %v11857_v4  ;;  %5096 = vmatprep.subr.bf16.mxu0 %v11858_v6  ;;  %v5051_v4 = vpack.c.bf16 %v6020_v40, %v6020_v40  ;;  %v11967_v6 = vld [vmem:[#allocation38_spill] sm:$0xff]  ;;  %v11984_v40 = vld [vmem:[#allocation60_spill] sm:$0xff] }
 0xac0   :  { %4978 = vmatmul.mubr.bf16.vlgmr.msra.gmra.mrb[76].mxu1 %v10190_v51  ;;  %5019 = vmatmul.mubr.bf16.vlgmr.msra.gmra.mrb[80].mxu0 %v10190_v51  ;;  %v11983_v51 = vld [vmem:[#allocation59_spill] sm:$0xff] }
 0xac1   :  { %5056 = vmatpush1.bf16.msra.mxu1 %v11859_v38  ;;  %5097 = vmatpush1.bf16.msra.mxu0 %v11860_v27  ;;  %v11968_v38 = vld [vmem:[#allocation39_spill] sm:$0xff]  ;;  %v11969_v27 = vld [vmem:[#allocation40_spill] sm:$0xff] }
 0xac2   :  { %5087 = vmatprep.mubr.bf16.mxu1 %v11344_v14  ;;  %5128 = vmatprep.mubr.bf16.mxu0 %v11344_v14 }
 0xac3   :  { %5137 = vmatprep.subr.bf16.mxu1 %v10032_v16  ;;  %5178 = vmatprep.subr.bf16.mxu0 %v10035_v43  ;;  %v11970_v16 = vld [vmem:[#allocation41_spill] sm:$0xff]  ;;  %v11971_v43 = vld [vmem:[#allocation42_spill] sm:$0xff] }
 0xac8   :  { %6021 = vmatmul.mubr.msk.bf16.vlgmr.msra.gmra.mrb[80].mxu1 %vm130_vm4, %v5051_v4  ;;  %6022 = vmatmul.mubr.msk.bf16.vlgmr.msra.gmra.mrb[84].mxu0 %vm130_vm4, %v5051_v4  ;;  %v11985_v4 = vld [vmem:[#allocation61_spill] sm:$0xff] }
 0xac9   :  { %5138 = vmatpush1.bf16.msra.mxu1 %v10040_v21  ;;  %5179 = vmatpush1.bf16.msra.mxu0 %v10043_v0  ;;  %v11972_v21 = vld [vmem:[#allocation43_spill] sm:$0xff]  ;;  %v11973_v0 = vld [vmem:[#allocation44_spill] sm:$0xff] }
 0xaca   :  { %5139 = vmatprep.subr.bf16.mxu1 %v10046_v60  ;;  %5180 = vmatprep.subr.bf16.mxu0 %v10049_v34  ;;  %v11974_v60 = vld [vmem:[#allocation45_spill] sm:$0xff]  ;;  %v11975_v34 = vld [vmem:[#allocation46_spill] sm:$0xff] }
 0xacb   :  { %5169 = vmatprep.mubr.bf16.mxu1 %v11344_v14  ;;  %5210 = vmatprep.mubr.bf16.mxu0 %v11344_v14 }
 0xacd   :  { %5140 = vmatpush1.bf16.msra.mxu1 %v10054_v28  ;;  %5181 = vmatpush1.bf16.msra.mxu0 %v10057_v41  ;;  %v11976_v28 = vld [vmem:[#allocation47_spill] sm:$0xff]  ;;  %v11977_v41 = vld [vmem:[#allocation48_spill] sm:$0xff] }
 0xace   :  { %5141 = vmatprep.subr.bf16.mxu1 %v10060_v9  ;;  %5182 = vmatprep.subr.bf16.mxu0 %v10063_v2  ;;  %v11978_v9 = vld [vmem:[#allocation49_spill] sm:$0xff]  ;;  %v11979_v2 = vld [vmem:[#allocation50_spill] sm:$0xff] }
 0xad1   :  { %5142 = vmatpush1.bf16.msra.mxu1 %v10066_v47  ;;  %5183 = vmatpush1.bf16.msra.mxu0 %v10069_v8  ;;  %v11980_v47 = vld [vmem:[#allocation56_spill] sm:$0xff]  ;;  %v11981_v8 = vld [vmem:[#allocation57_spill] sm:$0xff] }
 0xad2   :  { %5143 = vmatprep.subr.bf16.mxu1 %v10072_v39  ;;  %5184 = vmatprep.subr.bf16.mxu0 %v11967_v6  ;;  %v11982_v39 = vld [vmem:[#allocation58_spill] sm:$0xff] }
 0xad3   :  { %v10480_v6 = vld [vmem:[#allocation8 + $0x4] ss:$16 sps:$4 sm:$0xff]  }
 0xad4   :  { %11986 = vst [vmem:[#allocation90_spill] sm:$0xff] %v10480_v6 }
 0xad5   :  { %5144 = vmatpush1.bf16.msra.mxu1 %v11968_v38  ;;  %5185 = vmatpush1.bf16.msra.mxu0 %v11969_v27  ;;  %v10483_v38 = vld [vmem:[#allocation8 + $0xc] ss:$16 sps:$4 sm:$0xff]   ;;  %v10488_v27 = vld [vmem:[#allocation8] ss:$16 sps:$4 sm:$0xff]  }
 0xad6   :  { %5145 = vmatprep.subr.bf16.mxu1 %v11970_v16  ;;  %5186 = vmatprep.subr.bf16.mxu0 %v11971_v43  ;;  %11987 = vst [vmem:[#allocation91_spill] sm:$0xff] %v10483_v38  ;;  %11988 = vst [vmem:[#allocation54_spill] sm:$0xff] %v10488_v27  ;;  %v10491_v16 = vld [vmem:[#allocation8 + $0x8] ss:$16 sps:$4 sm:$0xff]   ;;  %v10494_v43 = vld [vmem:[#allocation8 + $0x24] ss:$16 sps:$4 sm:$0xff]  }
 0xad7   :  { %11989 = vst [vmem:[#allocation53_spill] sm:$0xff] %v10491_v16  ;;  %11990 = vst [vmem:[#allocation92_spill] sm:$0xff] %v10494_v43 }
 0xad9   :  { %5146 = vmatpush1.bf16.msra.mxu1 %v11972_v21  ;;  %5187 = vmatpush1.bf16.msra.mxu0 %v11973_v0  ;;  %v10497_v21 = vld [vmem:[#allocation8 + $0x2c] ss:$16 sps:$4 sm:$0xff]   ;;  %v10505_v0 = vld [vmem:[#allocation8 + $0x28] ss:$16 sps:$4 sm:$0xff]  }
 0xada   :  { %5147 = vmatprep.subr.bf16.mxu1 %v11974_v60  ;;  %5188 = vmatprep.subr.bf16.mxu0 %v11975_v34  ;;  %11991 = vst [vmem:[#allocation93_spill] sm:$0xff] %v10497_v21  ;;  %11993 = vst [vmem:[#allocation95_spill] sm:$0xff] %v10505_v0  ;;  %v10508_v60 = vld [vmem:[#allocation8 + $0x44] ss:$16 sps:$4 sm:$0xff]   ;;  %v10511_v34 = vld [vmem:[#allocation8 + $0x4c] ss:$16 sps:$4 sm:$0xff]  }
 0xadb   :  { %11994 = vst [vmem:[#allocation96_spill] sm:$0xff] %v10508_v60  ;;  %11995 = vst [vmem:[#allocation97_spill] sm:$0xff] %v10511_v34 }
 0xadd   :  { %5148 = vmatpush1.bf16.msra.mxu1 %v11976_v28  ;;  %5189 = vmatpush1.bf16.msra.mxu0 %v11977_v41  ;;  %v10514_v28 = vld [vmem:[#allocation8 + $0x40] ss:$16 sps:$4 sm:$0xff]   ;;  %v10517_v41 = vld [vmem:[#allocation8 + $0x48] ss:$16 sps:$4 sm:$0xff]  }
 0xade   :  { %5149 = vmatprep.subr.bf16.mxu1 %v11978_v9  ;;  %5190 = vmatprep.subr.bf16.mxu0 %v11979_v2  ;;  %11996 = vst [vmem:[#allocation98_spill] sm:$0xff] %v10514_v28  ;;  %11997 = vst [vmem:[#allocation99_spill] sm:$0xff] %v10517_v41  ;;  %v10520_v9 = vld [vmem:[#allocation8 + $0x64] ss:$16 sps:$4 sm:$0xff]   ;;  %v10523_v2 = vld [vmem:[#allocation8 + $0x6c] ss:$16 sps:$4 sm:$0xff]  }
 0xadf   :  { %11998 = vst [vmem:[#allocation100_spill] sm:$0xff] %v10520_v9  ;;  %11999 = vst [vmem:[#allocation101_spill] sm:$0xff] %v10523_v2 }
 0xae1   :  { %5150 = vmatpush1.bf16.msra.mxu1 %v11980_v47  ;;  %5191 = vmatpush1.bf16.msra.mxu0 %v11981_v8  ;;  %v10526_v47 = vld [vmem:[#allocation8 + $0x60] ss:$16 sps:$4 sm:$0xff]   ;;  %v10529_v8 = vld [vmem:[#allocation8 + $0x68] ss:$16 sps:$4 sm:$0xff]  }
 0xae2   :  { %5151 = vmatprep.subr.bf16.mxu1 %v11982_v39  ;;  %5192 = vmatprep.subr.bf16.mxu0 %v11983_v51  ;;  %12000 = vst [vmem:[#allocation102_spill] sm:$0xff] %v10526_v47  ;;  %12001 = vst [vmem:[#allocation103_spill] sm:$0xff] %v10529_v8  ;;  %v10532_v39 = vld [vmem:[#allocation8 + $0x84] ss:$16 sps:$4 sm:$0xff]   ;;  %v10535_v51 = vld [vmem:[#allocation8 + $0x8c] ss:$16 sps:$4 sm:$0xff]  }
 0xae3   :  { %12002 = vst [vmem:[#allocation104_spill] sm:$0xff] %v10532_v39  ;;  %12003 = vst [vmem:[#allocation105_spill] sm:$0xff] %v10535_v51 }
 0xae5   :  { %5152 = vmatpush1.bf16.msra.mxu1 %v11984_v40  ;;  %5193 = vmatpush1.bf16.msra.mxu0 %v11985_v4  ;;  %v10538_v40 = vld [vmem:[#allocation8 + $0x80] ss:$16 sps:$4 sm:$0xff]   ;;  %v10541_v4 = vld [vmem:[#allocation8 + $0x88] ss:$16 sps:$4 sm:$0xff]  }
 0xae6   :  { %5242 = vmatprep.subr.bf16.mxu1 %v10480_v6  ;;  %5283 = vmatprep.subr.bf16.mxu0 %v10483_v38  ;;  %12004 = vst [vmem:[#allocation106_spill] sm:$0xff] %v10538_v40  ;;  %12005 = vst [vmem:[#allocation107_spill] sm:$0xff] %v10541_v4 }
 0xae8   :  { %5170 = vmatmul.mubr.bf16.vlgmr.msra.gmra.mrb[80].mxu1 %v10331_v62  ;;  %5211 = vmatmul.mubr.bf16.vlgmr.msra.gmra.mrb[84].mxu0 %v10331_v62  ;;  %v10502_v62 = vld [vmem:[#allocation8 + $0x20] ss:$16 sps:$4 sm:$0xff]  }
 0xae9   :  { %5243 = vmatpush1.bf16.msra.mxu1 %v10488_v27  ;;  %5284 = vmatpush1.bf16.msra.mxu0 %v10491_v16  ;;  %11992 = vst [vmem:[#allocation94_spill] sm:$0xff] %v10502_v62 }
 0xaea   :  { %5244 = vmatprep.subr.bf16.mxu1 %v10494_v43  ;;  %5285 = vmatprep.subr.bf16.mxu0 %v10497_v21 }
 0xaeb   :  { %5274 = vmatprep.mubr.bf16.mxu1 %v11344_v14  ;;  %5315 = vmatprep.mubr.bf16.mxu0 %v11344_v14 }
 0xaed   :  { %5245 = vmatpush1.bf16.msra.mxu1 %v10502_v62  ;;  %5286 = vmatpush1.bf16.msra.mxu0 %v10505_v0 }
 0xaee   :  { %5246 = vmatprep.subr.bf16.mxu1 %v10508_v60  ;;  %5287 = vmatprep.subr.bf16.mxu0 %v10511_v34 }
 0xaf1   :  { %5247 = vmatpush1.bf16.msra.mxu1 %v10514_v28  ;;  %5288 = vmatpush1.bf16.msra.mxu0 %v10517_v41 }
 0xaf2   :  { %5248 = vmatprep.subr.bf16.mxu1 %v10520_v9  ;;  %5289 = vmatprep.subr.bf16.mxu0 %v10523_v2  ;;  %v12020_v9 = vld [vmem:[#allocation29_spill] sm:$0xff] }
 0xaf5   :  { %5249 = vmatpush1.bf16.msra.mxu1 %v10526_v47  ;;  %5290 = vmatpush1.bf16.msra.mxu0 %v10529_v8  ;;  %v10544_v47 = vld [vmem:[#allocation8 + $0xa4] ss:$16 sps:$4 sm:$0xff]   ;;  %v10547_v8 = vld [vmem:[#allocation8 + $0xac] ss:$16 sps:$4 sm:$0xff]  }
 0xaf6   :  { %5250 = vmatprep.subr.bf16.mxu1 %v10532_v39  ;;  %5291 = vmatprep.subr.bf16.mxu0 %v10535_v51  ;;  %12006 = vst [vmem:[#allocation108_spill] sm:$0xff] %v10544_v47  ;;  %12007 = vst [vmem:[#allocation109_spill] sm:$0xff] %v10547_v8  ;;  %v10550_v39 = vld [vmem:[#allocation8 + $0xa0] ss:$16 sps:$4 sm:$0xff]   ;;  %v10553_v51 = vld [vmem:[#allocation8 + $0xa8] ss:$16 sps:$4 sm:$0xff]  }
 0xaf7   :  { %12008 = vst [vmem:[#allocation110_spill] sm:$0xff] %v10550_v39  ;;  %12009 = vst [vmem:[#allocation111_spill] sm:$0xff] %v10553_v51 }
 0xaf9   :  { %5251 = vmatpush1.bf16.msra.mxu1 %v10538_v40  ;;  %5292 = vmatpush1.bf16.msra.mxu0 %v10541_v4  ;;  %v10556_v40 = vld [vmem:[#allocation8 + $0xc4] ss:$16 sps:$4 sm:$0xff]   ;;  %v10559_v4 = vld [vmem:[#allocation8 + $0xcc] ss:$16 sps:$4 sm:$0xff]  }
 0xafa   :  { %5252 = vmatprep.subr.bf16.mxu1 %v10544_v47  ;;  %5293 = vmatprep.subr.bf16.mxu0 %v10547_v8  ;;  %12010 = vst [vmem:[#allocation112_spill] sm:$0xff] %v10556_v40  ;;  %12011 = vst [vmem:[#allocation18_spill] sm:$0xff] %v10559_v4  ;;  %v10562_v47 = vld [vmem:[#allocation8 + $0xc0] ss:$16 sps:$4 sm:$0xff]   ;;  %v10565_v8 = vld [vmem:[#allocation8 + $0xc8] ss:$16 sps:$4 sm:$0xff]  }
 0xafb   :  { %12012 = vst [vmem:[#allocation19_spill] sm:$0xff] %v10562_v47  ;;  %12013 = vst [vmem:[#allocation20_spill] sm:$0xff] %v10565_v8 }
 0xafd   :  { %5253 = vmatpush1.bf16.msra.mxu1 %v10550_v39  ;;  %5294 = vmatpush1.bf16.msra.mxu0 %v10553_v51  ;;  %v10568_v39 = vld [vmem:[#allocation8 + $0xe4] ss:$16 sps:$4 sm:$0xff]   ;;  %v10571_v51 = vld [vmem:[#allocation8 + $0xec] ss:$16 sps:$4 sm:$0xff]  }
 0xafe   :  { %5254 = vmatprep.subr.bf16.mxu1 %v10556_v40  ;;  %5295 = vmatprep.subr.bf16.mxu0 %v10559_v4  ;;  %12014 = vst [vmem:[#allocation21_spill] sm:$0xff] %v10568_v39  ;;  %12015 = vst [vmem:[#allocation22_spill] sm:$0xff] %v10571_v51  ;;  %v10574_v40 = vld [vmem:[#allocation8 + $0xe0] ss:$16 sps:$4 sm:$0xff]   ;;  %v10577_v4 = vld [vmem:[#allocation8 + $0xe8] ss:$16 sps:$4 sm:$0xff]  }
 0xaff   :  { %12016 = vst [vmem:[#allocation23_spill] sm:$0xff] %v10574_v40  ;;  %12017 = vst [vmem:[#allocation24_spill] sm:$0xff] %v10577_v4 }
 0xb01   :  { %5255 = vmatpush1.bf16.msra.mxu1 %v10562_v47  ;;  %5296 = vmatpush1.bf16.msra.mxu0 %v10565_v8  ;;  %v10580_v47 = vld [vmem:[#allocation10 + $0x4] ss:$16 sps:$4 sm:$0xff]   ;;  %v10583_v8 = vld [vmem:[#allocation10 + $0xc] ss:$16 sps:$4 sm:$0xff]  }
 0xb02   :  { %5256 = vmatprep.subr.bf16.mxu1 %v10568_v39  ;;  %5297 = vmatprep.subr.bf16.mxu0 %v10571_v51  ;;  %12018 = vst [vmem:[#allocation25_spill] sm:$0xff] %v10580_v47  ;;  %12019 = vst [vmem:[#allocation26_spill] sm:$0xff] %v10583_v8 }
 0xb05   :  { %5257 = vmatpush1.bf16.msra.mxu1 %v10574_v40  ;;  %5298 = vmatpush1.bf16.msra.mxu0 %v10577_v4  ;;  %v12021_v40 = vld [vmem:[#allocation30_spill] sm:$0xff] }
 0xb06   :  { %5325 = vmatprep.subr.bf16.mxu1 %v10580_v47  ;;  %5366 = vmatprep.subr.bf16.mxu0 %v10583_v8  ;;  %v12022_v8 = vld [vmem:[#allocation31_spill] sm:$0xff] }
 0xb53   :  { %v4792_v39 = vpop.f32.mrb[72].mxu1  ;;  %v4833_v2 = vpop.f32.mrb[76].mxu0 }
 0xb54   :  { %v6104_v51 = vadd.f32 %v4792_v39, %v12020_v9  ;;  %v4794_v41 = vpop.f32.mrb[73].mxu1  ;;  %v10587_v28 = vpop.f32.mrb[77].mxu0  ;;  %v6106_v27 = vadd.f32 %v4833_v2, %v12022_v8 }
 0xb55   :  { %v6105_v34 = vadd.f32 %v4794_v41, %v12021_v40  ;;  %v4796_v60 = vpop.f32.mrb[74].mxu1  ;;  %v4837_v0 = vpop.f32.mrb[78].mxu0 }
 0xb56   :  { %v4840_v4 = vsub.f32 0.0, %v6104_v51  ;;  %v4797_v62 = vpop.f32.mrb[75].mxu1  ;;  %v4838_v21 = vpop.f32.mrb[79].mxu0 }
 0xb57   :  { %v4845_v43 = vsub.f32 0.0, %v6105_v34 }
 0xb58   :  { %v4841_v47 = vmul.f32 1.442695, %v4840_v4 }
 0xb59   :  { %v4846_v16 = vmul.f32 1.442695, %v4845_v43 }
 0xb5a   :  { %6861 = vpow2.f32 %v4841_v47 }
 0xb5b   :  { %6863 = vpow2.f32 %v4846_v16  ;;  %v12023_v16 = vld [vmem:[#allocation89_spill] sm:$0xff] }
 0xb5c   :  { %6865 = vtanh.f32 %v6106_v27 }
 0xb64   :  { %v6862_v38 = vpop.eup %6861 }
 0xb65   :  { %v6864_v6 = vpop.eup %6863  ;;  %v4843_v39 = vadd.f32 1.0, %v6862_v38 }
 0xb66   :  { %v4848_v9 = vadd.f32 1.0, %v6864_v6  ;;  %v6866_v41 = vpop.eup %6865 }
 0xb67   :  { %6867 = vrcp.f32 %v4843_v39 }
 0xb68   :  { %6869 = vrcp.f32 %v4848_v9 }
 0xb71   :  { %v6868_v60 = vpop.eup %6867 }
 0xb72   :  { %v6870_v0 = vpop.eup %6869  ;;  %v4858_v51 = vmul.f32 %v6868_v60, %v6866_v41 }
 0xb73   :  { %v4857_v21 = vmul.f32 %v6870_v0, %v10176_v50 }
 0xb75   :  { %v10592_v62 = vadd.f32 %v4858_v51, %v4857_v21 }
 0xb93   :  { %v4979_v43 = vpop.f32.mrb[76].mxu1  ;;  %v5020_v34 = vpop.f32.mrb[80].mxu0 }
 0xb94   :  { %v6108_v47 = vadd.f32 %v4979_v43, %v12023_v16  ;;  %v4981_v2 = vpop.f32.mrb[77].mxu1  ;;  %v5022_v4 = vpop.f32.mrb[81].mxu0  ;;  %v6110_v51 = vadd.f32 %v5020_v34, %v8286_v53  ;;  %v6107_v34 = vadd.f32 %v10587_v28, %v11594_v20 }
 0xb95   :  { %v6109_v38 = vadd.f32 %v4981_v2, %v11483_v42  ;;  %v4983_v27 = vpop.f32.mrb[78].mxu1  ;;  %v5024_v6 = vpop.f32.mrb[82].mxu0  ;;  %v6111_v50 = vadd.f32 %v5022_v4, %v8282_v12 }
 0xb96   :  { %v5027_v39 = vsub.f32 0.0, %v6108_v47  ;;  %v4984_v9 = vpop.f32.mrb[79].mxu1  ;;  %v5025_v8 = vpop.f32.mrb[83].mxu0 }
 0xb97   :  { %v5032_v40 = vsub.f32 0.0, %v6109_v38  ;;  %v5039_v60 = vsub.f32 0.0, %v6111_v50 }
 0xb98   :  { %v5028_v29 = vmul.f32 1.442695, %v5027_v39 }
 0xb99   :  { %v5033_v41 = vmul.f32 1.442695, %v5032_v40  ;;  %v5040_v0 = vmul.f32 1.442695, %v5039_v60 }
 0xb9a   :  { %6871 = vpow2.f32 %v5028_v29 }
 0xb9b   :  { %6873 = vpow2.f32 %v5033_v41 }
 0xb9c   :  { %6875 = vpow2.f32 %v5040_v0 }
 0xb9d   :  { %6877 = vtanh.f32 %v6110_v51 }
 0xba4   :  { %v6872_v21 = vpop.eup %6871 }
 0xba5   :  { %v6874_v43 = vpop.eup %6873  ;;  %v5030_v16 = vadd.f32 1.0, %v6872_v21 }
 0xba6   :  { %v5035_v2 = vadd.f32 1.0, %v6874_v43  ;;  %v6876_v8 = vpop.eup %6875 }
 0xba7   :  { %6879 = vrcp.f32 %v5030_v16  ;;  %v6878_v47 = vpop.eup %6877  ;;  %v5042_v4 = vadd.f32 1.0, %v6876_v8  ;;  %v4852_v16 = vsub.f32 0.0, %v6107_v34  ;;  %v10611_v34 = vld [vmem:[#allocation10] ss:$16 sps:$4 sm:$0xff]  }
 0xba8   :  { %6881 = vrcp.f32 %v5035_v2 }
 0xba9   :  { %6883 = vrcp.f32 %v5042_v4 }
 0xbb1   :  { %v6880_v38 = vpop.eup %6879 }
 0xbb2   :  { %v6882_v40 = vpop.eup %6881  ;;  %v5045_v27 = vmul.f32 %v6880_v38, %v6878_v47  ;;  %v4853_v38 = vmul.f32 1.442695, %v4852_v16  ;;  %v10620_v16 = vld [vmem:[#allocation10 + $0x2c] ss:$16 sps:$4 sm:$0xff]  }
 0xbb3   :  { %v5044_v29 = vmul.f32 %v6882_v40, %v10183_v11  ;;  %v6884_v47 = vpop.eup %6883 }
 0xbb5   :  { %v10599_v6 = vadd.f32 %v5045_v27, %v5044_v29 }
 0xbb7   :  { %6885 = vtanh.f32 %v10599_v6 }
 0xbbb   :  { %v5171_v39 = vpop.f32.mrb[80].mxu1  ;;  %v5212_v9 = vpop.f32.mrb[84].mxu0 }
 0xbbc   :  { %v6112_v41 = vadd.f32 %v5171_v39, %v11487_v32  ;;  %v5173_v50 = vpop.f32.mrb[81].mxu1  ;;  %v5214_v60 = vpop.f32.mrb[85].mxu0  ;;  %v10614_v39 = vld [vmem:[#allocation10 + $0x8] ss:$16 sps:$4 sm:$0xff]  }
 0xbbd   :  { %v6113_v0 = vadd.f32 %v5173_v50, %v7999_v58  ;;  %v5175_v51 = vpop.f32.mrb[82].mxu1  ;;  %v5216_v21 = vpop.f32.mrb[86].mxu0  ;;  %v6115_v4 = vadd.f32 %v5214_v60, %v11927_v45  ;;  %v10617_v45 = vld [vmem:[#allocation10 + $0x24] ss:$16 sps:$4 sm:$0xff]   ;;  %v6114_v50 = vadd.f32 %v5212_v9, %v8014_v17  ;;  %v10626_v60 = vld [vmem:[#allocation10 + $0x20] ss:$16 sps:$4 sm:$0xff]  }
 0xbbe   :  { %v5219_v11 = vsub.f32 0.0, %v6112_v41  ;;  %v5176_v43 = vpop.f32.mrb[83].mxu1  ;;  %v5217_v2 = vpop.f32.mrb[87].mxu0  ;;  %v10632_v21 = vld [vmem:[#allocation10 + $0x44] ss:$16 sps:$4 sm:$0xff]  }
 0xbbf   :  { %v5224_v8 = vsub.f32 0.0, %v6113_v0  ;;  %v5231_v58 = vsub.f32 0.0, %v6115_v4  ;;  %v10629_v0 = vld [vmem:[#allocation10 + $0x28] ss:$16 sps:$4 sm:$0xff]  }
 0xbc0   :  { %v5220_v40 = vmul.f32 1.442695, %v5219_v11  ;;  %v10635_v11 = vld [vmem:[#allocation10 + $0x4c] ss:$16 sps:$4 sm:$0xff]   ;;  %v10653_v4 = vld [vmem:[#allocation10 + $0x68] ss:$16 sps:$4 sm:$0xff]  }
 0xbc1   :  { %v6886_v27 = vpop.eup %6885  ;;  %v5225_v28 = vmul.f32 1.442695, %v5224_v8  ;;  %v5232_v41 = vmul.f32 1.442695, %v5231_v58  ;;  %v10638_v8 = vld [vmem:[#allocation10 + $0x40] ss:$16 sps:$4 sm:$0xff]  }
 0xbc2   :  { %6887 = vpow2.f32 %v5220_v40  ;;  %v5048_v29 = vmul.f32 %v6886_v27, %v6884_v47  ;;  %v10641_v47 = vld [vmem:[#allocation10 + $0x48] ss:$16 sps:$4 sm:$0xff]   ;;  %v10647_v40 = vld [vmem:[#allocation10 + $0x6c] ss:$16 sps:$4 sm:$0xff]   ;;  %12025 = vst [vmem:[#allocation28_spill] sm:$0xff] %v10653_v4 }
 0xbc3   :  { %6889 = vpow2.f32 %v5225_v28  ;;  %v10650_v28 = vld [vmem:[#allocation10 + $0x60] ss:$16 sps:$4 sm:$0xff]   ;;  %v10660_v58 = vld [vmem:[#allocation10 + $0x8c] ss:$16 sps:$4 sm:$0xff]  }
 0xbc4   :  { %6891 = vpow2.f32 %v4853_v38  ;;  %v10607_v32 = vpack.c.bf16 %v5048_v29, %v5048_v29  ;;  %v10644_v38 = vld [vmem:[#allocation10 + $0x64] ss:$16 sps:$4 sm:$0xff]   ;;  %12024 = vst [vmem:[#allocation27_spill] sm:$0xff] %v10650_v28  ;;  %12027 = vst [vmem:[#allocation32_spill] sm:$0xff] %v10660_v58 }
 0xbc5   :  { %6893 = vpow2.f32 %v5232_v41  ;;  %v10657_v29 = vld [vmem:[#allocation10 + $0x84] ss:$16 sps:$4 sm:$0xff]  }
 0xbc6   :  { %5275 = vmatmul.mubr.bf16.vlgmr.msra.gmra.mrb[84].mxu1 %v10607_v32  ;;  %5316 = vmatmul.mubr.bf16.vlgmr.msra.gmra.mrb[88].mxu0 %v10607_v32  ;;  %6895 = vtanh.f32 %v6114_v50  ;;  %12026 = vst [vmem:[#allocation55_spill] sm:$0xff] %v10657_v29  ;;  %v10663_v50 = vld [vmem:[#allocation10 + $0x80] ss:$16 sps:$4 sm:$0xff]  }
 0xbc7   :  { %5326 = vmatpush1.bf16.msra.mxu1 %v10611_v34  ;;  %5367 = vmatpush1.bf16.msra.mxu0 %v10614_v39  ;;  %12028 = vst [vmem:[#allocation33_spill] sm:$0xff] %v10663_v50 }
 0xbc8   :  { %5327 = vmatprep.subr.bf16.mxu1 %v10617_v45  ;;  %5368 = vmatprep.subr.bf16.mxu0 %v10620_v16 }
 0xbc9   :  { %5357 = vmatprep.mubr.bf16.mxu1 %v11344_v14  ;;  %5398 = vmatprep.mubr.bf16.mxu0 %v11344_v14 }
 0xbcb   :  { %5328 = vmatpush1.bf16.msra.mxu1 %v10626_v60  ;;  %5369 = vmatpush1.bf16.msra.mxu0 %v10629_v0 }
 0xbcc   :  { %v6888_v51 = vpop.eup %6887  ;;  %5329 = vmatprep.subr.bf16.mxu1 %v10632_v21  ;;  %5370 = vmatprep.subr.bf16.mxu0 %v10635_v11 }
 0xbcd   :  { %v6890_v43 = vpop.eup %6889  ;;  %v5222_v2 = vadd.f32 1.0, %v6888_v51  ;;  %v10666_v51 = vld [vmem:[#allocation10 + $0x88] ss:$16 sps:$4 sm:$0xff]  }
 0xbce   :  { %v6892_v17 = vpop.eup %6891  ;;  %v5227_v9 = vadd.f32 1.0, %v6890_v43  ;;  %12029 = vst [vmem:[#allocation34_spill] sm:$0xff] %v10666_v51 }
 0xbcf   :  { %6897 = vrcp.f32 %v5222_v2  ;;  %5330 = vmatpush1.bf16.msra.mxu1 %v10638_v8  ;;  %5371 = vmatpush1.bf16.msra.mxu0 %v10641_v47  ;;  %v4855_v27 = vadd.f32 1.0, %v6892_v17  ;;  %v6894_v41 = vpop.eup %6893  ;;  %v10669_v2 = vld [vmem:[#allocation10 + $0xa4] ss:$16 sps:$4 sm:$0xff]   ;;  %v10672_v17 = vld [vmem:[#allocation10 + $0xac] ss:$16 sps:$4 sm:$0xff]  }
 0xbd0   :  { %6899 = vrcp.f32 %v5227_v9  ;;  %5331 = vmatprep.subr.bf16.mxu1 %v10644_v38  ;;  %5372 = vmatprep.subr.bf16.mxu0 %v10647_v40  ;;  %v6896_v43 = vpop.eup %6895  ;;  %12030 = vst [vmem:[#allocation35_spill] sm:$0xff] %v10669_v2 }
 0xbd1   :  { %6901 = vtanh.f32 %v10592_v62 }
 0xbd2   :  { %6903 = vrcp.f32 %v4855_v27 }
 0xbd3   :  { %5332 = vmatpush1.bf16.msra.mxu1 %v10650_v28  ;;  %5373 = vmatpush1.bf16.msra.mxu0 %v10653_v4  ;;  %v10682_v28 = vld [vmem:[#allocation10 + $0xc4] ss:$16 sps:$4 sm:$0xff]  }
 0xbd4   :  { %5333 = vmatprep.subr.bf16.mxu1 %v10657_v29  ;;  %5374 = vmatprep.subr.bf16.mxu0 %v10660_v58  ;;  %v5234_v29 = vadd.f32 1.0, %v6894_v41  ;;  %12032 = vst [vmem:[#allocation37_spill] sm:$0xff] %v10682_v28 }
 0xbd6   :  { %6905 = vrcp.f32 %v5234_v29  ;;  %v10700_v29 = vld [vmem:[#allocation10 + $0xe0] ss:$16 sps:$4 sm:$0xff]  }
 0xbd7   :  { %5334 = vmatpush1.bf16.msra.mxu1 %v10663_v50  ;;  %5375 = vmatpush1.bf16.msra.mxu0 %v10666_v51  ;;  %v10676_v50 = vld [vmem:[#allocation10 + $0xa0] ss:$16 sps:$4 sm:$0xff]   ;;  %v10679_v51 = vld [vmem:[#allocation10 + $0xa8] ss:$16 sps:$4 sm:$0xff]  }
 0xbd8   :  { %5335 = vmatprep.subr.bf16.mxu1 %v10669_v2  ;;  %5376 = vmatprep.subr.bf16.mxu0 %v10672_v17  ;;  %12031 = vst [vmem:[#allocation36_spill] sm:$0xff] %v10679_v51  ;;  %v10685_v2 = vld [vmem:[#allocation10 + $0xcc] ss:$16 sps:$4 sm:$0xff]  }
 0xbd9   :  { %v6898_v9 = vpop.eup %6897 }
 0xbda   :  { %v6900_v27 = vpop.eup %6899  ;;  %v5237_v58 = vmul.f32 %v6898_v9, %v6896_v43  ;;  %v10688_v9 = vld [vmem:[#allocation10 + $0xc0] ss:$16 sps:$4 sm:$0xff]  }
 0xbdb   :  { %v5236_v4 = vmul.f32 %v6900_v27, %v10224_v3  ;;  %5336 = vmatpush1.bf16.msra.mxu1 %v10676_v50  ;;  %5377 = vmatpush1.bf16.msra.mxu0 %v10679_v51  ;;  %v6902_v43 = vpop.eup %6901  ;;  %v10691_v27 = vld [vmem:[#allocation10 + $0xc8] ss:$16 sps:$4 sm:$0xff]   ;;  %v10694_v51 = vld [vmem:[#allocation10 + $0xe4] ss:$16 sps:$4 sm:$0xff]  }
 0xbdc   :  { %5337 = vmatprep.subr.bf16.mxu1 %v10682_v28  ;;  %5378 = vmatprep.subr.bf16.mxu0 %v10685_v2  ;;  %v6904_v3 = vpop.eup %6903  ;;  %v10697_v28 = vld [vmem:[#allocation10 + $0xec] ss:$16 sps:$4 sm:$0xff]  }
 0xbdd   :  { %v5238_v41 = vadd.f32 %v5237_v58, %v5236_v4  ;;  %v4861_v4 = vmul.f32 %v6904_v3, %v6902_v43  ;;  %v10703_v58 = vld [vmem:[#allocation10 + $0xe8] ss:$16 sps:$4 sm:$0xff]  }
 0xbdf   :  { %6907 = vtanh.f32 %v5238_v41  ;;  %5338 = vmatpush1.bf16.msra.mxu1 %v10688_v9  ;;  %5379 = vmatpush1.bf16.msra.mxu0 %v10691_v27  ;;  %v5324_v41 = vpack.c.bf16 %v4861_v4, %v4861_v4 }
 0xbe0   :  { %5339 = vmatprep.subr.bf16.mxu1 %v10694_v51  ;;  %5380 = vmatprep.subr.bf16.mxu0 %v10697_v28  ;;  %v6906_v43 = vpop.eup %6905 }
 0xbe3   :  { %5340 = vmatpush1.bf16.msra.mxu1 %v10700_v29  ;;  %5381 = vmatpush1.bf16.msra.mxu0 %v10703_v58 }
 0xbe4   :  { %5430 = vmatprep.subr.bf16.mxu1 %v10232_v10  ;;  %5471 = vmatprep.subr.bf16.mxu0 %v10235_v36  ;;  %v12033_v10 = vld [vmem:[#allocation62_spill] sm:$0xff]  ;;  %v12034_v36 = vld [vmem:[#allocation63_spill] sm:$0xff] }
 0xbe6   :  { %5358 = vmatmul.mubr.bf16.vlgmr.msra.gmra.mrb[84].mxu1 %v5324_v41  ;;  %5399 = vmatmul.mubr.bf16.vlgmr.msra.gmra.mrb[88].mxu0 %v5324_v41  ;;  %v12059_v41 = vld [vmem:[#allocation84_spill] sm:$0xff] }
 0xbe7   :  { %5431 = vmatpush1.bf16.msra.mxu1 %v10238_v23  ;;  %5472 = vmatpush1.bf16.msra.mxu0 %v10241_v30  ;;  %v12035_v23 = vld [vmem:[#allocation64_spill] sm:$0xff]  ;;  %v12036_v30 = vld [vmem:[#allocation65_spill] sm:$0xff] }
 0xbe8   :  { %5432 = vmatprep.subr.bf16.mxu1 %v10244_v54  ;;  %5473 = vmatprep.subr.bf16.mxu0 %v10247_v18  ;;  %v12037_v54 = vld [vmem:[#allocation66_spill] sm:$0xff] }
 0xbe9   :  { %v6908_v3 = vpop.eup %6907  ;;  %5462 = vmatprep.mubr.bf16.mxu1 %v11344_v14  ;;  %5503 = vmatprep.mubr.bf16.mxu0 %v11344_v14 }
 0xbea   :  { %v5240_v4 = vmul.f32 %v6908_v3, %v6906_v43  ;;  %v12060_v43 = vld [vmem:[#allocation85_spill] sm:$0xff]  ;;  %v12061_v3 = vld [vmem:[#allocation86_spill] sm:$0xff] }
 0xbeb   :  { %5433 = vmatpush1.bf16.msra.mxu1 %v10252_v48  ;;  %5474 = vmatpush1.bf16.msra.mxu0 %v10255_v52  ;;  %v12038_v48 = vld [vmem:[#allocation67_spill] sm:$0xff]  ;;  %v12039_v52 = vld [vmem:[#allocation68_spill] sm:$0xff] }
 0xbec   :  { %5434 = vmatprep.subr.bf16.mxu1 %v10258_v26  ;;  %5475 = vmatprep.subr.bf16.mxu0 %v10261_v1  ;;  %v5429_v18 = vpack.c.bf16 %v5240_v4, %v5240_v4  ;;  %v12040_v26 = vld [vmem:[#allocation69_spill] sm:$0xff]  ;;  %v12041_v1 = vld [vmem:[#allocation70_spill] sm:$0xff]  ;;  %v12062_v4 = vld [vmem:[#allocation87_spill] sm:$0xff] }
 0xbef   :  { %5435 = vmatpush1.bf16.msra.mxu1 %v10264_v63  ;;  %5476 = vmatpush1.bf16.msra.mxu0 %v10267_v49  ;;  %v12042_v63 = vld [vmem:[#allocation71_spill] sm:$0xff]  ;;  %v12043_v49 = vld [vmem:[#allocation72_spill] sm:$0xff] }
 0xbf0   :  { %5436 = vmatprep.subr.bf16.mxu1 %v10270_v37  ;;  %5477 = vmatprep.subr.bf16.mxu0 %v10273_v24  ;;  %v12044_v37 = vld [vmem:[#allocation73_spill] sm:$0xff]  ;;  %v12045_v24 = vld [vmem:[#allocation74_spill] sm:$0xff] }
 0xbf3   :  { %5437 = vmatpush1.bf16.msra.mxu1 %v10276_v57  ;;  %5478 = vmatpush1.bf16.msra.mxu0 %v10279_v19  ;;  %v12046_v57 = vld [vmem:[#allocation75_spill] sm:$0xff]  ;;  %v12047_v19 = vld [vmem:[#allocation76_spill] sm:$0xff] }
 0xbf4   :  { %5438 = vmatprep.subr.bf16.mxu1 %v10283_v15  ;;  %5479 = vmatprep.subr.bf16.mxu0 %v10286_v59  ;;  %v12048_v15 = vld [vmem:[#allocation77_spill] sm:$0xff]  ;;  %v12049_v59 = vld [vmem:[#allocation78_spill] sm:$0xff] }
 0xbf7   :  { %5439 = vmatpush1.bf16.msra.mxu1 %v10289_v35  ;;  %5480 = vmatpush1.bf16.msra.mxu0 %v10292_v13  ;;  %v12050_v35 = vld [vmem:[#allocation79_spill] sm:$0xff]  ;;  %v12051_v13 = vld [vmem:[#allocation80_spill] sm:$0xff] }
 0xbf8   :  { %5440 = vmatprep.subr.bf16.mxu1 %v10295_v44  ;;  %5481 = vmatprep.subr.bf16.mxu0 %v10298_v33  ;;  %v12052_v44 = vld [vmem:[#allocation81_spill] sm:$0xff]  ;;  %v12053_v33 = vld [vmem:[#allocation82_spill] sm:$0xff] }
 0xbfb   :  { %5441 = vmatpush1.bf16.msra.mxu1 %v10301_v22  ;;  %5482 = vmatpush1.bf16.msra.mxu0 %v10304_v56  ;;  %v12054_v22 = vld [vmem:[#allocation83_spill] sm:$0xff] }
 0xbfc   :  { %5442 = vmatprep.subr.bf16.mxu1 %v10307_v5  ;;  %5483 = vmatprep.subr.bf16.mxu0 %v12033_v10  ;;  %v12055_v56 = vld [vmem:[#allocation15_spill] sm:$0xff]  ;;  %v12056_v5 = vld [vmem:[#allocation17_spill] sm:$0xff]  ;;  %v12063_v10 = vld [vmem:[#allocation88_spill] sm:$0xff] }
 0xbff   :  { %5443 = vmatpush1.bf16.msra.mxu1 %v12034_v36  ;;  %5484 = vmatpush1.bf16.msra.mxu0 %v12035_v23  ;;  %v12064_v36 = vld [vmem:[#allocation51_spill] sm:$0xff]  ;;  %v12065_v23 = vld [vmem:[#allocation52_spill] sm:$0xff] }
 0xc00   :  { %5444 = vmatprep.subr.bf16.mxu1 %v12036_v30  ;;  %5485 = vmatprep.subr.bf16.mxu0 %v10322_v61  ;;  %v12057_v61 = vld [vmem:[#allocation14_spill] sm:$0xff] }
 0xc01   :  { %v12066_v30 = vld [vmem:[#allocation90_spill] sm:$0xff] }
 0xc03   :  { %5445 = vmatpush1.bf16.msra.mxu1 %v10325_v55  ;;  %5486 = vmatpush1.bf16.msra.mxu0 %v12037_v54  ;;  %v12058_v55 = vld [vmem:[#allocation16_spill] sm:$0xff]  ;;  %v12067_v54 = vld [vmem:[#allocation91_spill] sm:$0xff] }
 0xc04   :  { %5512 = vmatprep.subr.bf16.mxu1 %v12038_v48  ;;  %5553 = vmatprep.subr.bf16.mxu0 %v12039_v52  ;;  %v12073_v48 = vld [vmem:[#allocation95_spill] sm:$0xff]  ;;  %v12074_v52 = vld [vmem:[#allocation96_spill] sm:$0xff] }
 0xc06   :  { %5463 = vmatmul.mubr.bf16.vlgmr.msra.gmra.mrb[88].mxu1 %v5429_v18  ;;  %5504 = vmatmul.mubr.bf16.vlgmr.msra.gmra.mrb[92].mxu0 %v5429_v18  ;;  %v12068_v18 = vld [vmem:[#allocation54_spill] sm:$0xff] }
 0xc07   :  { %5513 = vmatpush1.bf16.msra.mxu1 %v12040_v26  ;;  %5554 = vmatpush1.bf16.msra.mxu0 %v12041_v1  ;;  %v12075_v26 = vld [vmem:[#allocation97_spill] sm:$0xff]  ;;  %v12077_v1 = vld [vmem:[#allocation99_spill] sm:$0xff] }
 0xc08   :  { %5514 = vmatprep.subr.bf16.mxu1 %v12042_v63  ;;  %5555 = vmatprep.subr.bf16.mxu0 %v12043_v49  ;;  %v12078_v63 = vld [vmem:[#allocation100_spill] sm:$0xff]  ;;  %v12079_v49 = vld [vmem:[#allocation101_spill] sm:$0xff] }
 0xc09   :  { %5544 = vmatprep.mubr.bf16.mxu1 %v11344_v14  ;;  %5585 = vmatprep.mubr.bf16.mxu0 %v11344_v14 }
 0xc0b   :  { %5515 = vmatpush1.bf16.msra.mxu1 %v12044_v37  ;;  %5556 = vmatpush1.bf16.msra.mxu0 %v12045_v24  ;;  %v12080_v37 = vld [vmem:[#allocation102_spill] sm:$0xff]  ;;  %v12081_v24 = vld [vmem:[#allocation103_spill] sm:$0xff] }
 0xc0c   :  { %5516 = vmatprep.subr.bf16.mxu1 %v12046_v57  ;;  %5557 = vmatprep.subr.bf16.mxu0 %v12047_v19  ;;  %v12082_v57 = vld [vmem:[#allocation104_spill] sm:$0xff]  ;;  %v12083_v19 = vld [vmem:[#allocation105_spill] sm:$0xff] }
 0xc0f   :  { %5517 = vmatpush1.bf16.msra.mxu1 %v12048_v15  ;;  %5558 = vmatpush1.bf16.msra.mxu0 %v12049_v59  ;;  %v12084_v15 = vld [vmem:[#allocation106_spill] sm:$0xff]  ;;  %v12085_v59 = vld [vmem:[#allocation107_spill] sm:$0xff] }
 0xc10   :  { %5518 = vmatprep.subr.bf16.mxu1 %v12050_v35  ;;  %5559 = vmatprep.subr.bf16.mxu0 %v12051_v13  ;;  %v12086_v35 = vld [vmem:[#allocation108_spill] sm:$0xff]  ;;  %v12087_v13 = vld [vmem:[#allocation109_spill] sm:$0xff] }
 0xc13   :  { %5519 = vmatpush1.bf16.msra.mxu1 %v12052_v44  ;;  %5560 = vmatpush1.bf16.msra.mxu0 %v12053_v33  ;;  %v12088_v44 = vld [vmem:[#allocation110_spill] sm:$0xff]  ;;  %v12089_v33 = vld [vmem:[#allocation111_spill] sm:$0xff] }
 0xc14   :  { %5520 = vmatprep.subr.bf16.mxu1 %v12054_v22  ;;  %5561 = vmatprep.subr.bf16.mxu0 %v12055_v56  ;;  %v12090_v22 = vld [vmem:[#allocation112_spill] sm:$0xff]  ;;  %v12091_v56 = vld [vmem:[#allocation18_spill] sm:$0xff] }
 0xc17   :  { %5521 = vmatpush1.bf16.msra.mxu1 %v12056_v5  ;;  %5562 = vmatpush1.bf16.msra.mxu0 %v12057_v61  ;;  %v12092_v5 = vld [vmem:[#allocation19_spill] sm:$0xff]  ;;  %v12093_v61 = vld [vmem:[#allocation20_spill] sm:$0xff] }
 0xc18   :  { %5522 = vmatprep.subr.bf16.mxu1 %v12058_v55  ;;  %5563 = vmatprep.subr.bf16.mxu0 %v12059_v41  ;;  %v12094_v55 = vld [vmem:[#allocation21_spill] sm:$0xff]  ;;  %v12095_v41 = vld [vmem:[#allocation22_spill] sm:$0xff] }
 0xc1b   :  { %5523 = vmatpush1.bf16.msra.mxu1 %v12060_v43  ;;  %5564 = vmatpush1.bf16.msra.mxu0 %v12061_v3  ;;  %v12096_v43 = vld [vmem:[#allocation23_spill] sm:$0xff]  ;;  %v12097_v3 = vld [vmem:[#allocation24_spill] sm:$0xff] }
 0xc1c   :  { %5524 = vmatprep.subr.bf16.mxu1 %v12062_v4  ;;  %5565 = vmatprep.subr.bf16.mxu0 %v12063_v10  ;;  %v12098_v4 = vld [vmem:[#allocation25_spill] sm:$0xff]  ;;  %v12099_v10 = vld [vmem:[#allocation26_spill] sm:$0xff] }
 0xc1f   :  { %5525 = vmatpush1.bf16.msra.mxu1 %v10415_v46  ;;  %5566 = vmatpush1.bf16.msra.mxu0 %v10418_v25  ;;  %v12069_v46 = vld [vmem:[#allocation53_spill] sm:$0xff]  ;;  %v12070_v25 = vld [vmem:[#allocation92_spill] sm:$0xff] }
 0xc20   :  { %5526 = vmatprep.subr.bf16.mxu1 %v10421_v31  ;;  %5567 = vmatprep.subr.bf16.mxu0 %v10424_v7  ;;  %v12071_v31 = vld [vmem:[#allocation93_spill] sm:$0xff]  ;;  %v12072_v7 = vld [vmem:[#allocation94_spill] sm:$0xff] }
 0xc23   :  { %5527 = vmatpush1.bf16.msra.mxu1 %v12064_v36  ;;  %5568 = vmatpush1.bf16.msra.mxu0 %v12065_v23 }
 0xc24   :  { %5617 = vmatprep.subr.bf16.mxu1 %v12066_v30  ;;  %5658 = vmatprep.subr.bf16.mxu0 %v12067_v54  ;;  %v12100_v30 = vld [vmem:[#allocation29_spill] sm:$0xff] }
 0xc26   :  { %5545 = vmatmul.mubr.bf16.vlgmr.msra.gmra.mrb[88].mxu1 %v10607_v32  ;;  %5586 = vmatmul.mubr.bf16.vlgmr.msra.gmra.mrb[92].mxu0 %v10607_v32  ;;  %v12076_v32 = vld [vmem:[#allocation98_spill] sm:$0xff] }
 0xc27   :  { %5618 = vmatpush1.bf16.msra.mxu1 %v12068_v18  ;;  %5659 = vmatpush1.bf16.msra.mxu0 %v12069_v46 }
 0xc28   :  { %5619 = vmatprep.subr.bf16.mxu1 %v12070_v25  ;;  %5660 = vmatprep.subr.bf16.mxu0 %v12071_v31  ;;  %v12101_v25 = vld [vmem:[#allocation30_spill] sm:$0xff] }
 0xc29   :  { %5649 = vmatprep.mubr.bf16.mxu1 %v11344_v14  ;;  %5690 = vmatprep.mubr.bf16.mxu0 %v11344_v14 }
 0xc2b   :  { %5620 = vmatpush1.bf16.msra.mxu1 %v12072_v7  ;;  %5661 = vmatpush1.bf16.msra.mxu0 %v12073_v48 }
 0xc2c   :  { %5621 = vmatprep.subr.bf16.mxu1 %v12074_v52  ;;  %5662 = vmatprep.subr.bf16.mxu0 %v12075_v26 }
 0xc2f   :  { %5622 = vmatpush1.bf16.msra.mxu1 %v12076_v32  ;;  %5663 = vmatpush1.bf16.msra.mxu0 %v12077_v1 }
 0xc30   :  { %5623 = vmatprep.subr.bf16.mxu1 %v12078_v63  ;;  %5664 = vmatprep.subr.bf16.mxu0 %v12079_v49 }
 0xc33   :  { %5624 = vmatpush1.bf16.msra.mxu1 %v12080_v37  ;;  %5665 = vmatpush1.bf16.msra.mxu0 %v12081_v24  ;;  %v12102_v37 = vld [vmem:[#allocation31_spill] sm:$0xff] }
 0xc34   :  { %5625 = vmatprep.subr.bf16.mxu1 %v12082_v57  ;;  %5666 = vmatprep.subr.bf16.mxu0 %v12083_v19 }
 0xc37   :  { %5626 = vmatpush1.bf16.msra.mxu1 %v12084_v15  ;;  %5667 = vmatpush1.bf16.msra.mxu0 %v12085_v59 }
 0xc38   :  { %5627 = vmatprep.subr.bf16.mxu1 %v12086_v35  ;;  %5668 = vmatprep.subr.bf16.mxu0 %v12087_v13 }
 0xc3b   :  { %5628 = vmatpush1.bf16.msra.mxu1 %v12088_v44  ;;  %5669 = vmatpush1.bf16.msra.mxu0 %v12089_v33 }
 0xc3c   :  { %5629 = vmatprep.subr.bf16.mxu1 %v12090_v22  ;;  %5670 = vmatprep.subr.bf16.mxu0 %v12091_v56 }
 0xc3f   :  { %5630 = vmatpush1.bf16.msra.mxu1 %v12092_v5  ;;  %5671 = vmatpush1.bf16.msra.mxu0 %v12093_v61 }
 0xc40   :  { %5631 = vmatprep.subr.bf16.mxu1 %v12094_v55  ;;  %5672 = vmatprep.subr.bf16.mxu0 %v12095_v41  ;;  %v12103_v55 = vld [vmem:[#allocation89_spill] sm:$0xff] }
 0xc43   :  { %5632 = vmatpush1.bf16.msra.mxu1 %v12096_v43  ;;  %5673 = vmatpush1.bf16.msra.mxu0 %v12097_v3 }
 0xc44   :  { %5700 = vmatprep.subr.bf16.mxu1 %v12098_v4  ;;  %5741 = vmatprep.subr.bf16.mxu0 %v12099_v10 }
 0xcb9   :  { %v5359_v36 = vpop.f32.mrb[84].mxu1  ;;  %v5400_v23 = vpop.f32.mrb[88].mxu0 }
 0xcba   :  { %v6116_v54 = vadd.f32 %v5359_v36, %v12100_v30  ;;  %v5361_v18 = vpop.f32.mrb[85].mxu1  ;;  %v10813_v46 = vpop.f32.mrb[89].mxu0  ;;  %v6118_v24 = vadd.f32 %v5400_v23, %v12102_v37 }
 0xcbb   :  { %v6117_v31 = vadd.f32 %v5361_v18, %v12101_v25  ;;  %v5363_v7 = vpop.f32.mrb[86].mxu1  ;;  %v5404_v48 = vpop.f32.mrb[90].mxu0 }
 0xcbc   :  { %v5407_v52 = vsub.f32 0.0, %v6116_v54  ;;  %v5364_v26 = vpop.f32.mrb[87].mxu1  ;;  %v5405_v32 = vpop.f32.mrb[91].mxu0 }
 0xcbd   :  { %v5412_v1 = vsub.f32 0.0, %v6117_v31 }
 0xcbe   :  { %v5408_v63 = vmul.f32 1.442695, %v5407_v52 }
 0xcbf   :  { %v5413_v49 = vmul.f32 1.442695, %v5412_v1 }
 0xcc0   :  { %6909 = vpow2.f32 %v5408_v63 }
 0xcc1   :  { %6911 = vpow2.f32 %v5413_v49 }
 0xcc2   :  { %6913 = vtanh.f32 %v6118_v24 }
 0xcca   :  { %v6910_v57 = vpop.eup %6909 }
 0xccb   :  { %v6912_v19 = vpop.eup %6911  ;;  %v5410_v15 = vadd.f32 1.0, %v6910_v57 }
 0xccc   :  { %v5415_v59 = vadd.f32 1.0, %v6912_v19  ;;  %v6914_v35 = vpop.eup %6913 }
 0xccd   :  { %6915 = vrcp.f32 %v5410_v15 }
 0xcce   :  { %6917 = vrcp.f32 %v5415_v59 }
 0xcd7   :  { %v6916_v13 = vpop.eup %6915 }
 0xcd8   :  { %v6918_v44 = vpop.eup %6917  ;;  %v5425_v33 = vmul.f32 %v6916_v13, %v6914_v35 }
 0xcd9   :  { %v5424_v22 = vmul.f32 %v6918_v44, %v10592_v62 }
 0xcdb   :  { %v10818_v56 = vadd.f32 %v5425_v33, %v5424_v22 }
 0xcf9   :  { %v5546_v5 = vpop.f32.mrb[88].mxu1  ;;  %v5587_v61 = vpop.f32.mrb[92].mxu0 }
 0xcfa   :  { %v6120_v41 = vadd.f32 %v5546_v5, %v12103_v55  ;;  %v5548_v43 = vpop.f32.mrb[89].mxu1  ;;  %v5589_v3 = vpop.f32.mrb[93].mxu0  ;;  %v6122_v32 = vadd.f32 %v5587_v61, %v8286_v53  ;;  %v6119_v53 = vadd.f32 %v10813_v46, %v11594_v20 }
 0xcfb   :  { %v6121_v4 = vadd.f32 %v5548_v43, %v11483_v42  ;;  %v5550_v10 = vpop.f32.mrb[90].mxu1  ;;  %v5591_v36 = vpop.f32.mrb[94].mxu0  ;;  %v6123_v62 = vadd.f32 %v5589_v3, %v8282_v12 }
 0xcfc   :  { %v5594_v23 = vsub.f32 0.0, %v6120_v41  ;;  %v5551_v54 = vpop.f32.mrb[91].mxu1  ;;  %v5592_v18 = vpop.f32.mrb[95].mxu0  ;;  %v5419_v44 = vsub.f32 0.0, %v6119_v53 }
 0xcfd   :  { %v5599_v31 = vsub.f32 0.0, %v6121_v4  ;;  %v5606_v52 = vsub.f32 0.0, %v6123_v62 }
 0xcfe   :  { %v5595_v7 = vmul.f32 1.442695, %v5594_v23  ;;  %v5420_v22 = vmul.f32 1.442695, %v5419_v44 }
 0xcff   :  { %v5600_v48 = vmul.f32 1.442695, %v5599_v31  ;;  %v5607_v26 = vmul.f32 1.442695, %v5606_v52 }
 0xd00   :  { %6919 = vpow2.f32 %v5595_v7 }
 0xd01   :  { %6921 = vpow2.f32 %v5600_v48 }
 0xd02   :  { %6923 = vpow2.f32 %v5607_v26 }
 0xd03   :  { %6925 = vtanh.f32 %v6122_v32 }
 0xd0a   :  { %v6920_v1 = vpop.eup %6919 }
 0xd0b   :  { %v6922_v63 = vpop.eup %6921  ;;  %v5597_v49 = vadd.f32 1.0, %v6920_v1 }
 0xd0c   :  { %v5602_v42 = vadd.f32 1.0, %v6922_v63  ;;  %v6924_v24 = vpop.eup %6923 }
 0xd0d   :  { %6927 = vrcp.f32 %v5597_v49  ;;  %v6926_v57 = vpop.eup %6925  ;;  %v5609_v12 = vadd.f32 1.0, %v6924_v24 }
 0xd0e   :  { %6929 = vrcp.f32 %v5602_v42  ;;  %v6023_v42 = vld [vmem:[%s10884_s13] ss:$0 sm:$0xff] }
 0xd0f   :  { %6931 = vrcp.f32 %v5609_v12 }
 0xd17   :  { %v6928_v19 = vpop.eup %6927 }
 0xd18   :  { %v6930_v15 = vpop.eup %6929  ;;  %v5612_v59 = vmul.f32 %v6928_v19, %v6926_v57  ;;  %v6024_v19 = vld [vmem:[#allocation2] ss:$0 sm:$0xff] }
 0xd19   :  { %v5611_v35 = vmul.f32 %v6930_v15, %v10599_v6  ;;  %v6932_v33 = vpop.eup %6931 }
 0xd1b   :  { %v5613_v13 = vadd.f32 %v5612_v59, %v5611_v35 }
 0xd1d   :  { %6933 = vtanh.f32 %v5613_v13 }
 0xd1e   :  { %6935 = vpow2.f32 %v5420_v22 }
 0xd1f   :  { %6937 = vtanh.f32 %v10818_v56 }
 0xd27   :  { %v6934_v5 = vpop.eup %6933 }
 0xd28   :  { %v5615_v61 = vmul.f32 %v6934_v5, %v6932_v33  ;;  %v6936_v6 = vpop.eup %6935 }
 0xd2a   :  { %v5616_v55 = vpack.c.bf16 %v5615_v61, %v5615_v61 }
 0xd2c   :  { %5650 = vmatmul.mubr.bf16.vlgmr.msra.gmra.mrb[92].mxu1 %v5616_v55  ;;  %5691 = vmatmul.mubr.bf16.vlgmr.msra.gmra.mrb[96].mxu0 %v5616_v55 }
 0xd2d   :  { %5701 = vmatpush1.bf16.msra.mxu1 %v10611_v34  ;;  %5742 = vmatpush1.bf16.msra.mxu0 %v10614_v39  ;;  %v5422_v34 = vadd.f32 1.0, %v6936_v6  ;;  %v12104_v39 = vld [vmem:[#allocation27_spill] sm:$0xff] }
 0xd2e   :  { %5702 = vmatprep.subr.bf16.mxu1 %v10617_v45  ;;  %5743 = vmatprep.subr.bf16.mxu0 %v10620_v16  ;;  %v12106_v45 = vld [vmem:[#allocation55_spill] sm:$0xff]  ;;  %v12107_v16 = vld [vmem:[#allocation32_spill] sm:$0xff] }
 0xd2f   :  { %5732 = vmatprep.mubr.bf16.mxu1 %v11344_v14  ;;  %5773 = vmatprep.mubr.bf16.mxu0 %v11344_v14  ;;  %v12105_v14 = vld [vmem:[#allocation28_spill] sm:$0xff]  ;;  %6939 = vrcp.f32 %v5422_v34 }
 0xd31   :  { %5703 = vmatpush1.bf16.msra.mxu1 %v10626_v60  ;;  %5744 = vmatpush1.bf16.msra.mxu0 %v10629_v0  ;;  %v12108_v60 = vld [vmem:[#allocation33_spill] sm:$0xff]  ;;  %v12109_v0 = vld [vmem:[#allocation34_spill] sm:$0xff] }
 0xd32   :  { %5704 = vmatprep.subr.bf16.mxu1 %v10632_v21  ;;  %5745 = vmatprep.subr.bf16.mxu0 %v10635_v11  ;;  %v12110_v21 = vld [vmem:[#allocation35_spill] sm:$0xff]  ;;  %v12111_v11 = vld [vmem:[#allocation36_spill] sm:$0xff] }
 0xd35   :  { %5705 = vmatpush1.bf16.msra.mxu1 %v10638_v8  ;;  %5746 = vmatpush1.bf16.msra.mxu0 %v10641_v47  ;;  %v12112_v8 = vld [vmem:[#allocation37_spill] sm:$0xff]  ;;  %v6938_v47 = vpop.eup %6937 }
 0xd36   :  { %5706 = vmatprep.subr.bf16.mxu1 %v10644_v38  ;;  %5747 = vmatprep.subr.bf16.mxu0 %v10647_v40 }
 0xd39   :  { %5707 = vmatpush1.bf16.msra.mxu1 %v12104_v39  ;;  %5748 = vmatpush1.bf16.msra.mxu0 %v12105_v14  ;;  %v6940_v38 = vpop.eup %6939 }
 0xd3a   :  { %5708 = vmatprep.subr.bf16.mxu1 %v12106_v45  ;;  %5749 = vmatprep.subr.bf16.mxu0 %v12107_v16  ;;  %v5428_v40 = vmul.f32 %v6940_v38, %v6938_v47 }
 0xd3d   :  { %5709 = vmatpush1.bf16.msra.mxu1 %v12108_v60  ;;  %5750 = vmatpush1.bf16.msra.mxu0 %v12109_v0 }
 0xd3e   :  { %5710 = vmatprep.subr.bf16.mxu1 %v12110_v21  ;;  %5751 = vmatprep.subr.bf16.mxu0 %v10672_v17 }
 0xd41   :  { %5711 = vmatpush1.bf16.msra.mxu1 %v10676_v50  ;;  %5752 = vmatpush1.bf16.msra.mxu0 %v12111_v11  ;;  %v5699_v50 = vpack.c.bf16 %v5428_v40, %v5428_v40 }
 0xd42   :  { %5712 = vmatprep.subr.bf16.mxu1 %v12112_v8  ;;  %5753 = vmatprep.subr.bf16.mxu0 %v10685_v2 }
 0xd45   :  { %5713 = vmatpush1.bf16.msra.mxu1 %v10688_v9  ;;  %5754 = vmatpush1.bf16.msra.mxu0 %v10691_v27 }
 0xd46   :  { %5714 = vmatprep.subr.bf16.mxu1 %v10694_v51  ;;  %5755 = vmatprep.subr.bf16.mxu0 %v10697_v28 }
 0xd49   :  { %5715 = vmatpush1.bf16.msra.mxu1 %v10700_v29  ;;  %5756 = vmatpush1.bf16.msra.mxu0 %v10703_v58 }
 0xd4c   :  { %5733 = vmatmul.mubr.bf16.vlgmr.msra.gmra.mrb[92].mxu1 %v5699_v50  ;;  %5774 = vmatmul.mubr.bf16.vlgmr.msra.gmra.mrb[96].mxu0 %v5699_v50 }
 0xe1f   :  { %v5734_v17 = vpop.f32.mrb[92].mxu1  ;;  %v5775_v2 = vpop.f32.mrb[96].mxu0 }
 0xe20   :  { %v6124_v46 = vadd.f32 %v5734_v17, %v12100_v30  ;;  %v5736_v41 = vpop.f32.mrb[93].mxu1  ;;  %v5777_v9 = vpop.f32.mrb[97].mxu0  ;;  %v6126_v30 = vadd.f32 %v5775_v2, %v12102_v37 }
 0xe21   :  { %v6125_v27 = vadd.f32 %v5736_v41, %v12101_v25  ;;  %v5738_v43 = vpop.f32.mrb[94].mxu1  ;;  %v5779_v51 = vpop.f32.mrb[98].mxu0  ;;  %v6127_v58 = vadd.f32 %v5777_v9, %v11594_v20 }
 0xe22   :  { %v5782_v3 = vsub.f32 0.0, %v6124_v46  ;;  %v5739_v28 = vpop.f32.mrb[95].mxu1  ;;  %v5780_v4 = vpop.f32.mrb[99].mxu0 }
 0xe23   :  { %v5787_v10 = vsub.f32 0.0, %v6125_v27  ;;  %v5794_v23 = vsub.f32 0.0, %v6127_v58 }
 0xe24   :  { %v5783_v29 = vmul.f32 1.442695, %v5782_v3 }
 0xe25   :  { %v5788_v36 = vmul.f32 1.442695, %v5787_v10  ;;  %v5795_v54 = vmul.f32 1.442695, %v5794_v23 }
 0xe26   :  { %6941 = vpow2.f32 %v5783_v29 }
 0xe27   :  { %6943 = vpow2.f32 %v5788_v36 }
 0xe28   :  { %6945 = vpow2.f32 %v5795_v54 }
 0xe29   :  { %6947 = vtanh.f32 %v6126_v30 }
 0xe30   :  { %v6942_v18 = vpop.eup %6941 }
 0xe31   :  { %v6944_v31 = vpop.eup %6943  ;;  %v5785_v7 = vadd.f32 1.0, %v6942_v18 }
 0xe32   :  { %v5790_v25 = vadd.f32 1.0, %v6944_v31  ;;  %v6946_v48 = vpop.eup %6945 }
 0xe33   :  { %6949 = vrcp.f32 %v5785_v7  ;;  %v6948_v62 = vpop.eup %6947  ;;  %v5797_v20 = vadd.f32 1.0, %v6946_v48 }
 0xe34   :  { %6951 = vrcp.f32 %v5790_v25 }
 0xe35   :  { %6953 = vrcp.f32 %v5797_v20 }
 0xe3d   :  { %v6950_v52 = vpop.eup %6949 }
 0xe3e   :  { %v6952_v26 = vpop.eup %6951  ;;  %v5800_v32 = vmul.f32 %v6950_v52, %v6948_v62 }
 0xe3f   :  { %v5799_v1 = vmul.f32 %v6952_v26, %v10818_v56  ;;  %v6954_v37 = vpop.eup %6953 }
 0xe41   :  { %v5801_v63 = vadd.f32 %v5800_v32, %v5799_v1 }
 0xe43   :  { %6955 = vtanh.f32 %v5801_v63 }
 0xe4d   :  { %v6956_v49 = vpop.eup %6955 }
 0xe4e   :  { %v5803_v24 = vmul.f32 %v6956_v49, %v6954_v37 }
 0xe50   :  { %v5811_v57 = vmul.f32 %v6023_v42, %v5803_v24 }
 0xe52   :  { %5812 = vadd.xlane.f32.xlu0 %v5811_v57 }
 0xedf   :  { %v5813_v15 = vpop.xlane.xlu0 %5812 }
 0xee0   :  { %v5821_v59 = vadd.f32 %v6024_v19, %v5813_v15 }
 0xee2   :  { %v5822_v12 = vsub.f32 0.0, %v5821_v59 }
 0xee4   :  { %v5823_v35 = vmul.f32 1.442695, %v5822_v12 }
 0xee6   :  { %6957 = vpow2.f32 %v5823_v35 }
 0xef0   :  { %v6958_v13 = vpop.eup %6957 }
 0xef1   :  { %v5825_v56 = vadd.f32 1.0, %v6958_v13 }
 0xef3   :  { %6959 = vrcp.f32 %v5825_v56 }
 0xefd   :  { %v6960_v53 = vpop.eup %6959 }
 0xefe   :  { %5829 = vst.msk [vmem:[%s10886_s15] sm:$0xff] %vm5828_vm5, %v6960_v53 }
 0xeff   :  { %5834 = vsyncpa [#allocation4], 1 }
 0xf00   :  { %5835 = vsyncpa [#allocation6], 1 }
 0xf01   :  { %5836 = vsyncpa [#allocation9], 1 }

</bundles_post_ra>
